<compile_context>
chip_gen: v7x
topology: tpu7x:2x2x1
jax: 0.10.0
libtpu: 0.0.40
codegen_flags: <defaults>
</compile_context>

<pallas_src>
import jax
import jax.numpy as jnp
from jax import lax
from jax.experimental import pallas as pl
from jax.experimental.pallas import tpu as pltpu

EPS = 1e-5
C = 64                    # hidden channel width
N_MID = 15                # number of 64->64 convs
N_STEPS = N_MID + 2       # grid steps: conv0 | 15 mid convs | conv16


def upnet_kernel(p0_ref, w0_ref, wmid_ref, wlast_ref, b_ref, g_ref, bt_ref,
                 o_ref, v0_ref, v1_ref, v2_ref):
  """One conv layer per grid step; activations carried in VMEM scratch."""
  l = pl.program_id(0)
  N, H, W, Cn = v1_ref.shape
  M = N * H * W

  def shift_h(a, s):
    # Circular H shift: out[:, i] = a[:, (i - s) % H].  Axis 1 is an outer dim,
    # so this is pure whole-(W, C)-slab copies (no sublane shuffles).
    if s == 0:
      return a
    k = s % H
    hi = lax.slice_in_dim(a, H - k, H, axis=1)
    lo = lax.slice_in_dim(a, 0, H - k, axis=1)
    return lax.concatenate([hi, lo], 1)

  def bn_relu_store(y, li):
    # Fresh BatchRenorm2d (r=1, d=0) == batch-norm with batch statistics.
    # Single-pass stats: var = E[y^2] - mean^2, all f32.
    s1 = jnp.sum(y, axis=0, keepdims=True)
    s2 = jnp.sum(y * y, axis=0, keepdims=True)
    mean = s1 * (1.0 / M)
    var = s2 * (1.0 / M) - mean * mean
    inv = lax.rsqrt(var + EPS)
    g = g_ref[pl.ds(li, 1), :]
    bt = bt_ref[pl.ds(li, 1), :]
    act = jnp.maximum((y - mean) * (g * inv) + bt, 0.0)       # (M, C) f32
    a4 = act.reshape(N, H, W, Cn)
    # Pre-compute the two non-trivial W-axis circular shifts once per layer on
    # f32 data with an XLU rotate (pltpu.roll, jnp.roll convention), cast to
    # bf16 and stash; the next layer only needs cheap H-axis copies per tap.
    v0 = pltpu.roll(a4, 1, 2)          # kw = 0 tap: a[..., (j - 1) % W, :]
    v2 = pltpu.roll(a4, W - 1, 2)      # kw = 2 tap: a[..., (j + 1) % W, :]
    v0_ref[...] = v0.astype(jnp.bfloat16)
    v1_ref[...] = a4.astype(jnp.bfloat16)
    v2_ref[...] = v2.astype(jnp.bfloat16)

  # ---- step 0: conv0 (1 -> 64).  Patches built in the wrapper; one small
  # (M, 16) x (16, 64) bf16 MXU matmul lands directly in (M, 64) layout. -----
  @pl.when(l == 0)
  def _():
    y = jnp.dot(p0_ref[...], w0_ref[...], preferred_element_type=jnp.float32)
    # Conv bias is kept for fidelity (BN would cancel it anyway).
    bn_relu_store(y + b_ref[pl.ds(0, 1), :], 0)

  # ---- steps 1..15: conv l (64 -> 64) as 9 accumulated K=64 bf16 matmuls;
  # no (M, 576) patch buffer is ever materialized. ---------------------------
  @pl.when((l >= 1) & (l <= N_MID))
  def _():
    v = (v0_ref[...], v1_ref[...], v2_ref[...])    # pre-W-shifted bf16 variants
    acc = None
    for kh in range(3):
      for kw in range(3):
        tap = shift_h(v[kw], 1 - kh).reshape(M, Cn)            # bf16 (M, 64)
        p = jnp.dot(tap, wmid_ref[kh * 3 + kw],
                    preferred_element_type=jnp.float32)
        acc = p if acc is None else acc + p
    bn_relu_store(acc + b_ref[pl.ds(l, 1), :], l)

  # ---- step 16: conv16 (64 -> 1) on the VPU: 9 tap MACs accumulated as a
  # balanced pairwise tree + one cross-lane reduce; lane-dense (N, H*W) store.
  @pl.when(l == pl.num_programs(0) - 1)
  def _():
    v = (v0_ref[...].astype(jnp.float32),
         v1_ref[...].astype(jnp.float32),
         v2_ref[...].astype(jnp.float32))
    terms = []
    for kh in range(3):
      for kw in range(3):
        tap = shift_h(v[kw], 1 - kh).reshape(M, Cn)            # f32 (M, 64)
        terms.append(tap * wlast_ref[pl.ds(kh * 3 + kw, 1), :])
    while len(terms) > 1:                                      # pairwise tree
      nxt = [terms[i] + terms[i + 1] for i in range(0, len(terms) - 1, 2)]
      if len(terms) % 2:
        nxt.append(terms[-1])
      terms = nxt
    out = jnp.sum(terms[0].reshape(N, H * W, Cn), axis=-1)     # (N, H*W) f32
    o_ref[...] = out + b_ref[pl.ds(N_MID + 1, 1), pl.ds(0, 1)]


def init_params(key):
  conv_defs = [(1, C)] + [(C, C)] * N_MID + [(C, 1)]
  convs, bns = [], []
  for cin, cout in conv_defs:
    key, k1, k2 = jax.random.split(key, 3)
    w = jax.random.normal(k1, (3, 3, cin, cout), jnp.float32) / jnp.sqrt(
        9.0 * cin)
    b = 0.01 * jax.random.normal(k2, (cout,), jnp.float32)
    convs.append((w, b))
  for _ in range(N_MID + 1):
    key, k1, k2 = jax.random.split(key, 3)
    gamma = 1.0 + 0.05 * jax.random.normal(k1, (C,), jnp.float32)
    beta = 0.05 * jax.random.normal(k2, (C,), jnp.float32)
    bns.append((gamma, beta))
  return {"convs": convs, "bns": bns}


@jax.jit
def upnet_forward(params, x_nchw):
  x = x_nchw.astype(jnp.float32)[:, 0]                         # (N, H, W)
  N, H, W = x.shape
  M = N * H * W
  convs = params["convs"]

  # conv0 im2col in XLA: (M, 9) single-channel patches, zero-padded to K = 16.
  taps0 = [jnp.roll(x, (1 - kh, 1 - kw), axis=(1, 2))
           for kh in range(3) for kw in range(3)]
  patches0 = jnp.stack(taps0, axis=-1).reshape(M, 9)
  patches0 = jnp.pad(patches0, ((0, 0), (0, 7))).astype(jnp.bfloat16)
  w0 = jnp.pad(convs[0][0].reshape(9, C),
               ((0, 7), (0, 0))).astype(jnp.bfloat16)          # (16, 64)

  # Mid weights in per-tap layout (layer, tap, cin, cout); one layer per step.
  wmid = jnp.stack([convs[i][0].reshape(9, C, C)
                    for i in range(1, 1 + N_MID)]).astype(jnp.bfloat16)
  wlast = convs[N_MID + 1][0].reshape(9, C)                    # (9, 64) f32
  b_last = jnp.zeros((C,), jnp.float32).at[0].set(convs[N_MID + 1][1][0])
  biases = jnp.stack([convs[i][1] for i in range(N_MID + 1)] + [b_last])
  gamma = jnp.stack([g for g, _ in params["bns"]])             # (16, 64)
  beta = jnp.stack([b for _, b in params["bns"]])              # (16, 64)

  def _wmid_index(l):
    li = jnp.maximum(jnp.minimum(l - 1, N_MID - 1), 0)
    return (li, 0, 0, 0)

  full = lambda shape: pl.BlockSpec(shape, lambda l: (0,) * len(shape))

  out = pl.pallas_call(
      upnet_kernel,
      out_shape=jax.ShapeDtypeStruct((N, H * W), jnp.float32),
      grid_spec=pltpu.PrefetchScalarGridSpec(
          num_scalar_prefetch=0,
          grid=(N_STEPS,),
          in_specs=[
              full((M, 16)),                       # conv0 patches (bf16)
              full((16, C)),                       # conv0 weight  (bf16)
              pl.BlockSpec((None, 9, C, C), _wmid_index),   # per-layer weights
              full((9, C)),                        # conv16 weight (f32)
              full((N_MID + 2, C)),                # conv biases   (f32)
              full((N_MID + 1, C)),                # BN gamma      (f32)
              full((N_MID + 1, C)),                # BN beta       (f32)
          ],
          out_specs=pl.BlockSpec((N, H * W), lambda l: (0, 0)),
          scratch_shapes=[pltpu.VMEM((N, H, W, C), jnp.bfloat16)
                          for _ in range(3)],      # 3 pre-W-shifted variants
      ),
      compiler_params=pltpu.CompilerParams(
          dimension_semantics=("arbitrary",)),
  )(patches0, w0, wmid, wlast, biases, gamma, beta)
  return out.reshape(N, 1, H, W)                               # (N, 1, H, W)


if __name__ == "__main__":
  root = jax.random.PRNGKey(0)
  k_params, k_x = jax.random.split(root)
  params = init_params(k_params)
  x = jax.random.normal(k_x, (2, 1, 16, 16), jnp.float32)      # NCHW, Cin = 1

  out = jax.block_until_ready(upnet_forward(params, x))

  assert out.shape == (2, 1, 16, 16), out.shape
  assert bool(jnp.all(jnp.isfinite(out)))
  print("KERNEL_OK")
</pallas_src>

<mosaic_0001>
module attributes {stable_mosaic.version = 11 : i64} {
  func.func @upnet_kernel(%arg0: i32, %arg1: memref<512x16xbf16, #tpu.memory_space<vmem>>, %arg2: memref<16x64xbf16, #tpu.memory_space<vmem>>, %arg3: memref<1x9x64x64xbf16, #tpu.memory_space<vmem>>, %arg4: memref<9x64xf32, #tpu.memory_space<vmem>>, %arg5: memref<17x64xf32, #tpu.memory_space<vmem>>, %arg6: memref<16x64xf32, #tpu.memory_space<vmem>>, %arg7: memref<16x64xf32, #tpu.memory_space<vmem>>, %arg8: memref<2x256xf32, #tpu.memory_space<vmem>>, %arg9: memref<2x16x16x64xbf16, #tpu.memory_space<vmem>>, %arg10: memref<2x16x16x64xbf16, #tpu.memory_space<vmem>>, %arg11: memref<2x16x16x64xbf16, #tpu.memory_space<vmem>>) attributes {dimension_semantics = [#tpu.dimension_semantics<arbitrary>], iteration_bounds = array<i64: 17>, scalar_prefetch = 0 : i64, scratch_operands = 3 : i64, tpu.core_type = #tpu.core_type<tc>, window_params = [{pipeline_mode = #tpu.pipeline_mode<synchronous>, transform_indices = @transform_0, window_bounds = array<i64: 512, 16>}, {pipeline_mode = #tpu.pipeline_mode<synchronous>, transform_indices = @transform_1, window_bounds = array<i64: 16, 64>}, {transform_indices = @transform_2, window_bounds = array<i64: 1, 9, 64, 64>}, {pipeline_mode = #tpu.pipeline_mode<synchronous>, transform_indices = @transform_3, window_bounds = array<i64: 9, 64>}, {pipeline_mode = #tpu.pipeline_mode<synchronous>, transform_indices = @transform_4, window_bounds = array<i64: 17, 64>}, {pipeline_mode = #tpu.pipeline_mode<synchronous>, transform_indices = @transform_5, window_bounds = array<i64: 16, 64>}, {pipeline_mode = #tpu.pipeline_mode<synchronous>, transform_indices = @transform_6, window_bounds = array<i64: 16, 64>}, {pipeline_mode = #tpu.pipeline_mode<synchronous>, transform_indices = @transform_7, window_bounds = array<i64: 2, 256>}]} {
    %c0_i32 = arith.constant 0 : i32
    %0 = arith.cmpi eq, %arg0, %c0_i32 : i32
    %1 = arith.extui %0 : i1 to i32
    %c0_i32_0 = arith.constant 0 : i32
    %2 = arith.cmpi ne, %1, %c0_i32_0 : i32
    scf.if %2 {
      %c0 = arith.constant 0 : index
      %c0_3 = arith.constant 0 : index
      %11 = vector.load %arg1[%c0, %c0_3] : memref<512x16xbf16, #tpu.memory_space<vmem>>, vector<512x16xbf16>
      %c0_4 = arith.constant 0 : index
      %c0_5 = arith.constant 0 : index
      %12 = vector.load %arg2[%c0_4, %c0_5] : memref<16x64xbf16, #tpu.memory_space<vmem>>, vector<16x64xbf16>
      %cst = arith.constant dense<0.000000e+00> : vector<512x64xf32>
      %13 = tpu.matmul %11, %12, %cst {dimension_numbers = #tpu.dot_dimension_numbers<[1], [0], [0], [1], [0, 0, 1, 1], [], []>} : vector<512x16xbf16>, vector<16x64xbf16>, vector<512x64xf32> -> vector<512x64xf32>
      %c0_6 = arith.constant 0 : index
      %c0_7 = arith.constant 0 : index
      %14 = vector.load %arg5[%c0_6, %c0_7] : memref<17x64xf32, #tpu.memory_space<vmem>>, vector<1x64xf32>
      %15 = vector.broadcast %14 : vector<1x64xf32> to vector<512x64xf32>
      %16 = arith.addf %13, %15 : vector<512x64xf32>
      %cst_8 = arith.constant dense<0.000000e+00> : vector<64xf32>
      %17 = vector.multi_reduction <add>, %16, %cst_8 [0] : vector<512x64xf32> to vector<64xf32>
      %18 = vector.shape_cast %17 : vector<64xf32> to vector<1x64xf32>
      %19 = arith.mulf %16, %16 : vector<512x64xf32>
      %cst_9 = arith.constant dense<0.000000e+00> : vector<64xf32>
      %20 = vector.multi_reduction <add>, %19, %cst_9 [0] : vector<512x64xf32> to vector<64xf32>
      %21 = vector.shape_cast %20 : vector<64xf32> to vector<1x64xf32>
      %cst_10 = arith.constant 0.001953125 : f32
      %22 = vector.broadcast %cst_10 : f32 to vector<1x64xf32>
      %23 = arith.mulf %18, %22 : vector<1x64xf32>
      %cst_11 = arith.constant 0.001953125 : f32
      %24 = vector.broadcast %cst_11 : f32 to vector<1x64xf32>
      %25 = arith.mulf %21, %24 : vector<1x64xf32>
      %26 = arith.mulf %23, %23 : vector<1x64xf32>
      %27 = arith.subf %25, %26 : vector<1x64xf32>
      %cst_12 = arith.constant 9.99999974E-6 : f32
      %28 = vector.broadcast %cst_12 : f32 to vector<1x64xf32>
      %29 = arith.addf %27, %28 : vector<1x64xf32>
      %30 = math.rsqrt %29 : vector<1x64xf32>
      %c0_13 = arith.constant 0 : index
      %c0_14 = arith.constant 0 : index
      %31 = vector.load %arg6[%c0_13, %c0_14] : memref<16x64xf32, #tpu.memory_space<vmem>>, vector<1x64xf32>
      %c0_15 = arith.constant 0 : index
      %c0_16 = arith.constant 0 : index
      %32 = vector.load %arg7[%c0_15, %c0_16] : memref<16x64xf32, #tpu.memory_space<vmem>>, vector<1x64xf32>
      %33 = vector.broadcast %23 : vector<1x64xf32> to vector<512x64xf32>
      %34 = arith.subf %16, %33 : vector<512x64xf32>
      %35 = arith.mulf %31, %30 : vector<1x64xf32>
      %36 = vector.broadcast %35 : vector<1x64xf32> to vector<512x64xf32>
      %37 = arith.mulf %34, %36 : vector<512x64xf32>
      %38 = vector.broadcast %32 : vector<1x64xf32> to vector<512x64xf32>
      %39 = arith.addf %37, %38 : vector<512x64xf32>
      %cst_17 = arith.constant 0.000000e+00 : f32
      %40 = vector.broadcast %cst_17 : f32 to vector<512x64xf32>
      %41 = arith.maximumf %39, %40 : vector<512x64xf32>
      %42 = vector.shape_cast %41 : vector<512x64xf32> to vector<2x16x16x64xf32>
      %c1_i32_18 = arith.constant 1 : i32
      %43 = tpu.dynamic_rotate %42 by %c1_i32_18 dim 2 : vector<2x16x16x64xf32>, i32 -> vector<2x16x16x64xf32>
      %c15_i32_19 = arith.constant 15 : i32
      %44 = tpu.dynamic_rotate %42 by %c15_i32_19 dim 2 : vector<2x16x16x64xf32>, i32 -> vector<2x16x16x64xf32>
      %45 = arith.truncf %43 : vector<2x16x16x64xf32> to vector<2x16x16x64xbf16>
      %c0_20 = arith.constant 0 : index
      %c0_21 = arith.constant 0 : index
      %c0_22 = arith.constant 0 : index
      %c0_23 = arith.constant 0 : index
      %46 = vector.load %arg9[%c0_20, %c0_21, %c0_22, %c0_23] : memref<2x16x16x64xbf16, #tpu.memory_space<vmem>>, vector<2x16x16x64xbf16>
      tpu.vector_store %arg9[%c0_20, %c0_21, %c0_22, %c0_23], %45 {strides = array<i32>} : memref<2x16x16x64xbf16, #tpu.memory_space<vmem>>, vector<2x16x16x64xbf16>,
      %47 = arith.truncf %42 : vector<2x16x16x64xf32> to vector<2x16x16x64xbf16>
      %c0_24 = arith.constant 0 : index
      %c0_25 = arith.constant 0 : index
      %c0_26 = arith.constant 0 : index
      %c0_27 = arith.constant 0 : index
      %48 = vector.load %arg10[%c0_24, %c0_25, %c0_26, %c0_27] : memref<2x16x16x64xbf16, #tpu.memory_space<vmem>>, vector<2x16x16x64xbf16>
      tpu.vector_store %arg10[%c0_24, %c0_25, %c0_26, %c0_27], %47 {strides = array<i32>} : memref<2x16x16x64xbf16, #tpu.memory_space<vmem>>, vector<2x16x16x64xbf16>,
      %49 = arith.truncf %44 : vector<2x16x16x64xf32> to vector<2x16x16x64xbf16>
      %c0_28 = arith.constant 0 : index
      %c0_29 = arith.constant 0 : index
      %c0_30 = arith.constant 0 : index
      %c0_31 = arith.constant 0 : index
      %50 = vector.load %arg11[%c0_28, %c0_29, %c0_30, %c0_31] : memref<2x16x16x64xbf16, #tpu.memory_space<vmem>>, vector<2x16x16x64xbf16>
      tpu.vector_store %arg11[%c0_28, %c0_29, %c0_30, %c0_31], %49 {strides = array<i32>} : memref<2x16x16x64xbf16, #tpu.memory_space<vmem>>, vector<2x16x16x64xbf16>,
    } else {
    }
    %c1_i32 = arith.constant 1 : i32
    %3 = arith.cmpi sge, %arg0, %c1_i32 : i32
    %c15_i32 = arith.constant 15 : i32
    %4 = arith.cmpi sle, %arg0, %c15_i32 : i32
    %5 = arith.andi %3, %4 : i1
    %6 = arith.extui %5 : i1 to i32
    %c0_i32_1 = arith.constant 0 : i32
    %7 = arith.cmpi ne, %6, %c0_i32_1 : i32
    scf.if %7 {
      %c0 = arith.constant 0 : index
      %c0_3 = arith.constant 0 : index
      %c0_4 = arith.constant 0 : index
      %c0_5 = arith.constant 0 : index
      %11 = vector.load %arg9[%c0, %c0_3, %c0_4, %c0_5] : memref<2x16x16x64xbf16, #tpu.memory_space<vmem>>, vector<2x16x16x64xbf16>
      %c0_6 = arith.constant 0 : index
      %c0_7 = arith.constant 0 : index
      %c0_8 = arith.constant 0 : index
      %c0_9 = arith.constant 0 : index
      %12 = vector.load %arg10[%c0_6, %c0_7, %c0_8, %c0_9] : memref<2x16x16x64xbf16, #tpu.memory_space<vmem>>, vector<2x16x16x64xbf16>
      %c0_10 = arith.constant 0 : index
      %c0_11 = arith.constant 0 : index
      %c0_12 = arith.constant 0 : index
      %c0_13 = arith.constant 0 : index
      %13 = vector.load %arg11[%c0_10, %c0_11, %c0_12, %c0_13] : memref<2x16x16x64xbf16, #tpu.memory_space<vmem>>, vector<2x16x16x64xbf16>
      %14 = vector.extract_strided_slice %11 {offsets = [0, 15, 0, 0], sizes = [2, 1, 16, 64], strides = [1, 1, 1, 1]} : vector<2x16x16x64xbf16> to vector<2x1x16x64xbf16>
      %15 = vector.extract_strided_slice %11 {offsets = [0, 0, 0, 0], sizes = [2, 15, 16, 64], strides = [1, 1, 1, 1]} : vector<2x16x16x64xbf16> to vector<2x15x16x64xbf16>
      %16 = tpu.concatenate %14, %15 in 1 : vector<2x1x16x64xbf16>, vector<2x15x16x64xbf16> -> vector<2x16x16x64xbf16>
      %17 = vector.shape_cast %16 : vector<2x16x16x64xbf16> to vector<512x64xbf16>
      %c0_14 = arith.constant 0 : index
      %c0_15 = arith.constant 0 : index
      %c0_16 = arith.constant 0 : index
      %c0_17 = arith.constant 0 : index
      %18 = vector.load %arg3[%c0_14, %c0_15, %c0_16, %c0_17] : memref<1x9x64x64xbf16, #tpu.memory_space<vmem>>, vector<1x1x64x64xbf16>
      %19 = vector.shape_cast %18 : vector<1x1x64x64xbf16> to vector<64x64xbf16>
      %cst = arith.constant dense<0.000000e+00> : vector<512x64xf32>
      %20 = tpu.matmul %17, %19, %cst {dimension_numbers = #tpu.dot_dimension_numbers<[1], [0], [0], [1], [0, 0, 1, 1], [], []>} : vector<512x64xbf16>, vector<64x64xbf16>, vector<512x64xf32> -> vector<512x64xf32>
      %21 = vector.extract_strided_slice %12 {offsets = [0, 15, 0, 0], sizes = [2, 1, 16, 64], strides = [1, 1, 1, 1]} : vector<2x16x16x64xbf16> to vector<2x1x16x64xbf16>
      %22 = vector.extract_strided_slice %12 {offsets = [0, 0, 0, 0], sizes = [2, 15, 16, 64], strides = [1, 1, 1, 1]} : vector<2x16x16x64xbf16> to vector<2x15x16x64xbf16>
      %23 = tpu.concatenate %21, %22 in 1 : vector<2x1x16x64xbf16>, vector<2x15x16x64xbf16> -> vector<2x16x16x64xbf16>
      %24 = vector.shape_cast %23 : vector<2x16x16x64xbf16> to vector<512x64xbf16>
      %c0_18 = arith.constant 0 : index
      %c1 = arith.constant 1 : index
      %c0_19 = arith.constant 0 : index
      %c0_20 = arith.constant 0 : index
      %25 = vector.load %arg3[%c0_18, %c1, %c0_19, %c0_20] : memref<1x9x64x64xbf16, #tpu.memory_space<vmem>>, vector<1x1x64x64xbf16>
      %26 = vector.shape_cast %25 : vector<1x1x64x64xbf16> to vector<64x64xbf16>
      %cst_21 = arith.constant dense<0.000000e+00> : vector<512x64xf32>
      %27 = tpu.matmul %24, %26, %cst_21 {dimension_numbers = #tpu.dot_dimension_numbers<[1], [0], [0], [1], [0, 0, 1, 1], [], []>} : vector<512x64xbf16>, vector<64x64xbf16>, vector<512x64xf32> -> vector<512x64xf32>
      %28 = arith.addf %20, %27 : vector<512x64xf32>
      %29 = vector.extract_strided_slice %13 {offsets = [0, 15, 0, 0], sizes = [2, 1, 16, 64], strides = [1, 1, 1, 1]} : vector<2x16x16x64xbf16> to vector<2x1x16x64xbf16>
      %30 = vector.extract_strided_slice %13 {offsets = [0, 0, 0, 0], sizes = [2, 15, 16, 64], strides = [1, 1, 1, 1]} : vector<2x16x16x64xbf16> to vector<2x15x16x64xbf16>
      %31 = tpu.concatenate %29, %30 in 1 : vector<2x1x16x64xbf16>, vector<2x15x16x64xbf16> -> vector<2x16x16x64xbf16>
      %32 = vector.shape_cast %31 : vector<2x16x16x64xbf16> to vector<512x64xbf16>
      %c0_22 = arith.constant 0 : index
      %c2 = arith.constant 2 : index
      %c0_23 = arith.constant 0 : index
      %c0_24 = arith.constant 0 : index
      %33 = vector.load %arg3[%c0_22, %c2, %c0_23, %c0_24] : memref<1x9x64x64xbf16, #tpu.memory_space<vmem>>, vector<1x1x64x64xbf16>
      %34 = vector.shape_cast %33 : vector<1x1x64x64xbf16> to vector<64x64xbf16>
      %cst_25 = arith.constant dense<0.000000e+00> : vector<512x64xf32>
      %35 = tpu.matmul %32, %34, %cst_25 {dimension_numbers = #tpu.dot_dimension_numbers<[1], [0], [0], [1], [0, 0, 1, 1], [], []>} : vector<512x64xbf16>, vector<64x64xbf16>, vector<512x64xf32> -> vector<512x64xf32>
      %36 = arith.addf %28, %35 : vector<512x64xf32>
      %37 = vector.shape_cast %11 : vector<2x16x16x64xbf16> to vector<512x64xbf16>
      %c0_26 = arith.constant 0 : index
      %c3 = arith.constant 3 : index
      %c0_27 = arith.constant 0 : index
      %c0_28 = arith.constant 0 : index
      %38 = vector.load %arg3[%c0_26, %c3, %c0_27, %c0_28] : memref<1x9x64x64xbf16, #tpu.memory_space<vmem>>, vector<1x1x64x64xbf16>
      %39 = vector.shape_cast %38 : vector<1x1x64x64xbf16> to vector<64x64xbf16>
      %cst_29 = arith.constant dense<0.000000e+00> : vector<512x64xf32>
      %40 = tpu.matmul %37, %39, %cst_29 {dimension_numbers = #tpu.dot_dimension_numbers<[1], [0], [0], [1], [0, 0, 1, 1], [], []>} : vector<512x64xbf16>, vector<64x64xbf16>, vector<512x64xf32> -> vector<512x64xf32>
      %41 = arith.addf %36, %40 : vector<512x64xf32>
      %42 = vector.shape_cast %12 : vector<2x16x16x64xbf16> to vector<512x64xbf16>
      %c0_30 = arith.constant 0 : index
      %c4 = arith.constant 4 : index
      %c0_31 = arith.constant 0 : index
      %c0_32 = arith.constant 0 : index
      %43 = vector.load %arg3[%c0_30, %c4, %c0_31, %c0_32] : memref<1x9x64x64xbf16, #tpu.memory_space<vmem>>, vector<1x1x64x64xbf16>
      %44 = vector.shape_cast %43 : vector<1x1x64x64xbf16> to vector<64x64xbf16>
      %cst_33 = arith.constant dense<0.000000e+00> : vector<512x64xf32>
      %45 = tpu.matmul %42, %44, %cst_33 {dimension_numbers = #tpu.dot_dimension_numbers<[1], [0], [0], [1], [0, 0, 1, 1], [], []>} : vector<512x64xbf16>, vector<64x64xbf16>, vector<512x64xf32> -> vector<512x64xf32>
      %46 = arith.addf %41, %45 : vector<512x64xf32>
      %47 = vector.shape_cast %13 : vector<2x16x16x64xbf16> to vector<512x64xbf16>
      %c0_34 = arith.constant 0 : index
      %c5 = arith.constant 5 : index
      %c0_35 = arith.constant 0 : index
      %c0_36 = arith.constant 0 : index
      %48 = vector.load %arg3[%c0_34, %c5, %c0_35, %c0_36] : memref<1x9x64x64xbf16, #tpu.memory_space<vmem>>, vector<1x1x64x64xbf16>
      %49 = vector.shape_cast %48 : vector<1x1x64x64xbf16> to vector<64x64xbf16>
      %cst_37 = arith.constant dense<0.000000e+00> : vector<512x64xf32>
      %50 = tpu.matmul %47, %49, %cst_37 {dimension_numbers = #tpu.dot_dimension_numbers<[1], [0], [0], [1], [0, 0, 1, 1], [], []>} : vector<512x64xbf16>, vector<64x64xbf16>, vector<512x64xf32> -> vector<512x64xf32>
      %51 = arith.addf %46, %50 : vector<512x64xf32>
      %52 = vector.extract_strided_slice %11 {offsets = [0, 1, 0, 0], sizes = [2, 15, 16, 64], strides = [1, 1, 1, 1]} : vector<2x16x16x64xbf16> to vector<2x15x16x64xbf16>
      %53 = vector.extract_strided_slice %11 {offsets = [0, 0, 0, 0], sizes = [2, 1, 16, 64], strides = [1, 1, 1, 1]} : vector<2x16x16x64xbf16> to vector<2x1x16x64xbf16>
      %54 = tpu.concatenate %52, %53 in 1 : vector<2x15x16x64xbf16>, vector<2x1x16x64xbf16> -> vector<2x16x16x64xbf16>
      %55 = vector.shape_cast %54 : vector<2x16x16x64xbf16> to vector<512x64xbf16>
      %c0_38 = arith.constant 0 : index
      %c6 = arith.constant 6 : index
      %c0_39 = arith.constant 0 : index
      %c0_40 = arith.constant 0 : index
      %56 = vector.load %arg3[%c0_38, %c6, %c0_39, %c0_40] : memref<1x9x64x64xbf16, #tpu.memory_space<vmem>>, vector<1x1x64x64xbf16>
      %57 = vector.shape_cast %56 : vector<1x1x64x64xbf16> to vector<64x64xbf16>
      %cst_41 = arith.constant dense<0.000000e+00> : vector<512x64xf32>
      %58 = tpu.matmul %55, %57, %cst_41 {dimension_numbers = #tpu.dot_dimension_numbers<[1], [0], [0], [1], [0, 0, 1, 1], [], []>} : vector<512x64xbf16>, vector<64x64xbf16>, vector<512x64xf32> -> vector<512x64xf32>
      %59 = arith.addf %51, %58 : vector<512x64xf32>
      %60 = vector.extract_strided_slice %12 {offsets = [0, 1, 0, 0], sizes = [2, 15, 16, 64], strides = [1, 1, 1, 1]} : vector<2x16x16x64xbf16> to vector<2x15x16x64xbf16>
      %61 = vector.extract_strided_slice %12 {offsets = [0, 0, 0, 0], sizes = [2, 1, 16, 64], strides = [1, 1, 1, 1]} : vector<2x16x16x64xbf16> to vector<2x1x16x64xbf16>
      %62 = tpu.concatenate %60, %61 in 1 : vector<2x15x16x64xbf16>, vector<2x1x16x64xbf16> -> vector<2x16x16x64xbf16>
      %63 = vector.shape_cast %62 : vector<2x16x16x64xbf16> to vector<512x64xbf16>
      %c0_42 = arith.constant 0 : index
      %c7 = arith.constant 7 : index
      %c0_43 = arith.constant 0 : index
      %c0_44 = arith.constant 0 : index
      %64 = vector.load %arg3[%c0_42, %c7, %c0_43, %c0_44] : memref<1x9x64x64xbf16, #tpu.memory_space<vmem>>, vector<1x1x64x64xbf16>
      %65 = vector.shape_cast %64 : vector<1x1x64x64xbf16> to vector<64x64xbf16>
      %cst_45 = arith.constant dense<0.000000e+00> : vector<512x64xf32>
      %66 = tpu.matmul %63, %65, %cst_45 {dimension_numbers = #tpu.dot_dimension_numbers<[1], [0], [0], [1], [0, 0, 1, 1], [], []>} : vector<512x64xbf16>, vector<64x64xbf16>, vector<512x64xf32> -> vector<512x64xf32>
      %67 = arith.addf %59, %66 : vector<512x64xf32>
      %68 = vector.extract_strided_slice %13 {offsets = [0, 1, 0, 0], sizes = [2, 15, 16, 64], strides = [1, 1, 1, 1]} : vector<2x16x16x64xbf16> to vector<2x15x16x64xbf16>
      %69 = vector.extract_strided_slice %13 {offsets = [0, 0, 0, 0], sizes = [2, 1, 16, 64], strides = [1, 1, 1, 1]} : vector<2x16x16x64xbf16> to vector<2x1x16x64xbf16>
      %70 = tpu.concatenate %68, %69 in 1 : vector<2x15x16x64xbf16>, vector<2x1x16x64xbf16> -> vector<2x16x16x64xbf16>
      %71 = vector.shape_cast %70 : vector<2x16x16x64xbf16> to vector<512x64xbf16>
      %c0_46 = arith.constant 0 : index
      %c8 = arith.constant 8 : index
      %c0_47 = arith.constant 0 : index
      %c0_48 = arith.constant 0 : index
      %72 = vector.load %arg3[%c0_46, %c8, %c0_47, %c0_48] : memref<1x9x64x64xbf16, #tpu.memory_space<vmem>>, vector<1x1x64x64xbf16>
      %73 = vector.shape_cast %72 : vector<1x1x64x64xbf16> to vector<64x64xbf16>
      %cst_49 = arith.constant dense<0.000000e+00> : vector<512x64xf32>
      %74 = tpu.matmul %71, %73, %cst_49 {dimension_numbers = #tpu.dot_dimension_numbers<[1], [0], [0], [1], [0, 0, 1, 1], [], []>} : vector<512x64xbf16>, vector<64x64xbf16>, vector<512x64xf32> -> vector<512x64xf32>
      %75 = arith.addf %67, %74 : vector<512x64xf32>
      %76 = arith.index_cast %arg0 : i32 to index
      %c0_50 = arith.constant 0 : index
      %77 = vector.load %arg5[%76, %c0_50] : memref<17x64xf32, #tpu.memory_space<vmem>>, vector<1x64xf32>
      %78 = vector.broadcast %77 : vector<1x64xf32> to vector<512x64xf32>
      %79 = arith.addf %75, %78 : vector<512x64xf32>
      %cst_51 = arith.constant dense<0.000000e+00> : vector<64xf32>
      %80 = vector.multi_reduction <add>, %79, %cst_51 [0] : vector<512x64xf32> to vector<64xf32>
      %81 = vector.shape_cast %80 : vector<64xf32> to vector<1x64xf32>
      %82 = arith.mulf %79, %79 : vector<512x64xf32>
      %cst_52 = arith.constant dense<0.000000e+00> : vector<64xf32>
      %83 = vector.multi_reduction <add>, %82, %cst_52 [0] : vector<512x64xf32> to vector<64xf32>
      %84 = vector.shape_cast %83 : vector<64xf32> to vector<1x64xf32>
      %cst_53 = arith.constant 0.001953125 : f32
      %85 = vector.broadcast %cst_53 : f32 to vector<1x64xf32>
      %86 = arith.mulf %81, %85 : vector<1x64xf32>
      %cst_54 = arith.constant 0.001953125 : f32
      %87 = vector.broadcast %cst_54 : f32 to vector<1x64xf32>
      %88 = arith.mulf %84, %87 : vector<1x64xf32>
      %89 = arith.mulf %86, %86 : vector<1x64xf32>
      %90 = arith.subf %88, %89 : vector<1x64xf32>
      %cst_55 = arith.constant 9.99999974E-6 : f32
      %91 = vector.broadcast %cst_55 : f32 to vector<1x64xf32>
      %92 = arith.addf %90, %91 : vector<1x64xf32>
      %93 = math.rsqrt %92 : vector<1x64xf32>
      %94 = arith.index_cast %arg0 : i32 to index
      %c0_56 = arith.constant 0 : index
      %95 = vector.load %arg6[%94, %c0_56] : memref<16x64xf32, #tpu.memory_space<vmem>>, vector<1x64xf32>
      %96 = arith.index_cast %arg0 : i32 to index
      %c0_57 = arith.constant 0 : index
      %97 = vector.load %arg7[%96, %c0_57] : memref<16x64xf32, #tpu.memory_space<vmem>>, vector<1x64xf32>
      %98 = vector.broadcast %86 : vector<1x64xf32> to vector<512x64xf32>
      %99 = arith.subf %79, %98 : vector<512x64xf32>
      %100 = arith.mulf %95, %93 : vector<1x64xf32>
      %101 = vector.broadcast %100 : vector<1x64xf32> to vector<512x64xf32>
      %102 = arith.mulf %99, %101 : vector<512x64xf32>
      %103 = vector.broadcast %97 : vector<1x64xf32> to vector<512x64xf32>
      %104 = arith.addf %102, %103 : vector<512x64xf32>
      %cst_58 = arith.constant 0.000000e+00 : f32
      %105 = vector.broadcast %cst_58 : f32 to vector<512x64xf32>
      %106 = arith.maximumf %104, %105 : vector<512x64xf32>
      %107 = vector.shape_cast %106 : vector<512x64xf32> to vector<2x16x16x64xf32>
      %c1_i32_59 = arith.constant 1 : i32
      %108 = tpu.dynamic_rotate %107 by %c1_i32_59 dim 2 : vector<2x16x16x64xf32>, i32 -> vector<2x16x16x64xf32>
      %c15_i32_60 = arith.constant 15 : i32
      %109 = tpu.dynamic_rotate %107 by %c15_i32_60 dim 2 : vector<2x16x16x64xf32>, i32 -> vector<2x16x16x64xf32>
      %110 = arith.truncf %108 : vector<2x16x16x64xf32> to vector<2x16x16x64xbf16>
      %c0_61 = arith.constant 0 : index
      %c0_62 = arith.constant 0 : index
      %c0_63 = arith.constant 0 : index
      %c0_64 = arith.constant 0 : index
      %111 = vector.load %arg9[%c0_61, %c0_62, %c0_63, %c0_64] : memref<2x16x16x64xbf16, #tpu.memory_space<vmem>>, vector<2x16x16x64xbf16>
      tpu.vector_store %arg9[%c0_61, %c0_62, %c0_63, %c0_64], %110 {strides = array<i32>} : memref<2x16x16x64xbf16, #tpu.memory_space<vmem>>, vector<2x16x16x64xbf16>,
      %112 = arith.truncf %107 : vector<2x16x16x64xf32> to vector<2x16x16x64xbf16>
      %c0_65 = arith.constant 0 : index
      %c0_66 = arith.constant 0 : index
      %c0_67 = arith.constant 0 : index
      %c0_68 = arith.constant 0 : index
      %113 = vector.load %arg10[%c0_65, %c0_66, %c0_67, %c0_68] : memref<2x16x16x64xbf16, #tpu.memory_space<vmem>>, vector<2x16x16x64xbf16>
      tpu.vector_store %arg10[%c0_65, %c0_66, %c0_67, %c0_68], %112 {strides = array<i32>} : memref<2x16x16x64xbf16, #tpu.memory_space<vmem>>, vector<2x16x16x64xbf16>,
      %114 = arith.truncf %109 : vector<2x16x16x64xf32> to vector<2x16x16x64xbf16>
      %c0_69 = arith.constant 0 : index
      %c0_70 = arith.constant 0 : index
      %c0_71 = arith.constant 0 : index
      %c0_72 = arith.constant 0 : index
      %115 = vector.load %arg11[%c0_69, %c0_70, %c0_71, %c0_72] : memref<2x16x16x64xbf16, #tpu.memory_space<vmem>>, vector<2x16x16x64xbf16>
      tpu.vector_store %arg11[%c0_69, %c0_70, %c0_71, %c0_72], %114 {strides = array<i32>} : memref<2x16x16x64xbf16, #tpu.memory_space<vmem>>, vector<2x16x16x64xbf16>,
    } else {
    }
    %c16_i32 = arith.constant 16 : i32
    %8 = arith.cmpi eq, %arg0, %c16_i32 : i32
    %9 = arith.extui %8 : i1 to i32
    %c0_i32_2 = arith.constant 0 : i32
    %10 = arith.cmpi ne, %9, %c0_i32_2 : i32
    scf.if %10 {
      %c0 = arith.constant 0 : index
      %c0_3 = arith.constant 0 : index
      %c0_4 = arith.constant 0 : index
      %c0_5 = arith.constant 0 : index
      %11 = vector.load %arg9[%c0, %c0_3, %c0_4, %c0_5] : memref<2x16x16x64xbf16, #tpu.memory_space<vmem>>, vector<2x16x16x64xbf16>
      %12 = arith.extf %11 : vector<2x16x16x64xbf16> to vector<2x16x16x64xf32>
      %c0_6 = arith.constant 0 : index
      %c0_7 = arith.constant 0 : index
      %c0_8 = arith.constant 0 : index
      %c0_9 = arith.constant 0 : index
      %13 = vector.load %arg10[%c0_6, %c0_7, %c0_8, %c0_9] : memref<2x16x16x64xbf16, #tpu.memory_space<vmem>>, vector<2x16x16x64xbf16>
      %14 = arith.extf %13 : vector<2x16x16x64xbf16> to vector<2x16x16x64xf32>
      %c0_10 = arith.constant 0 : index
      %c0_11 = arith.constant 0 : index
      %c0_12 = arith.constant 0 : index
      %c0_13 = arith.constant 0 : index
      %15 = vector.load %arg11[%c0_10, %c0_11, %c0_12, %c0_13] : memref<2x16x16x64xbf16, #tpu.memory_space<vmem>>, vector<2x16x16x64xbf16>
      %16 = arith.extf %15 : vector<2x16x16x64xbf16> to vector<2x16x16x64xf32>
      %17 = vector.extract_strided_slice %12 {offsets = [0, 15, 0, 0], sizes = [2, 1, 16, 64], strides = [1, 1, 1, 1]} : vector<2x16x16x64xf32> to vector<2x1x16x64xf32>
      %18 = vector.extract_strided_slice %12 {offsets = [0, 0, 0, 0], sizes = [2, 15, 16, 64], strides = [1, 1, 1, 1]} : vector<2x16x16x64xf32> to vector<2x15x16x64xf32>
      %19 = tpu.concatenate %17, %18 in 1 : vector<2x1x16x64xf32>, vector<2x15x16x64xf32> -> vector<2x16x16x64xf32>
      %20 = vector.shape_cast %19 : vector<2x16x16x64xf32> to vector<512x64xf32>
      %c0_14 = arith.constant 0 : index
      %c0_15 = arith.constant 0 : index
      %21 = vector.load %arg4[%c0_14, %c0_15] : memref<9x64xf32, #tpu.memory_space<vmem>>, vector<1x64xf32>
      %22 = vector.broadcast %21 : vector<1x64xf32> to vector<512x64xf32>
      %23 = arith.mulf %20, %22 : vector<512x64xf32>
      %24 = vector.extract_strided_slice %14 {offsets = [0, 15, 0, 0], sizes = [2, 1, 16, 64], strides = [1, 1, 1, 1]} : vector<2x16x16x64xf32> to vector<2x1x16x64xf32>
      %25 = vector.extract_strided_slice %14 {offsets = [0, 0, 0, 0], sizes = [2, 15, 16, 64], strides = [1, 1, 1, 1]} : vector<2x16x16x64xf32> to vector<2x15x16x64xf32>
      %26 = tpu.concatenate %24, %25 in 1 : vector<2x1x16x64xf32>, vector<2x15x16x64xf32> -> vector<2x16x16x64xf32>
      %27 = vector.shape_cast %26 : vector<2x16x16x64xf32> to vector<512x64xf32>
      %c1 = arith.constant 1 : index
      %c0_16 = arith.constant 0 : index
      %28 = vector.load %arg4[%c1, %c0_16] : memref<9x64xf32, #tpu.memory_space<vmem>>, vector<1x64xf32>
      %29 = vector.broadcast %28 : vector<1x64xf32> to vector<512x64xf32>
      %30 = arith.mulf %27, %29 : vector<512x64xf32>
      %31 = vector.extract_strided_slice %16 {offsets = [0, 15, 0, 0], sizes = [2, 1, 16, 64], strides = [1, 1, 1, 1]} : vector<2x16x16x64xf32> to vector<2x1x16x64xf32>
      %32 = vector.extract_strided_slice %16 {offsets = [0, 0, 0, 0], sizes = [2, 15, 16, 64], strides = [1, 1, 1, 1]} : vector<2x16x16x64xf32> to vector<2x15x16x64xf32>
      %33 = tpu.concatenate %31, %32 in 1 : vector<2x1x16x64xf32>, vector<2x15x16x64xf32> -> vector<2x16x16x64xf32>
      %34 = vector.shape_cast %33 : vector<2x16x16x64xf32> to vector<512x64xf32>
      %c2 = arith.constant 2 : index
      %c0_17 = arith.constant 0 : index
      %35 = vector.load %arg4[%c2, %c0_17] : memref<9x64xf32, #tpu.memory_space<vmem>>, vector<1x64xf32>
      %36 = vector.broadcast %35 : vector<1x64xf32> to vector<512x64xf32>
      %37 = arith.mulf %34, %36 : vector<512x64xf32>
      %38 = vector.shape_cast %12 : vector<2x16x16x64xf32> to vector<512x64xf32>
      %c3 = arith.constant 3 : index
      %c0_18 = arith.constant 0 : index
      %39 = vector.load %arg4[%c3, %c0_18] : memref<9x64xf32, #tpu.memory_space<vmem>>, vector<1x64xf32>
      %40 = vector.broadcast %39 : vector<1x64xf32> to vector<512x64xf32>
      %41 = arith.mulf %38, %40 : vector<512x64xf32>
      %42 = vector.shape_cast %14 : vector<2x16x16x64xf32> to vector<512x64xf32>
      %c4 = arith.constant 4 : index
      %c0_19 = arith.constant 0 : index
      %43 = vector.load %arg4[%c4, %c0_19] : memref<9x64xf32, #tpu.memory_space<vmem>>, vector<1x64xf32>
      %44 = vector.broadcast %43 : vector<1x64xf32> to vector<512x64xf32>
      %45 = arith.mulf %42, %44 : vector<512x64xf32>
      %46 = vector.shape_cast %16 : vector<2x16x16x64xf32> to vector<512x64xf32>
      %c5 = arith.constant 5 : index
      %c0_20 = arith.constant 0 : index
      %47 = vector.load %arg4[%c5, %c0_20] : memref<9x64xf32, #tpu.memory_space<vmem>>, vector<1x64xf32>
      %48 = vector.broadcast %47 : vector<1x64xf32> to vector<512x64xf32>
      %49 = arith.mulf %46, %48 : vector<512x64xf32>
      %50 = vector.extract_strided_slice %12 {offsets = [0, 1, 0, 0], sizes = [2, 15, 16, 64], strides = [1, 1, 1, 1]} : vector<2x16x16x64xf32> to vector<2x15x16x64xf32>
      %51 = vector.extract_strided_slice %12 {offsets = [0, 0, 0, 0], sizes = [2, 1, 16, 64], strides = [1, 1, 1, 1]} : vector<2x16x16x64xf32> to vector<2x1x16x64xf32>
      %52 = tpu.concatenate %50, %51 in 1 : vector<2x15x16x64xf32>, vector<2x1x16x64xf32> -> vector<2x16x16x64xf32>
      %53 = vector.shape_cast %52 : vector<2x16x16x64xf32> to vector<512x64xf32>
      %c6 = arith.constant 6 : index
      %c0_21 = arith.constant 0 : index
      %54 = vector.load %arg4[%c6, %c0_21] : memref<9x64xf32, #tpu.memory_space<vmem>>, vector<1x64xf32>
      %55 = vector.broadcast %54 : vector<1x64xf32> to vector<512x64xf32>
      %56 = arith.mulf %53, %55 : vector<512x64xf32>
      %57 = vector.extract_strided_slice %14 {offsets = [0, 1, 0, 0], sizes = [2, 15, 16, 64], strides = [1, 1, 1, 1]} : vector<2x16x16x64xf32> to vector<2x15x16x64xf32>
      %58 = vector.extract_strided_slice %14 {offsets = [0, 0, 0, 0], sizes = [2, 1, 16, 64], strides = [1, 1, 1, 1]} : vector<2x16x16x64xf32> to vector<2x1x16x64xf32>
      %59 = tpu.concatenate %57, %58 in 1 : vector<2x15x16x64xf32>, vector<2x1x16x64xf32> -> vector<2x16x16x64xf32>
      %60 = vector.shape_cast %59 : vector<2x16x16x64xf32> to vector<512x64xf32>
      %c7 = arith.constant 7 : index
      %c0_22 = arith.constant 0 : index
      %61 = vector.load %arg4[%c7, %c0_22] : memref<9x64xf32, #tpu.memory_space<vmem>>, vector<1x64xf32>
      %62 = vector.broadcast %61 : vector<1x64xf32> to vector<512x64xf32>
      %63 = arith.mulf %60, %62 : vector<512x64xf32>
      %64 = vector.extract_strided_slice %16 {offsets = [0, 1, 0, 0], sizes = [2, 15, 16, 64], strides = [1, 1, 1, 1]} : vector<2x16x16x64xf32> to vector<2x15x16x64xf32>
      %65 = vector.extract_strided_slice %16 {offsets = [0, 0, 0, 0], sizes = [2, 1, 16, 64], strides = [1, 1, 1, 1]} : vector<2x16x16x64xf32> to vector<2x1x16x64xf32>
      %66 = tpu.concatenate %64, %65 in 1 : vector<2x15x16x64xf32>, vector<2x1x16x64xf32> -> vector<2x16x16x64xf32>
      %67 = vector.shape_cast %66 : vector<2x16x16x64xf32> to vector<512x64xf32>
      %c8 = arith.constant 8 : index
      %c0_23 = arith.constant 0 : index
      %68 = vector.load %arg4[%c8, %c0_23] : memref<9x64xf32, #tpu.memory_space<vmem>>, vector<1x64xf32>
      %69 = vector.broadcast %68 : vector<1x64xf32> to vector<512x64xf32>
      %70 = arith.mulf %67, %69 : vector<512x64xf32>
      %71 = arith.addf %23, %30 : vector<512x64xf32>
      %72 = arith.addf %37, %41 : vector<512x64xf32>
      %73 = arith.addf %45, %49 : vector<512x64xf32>
      %74 = arith.addf %56, %63 : vector<512x64xf32>
      %75 = arith.addf %71, %72 : vector<512x64xf32>
      %76 = arith.addf %73, %74 : vector<512x64xf32>
      %77 = arith.addf %75, %76 : vector<512x64xf32>
      %78 = arith.addf %77, %70 : vector<512x64xf32>
      %79 = vector.shape_cast %78 : vector<512x64xf32> to vector<2x256x64xf32>
      %cst = arith.constant dense<0.000000e+00> : vector<2x256xf32>
      %80 = vector.multi_reduction <add>, %79, %cst [2] : vector<2x256x64xf32> to vector<2x256xf32>
      %c16 = arith.constant 16 : index
      %c0_24 = arith.constant 0 : index
      %81 = vector.load %arg5[%c16, %c0_24] : memref<17x64xf32, #tpu.memory_space<vmem>>, vector<1x1xf32>
      %82 = vector.broadcast %81 : vector<1x1xf32> to vector<2x256xf32>
      %83 = arith.addf %80, %82 : vector<2x256xf32>
      %c0_25 = arith.constant 0 : index
      %c0_26 = arith.constant 0 : index
      %84 = vector.load %arg8[%c0_25, %c0_26] : memref<2x256xf32, #tpu.memory_space<vmem>>, vector<2x256xf32>
      tpu.vector_store %arg8[%c0_25, %c0_26], %83 {strides = array<i32>} : memref<2x256xf32, #tpu.memory_space<vmem>>, vector<2x256xf32>,
    } else {
    }
    return
  }
  func.func @transform_0(%arg0: i32) -> (i32, i32) {
    %c0_i32 = arith.constant 0 : i32
    %c0_i32_0 = arith.constant 0 : i32
    %c0_i32_1 = arith.constant 0 : i32
    return %c0_i32, %c0_i32_0 : i32, i32
  }
  func.func @transform_1(%arg0: i32) -> (i32, i32) {
    %c0_i32 = arith.constant 0 : i32
    %c0_i32_0 = arith.constant 0 : i32
    %c0_i32_1 = arith.constant 0 : i32
    return %c0_i32, %c0_i32_0 : i32, i32
  }
  func.func @transform_2(%arg0: i32) -> (i32, i32, i32, i32) {
    %c1_i32 = arith.constant 1 : i32
    %0 = arith.subi %arg0, %c1_i32 : i32
    %c14_i32 = arith.constant 14 : i32
    %1 = arith.minsi %0, %c14_i32 : i32
    %c0_i32 = arith.constant 0 : i32
    %2 = arith.maxsi %1, %c0_i32 : i32
    %c0_i32_0 = arith.constant 0 : i32
    %c0_i32_1 = arith.constant 0 : i32
    %c0_i32_2 = arith.constant 0 : i32
    %c0_i32_3 = arith.constant 0 : i32
    return %2, %c0_i32_0, %c0_i32_1, %c0_i32_2 : i32, i32, i32, i32
  }
  func.func @transform_3(%arg0: i32) -> (i32, i32) {
    %c0_i32 = arith.constant 0 : i32
    %c0_i32_0 = arith.constant 0 : i32
    %c0_i32_1 = arith.constant 0 : i32
    return %c0_i32, %c0_i32_0 : i32, i32
  }
  func.func @transform_4(%arg0: i32) -> (i32, i32) {
    %c0_i32 = arith.constant 0 : i32
    %c0_i32_0 = arith.constant 0 : i32
    %c0_i32_1 = arith.constant 0 : i32
    return %c0_i32, %c0_i32_0 : i32, i32
  }
  func.func @transform_5(%arg0: i32) -> (i32, i32) {
    %c0_i32 = arith.constant 0 : i32
    %c0_i32_0 = arith.constant 0 : i32
    %c0_i32_1 = arith.constant 0 : i32
    return %c0_i32, %c0_i32_0 : i32, i32
  }
  func.func @transform_6(%arg0: i32) -> (i32, i32) {
    %c0_i32 = arith.constant 0 : i32
    %c0_i32_0 = arith.constant 0 : i32
    %c0_i32_1 = arith.constant 0 : i32
    return %c0_i32, %c0_i32_0 : i32, i32
  }
  func.func @transform_7(%arg0: i32) -> (i32, i32) {
    %c0_i32 = arith.constant 0 : i32
    %c0_i32_0 = arith.constant 0 : i32
    %c0_i32_1 = arith.constant 0 : i32
    return %c0_i32, %c0_i32_0 : i32, i32
  }
}

</mosaic_0001>

<bundles_post_ra>
// kernel: upnet_forward.1
= control target key start
LH: loop header
LB: loop body
LE: loop exit
PB: predicated region body
PF: predicated region fallthrough
CT: control target
= control target key end

     0   :  { %s14319_s24 = smov 0   ;;  %s24267_s0 = inlined_call_operand.vmem [shape: bf16[512,16], index: 0, kind: input, shape index: {}]   ;;  %s24268_s1 = inlined_call_operand.vmem [shape: bf16[16,64], index: 1, kind: input, shape index: {}]   ;;  %s24269_s2 = inlined_call_operand.vmem [shape: bf16[15,9,64,64], index: 2, kind: input, shape index: {}]   ;;  %s24270_s3 = inlined_call_operand.vmem [shape: f32[9,64], index: 3, kind: input, shape index: {}]   ;;  %s24271_s4 = inlined_call_operand.vmem [shape: f32[17,64], index: 4, kind: input, shape index: {}]   ;;  %s24272_s5 = inlined_call_operand.vmem [shape: f32[16,64], index: 5, kind: input, shape index: {}]   ;;  %s24273_s6 = inlined_call_operand.vmem [shape: f32[16,64], index: 6, kind: input, shape index: {}]   ;;  %s24274_s7 = inlined_call_operand.vmem [shape: f32[2,256], index: 7, kind: output, shape index: {}]  }
   0x1 LB: > { %s14325_s25 = sadd.s32 4294967295, %s14271_s24   ;;  %p12076_p0 = scmp.ge.s32.totalorder %s14271_s24, 1  ;;  %s14271_s24 = sphi %s14319_s24, %s17_s24  }
   0x2   : > { %p252_p1 = scmp.lt.s32.totalorder %s14271_s24, 18 }
   0x4   : > { %p253_p2 = pnand %p12076_p0, %p252_p1 }
   0x5   : > { %s12077_s26 = sadd.s32 (!%p253_p2), 4294967295, %s14325_s25  ;;  %p12084_p6 = scmp.ne.s32.totalorder (!%p253_p2), %s14325_s25, 0 }
   0x6   : > { %256 = sbr.rel (%p253_p2) target bundleno = 2403 (0x963), region = 48  ;;  %p285_p3 = scmp.lt.s32.totalorder (!%p253_p2), %s12077_s26, 14 }
   0x7   : > { %p12078_p4 = scmp.gt.s32.totalorder (!%p253_p2), %s12077_s26, 0 }
   0xd   : > { %s26280_s26 = smov (!%p285_p3, %s12077_s26), 14 }
   0xe   : > { %s26282_s26 = smov (!%p12078_p4, %s26280_s26), 0  ;;  %303 = sbr.rel (%p12084_p6) target bundleno = 646 (0x286), region = 52 }
   0xf   : > { %p289_p5 = scmp.lt.s32.totalorder %s26282_s26, 14 }
  0x11   : > { %s26284_s26 = smov (!%p289_p5, %s26282_s26), 14 }
  0x12   : > { %s14154_s27 = smul.u32 288, %s26284_s26 }
  0x14   : > { %s14333_s30 = scalar_lea.vmem %s24269_s2, %s14154_s27 }
  0x15   : > { %v14171_v0 = vld [vmem:[%s24268_s1] sm:$0xff]   ;;  %vm541_vm0 = vcmask 130048   ;;  %v14173_v2 = vld [vmem:[%s24267_s0 + $0x8] sm:$0xff]   ;;  %v14174_v3 = vld [vmem:[%s24267_s0 + $0x10] sm:$0xff]   ;;  %vm927_vm1 = vcmask 523264  }
  0x16   : > { %v14172_v1 = vld [vmem:[%s24267_s0] sm:$0xff]   ;;  %12918 = vmatprep.subr.bf16.mxu0 %v14171_v0  ;;  %13632 = vmatprep.subr.bf16.mxu1 %v14171_v0  ;;  %v14175_v4 = vld [vmem:[%s24267_s0 + $0x18] sm:$0xff]   ;;  %v14177_v6 = vld [vmem:[%s24267_s0 + $0x28] sm:$0xff]  }
  0x17   : > { %12919 = vmatpush3.bf16.msra.mxu0 %v14171_v0  ;;  %12920 = vmatprep.mubr.msk.bf16.mxu0 %vm541_vm0, %v14172_v1  ;;  %v14176_v5 = vld [vmem:[%s24267_s0 + $0x20] sm:$0xff]   ;;  %v14178_v7 = vld [vmem:[%s24267_s0 + $0x30] sm:$0xff]   ;;  %v14189_v9 = vld [vmem:[%s24267_s0 + $0x88] sm:$0xff]  }
  0x18   : > { %13633 = vmatpush3.bf16.msra.mxu1 %v14171_v0  ;;  %v14188_v8 = vld [vmem:[%s24267_s0 + $0x80] sm:$0xff]   ;;  %v14190_v10 = vld [vmem:[%s24267_s0 + $0x90] sm:$0xff]   ;;  %v14191_v11 = vld [vmem:[%s24267_s0 + $0x98] sm:$0xff]  }
  0x19   : > { %12952 = vmatprep.mubr.msk.bf16.mxu1 %vm541_vm0, %v14188_v8  ;;  %v14192_v12 = vld [vmem:[%s24267_s0 + $0xa0] sm:$0xff]   ;;  %v14179_v13 = vld [vmem:[%s24267_s0 + $0x38] sm:$0xff]   ;;  %v14193_v15 = vld [vmem:[%s24267_s0 + $0xa8] sm:$0xff]  }
  0x1a   : > { %12921 = vmatmul.mubr.msk.bf16.vlgmr.msra.gmra.mrb[0].mxu0 %vm541_vm0, %v14173_v2  ;;  %v14180_v14 = vld [vmem:[%s24267_s0 + $0x40] sm:$0xff]   ;;  %v14194_v16 = vld [vmem:[%s24267_s0 + $0xb0] sm:$0xff]   ;;  %v14181_v17 = vld [vmem:[%s24267_s0 + $0x48] sm:$0xff]  }
  0x1b   : > { %12924 = vmatprep.mubr.msk.bf16.mxu0 %vm541_vm0, %v14174_v3  ;;  %12953 = vmatmul.mubr.msk.bf16.vlgmr.msra.gmra.mrb[0].mxu1 %vm541_vm0, %v14189_v9  ;;  %v14182_v18 = vld [vmem:[%s24267_s0 + $0x50] sm:$0xff]   ;;  %v14195_v19 = vld [vmem:[%s24267_s0 + $0xb8] sm:$0xff]   ;;  %v14196_v20 = vld [vmem:[%s24267_s0 + $0xc0] sm:$0xff]  }
  0x1c   : > { %12956 = vmatprep.mubr.msk.bf16.mxu1 %vm541_vm0, %v14190_v10  ;;  %v14183_v21 = vld [vmem:[%s24267_s0 + $0x58] sm:$0xff]   ;;  %v14184_v22 = vld [vmem:[%s24267_s0 + $0x60] sm:$0xff]   ;;  %v14197_v23 = vld [vmem:[%s24267_s0 + $0xc8] sm:$0xff]  }
  0x1d   : > { %v14198_v24 = vld [vmem:[%s24267_s0 + $0xd0] sm:$0xff]   ;;  %v14185_v25 = vld [vmem:[%s24267_s0 + $0x68] sm:$0xff]   ;;  %v14199_v27 = vld [vmem:[%s24267_s0 + $0xd8] sm:$0xff]  }
  0x1e   : > { %v14186_v26 = vld [vmem:[%s24267_s0 + $0x70] sm:$0xff]   ;;  %v14200_v28 = vld [vmem:[%s24267_s0 + $0xe0] sm:$0xff]   ;;  %v14187_v29 = vld [vmem:[%s24267_s0 + $0x78] sm:$0xff]  }
  0x1f   : > { %v14201_v30 = vld [vmem:[%s24267_s0 + $0xe8] sm:$0xff]   ;;  %v14202_v31 = vld [vmem:[%s24267_s0 + $0xf0] sm:$0xff]   ;;  %v14203_v32 = vld [vmem:[%s24267_s0 + $0xf8] sm:$0xff]  }
  0x20   : > { %v14470_v33 = vld [vmem:[%s24271_s4] ss:$0 sm:$0xff] }
  0x22   : > { %12925 = vmatmul.mubr.msk.bf16.gmra.mrb[4].mxu0 %vm541_vm0, %v14175_v4 }
  0x23   : > { %12928 = vmatprep.mubr.msk.bf16.mxu0 %vm541_vm0, %v14176_v5  ;;  %12957 = vmatmul.mubr.msk.bf16.gmra.mrb[4].mxu1 %vm541_vm0, %v14191_v11 }
  0x24   : > { %12960 = vmatprep.mubr.msk.bf16.mxu1 %vm541_vm0, %v14192_v12 }
  0x2a   : > { %12929 = vmatmul.mubr.msk.bf16.gmra.mrb[8].mxu0 %vm541_vm0, %v14177_v6 }
  0x2b   : > { %12932 = vmatprep.mubr.msk.bf16.mxu0 %vm541_vm0, %v14178_v7  ;;  %12961 = vmatmul.mubr.msk.bf16.gmra.mrb[8].mxu1 %vm541_vm0, %v14193_v15 }
  0x2c   : > { %12964 = vmatprep.mubr.msk.bf16.mxu1 %vm541_vm0, %v14194_v16 }
  0x32   : > { %12933 = vmatmul.mubr.msk.bf16.gmra.mrb[12].mxu0 %vm541_vm0, %v14179_v13 }
  0x33   : > { %12936 = vmatprep.mubr.msk.bf16.mxu0 %vm541_vm0, %v14180_v14  ;;  %12965 = vmatmul.mubr.msk.bf16.gmra.mrb[12].mxu1 %vm541_vm0, %v14195_v19 }
  0x34   : > { %12968 = vmatprep.mubr.msk.bf16.mxu1 %vm541_vm0, %v14196_v20 }
  0x3a   : > { %12937 = vmatmul.mubr.msk.bf16.gmra.mrb[16].mxu0 %vm541_vm0, %v14181_v17 }
  0x3b   : > { %12940 = vmatprep.mubr.msk.bf16.mxu0 %vm541_vm0, %v14182_v18  ;;  %12969 = vmatmul.mubr.msk.bf16.gmra.mrb[16].mxu1 %vm541_vm0, %v14197_v23 }
  0x3c   : > { %12972 = vmatprep.mubr.msk.bf16.mxu1 %vm541_vm0, %v14198_v24 }
  0x42   : > { %12941 = vmatmul.mubr.msk.bf16.gmra.mrb[20].mxu0 %vm541_vm0, %v14183_v21 }
  0x43   : > { %12944 = vmatprep.mubr.msk.bf16.mxu0 %vm541_vm0, %v14184_v22  ;;  %12973 = vmatmul.mubr.msk.bf16.gmra.mrb[20].mxu1 %vm541_vm0, %v14199_v27 }
  0x44   : > { %12976 = vmatprep.mubr.msk.bf16.mxu1 %vm541_vm0, %v14200_v28 }
  0x4a   : > { %12945 = vmatmul.mubr.msk.bf16.gmra.mrb[24].mxu0 %vm541_vm0, %v14185_v25 }
  0x4b   : > { %12948 = vmatprep.mubr.msk.bf16.mxu0 %vm541_vm0, %v14186_v26  ;;  %12977 = vmatmul.mubr.msk.bf16.gmra.mrb[24].mxu1 %vm541_vm0, %v14201_v30 }
  0x4c   : > { %12980 = vmatprep.mubr.msk.bf16.mxu1 %vm541_vm0, %v14202_v31 }
  0x52   : > { %12949 = vmatmul.mubr.msk.bf16.gmra.mrb[28].mxu0 %vm541_vm0, %v14187_v29 }
  0x53   : > { %12981 = vmatmul.mubr.msk.bf16.gmra.mrb[28].mxu1 %vm541_vm0, %v14203_v32 }
  0xed   : > { %v12922_v34 = vpop.f32.mrb[0].mxu0 }
  0xee   : > { %v672_v35 = vpop.f32.mrb[1].mxu0  ;;  %v14473_v36 = vadd.f32 %v12922_v34, %v14470_v33  ;;  %v14523_v9 = vpop.f32.mrb[0].mxu1 }
  0xef   : > { %v14476_v37 = vadd.f32 %v14470_v33, %v672_v35  ;;  %v12923_v38 = vpop.f32.mrb[2].mxu0  ;;  %v14529_v14 = vpop.f32.mrb[1].mxu1 }
  0xf0   : > { %v675_v39 = vpop.f32.mrb[3].mxu0  ;;  %v14481_v41 = vadd.f32 %v12923_v38, %v14470_v33  ;;  %v1063_v43 = vmul.f32 %v14473_v36, %v14473_v36  ;;  %v931_v48 = vsel %vm927_vm1, %v14473_v36, 0.0  ;;  %v14533_v17 = vpop.f32.mrb[2].mxu1 }
  0xf1   : > { %v1061_v40 = vmul.f32 %v14476_v37, %v14476_v37  ;;  %v14484_v42 = vadd.f32 %v14470_v33, %v675_v39  ;;  %v928_v44 = vsel %vm927_vm1, %v14476_v37, 0.0  ;;  %v14538_v22 = vpop.f32.mrb[3].mxu1 }
  0xf2   : > { %v1064_v50 = vmul.f32 %v14481_v41, %v14481_v41  ;;  %v1128_v56 = vsel %vm927_vm1, %v1063_v43, 0.0  ;;  %v933_v57 = vsel %vm927_vm1, %v14481_v41, 0.0 }
  0xf3   : > { %v929_v45 = vsel %vm927_vm1, %v14484_v42, 0.0  ;;  %v1062_v46 = vmul.f32 %v14484_v42, %v14484_v42  ;;  %v1125_v49 = vsel %vm927_vm1, %v1061_v40, 0.0 }
  0xf4   : > { %v930_v47 = vadd.f32 %v929_v45, %v928_v44  ;;  %v1130_v0 = vsel %vm927_vm1, %v1064_v50, 0.0 }
  0xf5   : > { %v1126_v51 = vsel %vm927_vm1, %v1062_v46, 0.0  ;;  %v12926_v52 = vpop.f32.mrb[4].mxu0 }
  0xf6   : > { %v932_v53 = vadd.f32 %v931_v48, %v930_v47  ;;  %v1127_v54 = vadd.f32 %v1126_v51, %v1125_v49  ;;  %v688_v55 = vpop.f32.mrb[5].mxu0  ;;  %v14507_v61 = vadd.f32 %v12926_v52, %v14470_v33  ;;  %v14565_v47 = vpop.f32.mrb[4].mxu1 }
  0xf7   : > { %v14504_v58 = vadd.f32 %v14470_v33, %v688_v55  ;;  %v12927_v59 = vpop.f32.mrb[6].mxu0  ;;  %v14569_v50 = vpop.f32.mrb[5].mxu1 }
  0xf8   : > { %v1129_v60 = vadd.f32 %v1128_v56, %v1127_v54  ;;  %v934_v62 = vadd.f32 %v933_v57, %v932_v53  ;;  %v691_v63 = vpop.f32.mrb[7].mxu0  ;;  %v14518_v6 = vadd.f32 %v12927_v59, %v14470_v33  ;;  %v1067_v10 = vmul.f32 %v14507_v61, %v14507_v61  ;;  %v14574_v55 = vpop.f32.mrb[6].mxu1 }
  0xf9   : > { %v935_v1 = vsel %vm927_vm1, %v14504_v58, 0.0  ;;  %v1065_v2 = vmul.f32 %v14504_v58, %v14504_v58  ;;  %v14515_v3 = vadd.f32 %v14470_v33, %v691_v63  ;;  %v939_v15 = vsel %vm927_vm1, %v14507_v61, 0.0 }
  0xfa   : > { %v936_v4 = vadd.f32 %v935_v1, %v934_v62  ;;  %v1131_v5 = vadd.f32 %v1130_v0, %v1129_v60  ;;  %v1068_v18 = vmul.f32 %v14518_v6, %v14518_v6  ;;  %v941_v23 = vsel %vm927_vm1, %v14518_v6, 0.0  ;;  %v14578_v60 = vpop.f32.mrb[7].mxu1 }
  0xfb   : > { %v1132_v7 = vsel %vm927_vm1, %v1065_v2, 0.0  ;;  %v937_v8 = vsel %vm927_vm1, %v14515_v3, 0.0  ;;  %v1066_v13 = vmul.f32 %v14515_v3, %v14515_v3  ;;  %v1136_v27 = vsel %vm927_vm1, %v1067_v10, 0.0 }
  0xfc   : > { %v1133_v11 = vadd.f32 %v1132_v7, %v1131_v5  ;;  %v938_v12 = vadd.f32 %v937_v8, %v936_v4  ;;  %v1138_v38 = vsel %vm927_vm1, %v1068_v18, 0.0 }
  0xfd   : > { %v12930_v16 = vpop.f32.mrb[8].mxu0  ;;  %v1134_v20 = vsel %vm927_vm1, %v1066_v13, 0.0 }
  0xfe   : > { %v940_v19 = vadd.f32 %v939_v15, %v938_v12  ;;  %v704_v21 = vpop.f32.mrb[9].mxu0  ;;  %v1135_v24 = vadd.f32 %v1134_v20, %v1133_v11  ;;  %v14547_v28 = vadd.f32 %v12930_v16, %v14470_v33 }
  0xff   : > { %v14543_v25 = vadd.f32 %v14470_v33, %v704_v21  ;;  %v12931_v26 = vpop.f32.mrb[10].mxu0 }
 0x100   : > { %v942_v29 = vadd.f32 %v941_v23, %v940_v19  ;;  %v707_v30 = vpop.f32.mrb[11].mxu0  ;;  %v1137_v31 = vadd.f32 %v1136_v27, %v1135_v24  ;;  %v14558_v40 = vadd.f32 %v12931_v26, %v14470_v33  ;;  %v1071_v48 = vmul.f32 %v14547_v28, %v14547_v28  ;;  %v14605_v23 = vpop.f32.mrb[8].mxu1 }
 0x101   : > { %v943_v32 = vsel %vm927_vm1, %v14543_v25, 0.0  ;;  %v1069_v34 = vmul.f32 %v14543_v25, %v14543_v25  ;;  %v14554_v35 = vadd.f32 %v14470_v33, %v707_v30  ;;  %v947_v51 = vsel %vm927_vm1, %v14547_v28, 0.0  ;;  %v14609_v27 = vpop.f32.mrb[9].mxu1 }
 0x102   : > { %v944_v39 = vadd.f32 %v943_v32, %v942_v29  ;;  %v1139_v43 = vadd.f32 %v1138_v38, %v1137_v31  ;;  %v1072_v56 = vmul.f32 %v14558_v40, %v14558_v40  ;;  %v949_v62 = vsel %vm927_vm1, %v14558_v40, 0.0 }
 0x103   : > { %v1140_v44 = vsel %vm927_vm1, %v1069_v34, 0.0  ;;  %v945_v45 = vsel %vm927_vm1, %v14554_v35, 0.0  ;;  %v1070_v46 = vmul.f32 %v14554_v35, %v14554_v35  ;;  %v1144_v2 = vsel %vm927_vm1, %v1071_v48, 0.0  ;;  %v14614_v34 = vpop.f32.mrb[10].mxu1 }
 0x104   : > { %v946_v49 = vadd.f32 %v945_v45, %v944_v39  ;;  %v1141_v52 = vadd.f32 %v1140_v44, %v1139_v43  ;;  %v1146_v13 = vsel %vm927_vm1, %v1072_v56, 0.0  ;;  %v14618_v44 = vpop.f32.mrb[11].mxu1 }
 0x105   : > { %v1142_v53 = vsel %vm927_vm1, %v1070_v46, 0.0  ;;  %v12934_v54 = vpop.f32.mrb[12].mxu0 }
 0x106   : > { %v948_v57 = vadd.f32 %v947_v51, %v946_v49  ;;  %v720_v59 = vpop.f32.mrb[13].mxu0  ;;  %v1143_v63 = vadd.f32 %v1142_v53, %v1141_v52  ;;  %v14587_v4 = vadd.f32 %v12934_v54, %v14470_v33 }
 0x107   : > { %v14583_v0 = vadd.f32 %v14470_v33, %v720_v59  ;;  %v12935_v1 = vpop.f32.mrb[14].mxu0 }
 0x108   : > { %v950_v5 = vadd.f32 %v949_v62, %v948_v57  ;;  %v723_v7 = vpop.f32.mrb[15].mxu0  ;;  %v1145_v8 = vadd.f32 %v1144_v2, %v1143_v63  ;;  %v14598_v16 = vadd.f32 %v12935_v1, %v14470_v33  ;;  %v1075_v24 = vmul.f32 %v14587_v4, %v14587_v4 }
 0x109   : > { %v951_v10 = vsel %vm927_vm1, %v14583_v0, 0.0  ;;  %v1073_v11 = vmul.f32 %v14583_v0, %v14583_v0  ;;  %v14594_v12 = vadd.f32 %v14470_v33, %v723_v7  ;;  %v955_v29 = vsel %vm927_vm1, %v14587_v4, 0.0 }
 0x10a   : > { %v952_v15 = vadd.f32 %v951_v10, %v950_v5  ;;  %v1147_v18 = vadd.f32 %v1146_v13, %v1145_v8  ;;  %v1076_v38 = vmul.f32 %v14598_v16, %v14598_v16  ;;  %v957_v45 = vsel %vm927_vm1, %v14598_v16, 0.0 }
 0x10b   : > { %v1148_v19 = vsel %vm927_vm1, %v1073_v11, 0.0  ;;  %v953_v20 = vsel %vm927_vm1, %v14594_v12, 0.0  ;;  %v1074_v21 = vmul.f32 %v14594_v12, %v14594_v12  ;;  %v1152_v51 = vsel %vm927_vm1, %v1075_v24, 0.0  ;;  %v14645_v11 = vpop.f32.mrb[12].mxu1 }
 0x10c   : > { %v954_v26 = vadd.f32 %v953_v20, %v952_v15  ;;  %v1149_v30 = vadd.f32 %v1148_v19, %v1147_v18  ;;  %v1154_v63 = vsel %vm927_vm1, %v1076_v38, 0.0  ;;  %v14649_v18 = vpop.f32.mrb[13].mxu1 }
 0x10d   : > { %v1150_v31 = vsel %vm927_vm1, %v1074_v21, 0.0  ;;  %v12938_v32 = vpop.f32.mrb[16].mxu0 }
 0x10e   : > { %v956_v39 = vadd.f32 %v955_v29, %v954_v26  ;;  %v736_v43 = vpop.f32.mrb[17].mxu0  ;;  %v1151_v46 = vadd.f32 %v1150_v31, %v1149_v30  ;;  %v14627_v52 = vadd.f32 %v12938_v32, %v14470_v33  ;;  %v14654_v26 = vpop.f32.mrb[14].mxu1 }
 0x10f   : > { %v14623_v48 = vadd.f32 %v14470_v33, %v736_v43  ;;  %v12939_v49 = vpop.f32.mrb[18].mxu0  ;;  %v14658_v32 = vpop.f32.mrb[15].mxu1 }
 0x110   : > { %24616 = vst [vmem:[#allocation5_spill] sm:$0xff] %v14627_v52  ;;  %v958_v53 = vadd.f32 %v957_v45, %v956_v39  ;;  %v739_v54 = vpop.f32.mrb[19].mxu0  ;;  %v1153_v56 = vadd.f32 %v1152_v51, %v1151_v46  ;;  %v14638_v2 = vadd.f32 %v12939_v49, %v14470_v33  ;;  %v1079_v13 = vmul.f32 %v14627_v52, %v14627_v52 }
 0x111   : > { %v959_v57 = vsel %vm927_vm1, %v14623_v48, 0.0  ;;  %v1077_v59 = vmul.f32 %v14623_v48, %v14623_v48  ;;  %v14634_v62 = vadd.f32 %v14470_v33, %v739_v54  ;;  %v963_v19 = vsel %vm927_vm1, %v14627_v52, 0.0 }
 0x112   : > { %v960_v1 = vadd.f32 %v959_v57, %v958_v53  ;;  %24617 = vst [vmem:[#allocation6_spill] sm:$0xff] %v14638_v2  ;;  %v1155_v5 = vadd.f32 %v1154_v63, %v1153_v56  ;;  %v1080_v29 = vmul.f32 %v14638_v2, %v14638_v2  ;;  %v965_v38 = vsel %vm927_vm1, %v14638_v2, 0.0 }
 0x113   : > { %v1156_v7 = vsel %vm927_vm1, %v1077_v59, 0.0  ;;  %v961_v8 = vsel %vm927_vm1, %v14634_v62, 0.0  ;;  %v1078_v10 = vmul.f32 %v14634_v62, %v14634_v62  ;;  %v1160_v46 = vsel %vm927_vm1, %v1079_v13, 0.0 }
 0x114   : > { %v962_v15 = vadd.f32 %v961_v8, %v960_v1  ;;  %v1157_v20 = vadd.f32 %v1156_v7, %v1155_v5  ;;  %v1162_v63 = vsel %vm927_vm1, %v1080_v29, 0.0  ;;  %v14802_v2 = vadd.f32 %v14533_v17, %v14470_v33 }
 0x115   : > { %v1158_v21 = vsel %vm927_vm1, %v1078_v10, 0.0  ;;  %v12942_v24 = vpop.f32.mrb[20].mxu0 }
 0x116   : > { %v964_v30 = vadd.f32 %v963_v19, %v962_v15  ;;  %v752_v31 = vpop.f32.mrb[21].mxu0  ;;  %v1159_v39 = vadd.f32 %v1158_v21, %v1157_v20  ;;  %v14667_v49 = vadd.f32 %v12942_v24, %v14470_v33  ;;  %v14685_v15 = vpop.f32.mrb[16].mxu1 }
 0x117   : > { %v14663_v43 = vadd.f32 %v14470_v33, %v752_v31  ;;  %v12943_v45 = vpop.f32.mrb[22].mxu0  ;;  %v14689_v21 = vpop.f32.mrb[17].mxu1 }
 0x118   : > { %24619 = vst [vmem:[#allocation8_spill] sm:$0xff] %v14667_v49  ;;  %v966_v51 = vadd.f32 %v965_v38, %v964_v30  ;;  %v755_v53 = vpop.f32.mrb[23].mxu0  ;;  %v1161_v54 = vadd.f32 %v1160_v46, %v1159_v39  ;;  %v14678_v5 = vadd.f32 %v12943_v45, %v14470_v33  ;;  %v1083_v19 = vmul.f32 %v14667_v49, %v14667_v49  ;;  %v14694_v38 = vpop.f32.mrb[18].mxu1 }
 0x119   : > { %24618 = vst [vmem:[#allocation7_spill] sm:$0xff] %v14663_v43  ;;  %v967_v56 = vsel %vm927_vm1, %v14663_v43, 0.0  ;;  %v1081_v57 = vmul.f32 %v14663_v43, %v14663_v43  ;;  %v14674_v59 = vadd.f32 %v14470_v33, %v755_v53  ;;  %v971_v24 = vsel %vm927_vm1, %v14667_v49, 0.0 }
 0x11a   : > { %v968_v1 = vadd.f32 %v967_v56, %v966_v51  ;;  %24621 = vst [vmem:[#allocation10_spill] sm:$0xff] %v14678_v5  ;;  %v1163_v7 = vadd.f32 %v1162_v63, %v1161_v54  ;;  %v1084_v39 = vmul.f32 %v14678_v5, %v14678_v5  ;;  %v14698_v51 = vpop.f32.mrb[19].mxu1  ;;  %v973_v53 = vsel %vm927_vm1, %v14678_v5, 0.0 }
 0x11b   : > { %24620 = vst [vmem:[#allocation9_spill] sm:$0xff] %v14674_v59  ;;  %v1164_v8 = vsel %vm927_vm1, %v1081_v57, 0.0  ;;  %v969_v10 = vsel %vm927_vm1, %v14674_v59, 0.0  ;;  %v1082_v13 = vmul.f32 %v14674_v59, %v14674_v59  ;;  %v1168_v63 = vsel %vm927_vm1, %v1083_v19, 0.0 }
 0x11c   : > { %v970_v20 = vadd.f32 %v969_v10, %v968_v1  ;;  %v1165_v29 = vadd.f32 %v1164_v8, %v1163_v7  ;;  %v14797_v43 = vadd.f32 %v14523_v9, %v14470_v33 }
 0x11d   : > { %v1166_v30 = vsel %vm927_vm1, %v1082_v13, 0.0  ;;  %v12946_v31 = vpop.f32.mrb[24].mxu0 }
 0x11e   : > { %v972_v45 = vadd.f32 %v971_v24, %v970_v20  ;;  %v768_v46 = vpop.f32.mrb[25].mxu0  ;;  %v1167_v54 = vadd.f32 %v1166_v30, %v1165_v29  ;;  %v14707_v1 = vadd.f32 %v12946_v31, %v14470_v33  ;;  %v1170_v29 = vsel %vm927_vm1, %v1084_v39, 0.0  ;;  %24632 = vst [vmem:[#allocation21_spill] sm:$0xff] %v14797_v43 }
 0x11f   : > { %v14703_v56 = vadd.f32 %v14470_v33, %v768_v46  ;;  %v12947_v57 = vpop.f32.mrb[26].mxu0  ;;  %v1095_v17 = vmul.f32 %v14797_v43, %v14797_v43 }
 0x120   : > { %24623 = vst [vmem:[#allocation12_spill] sm:$0xff] %v14707_v1  ;;  %v974_v7 = vadd.f32 %v973_v53, %v972_v45  ;;  %v771_v8 = vpop.f32.mrb[27].mxu0  ;;  %v1169_v10 = vadd.f32 %v1168_v63, %v1167_v54  ;;  %v14718_v19 = vadd.f32 %v12947_v57, %v14470_v33  ;;  %v14725_v54 = vpop.f32.mrb[20].mxu1  ;;  %v1087_v63 = vmul.f32 %v14707_v1, %v14707_v1 }
 0x121   : > { %24622 = vst [vmem:[#allocation11_spill] sm:$0xff] %v14703_v56  ;;  %v975_v13 = vsel %vm927_vm1, %v14703_v56, 0.0  ;;  %v1085_v20 = vmul.f32 %v14703_v56, %v14703_v56  ;;  %v14714_v24 = vadd.f32 %v14470_v33, %v771_v8  ;;  %v14729_v39 = vpop.f32.mrb[21].mxu1  ;;  %v979_v57 = vsel %vm927_vm1, %v14707_v1, 0.0 }
 0x122   : > { %v976_v30 = vadd.f32 %v975_v13, %v974_v7  ;;  %24625 = vst [vmem:[#allocation14_spill] sm:$0xff] %v14718_v19  ;;  %v1171_v31 = vadd.f32 %v1170_v29, %v1169_v10  ;;  %v1088_v29 = vmul.f32 %v14718_v19, %v14718_v19 }
 0x123   : > { %24624 = vst [vmem:[#allocation13_spill] sm:$0xff] %v14714_v24  ;;  %v1172_v45 = vsel %vm927_vm1, %v1085_v20, 0.0  ;;  %v977_v46 = vsel %vm927_vm1, %v14714_v24, 0.0  ;;  %v1086_v53 = vmul.f32 %v14714_v24, %v14714_v24  ;;  %v14734_v20 = vpop.f32.mrb[22].mxu1 }
 0x124   : > { %v978_v8 = vadd.f32 %v977_v46, %v976_v30  ;;  %v1173_v7 = vadd.f32 %v1172_v45, %v1171_v31  ;;  %v14738_v5 = vpop.f32.mrb[23].mxu1  ;;  %v981_v30 = vsel %vm927_vm1, %v14718_v19, 0.0  ;;  %v1176_v45 = vsel %vm927_vm1, %v1087_v63, 0.0 }
 0x125   : > { %v1174_v10 = vsel %vm927_vm1, %v1086_v53, 0.0  ;;  %v12950_v13 = vpop.f32.mrb[28].mxu0  ;;  %v1178_v63 = vsel %vm927_vm1, %v1088_v29, 0.0 }
 0x126   : > { %v980_v24 = vadd.f32 %v979_v57, %v978_v8  ;;  %v784_v56 = vpop.f32.mrb[29].mxu0  ;;  %v1175_v46 = vadd.f32 %v1174_v10, %v1173_v7  ;;  %v14747_v53 = vadd.f32 %v12950_v13, %v14470_v33  ;;  %v14751_v8 = vadd.f32 %v14470_v33, %v14529_v14 }
 0x127   : > { %v14743_v49 = vadd.f32 %v14470_v33, %v784_v56  ;;  %v12951_v31 = vpop.f32.mrb[30].mxu0 }
 0x128   : > { %24627 = vst [vmem:[#allocation16_spill] sm:$0xff] %v14747_v53  ;;  %v982_v1 = vadd.f32 %v981_v30, %v980_v24  ;;  %v787_v59 = vpop.f32.mrb[31].mxu0  ;;  %24628 = vst [vmem:[#allocation17_spill] sm:$0xff] %v14751_v8  ;;  %v1177_v57 = vadd.f32 %v1176_v45, %v1175_v46  ;;  %v14762_v24 = vadd.f32 %v12951_v31, %v14470_v33  ;;  %v14769_v45 = vpop.f32.mrb[24].mxu1 }
 0x129   : > { %24626 = vst [vmem:[#allocation15_spill] sm:$0xff] %v14743_v49  ;;  %v983_v19 = vsel %vm927_vm1, %v14743_v49, 0.0  ;;  %v1089_v56 = vmul.f32 %v14743_v49, %v14743_v49  ;;  %v14758_v7 = vadd.f32 %v14470_v33, %v787_v59  ;;  %v1091_v59 = vmul.f32 %v14747_v53, %v14747_v53  ;;  %v14773_v29 = vpop.f32.mrb[25].mxu1 }
 0x12a   : > { %v984_v10 = vadd.f32 %v983_v19, %v982_v1  ;;  %24630 = vst [vmem:[#allocation19_spill] sm:$0xff] %v14762_v24  ;;  %v1179_v13 = vadd.f32 %v1178_v63, %v1177_v57  ;;  %v987_v1 = vsel %vm927_vm1, %v14747_v53, 0.0  ;;  %v1093_v57 = vmul.f32 %v14751_v8, %v14751_v8 }
 0x12b   : > { %24629 = vst [vmem:[#allocation18_spill] sm:$0xff] %v14758_v7  ;;  %v1180_v14 = vsel %vm927_vm1, %v1089_v56, 0.0  ;;  %v985_v30 = vsel %vm927_vm1, %v14758_v7, 0.0  ;;  %v1090_v46 = vmul.f32 %v14758_v7, %v14758_v7  ;;  %v14780_v56 = vpop.f32.mrb[26].mxu1  ;;  %v1092_v63 = vmul.f32 %v14762_v24, %v14762_v24 }
 0x12c   : > { %v986_v49 = vadd.f32 %v985_v30, %v984_v10  ;;  %v1181_v19 = vadd.f32 %v1180_v14, %v1179_v13  ;;  %v14786_v10 = vadd.f32 %v14470_v33, %v14538_v22  ;;  %v14788_v30 = vpop.f32.mrb[27].mxu1  ;;  %v989_v13 = vsel %vm927_vm1, %v14762_v24, 0.0 }
 0x12d   : > { %v1182_v31 = vsel %vm927_vm1, %v1090_v46, 0.0  ;;  %v991_v46 = vsel %vm927_vm1, %v14751_v8, 0.0  ;;  %v1184_v53 = vsel %vm927_vm1, %v1091_v59, 0.0  ;;  %v1188_v22 = vsel %vm927_vm1, %v1093_v57, 0.0 }
 0x12e   : > { %v988_v7 = vadd.f32 %v987_v1, %v986_v49  ;;  %24631 = vst [vmem:[#allocation20_spill] sm:$0xff] %v14786_v10  ;;  %v1183_v14 = vadd.f32 %v1182_v31, %v1181_v19  ;;  %v1186_v24 = vsel %vm927_vm1, %v1092_v63, 0.0  ;;  %v1094_v31 = vmul.f32 %v14786_v10, %v14786_v10 }
 0x12f   : > { %v14809_v59 = vadd.f32 %v14470_v33, %v14569_v50  ;;  %v995_v63 = vsel %vm927_vm1, %v14797_v43, 0.0  ;;  %v1096_v50 = vmul.f32 %v14802_v2, %v14802_v2  ;;  %v14846_v8 = vadd.f32 %v14574_v55, %v14470_v33 }
 0x130   : > { %v990_v49 = vadd.f32 %v989_v13, %v988_v7  ;;  %v1185_v1 = vadd.f32 %v1184_v53, %v1183_v14  ;;  %v993_v53 = vsel %vm927_vm1, %v14786_v10, 0.0  ;;  %v14813_v7 = vpop.f32.mrb[28].mxu1 }
 0x131   : > { %v14817_v13 = vpop.f32.mrb[29].mxu1  ;;  %v999_v43 = vsel %vm927_vm1, %v14809_v59, 0.0  ;;  %v1194_v10 = vsel %vm927_vm1, %v1096_v50, 0.0 }
 0x132   : > { %v992_v19 = vadd.f32 %v991_v46, %v990_v49  ;;  %v1187_v9 = vadd.f32 %v1186_v24, %v1185_v1  ;;  %v14823_v46 = vpop.f32.mrb[30].mxu1  ;;  %v1190_v49 = vsel %vm927_vm1, %v1094_v31, 0.0  ;;  %v1097_v1 = vmul.f32 %v14809_v59, %v14809_v59 }
 0x133   : > { %v14841_v31 = vadd.f32 %v14565_v47, %v14470_v33 }
 0x134   : > { %v994_v57 = vadd.f32 %v993_v53, %v992_v19  ;;  %v1189_v14 = vadd.f32 %v1188_v22, %v1187_v9  ;;  %v14830_v19 = vadd.f32 %v14470_v33, %v14578_v60  ;;  %v14832_v53 = vpop.f32.mrb[31].mxu1  ;;  %v997_v22 = vsel %vm927_vm1, %v14802_v2, 0.0 }
 0x135   : > { %v1099_v50 = vmul.f32 %v14841_v31, %v14841_v31  ;;  %v1003_v55 = vsel %vm927_vm1, %v14841_v31, 0.0 }
 0x136   : > { %v996_v24 = vadd.f32 %v995_v63, %v994_v57  ;;  %v1191_v9 = vadd.f32 %v1190_v49, %v1189_v14  ;;  %v1192_v57 = vsel %vm927_vm1, %v1095_v17, 0.0  ;;  %v1196_v14 = vsel %vm927_vm1, %v1097_v1, 0.0 }
 0x137   : > { %v1098_v49 = vmul.f32 %v14830_v19, %v14830_v19  ;;  %v14853_v17 = vadd.f32 %v14470_v33, %v14609_v27  ;;  %v1100_v1 = vmul.f32 %v14846_v8, %v14846_v8 }
 0x138   : > { %v998_v63 = vadd.f32 %v997_v22, %v996_v24  ;;  %v1193_v60 = vadd.f32 %v1192_v57, %v1191_v9  ;;  %v1001_v24 = vsel %vm927_vm1, %v14830_v19, 0.0 }
 0x139   : > { %v1198_v57 = vsel %vm927_vm1, %v1098_v49, 0.0  ;;  %v1101_v27 = vmul.f32 %v14853_v17, %v14853_v17 }
 0x13a   : > { %v1000_v52 = vadd.f32 %v999_v43, %v998_v63  ;;  %v1195_v47 = vadd.f32 %v1194_v10, %v1193_v60  ;;  %v14868_v10 = vadd.f32 %v14470_v33, %v14618_v44  ;;  %v1007_v60 = vsel %vm927_vm1, %v14853_v17, 0.0 }
 0x13b   : > { %v14882_v44 = vadd.f32 %v14614_v34, %v14470_v33 }
 0x13c   : > { %v1002_v22 = vadd.f32 %v1001_v24, %v1000_v52  ;;  %v1197_v43 = vadd.f32 %v1196_v14, %v1195_v47  ;;  %v1005_v52 = vsel %vm927_vm1, %v14846_v8, 0.0  ;;  %v1200_v14 = vsel %vm927_vm1, %v1099_v50, 0.0 }
 0x13d   : > { %v14877_v47 = vadd.f32 %v14605_v23, %v14470_v33  ;;  %v1202_v24 = vsel %vm927_vm1, %v1100_v1, 0.0  ;;  %v14889_v50 = vadd.f32 %v14470_v33, %v14649_v18 }
 0x13e   : > { %v1004_v9 = vadd.f32 %v1003_v55, %v1002_v22  ;;  %v1199_v63 = vadd.f32 %v1198_v57, %v1197_v43  ;;  %v1204_v43 = vsel %vm927_vm1, %v1101_v27, 0.0  ;;  %v1102_v57 = vmul.f32 %v14868_v10, %v14868_v10 }
 0x13f   : > { %v1103_v1 = vmul.f32 %v14877_v47, %v14877_v47  ;;  %v1011_v34 = vsel %vm927_vm1, %v14877_v47, 0.0  ;;  %v1104_v27 = vmul.f32 %v14882_v44, %v14882_v44  ;;  %v1105_v18 = vmul.f32 %v14889_v50, %v14889_v50 }
 0x140   : > { %v1006_v49 = vadd.f32 %v1005_v52, %v1004_v9  ;;  %v1201_v22 = vadd.f32 %v1200_v14, %v1199_v63  ;;  %v1009_v9 = vsel %vm927_vm1, %v14868_v10, 0.0  ;;  %v1206_v14 = vsel %vm927_vm1, %v1102_v57, 0.0 }
 0x142   : > { %v1008_v55 = vadd.f32 %v1007_v60, %v1006_v49  ;;  %v1203_v23 = vadd.f32 %v1202_v24, %v1201_v22  ;;  %v14904_v49 = vadd.f32 %v14470_v33, %v14658_v32  ;;  %v1013_v24 = vsel %vm927_vm1, %v14882_v44, 0.0 }
 0x143   : > { %v14918_v32 = vadd.f32 %v14654_v26, %v14470_v33 }
 0x144   : > { %v1010_v52 = vadd.f32 %v1009_v9, %v1008_v55  ;;  %v1205_v63 = vadd.f32 %v1204_v43, %v1203_v23  ;;  %24633 = vst [vmem:[#allocation22_spill] sm:$0xff] %v14904_v49  ;;  %v1015_v55 = vsel %vm927_vm1, %v14889_v50, 0.0  ;;  %v1208_v43 = vsel %vm927_vm1, %v1103_v1, 0.0 }
 0x145   : > { %v14913_v23 = vadd.f32 %v14645_v11, %v14470_v33  ;;  %v1210_v9 = vsel %vm927_vm1, %v1104_v27, 0.0  ;;  %24635 = vst [vmem:[#allocation24_spill] sm:$0xff] %v14918_v32  ;;  %v14925_v1 = vadd.f32 %v14470_v33, %v14689_v21 }
 0x146   : > { %v1012_v60 = vadd.f32 %v1011_v34, %v1010_v52  ;;  %v1207_v22 = vadd.f32 %v1206_v14, %v1205_v63  ;;  %v1212_v63 = vsel %vm927_vm1, %v1105_v18, 0.0  ;;  %v1106_v14 = vmul.f32 %v14904_v49, %v14904_v49 }
 0x147   : > { %24634 = vst [vmem:[#allocation23_spill] sm:$0xff] %v14913_v23  ;;  %24636 = vst [vmem:[#allocation25_spill] sm:$0xff] %v14925_v1  ;;  %v1107_v27 = vmul.f32 %v14913_v23, %v14913_v23  ;;  %v1019_v26 = vsel %vm927_vm1, %v14913_v23, 0.0  ;;  %v1108_v18 = vmul.f32 %v14918_v32, %v14918_v32  ;;  %v1109_v21 = vmul.f32 %v14925_v1, %v14925_v1 }
 0x148   : > { %v1014_v57 = vadd.f32 %v1013_v24, %v1012_v60  ;;  %v1209_v52 = vadd.f32 %v1208_v43, %v1207_v22  ;;  %v1017_v60 = vsel %vm927_vm1, %v14904_v49, 0.0  ;;  %v1214_v43 = vsel %vm927_vm1, %v1106_v14, 0.0 }
 0x149   : > { %v1331_v23 = vlaneseq }
 0x14a   : > { %v1016_v34 = vadd.f32 %v1015_v55, %v1014_v57  ;;  %v1211_v11 = vadd.f32 %v1210_v9, %v1209_v52  ;;  %v14940_v57 = vadd.f32 %v14470_v33, %v14698_v51  ;;  %v1021_v9 = vsel %vm927_vm1, %v14918_v32, 0.0 }
 0x14b   : > { %v14954_v51 = vadd.f32 %v14694_v38, %v14470_v33 }
 0x14c   : > { %v1018_v24 = vadd.f32 %v1017_v60, %v1016_v34  ;;  %v1213_v22 = vadd.f32 %v1212_v63, %v1211_v11  ;;  %24637 = vst [vmem:[#allocation26_spill] sm:$0xff] %v14940_v57  ;;  %v1023_v34 = vsel %vm927_vm1, %v14925_v1, 0.0  ;;  %v1216_v63 = vsel %vm927_vm1, %v1107_v27, 0.0 }
 0x14d   : > { %v14949_v11 = vadd.f32 %v14685_v15, %v14470_v33  ;;  %v1218_v60 = vsel %vm927_vm1, %v1108_v18, 0.0  ;;  %24639 = vst [vmem:[#allocation28_spill] sm:$0xff] %v14954_v51  ;;  %v14961_v27 = vadd.f32 %v14470_v33, %v14729_v39 }
 0x14e   : > { %v1020_v55 = vadd.f32 %v1019_v26, %v1018_v24  ;;  %v1215_v52 = vadd.f32 %v1214_v43, %v1213_v22  ;;  %v1220_v22 = vsel %vm927_vm1, %v1109_v21, 0.0  ;;  %v1110_v43 = vmul.f32 %v14940_v57, %v14940_v57 }
 0x14f   : > { %24638 = vst [vmem:[#allocation27_spill] sm:$0xff] %v14949_v11  ;;  %v1111_v18 = vmul.f32 %v14949_v11, %v14949_v11  ;;  %v1027_v38 = vsel %vm927_vm1, %v14949_v11, 0.0  ;;  %v1112_v21 = vmul.f32 %v14954_v51, %v14954_v51  ;;  %v1113_v39 = vmul.f32 %v14961_v27, %v14961_v27 }
 0x150   : > { %v1022_v14 = vadd.f32 %v1021_v9, %v1020_v55  ;;  %v1217_v24 = vadd.f32 %v1216_v63, %v1215_v52  ;;  %v1025_v55 = vsel %vm927_vm1, %v14940_v57, 0.0  ;;  %v1222_v63 = vsel %vm927_vm1, %v1110_v43, 0.0 }
 0x152   : > { %v1024_v26 = vadd.f32 %v1023_v34, %v1022_v14  ;;  %v1219_v15 = vadd.f32 %v1218_v60, %v1217_v24  ;;  %v14976_v14 = vadd.f32 %v14470_v33, %v14738_v5  ;;  %v1029_v60 = vsel %vm927_vm1, %v14954_v51, 0.0 }
 0x153   : > { %v14990_v5 = vadd.f32 %v14734_v20, %v14470_v33  ;;  %v15063_v51 = vadd.f32 %v14823_v46, %v14470_v33 }
 0x154   : > { %v1026_v9 = vadd.f32 %v1025_v55, %v1024_v26  ;;  %v1221_v52 = vadd.f32 %v1220_v22, %v1219_v15  ;;  %v1031_v26 = vsel %vm927_vm1, %v14961_v27, 0.0  ;;  %v1224_v22 = vsel %vm927_vm1, %v1111_v18, 0.0 }
 0x155   : > { %v14985_v15 = vadd.f32 %v14725_v54, %v14470_v33  ;;  %v1226_v55 = vsel %vm927_vm1, %v1112_v21, 0.0  ;;  %24641 = vst [vmem:[#allocation30_spill] sm:$0xff] %v14990_v5  ;;  %v14997_v18 = vadd.f32 %v14470_v33, %v14773_v29  ;;  %24648 = vst [vmem:[#allocation37_spill] sm:$0xff] %v15063_v51 }
 0x156   : > { %v1028_v34 = vadd.f32 %v1027_v38, %v1026_v9  ;;  %v1223_v24 = vadd.f32 %v1222_v63, %v1221_v52  ;;  %v1228_v52 = vsel %vm927_vm1, %v1113_v39, 0.0  ;;  %v1114_v63 = vmul.f32 %v14976_v14, %v14976_v14 }
 0x157   : > { %24640 = vst [vmem:[#allocation29_spill] sm:$0xff] %v14985_v15  ;;  %v1115_v21 = vmul.f32 %v14985_v15, %v14985_v15  ;;  %v1035_v20 = vsel %vm927_vm1, %v14985_v15, 0.0  ;;  %v1116_v39 = vmul.f32 %v14990_v5, %v14990_v5  ;;  %v1117_v29 = vmul.f32 %v14997_v18, %v14997_v18 }
 0x158   : > { %v1030_v43 = vadd.f32 %v1029_v60, %v1028_v34  ;;  %v1225_v9 = vadd.f32 %v1224_v22, %v1223_v24  ;;  %v1033_v34 = vsel %vm927_vm1, %v14976_v14, 0.0  ;;  %v1230_v22 = vsel %vm927_vm1, %v1114_v63, 0.0 }
 0x15a   : > { %v1032_v38 = vadd.f32 %v1031_v26, %v1030_v43  ;;  %v1227_v54 = vadd.f32 %v1226_v55, %v1225_v9  ;;  %v15012_v43 = vadd.f32 %v14470_v33, %v14788_v30  ;;  %v1037_v55 = vsel %vm927_vm1, %v14990_v5, 0.0 }
 0x15b   : > { %v15026_v30 = vadd.f32 %v14780_v56, %v14470_v33 }
 0x15c   : > { %v1034_v60 = vadd.f32 %v1033_v34, %v1032_v38  ;;  %v1229_v24 = vadd.f32 %v1228_v52, %v1227_v54  ;;  %24642 = vst [vmem:[#allocation31_spill] sm:$0xff] %v15012_v43  ;;  %v1039_v38 = vsel %vm927_vm1, %v14997_v18, 0.0  ;;  %v1232_v52 = vsel %vm927_vm1, %v1115_v21, 0.0 }
 0x15d   : > { %v15021_v54 = vadd.f32 %v14769_v45, %v14470_v33  ;;  %v1234_v34 = vsel %vm927_vm1, %v1116_v39, 0.0  ;;  %24644 = vst [vmem:[#allocation33_spill] sm:$0xff] %v15026_v30  ;;  %v15033_v21 = vadd.f32 %v14470_v33, %v14817_v13 }
 0x15e   : > { %v1036_v26 = vadd.f32 %v1035_v20, %v1034_v60  ;;  %v1231_v9 = vadd.f32 %v1230_v22, %v1229_v24  ;;  %v1236_v24 = vsel %vm927_vm1, %v1117_v29, 0.0  ;;  %v1118_v22 = vmul.f32 %v15012_v43, %v15012_v43 }
 0x15f   : > { %24643 = vst [vmem:[#allocation32_spill] sm:$0xff] %v15021_v54  ;;  %24645 = vst [vmem:[#allocation34_spill] sm:$0xff] %v15033_v21  ;;  %v1119_v39 = vmul.f32 %v15021_v54, %v15021_v54  ;;  %v1043_v56 = vsel %vm927_vm1, %v15021_v54, 0.0  ;;  %v1120_v29 = vmul.f32 %v15026_v30, %v15026_v30  ;;  %v1121_v13 = vmul.f32 %v15033_v21, %v15033_v21 }
 0x160   : > { %v1038_v63 = vadd.f32 %v1037_v55, %v1036_v26  ;;  %v1233_v60 = vadd.f32 %v1232_v52, %v1231_v9  ;;  %v1041_v26 = vsel %vm927_vm1, %v15012_v43, 0.0  ;;  %v1238_v52 = vsel %vm927_vm1, %v1118_v22, 0.0 }
 0x162   : > { %v1040_v20 = vadd.f32 %v1039_v38, %v1038_v63  ;;  %v1235_v45 = vadd.f32 %v1234_v34, %v1233_v60  ;;  %v15048_v63 = vadd.f32 %v14470_v33, %v14832_v53  ;;  %v1045_v34 = vsel %vm927_vm1, %v15026_v30, 0.0 }
 0x163   : > { %v1244_v53 = vsel %vm927_vm1, %v1121_v13, 0.0  ;;  %v1124_v13 = vmul.f32 %v15063_v51, %v15063_v51 }
 0x164   : > { %v1042_v55 = vadd.f32 %v1041_v26, %v1040_v20  ;;  %v1237_v9 = vadd.f32 %v1236_v24, %v1235_v45  ;;  %24646 = vst [vmem:[#allocation35_spill] sm:$0xff] %v15048_v63  ;;  %v1047_v20 = vsel %vm927_vm1, %v15033_v21, 0.0  ;;  %v1240_v24 = vsel %vm927_vm1, %v1119_v39, 0.0 }
 0x165   : > { %v15057_v45 = vadd.f32 %v14813_v7, %v14470_v33  ;;  %v1242_v26 = vsel %vm927_vm1, %v1120_v29, 0.0  ;;  %v1049_v39 = vsel %vm927_vm1, %v15048_v63, 0.0 }
 0x166   : > { %v1044_v38 = vadd.f32 %v1043_v56, %v1042_v55  ;;  %v1239_v60 = vadd.f32 %v1238_v52, %v1237_v9  ;;  %v1122_v9 = vmul.f32 %v15048_v63, %v15048_v63 }
 0x167   : > { %24647 = vst [vmem:[#allocation36_spill] sm:$0xff] %v15057_v45  ;;  %v1123_v7 = vmul.f32 %v15057_v45, %v15057_v45  ;;  %v1051_v29 = vsel %vm927_vm1, %v15057_v45, 0.0 }
 0x168   : > { %v1046_v22 = vadd.f32 %v1045_v34, %v1044_v38  ;;  %v1241_v55 = vadd.f32 %v1240_v24, %v1239_v60  ;;  %v1246_v46 = vsel %vm927_vm1, %v1122_v9, 0.0  ;;  %v1053_v60 = vsel %vm927_vm1, %v15063_v51, 0.0 }
 0x169   : > { %v1248_v24 = vsel %vm927_vm1, %v1123_v7, 0.0 }
 0x16a   : > { %v1048_v56 = vadd.f32 %v1047_v20, %v1046_v22  ;;  %v1243_v52 = vadd.f32 %v1242_v26, %v1241_v55  ;;  %v1250_v55 = vsel %vm927_vm1, %v1124_v13, 0.0  ;;  %v15084_v13 = vshrl.u32 %v1331_v23, 7  ;;  %v24666_v23 = vld [vmem:[#allocation21_spill] sm:$0xff] }
 0x16c   : > { %v1050_v38 = vadd.f32 %v1049_v39, %v1048_v56  ;;  %v1245_v34 = vadd.f32 %v1244_v53, %v1243_v52  ;;  %24649 = vst [vmem:[#allocation38_spill] sm:$0xff] %v15084_v13 }
 0x16e   : > { %v1052_v33 = vadd.f32 %v1051_v29, %v1050_v38  ;;  %v1247_v20 = vadd.f32 %v1246_v46, %v1245_v34 }
 0x170   : > { %v1054_v22 = vadd.f32 %v1053_v60, %v1052_v33  ;;  %v1249_v26 = vadd.f32 %v1248_v24, %v1247_v20 }
 0x172   : > { %v1055_v56 = vrot.slane %v1054_v22, 4  ;;  %v1251_v39 = vadd.f32 %v1250_v55, %v1249_v26  ;;  %v24662_v55 = vld [vmem:[#allocation16_spill] sm:$0xff]  ;;  %v24663_v26 = vld [vmem:[#allocation19_spill] sm:$0xff] }
 0x174   : > { %v1056_v11 = vadd.f32 %v1055_v56, %v1054_v22  ;;  %v1252_v53 = vrot.slane %v1251_v39, 4  ;;  %v24661_v56 = vld [vmem:[#allocation18_spill] sm:$0xff]  ;;  %v24664_v22 = vld [vmem:[#allocation17_spill] sm:$0xff] }
 0x176   : > { %v1057_v52 = vrot.slane %v1056_v11, 2  ;;  %v1253_v57 = vadd.f32 %v1252_v53, %v1251_v39  ;;  %v24660_v39 = vld [vmem:[#allocation15_spill] sm:$0xff] }
 0x178   : > { %v1058_v1 = vadd.f32 %v1057_v52, %v1056_v11  ;;  %v1254_v38 = vrot.slane %v1253_v57, 2  ;;  %v1264_v11 = vld [vmem:[%s24272_s5] sm:$0x1] }
 0x17a   : > { %v1059_v29 = vrot.slane %v1058_v1, 1  ;;  %v1255_v9 = vadd.f32 %v1254_v38, %v1253_v57  ;;  %v24652_v38 = vld [vmem:[#allocation7_spill] sm:$0xff]  ;;  %v24665_v57 = vld [vmem:[#allocation20_spill] sm:$0xff] }
 0x17c   : > { %v1060_v32 = vadd.f32 %v1059_v29, %v1058_v1  ;;  %v1256_v49 = vrot.slane %v1255_v9, 1  ;;  %v24653_v29 = vld [vmem:[#allocation9_spill] sm:$0xff] }
 0x17e   : > { %v15080_v34 = vmul.f32 0.001953125, %v1060_v32  ;;  %v1257_v7 = vadd.f32 %v1256_v49, %v1255_v9  ;;  %v24654_v9 = vld [vmem:[#allocation8_spill] sm:$0xff] }
 0x180   : > { %v1260_v33 = vmul.f32 %v15080_v34, %v15080_v34  ;;  %v1259_v46 = vmul.f32 0.001953125, %v1257_v7  ;;  %v24655_v7 = vld [vmem:[#allocation10_spill] sm:$0xff]  ;;  %v1301_v52 = vsub.f32 %v14802_v2, %v15080_v34  ;;  %v1302_v53 = vsub.f32 %v14809_v59, %v15080_v34 }
 0x181   : > { %v1303_v49 = vsub.f32 %v14830_v19, %v15080_v34  ;;  %v1304_v1 = vsub.f32 %v14841_v31, %v15080_v34  ;;  %v1305_v15 = vsub.f32 %v14846_v8, %v15080_v34  ;;  %v1306_v20 = vsub.f32 %v14853_v17, %v15080_v34  ;;  %v24667_v31 = vld [vmem:[#allocation22_spill] sm:$0xff]  ;;  %v24668_v8 = vld [vmem:[#allocation23_spill] sm:$0xff]  ;;  %v24669_v17 = vld [vmem:[#allocation24_spill] sm:$0xff] }
 0x182   : > { %v1261_v60 = vsub.f32 %v1259_v46, %v1260_v33  ;;  %v24650_v46 = vld [vmem:[#allocation5_spill] sm:$0xff]  ;;  %v24656_v33 = vld [vmem:[#allocation11_spill] sm:$0xff]  ;;  %v1307_v2 = vsub.f32 %v14868_v10, %v15080_v34  ;;  %v1308_v59 = vsub.f32 %v14877_v47, %v15080_v34  ;;  %v1309_v19 = vsub.f32 %v14882_v44, %v15080_v34  ;;  %v24672_v44 = vld [vmem:[#allocation26_spill] sm:$0xff] }
 0x183   : > { %v1310_v32 = vsub.f32 %v14889_v50, %v15080_v34  ;;  %v1311_v51 = vsub.f32 %v24667_v31, %v15080_v34  ;;  %v1312_v63 = vsub.f32 %v24668_v8, %v15080_v34  ;;  %v24670_v10 = vsub.s32 0, %v15084_v13  ;;  %v24671_v47 = vld [vmem:[#allocation25_spill] sm:$0xff]  ;;  %v24673_v50 = vld [vmem:[#allocation27_spill] sm:$0xff]  ;;  %v24674_v31 = vld [vmem:[#allocation28_spill] sm:$0xff] }
 0x184   : > { %v1262_v24 = vadd.f32 1e-05, %v1261_v60  ;;  %v24657_v60 = vld [vmem:[#allocation13_spill] sm:$0xff]  ;;  %v1314_v21 = vsub.f32 %v24671_v47, %v15080_v34  ;;  %v1315_v30 = vsub.f32 %v24672_v44, %v15080_v34  ;;  %v1316_v54 = vsub.f32 %v24673_v50, %v15080_v34 }
 0x185   : > { %v1317_v43 = vsub.f32 %v24674_v31, %v15080_v34  ;;  %v24675_v8 = vsub.f32 %v14476_v37, %v15080_v34  ;;  %v24677_v47 = vsub.f32 %v14473_v36, %v15080_v34  ;;  %v24678_v50 = vsub.f32 %v14481_v41, %v15080_v34 }
 0x186   : > { %14204 = vrsqrt.f32 %v1262_v24  ;;  %v24651_v24 = vld [vmem:[#allocation6_spill] sm:$0xff]  ;;  %v24679_v31 = vsub.f32 %v14504_v58, %v15080_v34 }
 0x190   : > { %v14205_v5 = vpop.eup %14204 }
 0x191   : > { %v1330_v45 = vmul.f32 %v14205_v5, %v1264_v11  ;;  %v1313_v5 = vsub.f32 %v24669_v17, %v15080_v34 }
 0x193   : > { %v15212_v11 = vrot.slane %v1330_v45, %v24670_v10  ;;  %v24676_v45 = vsub.f32 %v14484_v42, %v15080_v34 }
 0x195   : > { %v15226_v17 = vmul.f32 %v15212_v11, %v24675_v8  ;;  %v15232_v10 = vmul.f32 %v15212_v11, %v24676_v45  ;;  %v15238_v44 = vmul.f32 %v15212_v11, %v24677_v47  ;;  %v15244_v37 = vmul.f32 %v15212_v11, %v24678_v50 }
 0x196   : > { %v15250_v42 = vmul.f32 %v15212_v11, %v24679_v31  ;;  %v24680_v8 = vsub.f32 %v14515_v3, %v15080_v34  ;;  %v24681_v45 = vsub.f32 %v14507_v61, %v15080_v34  ;;  %v24682_v47 = vsub.f32 %v14518_v6, %v15080_v34 }
 0x197   : > { %v24683_v50 = vsub.f32 %v14543_v25, %v15080_v34  ;;  %v24684_v31 = vsub.f32 %v14554_v35, %v15080_v34 }
 0x198   : > { %v15256_v36 = vmul.f32 %v15212_v11, %v24680_v8  ;;  %v15262_v41 = vmul.f32 %v15212_v11, %v24681_v45  ;;  %v15268_v58 = vmul.f32 %v15212_v11, %v24682_v47  ;;  %v24685_v8 = vsub.f32 %v14547_v28, %v15080_v34 }
 0x199   : > { %v15274_v3 = vmul.f32 %v15212_v11, %v24683_v50  ;;  %v15280_v61 = vmul.f32 %v15212_v11, %v24684_v31  ;;  %v24686_v45 = vsub.f32 %v14558_v40, %v15080_v34  ;;  %v24687_v47 = vsub.f32 %v14583_v0, %v15080_v34 }
 0x19a   : > { %v15286_v6 = vmul.f32 %v15212_v11, %v24685_v8  ;;  %v24688_v50 = vsub.f32 %v14594_v12, %v15080_v34  ;;  %v24689_v31 = vsub.f32 %v14587_v4, %v15080_v34  ;;  %v24690_v8 = vsub.f32 %v14598_v16, %v15080_v34 }
 0x19b   : > { %v15292_v25 = vmul.f32 %v15212_v11, %v24686_v45  ;;  %v15298_v35 = vmul.f32 %v15212_v11, %v24687_v47  ;;  %v24691_v45 = vsub.f32 %v14623_v48, %v15080_v34  ;;  %v24692_v47 = vsub.f32 %v14634_v62, %v15080_v34 }
 0x19c   : > { %v15304_v28 = vmul.f32 %v15212_v11, %v24688_v50  ;;  %v15310_v40 = vmul.f32 %v15212_v11, %v24689_v31  ;;  %v15316_v0 = vmul.f32 %v15212_v11, %v24690_v8  ;;  %v24693_v50 = vsub.f32 %v24650_v46, %v15080_v34 }
 0x19d   : > { %v15322_v12 = vmul.f32 %v15212_v11, %v24691_v45  ;;  %v15328_v4 = vmul.f32 %v15212_v11, %v24692_v47  ;;  %v24694_v31 = vsub.f32 %v24651_v24, %v15080_v34  ;;  %v24695_v8 = vsub.f32 %v24652_v38, %v15080_v34 }
 0x19e   : > { %v15334_v16 = vmul.f32 %v15212_v11, %v24693_v50  ;;  %v24696_v45 = vsub.f32 %v24653_v29, %v15080_v34  ;;  %v24697_v47 = vsub.f32 %v24654_v9, %v15080_v34  ;;  %v24698_v50 = vsub.f32 %v24655_v7, %v15080_v34 }
 0x19f   : > { %v15340_v48 = vmul.f32 %v15212_v11, %v24694_v31  ;;  %v15346_v62 = vmul.f32 %v15212_v11, %v24695_v8  ;;  %v24699_v31 = vsub.f32 %v24656_v33, %v15080_v34  ;;  %v24700_v8 = vsub.f32 %v24657_v60, %v15080_v34 }
 0x1a0   : > { %v15352_v46 = vmul.f32 %v15212_v11, %v24696_v45  ;;  %v15358_v24 = vmul.f32 %v15212_v11, %v24697_v47  ;;  %v15364_v38 = vmul.f32 %v15212_v11, %v24698_v50  ;;  %v24701_v45 = vld [vmem:[#allocation12_spill] sm:$0xff]  ;;  %v24703_v50 = vld [vmem:[#allocation14_spill] sm:$0xff] }
 0x1a1   : > { %v15370_v29 = vmul.f32 %v15212_v11, %v24699_v31  ;;  %v15376_v9 = vmul.f32 %v15212_v11, %v24700_v8  ;;  %v24702_v47 = vsub.f32 %v24701_v45, %v15080_v34  ;;  %v24704_v13 = vsub.f32 %v24703_v50, %v15080_v34 }
 0x1a2   : > { %v24705_v31 = vsub.f32 %v24660_v39, %v15080_v34  ;;  %v24706_v8 = vsub.f32 %v24661_v56, %v15080_v34 }
 0x1a3   : > { %v15382_v7 = vmul.f32 %v15212_v11, %v24702_v47  ;;  %v15388_v33 = vmul.f32 %v15212_v11, %v24704_v13  ;;  %v24707_v47 = vsub.f32 %v24662_v55, %v15080_v34  ;;  %v24708_v13 = vsub.f32 %v24663_v26, %v15080_v34 }
 0x1a4   : > { %v15394_v60 = vmul.f32 %v15212_v11, %v24705_v31  ;;  %v15400_v45 = vmul.f32 %v15212_v11, %v24706_v8  ;;  %v24709_v31 = vsub.f32 %v24664_v22, %v15080_v34  ;;  %v24710_v8 = vsub.f32 %v24665_v57, %v15080_v34 }
 0x1a5   : > { %v15406_v50 = vmul.f32 %v15212_v11, %v24707_v47  ;;  %v15412_v39 = vmul.f32 %v15212_v11, %v24708_v13  ;;  %v24711_v47 = vsub.f32 %v24666_v23, %v15080_v34  ;;  %v15433_v13 = vmul.f32 %v15212_v11, %v1301_v52 }
 0x1a6   : > { %v15418_v56 = vmul.f32 %v15212_v11, %v24709_v31  ;;  %v15424_v55 = vmul.f32 %v15212_v11, %v24710_v8  ;;  %v15436_v22 = vmul.f32 %v15212_v11, %v1302_v53  ;;  %v15439_v31 = vmul.f32 %v15212_v11, %v1303_v49 }
 0x1a7   : > { %v15430_v26 = vmul.f32 %v15212_v11, %v24711_v47  ;;  %v15442_v57 = vmul.f32 %v15212_v11, %v1304_v1  ;;  %v15445_v8 = vmul.f32 %v15212_v11, %v1305_v15  ;;  %v15448_v23 = vmul.f32 %v15212_v11, %v1306_v20 }
 0x1a8   : > { %v15451_v47 = vmul.f32 %v15212_v11, %v1307_v2  ;;  %v15454_v52 = vmul.f32 %v15212_v11, %v1308_v59  ;;  %v15457_v53 = vmul.f32 %v15212_v11, %v1309_v19  ;;  %v15460_v49 = vmul.f32 %v15212_v11, %v1310_v32 }
 0x1a9   : > { %v15463_v1 = vmul.f32 %v15212_v11, %v1311_v51  ;;  %v15466_v15 = vmul.f32 %v15212_v11, %v1312_v63  ;;  %v15469_v20 = vmul.f32 %v15212_v11, %v1313_v5  ;;  %v15472_v2 = vmul.f32 %v15212_v11, %v1314_v21  ;;  %v15486_v51 = vld [vmem:[%s24273_s6] ss:$0 sm:$0xff] }
 0x1aa   : > { %v15475_v59 = vmul.f32 %v15212_v11, %v1315_v30  ;;  %v15478_v19 = vmul.f32 %v15212_v11, %v1316_v54  ;;  %v15481_v32 = vmul.f32 %v15212_v11, %v1317_v43  ;;  %v24715_v63 = vsub.f32 %v14961_v27, %v15080_v34  ;;  %v24718_v5 = vld [vmem:[#allocation29_spill] sm:$0xff] }
 0x1ab   : > { %v24716_v30 = vsub.f32 %v14976_v14, %v15080_v34  ;;  %v24719_v43 = vsub.f32 %v24718_v5, %v15080_v34 }
 0x1ac   : > { %24712 = vst [vmem:[#allocation5_spill] sm:$0xff] %v15475_v59  ;;  %24713 = vst [vmem:[#allocation6_spill] sm:$0xff] %v15478_v19  ;;  %v15492_v21 = vmul.f32 %v15212_v11, %v24715_v63  ;;  %v24721_v19 = vld [vmem:[#allocation30_spill] sm:$0xff]  ;;  %v24724_v63 = vsub.f32 %v14997_v18, %v15080_v34 }
 0x1ad   : > { %24714 = vst [vmem:[#allocation7_spill] sm:$0xff] %v15481_v32  ;;  %v15498_v54 = vmul.f32 %v15212_v11, %v24716_v30  ;;  %v15504_v32 = vmul.f32 %v15212_v11, %v24719_v43  ;;  %v24722_v59 = vsub.f32 %v24721_v19, %v15080_v34  ;;  %v24726_v30 = vld [vmem:[#allocation31_spill] sm:$0xff]  ;;  %v24729_v43 = vld [vmem:[#allocation32_spill] sm:$0xff] }
 0x1ae   : > { %v15516_v14 = vmul.f32 %v15212_v11, %v24724_v63  ;;  %v24735_v63 = vld [vmem:[#allocation34_spill] sm:$0xff] }
 0x1af   : > { %24717 = vst [vmem:[#allocation9_spill] sm:$0xff] %v15498_v54  ;;  %24720 = vst [vmem:[#allocation8_spill] sm:$0xff] %v15504_v32  ;;  %v15510_v27 = vmul.f32 %v15212_v11, %v24722_v59  ;;  %v24727_v54 = vsub.f32 %v24726_v30, %v15080_v34  ;;  %v24730_v32 = vsub.f32 %v24729_v43, %v15080_v34  ;;  %v24732_v59 = vld [vmem:[#allocation33_spill] sm:$0xff] }
 0x1b0   : > { %24725 = vst [vmem:[#allocation11_spill] sm:$0xff] %v15516_v14  ;;  %v24736_v14 = vsub.f32 %v24735_v63, %v15080_v34 }
 0x1b1   : > { %24723 = vst [vmem:[#allocation10_spill] sm:$0xff] %v15510_v27  ;;  %v15522_v5 = vmul.f32 %v15212_v11, %v24727_v54  ;;  %v15528_v19 = vmul.f32 %v15212_v11, %v24730_v32  ;;  %v24733_v27 = vsub.f32 %v24732_v59, %v15080_v34  ;;  %v24737_v54 = vld [vmem:[#allocation35_spill] sm:$0xff]  ;;  %v24739_v32 = vld [vmem:[#allocation36_spill] sm:$0xff] }
 0x1b2   : > { %v15540_v30 = vmul.f32 %v15212_v11, %v24736_v14  ;;  %v15562_v14 = vadd.f32 %v15486_v51, %v15226_v17  ;;  %v15586_v17 = vadd.f32 %v15486_v51, %v15262_v41  ;;  %v15610_v41 = vadd.f32 %v15486_v51, %v15298_v35 }
 0x1b3   : > { %24728 = vst [vmem:[#allocation13_spill] sm:$0xff] %v15522_v5  ;;  %24731 = vst [vmem:[#allocation15_spill] sm:$0xff] %v15528_v19  ;;  %v15534_v18 = vmul.f32 %v15212_v11, %v24733_v27  ;;  %v24738_v5 = vsub.f32 %v24737_v54, %v15080_v34  ;;  %v24740_v19 = vsub.f32 %v24739_v32, %v15080_v34  ;;  %v24741_v27 = vld [vmem:[#allocation37_spill] sm:$0xff] }
 0x1b4   : > { %v15570_v54 = vadd.f32 %v15486_v51, %v15238_v44  ;;  %v15594_v44 = vadd.f32 %v15486_v51, %v15274_v3  ;;  %v15618_v3 = vadd.f32 %v15486_v51, %v15310_v40  ;;  %v15634_v35 = vadd.f32 %v15486_v51, %v15334_v16  ;;  %v24748_v32 = vld [vmem:[#allocation7_spill] sm:$0xff] }
 0x1b5   : > { %24734 = vst [vmem:[#allocation18_spill] sm:$0xff] %v15534_v18  ;;  %v15546_v43 = vmul.f32 %v15212_v11, %v24738_v5  ;;  %v15552_v59 = vmul.f32 %v15212_v11, %v24740_v19  ;;  %v24742_v18 = vsub.f32 %v24741_v27, %v15080_v34  ;;  %v15566_v5 = vadd.f32 %v15486_v51, %v15232_v10 }
 0x1b6   : > { %v15574_v19 = vadd.f32 %v15486_v51, %v15244_v37  ;;  %v15578_v34 = vadd.f32 %v15486_v51, %v15250_v42  ;;  %v15590_v10 = vadd.f32 %v15486_v51, %v15268_v58  ;;  %v15598_v37 = vadd.f32 %v15486_v51, %v15280_v61  ;;  %v24751_v27 = vld [vmem:[#allocation9_spill] sm:$0xff] }
 0x1b7   : > { %v15558_v63 = vmul.f32 %v15212_v11, %v24742_v18  ;;  %v15582_v11 = vadd.f32 %v15486_v51, %v15256_v36  ;;  %v15602_v42 = vadd.f32 %v15486_v51, %v15286_v6  ;;  %v15606_v36 = vadd.f32 %v15486_v51, %v15292_v25  ;;  %v24746_v18 = vld [vmem:[#allocation6_spill] sm:$0xff] }
 0x1b8   : > { %v15614_v58 = vadd.f32 %v15486_v51, %v15304_v28  ;;  %v15622_v61 = vadd.f32 %v15486_v51, %v15316_v0  ;;  %v15626_v6 = vadd.f32 %v15486_v51, %v15322_v12  ;;  %v15630_v25 = vadd.f32 %v15486_v51, %v15328_v4 }
 0x1b9   : > { %v15638_v28 = vadd.f32 %v15486_v51, %v15340_v48  ;;  %v15642_v40 = vadd.f32 %v15486_v51, %v15346_v62  ;;  %v15646_v0 = vadd.f32 %v15486_v51, %v15352_v46  ;;  %v15650_v12 = vadd.f32 %v15486_v51, %v15358_v24 }
 0x1ba   : > { %v15654_v4 = vadd.f32 %v15486_v51, %v15364_v38  ;;  %v15658_v16 = vadd.f32 %v15486_v51, %v15370_v29  ;;  %v15662_v48 = vadd.f32 %v15486_v51, %v15376_v9  ;;  %v15666_v62 = vadd.f32 %v15486_v51, %v15382_v7 }
 0x1bb   : > { %v15670_v46 = vadd.f32 %v15486_v51, %v15388_v33  ;;  %v15674_v24 = vadd.f32 %v15486_v51, %v15394_v60  ;;  %v15678_v38 = vadd.f32 %v15486_v51, %v15400_v45  ;;  %v15682_v29 = vadd.f32 %v15486_v51, %v15406_v50 }
 0x1bc   : > { %v15686_v9 = vadd.f32 %v15486_v51, %v15412_v39  ;;  %v15690_v7 = vadd.f32 %v15486_v51, %v15418_v56  ;;  %v15694_v33 = vadd.f32 %v15486_v51, %v15424_v55  ;;  %v15698_v60 = vadd.f32 %v15486_v51, %v15430_v26 }
 0x1bd   : > { %v15702_v45 = vadd.f32 %v15486_v51, %v15433_v13  ;;  %v15706_v50 = vadd.f32 %v15486_v51, %v15436_v22  ;;  %v15710_v39 = vadd.f32 %v15486_v51, %v15439_v31  ;;  %v15714_v56 = vadd.f32 %v15486_v51, %v15442_v57 }
 0x1be   : > { %v15718_v55 = vadd.f32 %v15486_v51, %v15445_v8  ;;  %v15722_v26 = vadd.f32 %v15486_v51, %v15448_v23  ;;  %v15726_v13 = vadd.f32 %v15486_v51, %v15451_v47  ;;  %v15730_v22 = vadd.f32 %v15486_v51, %v15454_v52 }
 0x1bf   : > { %v15734_v31 = vadd.f32 %v15486_v51, %v15457_v53  ;;  %v15738_v57 = vadd.f32 %v15486_v51, %v15460_v49  ;;  %v15742_v8 = vadd.f32 %v15486_v51, %v15463_v1  ;;  %v15746_v23 = vadd.f32 %v15486_v51, %v15466_v15  ;;  %v24744_v53 = vld [vmem:[#allocation5_spill] sm:$0xff] }
 0x1c0   : > { %v15750_v47 = vadd.f32 %v15486_v51, %v15469_v20  ;;  %v15754_v52 = vadd.f32 %v15486_v51, %v15472_v2  ;;  %v15758_v49 = vadd.f32 %v15486_v51, %v24744_v53  ;;  %v15762_v1 = vadd.f32 %v15486_v51, %v24746_v18 }
 0x1c1   : > { %v15766_v15 = vadd.f32 %v15486_v51, %v24748_v32  ;;  %v15770_v20 = vadd.f32 %v15486_v51, %v15492_v21  ;;  %v15774_v2 = vadd.f32 %v15486_v51, %v24751_v27 }
 0x1c2   : > { %24743 = vst [vmem:[#allocation16_spill] sm:$0xff] %v15754_v52  ;;  %24745 = vst [vmem:[#allocation19_spill] sm:$0xff] %v15758_v49  ;;  %v24753_v52 = vld [vmem:[#allocation8_spill] sm:$0xff]  ;;  %v24754_v49 = vld [vmem:[#allocation10_spill] sm:$0xff] }
 0x1c3   : > { %24747 = vst [vmem:[#allocation17_spill] sm:$0xff] %v15762_v1  ;;  %24749 = vst [vmem:[#allocation20_spill] sm:$0xff] %v15766_v15  ;;  %v15778_v53 = vadd.f32 %v15486_v51, %v24753_v52  ;;  %v15782_v18 = vadd.f32 %v15486_v51, %v24754_v49  ;;  %v24755_v1 = vld [vmem:[#allocation11_spill] sm:$0xff]  ;;  %v24756_v15 = vld [vmem:[#allocation13_spill] sm:$0xff]  ;;  %v15802_v49 = vadd.f32 %v15486_v51, %v15540_v30  ;;  %v15823_v30 = vmax.f32 %v15570_v54, 0.0 }
 0x1c4   : > { %24750 = vst [vmem:[#allocation21_spill] sm:$0xff] %v15770_v20  ;;  %24752 = vst [vmem:[#allocation22_spill] sm:$0xff] %v15774_v2  ;;  %v15786_v32 = vadd.f32 %v15486_v51, %v24755_v1  ;;  %v15790_v21 = vadd.f32 %v15486_v51, %v24756_v15  ;;  %v24757_v20 = vld [vmem:[#allocation15_spill] sm:$0xff]  ;;  %v24759_v2 = vld [vmem:[#allocation18_spill] sm:$0xff]  ;;  %v15806_v1 = vadd.f32 %v15486_v51, %v15546_v43  ;;  %v15826_v43 = vmax.f32 %v15574_v19, 0.0 }
 0x1c5   : > { %v15794_v27 = vadd.f32 %v15486_v51, %v24757_v20  ;;  %v15798_v52 = vadd.f32 %v15486_v51, %v24759_v2  ;;  %v15810_v15 = vadd.f32 %v15486_v51, %v15552_v59  ;;  %v15814_v20 = vadd.f32 %v15486_v51, %v15558_v63 }
 0x1c6   : > { %24760 = vst [vmem:[#allocation24_spill] sm:$0xff] %v15806_v1  ;;  %v15820_v2 = vmax.f32 %v15566_v5, 0.0  ;;  %v15829_v1 = vmax.f32 %v15578_v34, 0.0  ;;  %v15832_v59 = vmax.f32 %v15582_v11, 0.0  ;;  %v15835_v51 = vmax.f32 %v15586_v17, 0.0 }
 0x1c7   : > { %24758 = vst [vmem:[#allocation23_spill] sm:$0xff] %v15794_v27  ;;  %v15817_v27 = vmax.f32 %v15562_v14, 0.0  ;;  %v15838_v63 = vmax.f32 %v15590_v10, 0.0  ;;  %v15841_v14 = vmax.f32 %v15594_v44, 0.0  ;;  %v15844_v5 = vmax.f32 %v15598_v37, 0.0 }
 0x1c8   : > { %v15847_v54 = vmax.f32 %v15602_v42, 0.0  ;;  %v15850_v19 = vmax.f32 %v15606_v36, 0.0  ;;  %v15853_v34 = vmax.f32 %v15610_v41, 0.0  ;;  %v15856_v11 = vmax.f32 %v15614_v58, 0.0 }
 0x1c9   : > { %v15859_v17 = vmax.f32 %v15618_v3, 0.0  ;;  %v15862_v10 = vmax.f32 %v15622_v61, 0.0  ;;  %v15865_v44 = vmax.f32 %v15626_v6, 0.0  ;;  %v15868_v37 = vmax.f32 %v15630_v25, 0.0 }
 0x1ca   : > { %v15871_v42 = vmax.f32 %v15634_v35, 0.0  ;;  %v15874_v36 = vmax.f32 %v15638_v28, 0.0  ;;  %v15877_v41 = vmax.f32 %v15642_v40, 0.0  ;;  %v15880_v58 = vmax.f32 %v15646_v0, 0.0 }
 0x1cb   : > { %v15883_v3 = vmax.f32 %v15650_v12, 0.0  ;;  %v15886_v61 = vmax.f32 %v15654_v4, 0.0  ;;  %v15889_v6 = vmax.f32 %v15658_v16, 0.0  ;;  %v15892_v25 = vmax.f32 %v15662_v48, 0.0 }
 0x1cc   : > { %24761 = vst [vmem:[#allocation25_spill] sm:$0xff] %v15874_v36  ;;  %v15895_v35 = vmax.f32 %v15666_v62, 0.0  ;;  %v15898_v28 = vmax.f32 %v15670_v46, 0.0  ;;  %v15901_v40 = vmax.f32 %v15674_v24, 0.0  ;;  %v15904_v0 = vmax.f32 %v15678_v38, 0.0 }
 0x1cd   : > { %24762 = vst [vmem:[#allocation26_spill] sm:$0xff] %v15886_v61  ;;  %v15907_v12 = vmax.f32 %v15682_v29, 0.0  ;;  %v15910_v4 = vmax.f32 %v15686_v9, 0.0  ;;  %v15913_v16 = vmax.f32 %v15690_v7, 0.0  ;;  %v15916_v48 = vmax.f32 %v15694_v33, 0.0 }
 0x1ce   : > { %24763 = vst [vmem:[#allocation27_spill] sm:$0xff] %v15895_v35  ;;  %v15919_v62 = vmax.f32 %v15698_v60, 0.0  ;;  %v15922_v46 = vmax.f32 %v15702_v45, 0.0  ;;  %v15925_v24 = vmax.f32 %v15706_v50, 0.0  ;;  %v15928_v38 = vmax.f32 %v15710_v39, 0.0  ;;  %v24798_v35 = vld [vmem:[#allocation38_spill] sm:$0xff] }
 0x1cf   : > { %v15931_v29 = vmax.f32 %v15714_v56, 0.0  ;;  %v15934_v9 = vmax.f32 %v15718_v55, 0.0  ;;  %v15937_v7 = vmax.f32 %v15722_v26, 0.0  ;;  %v15940_v33 = vmax.f32 %v15726_v13, 0.0  ;;  %v24774_v26 = vld [vmem:[#allocation16_spill] sm:$0xff] }
 0x1d0   : > { %24764 = vst [vmem:[#allocation28_spill] sm:$0xff] %v15922_v46  ;;  %24765 = vst [vmem:[#allocation12_spill] sm:$0xff] %v15928_v38  ;;  %v15943_v60 = vmax.f32 %v15730_v22, 0.0  ;;  %v15946_v45 = vmax.f32 %v15734_v31, 0.0  ;;  %v15949_v50 = vmax.f32 %v15738_v57, 0.0  ;;  %v15952_v39 = vmax.f32 %v15742_v8, 0.0 }
 0x1d1   : > { %24766 = vst [vmem:[#allocation14_spill] sm:$0xff] %v15934_v9  ;;  %24767 = vst [vmem:[#allocation29_spill] sm:$0xff] %v15940_v33  ;;  %v15955_v56 = vmax.f32 %v15746_v23, 0.0  ;;  %v15958_v55 = vmax.f32 %v15750_v47, 0.0  ;;  %v15961_v13 = vmax.f32 %v24774_v26, 0.0  ;;  %v24776_v22 = vld [vmem:[#allocation19_spill] sm:$0xff] }
 0x1d2   : > { %24768 = vst [vmem:[#allocation30_spill] sm:$0xff] %v15943_v60  ;;  %24769 = vst [vmem:[#allocation31_spill] sm:$0xff] %v15946_v45  ;;  %v15964_v33 = vmax.f32 %v24776_v22, 0.0  ;;  %v24778_v31 = vld [vmem:[#allocation17_spill] sm:$0xff]  ;;  %v24780_v57 = vld [vmem:[#allocation20_spill] sm:$0xff]  ;;  %v15979_v47 = vmax.f32 %v15778_v53, 0.0 }
 0x1d3   : > { %24770 = vst [vmem:[#allocation32_spill] sm:$0xff] %v15949_v50  ;;  %24771 = vst [vmem:[#allocation33_spill] sm:$0xff] %v15952_v39  ;;  %v15967_v45 = vmax.f32 %v24778_v31, 0.0  ;;  %v15970_v9 = vmax.f32 %v24780_v57, 0.0  ;;  %v24782_v8 = vld [vmem:[#allocation21_spill] sm:$0xff]  ;;  %v24784_v23 = vld [vmem:[#allocation22_spill] sm:$0xff] }
 0x1d4   : > { %24772 = vst [vmem:[#allocation34_spill] sm:$0xff] %v15955_v56  ;;  %24773 = vst [vmem:[#allocation35_spill] sm:$0xff] %v15958_v55  ;;  %v15973_v39 = vmax.f32 %v24782_v8, 0.0  ;;  %v15976_v38 = vmax.f32 %v24784_v23, 0.0  ;;  %v15982_v26 = vmax.f32 %v15782_v18, 0.0  ;;  %v15985_v22 = vmax.f32 %v15786_v32, 0.0 }
 0x1d5   : > { %24775 = vst [vmem:[#allocation36_spill] sm:$0xff] %v15961_v13  ;;  %24777 = vst [vmem:[#allocation37_spill] sm:$0xff] %v15964_v33  ;;  %v15988_v31 = vmax.f32 %v15790_v21, 0.0  ;;  %v24790_v57 = vld [vmem:[#allocation23_spill] sm:$0xff]  ;;  %v15994_v8 = vmax.f32 %v15798_v52, 0.0  ;;  %v15997_v23 = vmax.f32 %v15802_v49, 0.0 }
 0x1d6   : > { %24779 = vst [vmem:[#allocation5_spill] sm:$0xff] %v15967_v45  ;;  %24781 = vst [vmem:[#allocation6_spill] sm:$0xff] %v15970_v9  ;;  %v15991_v9 = vmax.f32 %v24790_v57, 0.0  ;;  %v24794_v53 = vld [vmem:[#allocation24_spill] sm:$0xff]  ;;  %v16003_v18 = vmax.f32 %v15810_v15, 0.0  ;;  %v16006_v32 = vmax.f32 %v15814_v20, 0.0 }
 0x1d7   : > { %24783 = vst [vmem:[#allocation7_spill] sm:$0xff] %v15973_v39  ;;  %24785 = vst [vmem:[#allocation9_spill] sm:$0xff] %v15976_v38  ;;  %v16000_v38 = vmax.f32 %v24794_v53, 0.0  ;;  %vm1597_vm2 = vcmp.lt.s32.totalorder %v24798_v35, 1  ;;  %v24806_v13 = vmov %v15988_v31  ;;  %v24807_v56 = vmov %v15994_v8 }
 0x1d8   : > { %24786 = vst [vmem:[#allocation8_spill] sm:$0xff] %v15979_v47  ;;  %24787 = vst [vmem:[#allocation10_spill] sm:$0xff] %v15982_v26  ;;  %v24810_v53 = vrot.slane %v15817_v27, 7  ;;  %v24812_v20 = vrot.slane %v15826_v43, 7  ;;  %v24813_v21 = vrot.slane %v15823_v30, 7  ;;  %v24815_v52 = vrot.slane %v15832_v59, 7 }
 0x1d9   : > { %24788 = vst [vmem:[#allocation11_spill] sm:$0xff] %v15985_v22  ;;  %24789 = vst [vmem:[#allocation13_spill] sm:$0xff] %v15988_v31  ;;  %v24802_v22 = vld [vmem:[#allocation31_spill] sm:$0xff]  ;;  %v24808_v50 = vmov %v16000_v38  ;;  %v24816_v49 = vrot.slane %v15829_v1, 7  ;;  %vm1726_vm3 = vcmp.lt.s32.totalorder %v24798_v35, 7 }
 0x1da   : > { %24791 = vst [vmem:[#allocation15_spill] sm:$0xff] %v15991_v9  ;;  %24792 = vst [vmem:[#allocation18_spill] sm:$0xff] %v15994_v8  ;;  %v24801_v9 = vld [vmem:[#allocation29_spill] sm:$0xff]  ;;  %v24809_v8 = vrot.slane %v15820_v2, 7  ;;  %v16087_v57 = vsel %vm1597_vm2, %v24813_v21, %v24812_v20  ;;  %v24822_v21 = vrot.slane %v15841_v14, 7 }
 0x1db   : > { %24793 = vst [vmem:[#allocation16_spill] sm:$0xff] %v15997_v23  ;;  %24795 = vst [vmem:[#allocation19_spill] sm:$0xff] %v16000_v38  ;;  %v24800_v23 = vld [vmem:[#allocation14_spill] sm:$0xff]  ;;  %v24803_v47 = vld [vmem:[#allocation33_spill] sm:$0xff]  ;;  %v16095_v31 = vsel %vm1597_vm2, %v24816_v49, %v24815_v52  ;;  %v24818_v38 = vrot.slane %v15838_v63, 7  ;;  %v24825_v52 = vrot.slane %v15847_v54, 7 }
 0x1dc   : > { %24796 = vst [vmem:[#allocation17_spill] sm:$0xff] %v16003_v18  ;;  %24797 = vst [vmem:[#allocation20_spill] sm:$0xff] %v16006_v32  ;;  %v24799_v18 = vld [vmem:[#allocation12_spill] sm:$0xff]  ;;  %v16079_v15 = vsel %vm1597_vm2, %v24810_v53, %v24809_v8  ;;  %v24819_v8 = vrot.slane %v15835_v51, 7 }
 0x1dd   : > { %v24804_v39 = vld [vmem:[#allocation6_spill] sm:$0xff]  ;;  %24811 = vst [vmem:[#allocation21_spill] sm:$0xff] %v16079_v15  ;;  %24814 = vst [vmem:[#allocation22_spill] sm:$0xff] %v16087_v57  ;;  %v24821_v15 = vrot.slane %v15844_v5, 7  ;;  %v24824_v57 = vrot.slane %v15850_v19, 7 }
 0x1de   : > { %v24805_v45 = vld [vmem:[#allocation9_spill] sm:$0xff]  ;;  %24817 = vst [vmem:[#allocation23_spill] sm:$0xff] %v16095_v31  ;;  %v16103_v53 = vsel %vm1597_vm2, %v24819_v8, %v24818_v38  ;;  %v24827_v31 = vrot.slane %v15856_v11, 7  ;;  %v24828_v38 = vrot.slane %v15853_v34, 7 }
 0x1df   : > { %24820 = vst [vmem:[#allocation24_spill] sm:$0xff] %v16103_v53  ;;  %v16111_v20 = vsel %vm1597_vm2, %v24822_v21, %v24821_v15  ;;  %v16119_v49 = vsel %vm1597_vm2, %v24825_v52, %v24824_v57  ;;  %v24830_v53 = vrot.slane %v15862_v10, 7  ;;  %v24831_v15 = vrot.slane %v15859_v17, 7 }
 0x1e0   : > { %24823 = vst [vmem:[#allocation38_spill] sm:$0xff] %v16111_v20  ;;  %24826 = vst [vmem:[#allocation39_spill] sm:$0xff] %v16119_v49  ;;  %v16127_v8 = vsel %vm1597_vm2, %v24828_v38, %v24827_v31  ;;  %v24833_v20 = vrot.slane %v15868_v37, 7  ;;  %v24834_v57 = vrot.slane %v15865_v44, 7  ;;  %v24836_v49 = vrot.slane %v15874_v36, 7 }
 0x1e1   : > { %24829 = vst [vmem:[#allocation40_spill] sm:$0xff] %v16127_v8  ;;  %v16135_v21 = vsel %vm1597_vm2, %v24831_v15, %v24830_v53  ;;  %v24837_v31 = vrot.slane %v15871_v42, 7  ;;  %v24839_v8 = vrot.slane %v15880_v58, 7  ;;  %v24840_v53 = vrot.slane %v15877_v41, 7 }
 0x1e2   : > { %24832 = vst [vmem:[#allocation41_spill] sm:$0xff] %v16135_v21  ;;  %v16143_v52 = vsel %vm1597_vm2, %v24834_v57, %v24833_v20  ;;  %v24842_v21 = vrot.slane %v15886_v61, 7  ;;  %v24843_v20 = vrot.slane %v15883_v3, 7  ;;  %v24852_v61 = vrot.slane %v15904_v0, 7 }
 0x1e3   : > { %24835 = vst [vmem:[#allocation42_spill] sm:$0xff] %v16143_v52  ;;  %v16151_v38 = vsel %vm1597_vm2, %v24837_v31, %v24836_v49  ;;  %v16159_v15 = vsel %vm1597_vm2, %v24840_v53, %v24839_v8  ;;  %v24845_v52 = vrot.slane %v15892_v25, 7  ;;  %v24846_v49 = vrot.slane %v15889_v6, 7  ;;  %v24849_v8 = vld [vmem:[#allocation27_spill] sm:$0xff] }
 0x1e4   : > { %24838 = vst [vmem:[#allocation43_spill] sm:$0xff] %v16151_v38  ;;  %24841 = vst [vmem:[#allocation44_spill] sm:$0xff] %v16159_v15  ;;  %v16167_v57 = vsel %vm1597_vm2, %v24843_v20, %v24842_v21  ;;  %v24848_v38 = vrot.slane %v15898_v28, 7  ;;  %v24850_v53 = vrot.slane %v24849_v8, 7  ;;  %v24853_v21 = vrot.slane %v15901_v40, 7 }
 0x1e5   : > { %24844 = vst [vmem:[#allocation45_spill] sm:$0xff] %v16167_v57  ;;  %v16175_v31 = vsel %vm1597_vm2, %v24846_v49, %v24845_v52  ;;  %v24855_v57 = vrot.slane %v15910_v4, 7  ;;  %v24856_v52 = vrot.slane %v15907_v12, 7 }
 0x1e6   : > { %24847 = vst [vmem:[#allocation46_spill] sm:$0xff] %v16175_v31  ;;  %v16183_v15 = vsel %vm1597_vm2, %v24850_v53, %v24848_v38  ;;  %v16191_v20 = vsel %vm1597_vm2, %v24853_v21, %v24852_v61  ;;  %v24858_v31 = vrot.slane %v15916_v48, 7  ;;  %v24859_v38 = vrot.slane %v15913_v16, 7 }
 0x1e7   : > { %24851 = vst [vmem:[#allocation27_spill] sm:$0xff] %v16183_v15  ;;  %24854 = vst [vmem:[#allocation47_spill] sm:$0xff] %v16191_v20  ;;  %v16199_v49 = vsel %vm1597_vm2, %v24856_v52, %v24855_v57  ;;  %v24861_v15 = vrot.slane %v15922_v46, 7  ;;  %v24862_v61 = vrot.slane %v15919_v62, 7  ;;  %v24864_v20 = vrot.slane %v24799_v18, 7 }
 0x1e8   : > { %24857 = vst [vmem:[#allocation48_spill] sm:$0xff] %v16199_v49  ;;  %v16207_v53 = vsel %vm1597_vm2, %v24859_v38, %v24858_v31  ;;  %v24865_v57 = vrot.slane %v15925_v24, 7  ;;  %v24867_v49 = vrot.slane %v24800_v23, 7  ;;  %v24868_v31 = vrot.slane %v15931_v29, 7 }
 0x1e9   : > { %24860 = vst [vmem:[#allocation49_spill] sm:$0xff] %v16207_v53  ;;  %v16215_v21 = vsel %vm1597_vm2, %v24862_v61, %v24861_v15  ;;  %v24870_v53 = vrot.slane %v24801_v9, 7  ;;  %v24871_v15 = vrot.slane %v15937_v7, 7  ;;  %v24880_v9 = vrot.slane %v15958_v55, 7 }
 0x1ea   : > { %24863 = vst [vmem:[#allocation50_spill] sm:$0xff] %v16215_v21  ;;  %v16223_v52 = vsel %vm1597_vm2, %v24865_v57, %v24864_v20  ;;  %v16231_v38 = vsel %vm1597_vm2, %v24868_v31, %v24867_v49  ;;  %v24873_v21 = vrot.slane %v24802_v22, 7  ;;  %v24874_v20 = vrot.slane %v15943_v60, 7  ;;  %v24877_v49 = vld [vmem:[#allocation32_spill] sm:$0xff] }
 0x1eb   : > { %24866 = vst [vmem:[#allocation51_spill] sm:$0xff] %v16223_v52  ;;  %24869 = vst [vmem:[#allocation52_spill] sm:$0xff] %v16231_v38  ;;  %v16239_v61 = vsel %vm1597_vm2, %v24871_v15, %v24870_v53  ;;  %v24876_v52 = vrot.slane %v24803_v47, 7  ;;  %v24878_v31 = vrot.slane %v24877_v49, 7  ;;  %v24881_v53 = vld [vmem:[#allocation34_spill] sm:$0xff]  ;;  %v24884_v22 = vrot.slane %v15964_v33, 7 }
 0x1ec   : > { %24872 = vst [vmem:[#allocation53_spill] sm:$0xff] %v16239_v61  ;;  %v16247_v57 = vsel %vm1597_vm2, %v24874_v20, %v24873_v21  ;;  %v24882_v15 = vrot.slane %v24881_v53, 7  ;;  %v24885_v21 = vld [vmem:[#allocation36_spill] sm:$0xff]  ;;  %v24888_v47 = vrot.slane %v24804_v39, 7  ;;  %v24892_v55 = vrot.slane %v24805_v45, 7 }
 0x1ed   : > { %24875 = vst [vmem:[#allocation54_spill] sm:$0xff] %v16247_v57  ;;  %v16255_v38 = vsel %vm1597_vm2, %v24878_v31, %v24876_v52  ;;  %v24886_v20 = vrot.slane %v24885_v21, 7  ;;  %v24889_v52 = vld [vmem:[#allocation5_spill] sm:$0xff]  ;;  %v24896_v33 = vrot.slane %v15982_v26, 7  ;;  %v24900_v39 = vrot.slane %v24806_v13, 7 }
 0x1ee   : > { %24879 = vst [vmem:[#allocation55_spill] sm:$0xff] %v16255_v38  ;;  %v16263_v61 = vsel %vm1597_vm2, %v24882_v15, %v24880_v9  ;;  %v24890_v31 = vrot.slane %v24889_v52, 7  ;;  %v24893_v9 = vld [vmem:[#allocation7_spill] sm:$0xff]  ;;  %v24904_v45 = vrot.slane %v24807_v56, 7  ;;  %v24908_v26 = vrot.slane %v24808_v50, 7 }
 0x1ef   : > { %24883 = vst [vmem:[#allocation56_spill] sm:$0xff] %v16263_v61  ;;  %v16271_v57 = vsel %vm1597_vm2, %v24886_v20, %v24884_v22  ;;  %v24894_v15 = vrot.slane %v24893_v9, 7  ;;  %v24897_v22 = vld [vmem:[#allocation8_spill] sm:$0xff]  ;;  %v24912_v13 = vrot.slane %v16006_v32, 7  ;;  %v24916_v56 = vrot.slane %v15817_v27, 7 }
 0x1f0   : > { %24887 = vst [vmem:[#allocation57_spill] sm:$0xff] %v16271_v57  ;;  %v16279_v38 = vsel %vm1597_vm2, %v24890_v31, %v24888_v47  ;;  %v24898_v20 = vrot.slane %v24897_v22, 7  ;;  %v24901_v47 = vld [vmem:[#allocation11_spill] sm:$0xff] }
 0x1f1   : > { %24891 = vst [vmem:[#allocation58_spill] sm:$0xff] %v16279_v38  ;;  %v16287_v61 = vsel %vm1597_vm2, %v24894_v15, %v24892_v55  ;;  %v24902_v31 = vrot.slane %v24901_v47, 7  ;;  %v24905_v55 = vld [vmem:[#allocation15_spill] sm:$0xff] }
 0x1f2   : > { %24895 = vst [vmem:[#allocation59_spill] sm:$0xff] %v16287_v61  ;;  %v16295_v57 = vsel %vm1597_vm2, %v24898_v20, %v24896_v33  ;;  %v24906_v15 = vrot.slane %v24905_v55, 7  ;;  %v24909_v33 = vld [vmem:[#allocation16_spill] sm:$0xff] }
 0x1f3   : > { %24899 = vst [vmem:[#allocation60_spill] sm:$0xff] %v16295_v57  ;;  %v16303_v38 = vsel %vm1597_vm2, %v24902_v31, %v24900_v39  ;;  %v24910_v20 = vrot.slane %v24909_v33, 7  ;;  %v24913_v39 = vld [vmem:[#allocation17_spill] sm:$0xff] }
 0x1f4   : > { %24903 = vst [vmem:[#allocation61_spill] sm:$0xff] %v16303_v38  ;;  %v16311_v61 = vsel %vm1597_vm2, %v24906_v15, %v24904_v45  ;;  %v24914_v31 = vrot.slane %v24913_v39, 7  ;;  %v24917_v45 = vrot.slane %v15820_v2, 7 }
 0x1f5   : > { %24907 = vst [vmem:[#allocation62_spill] sm:$0xff] %v16311_v61  ;;  %v16319_v57 = vsel %vm1597_vm2, %v24910_v20, %v24908_v26  ;;  %v24919_v61 = vrot.slane %v15823_v30, 7  ;;  %v24920_v26 = vrot.slane %v15826_v43, 7 }
 0x1f6   : > { %24911 = vst [vmem:[#allocation63_spill] sm:$0xff] %v16319_v57  ;;  %v16327_v38 = vsel %vm1597_vm2, %v24914_v31, %v24912_v13  ;;  %v16335_v15 = vsel %vm1597_vm2, %v24917_v45, %v24916_v56  ;;  %v24922_v57 = vrot.slane %v15829_v1, 7  ;;  %v24923_v13 = vrot.slane %v15832_v59, 7 }
 0x1f7   : > { %24915 = vst [vmem:[#allocation64_spill] sm:$0xff] %v16327_v38  ;;  %24918 = vst [vmem:[#allocation65_spill] sm:$0xff] %v16335_v15  ;;  %v16343_v20 = vsel %vm1597_vm2, %v24920_v26, %v24919_v61  ;;  %v24925_v38 = vrot.slane %v15835_v51, 7  ;;  %v24926_v56 = vrot.slane %v15838_v63, 7  ;;  %v24928_v15 = vrot.slane %v15841_v14, 7 }
 0x1f8   : > { %24921 = vst [vmem:[#allocation66_spill] sm:$0xff] %v16343_v20  ;;  %v16351_v31 = vsel %vm1597_vm2, %v24923_v13, %v24922_v57  ;;  %v24929_v61 = vrot.slane %v15844_v5, 7  ;;  %v24931_v20 = vrot.slane %v15847_v54, 7  ;;  %v24932_v57 = vrot.slane %v15850_v19, 7 }
 0x1f9   : > { %24924 = vst [vmem:[#allocation67_spill] sm:$0xff] %v16351_v31  ;;  %v16359_v45 = vsel %vm1597_vm2, %v24926_v56, %v24925_v38  ;;  %v24934_v31 = vrot.slane %v15853_v34, 7  ;;  %v24935_v38 = vrot.slane %v15856_v11, 7 }
 0x1fa   : > { %24927 = vst [vmem:[#allocation68_spill] sm:$0xff] %v16359_v45  ;;  %v16367_v26 = vsel %vm1597_vm2, %v24929_v61, %v24928_v15  ;;  %v16375_v13 = vsel %vm1597_vm2, %v24932_v57, %v24931_v20  ;;  %v24937_v45 = vrot.slane %v15859_v17, 7  ;;  %v24938_v15 = vrot.slane %v15862_v10, 7 }
 0x1fb   : > { %24930 = vst [vmem:[#allocation69_spill] sm:$0xff] %v16367_v26  ;;  %24933 = vst [vmem:[#allocation70_spill] sm:$0xff] %v16375_v13  ;;  %v16383_v56 = vsel %vm1597_vm2, %v24935_v38, %v24934_v31  ;;  %v24940_v26 = vrot.slane %v15865_v44, 7  ;;  %v24941_v20 = vrot.slane %v15868_v37, 7  ;;  %v24943_v13 = vrot.slane %v15871_v42, 7 }
 0x1fc   : > { %24936 = vst [vmem:[#allocation71_spill] sm:$0xff] %v16383_v56  ;;  %v16391_v61 = vsel %vm1597_vm2, %v24938_v15, %v24937_v45  ;;  %v24944_v31 = vrot.slane %v15874_v36, 7  ;;  %v24946_v56 = vrot.slane %v15877_v41, 7  ;;  %v24947_v45 = vrot.slane %v15880_v58, 7 }
 0x1fd   : > { %24939 = vst [vmem:[#allocation72_spill] sm:$0xff] %v16391_v61  ;;  %v16399_v57 = vsel %vm1597_vm2, %v24941_v20, %v24940_v26  ;;  %v24949_v61 = vrot.slane %v15883_v3, 7  ;;  %v24950_v26 = vld [vmem:[#allocation26_spill] sm:$0xff]  ;;  %v24953_v36 = vrot.slane %v15889_v6, 7 }
 0x1fe   : > { %24942 = vst [vmem:[#allocation73_spill] sm:$0xff] %v16399_v57  ;;  %v16407_v38 = vsel %vm1597_vm2, %v24944_v31, %v24943_v13  ;;  %v16415_v15 = vsel %vm1597_vm2, %v24947_v45, %v24946_v56  ;;  %v24951_v20 = vrot.slane %v24950_v26, 7  ;;  %v24954_v13 = vrot.slane %v15892_v25, 7 }
 0x1ff   : > { %24945 = vst [vmem:[#allocation74_spill] sm:$0xff] %v16407_v38  ;;  %24948 = vst [vmem:[#allocation75_spill] sm:$0xff] %v16415_v15  ;;  %v24956_v38 = vrot.slane %v24849_v8, 7  ;;  %v24957_v56 = vrot.slane %v15898_v28, 7  ;;  %v24959_v15 = vrot.slane %v15901_v40, 7 }
 0x200   : > { %v16423_v57 = vsel %vm1597_vm2, %v24951_v20, %v24949_v61  ;;  %v16431_v31 = vsel %vm1597_vm2, %v24954_v13, %v24953_v36  ;;  %v24960_v61 = vrot.slane %v15904_v0, 7  ;;  %v24963_v36 = vrot.slane %v15910_v4, 7 }
 0x201   : > { %24952 = vst [vmem:[#allocation26_spill] sm:$0xff] %v16423_v57  ;;  %24955 = vst [vmem:[#allocation76_spill] sm:$0xff] %v16431_v31  ;;  %v16439_v45 = vsel %vm1597_vm2, %v24957_v56, %v24956_v38  ;;  %v24962_v57 = vrot.slane %v15907_v12, 7  ;;  %v24965_v31 = vrot.slane %v15913_v16, 7  ;;  %v24966_v38 = vrot.slane %v15916_v48, 7 }
 0x202   : > { %24958 = vst [vmem:[#allocation77_spill] sm:$0xff] %v16439_v45  ;;  %v16447_v20 = vsel %vm1597_vm2, %v24960_v61, %v24959_v15  ;;  %v24968_v45 = vrot.slane %v15919_v62, 7  ;;  %v24969_v15 = vrot.slane %v15922_v46, 7 }
 0x203   : > { %24961 = vst [vmem:[#allocation78_spill] sm:$0xff] %v16447_v20  ;;  %v16455_v13 = vsel %vm1597_vm2, %v24963_v36, %v24962_v57  ;;  %v16463_v56 = vsel %vm1597_vm2, %v24966_v38, %v24965_v31  ;;  %v24971_v20 = vrot.slane %v15925_v24, 7  ;;  %v24972_v57 = vrot.slane %v24799_v18, 7 }
 0x204   : > { %24964 = vst [vmem:[#allocation79_spill] sm:$0xff] %v16455_v13  ;;  %24967 = vst [vmem:[#allocation80_spill] sm:$0xff] %v16463_v56  ;;  %v16471_v61 = vsel %vm1597_vm2, %v24969_v15, %v24968_v45  ;;  %v24974_v13 = vrot.slane %v15931_v29, 7  ;;  %v24975_v31 = vrot.slane %v24800_v23, 7  ;;  %v24977_v56 = vrot.slane %v15937_v7, 7  ;;  %v24978_v45 = vld [vmem:[#allocation29_spill] sm:$0xff] }
 0x205   : > { %24970 = vst [vmem:[#allocation81_spill] sm:$0xff] %v16471_v61  ;;  %v16479_v36 = vsel %vm1597_vm2, %v24972_v57, %v24971_v20  ;;  %v24979_v15 = vrot.slane %v24978_v45, 7  ;;  %v24981_v18 = vrot.slane %v15943_v60, 7  ;;  %v24982_v20 = vld [vmem:[#allocation31_spill] sm:$0xff]  ;;  %v24985_v23 = vrot.slane %v24877_v49, 7 }
 0x206   : > { %24973 = vst [vmem:[#allocation82_spill] sm:$0xff] %v16479_v36  ;;  %v16487_v38 = vsel %vm1597_vm2, %v24975_v31, %v24974_v13  ;;  %v24983_v57 = vrot.slane %v24982_v20, 7  ;;  %v24986_v13 = vld [vmem:[#allocation33_spill] sm:$0xff]  ;;  %v24989_v45 = vrot.slane %v24881_v53, 7  ;;  %v24993_v20 = vrot.slane %v24885_v21, 7  ;;  %v25033_v53 = vld [vmem:[#allocation10_spill] sm:$0xff] }
 0x207   : > { %24976 = vst [vmem:[#allocation83_spill] sm:$0xff] %v16487_v38  ;;  %v16495_v61 = vsel %vm1597_vm2, %v24979_v15, %v24977_v56  ;;  %v24987_v31 = vrot.slane %v24986_v13, 7  ;;  %v24990_v56 = vld [vmem:[#allocation35_spill] sm:$0xff]  ;;  %v24997_v13 = vrot.slane %v24889_v52, 7  ;;  %v25031_v52 = vld [vmem:[#allocation6_spill] sm:$0xff]  ;;  %v25032_v21 = vld [vmem:[#allocation9_spill] sm:$0xff]  ;;  %v25034_v49 = vmov %v24808_v50 }
 0x208   : > { %24980 = vst [vmem:[#allocation84_spill] sm:$0xff] %v16495_v61  ;;  %v16503_v36 = vsel %vm1597_vm2, %v24983_v57, %v24981_v18  ;;  %v24991_v15 = vrot.slane %v24990_v56, 7  ;;  %v24994_v18 = vld [vmem:[#allocation37_spill] sm:$0xff]  ;;  %v25001_v56 = vrot.slane %v24893_v9, 7  ;;  %v25035_v60 = vmov %v16006_v32 }
 0x209   : > { %24984 = vst [vmem:[#allocation85_spill] sm:$0xff] %v16503_v36  ;;  %v16511_v38 = vsel %vm1597_vm2, %v24987_v31, %v24985_v23  ;;  %v24995_v57 = vrot.slane %v24994_v18, 7  ;;  %v24998_v23 = vld [vmem:[#allocation6_spill] sm:$0xff]  ;;  %v25005_v18 = vrot.slane %v24897_v22, 7  ;;  %v25029_v22 = vld [vmem:[#allocation35_spill] sm:$0xff]  ;;  %v25030_v9 = vld [vmem:[#allocation37_spill] sm:$0xff] }
 0x20a   : > { %24988 = vst [vmem:[#allocation86_spill] sm:$0xff] %v16511_v38  ;;  %v16519_v61 = vsel %vm1597_vm2, %v24991_v15, %v24989_v45  ;;  %v24999_v31 = vrot.slane %v24998_v23, 7  ;;  %v25002_v45 = vld [vmem:[#allocation9_spill] sm:$0xff]  ;;  %v25009_v23 = vrot.slane %v24901_v47, 7 }
 0x20b   : > { %24992 = vst [vmem:[#allocation87_spill] sm:$0xff] %v16519_v61  ;;  %v16527_v36 = vsel %vm1597_vm2, %v24995_v57, %v24993_v20  ;;  %v25003_v15 = vrot.slane %v25002_v45, 7  ;;  %v25006_v20 = vld [vmem:[#allocation10_spill] sm:$0xff]  ;;  %v25013_v45 = vrot.slane %v24905_v55, 7  ;;  %v25027_v55 = vld [vmem:[#allocation31_spill] sm:$0xff]  ;;  %v25028_v47 = vld [vmem:[#allocation33_spill] sm:$0xff] }
 0x20c   : > { %24996 = vst [vmem:[#allocation88_spill] sm:$0xff] %v16527_v36  ;;  %v16535_v38 = vsel %vm1597_vm2, %v24999_v31, %v24997_v13  ;;  %v25007_v57 = vrot.slane %v25006_v20, 7  ;;  %v25010_v13 = vld [vmem:[#allocation13_spill] sm:$0xff]  ;;  %v25017_v20 = vrot.slane %v24909_v33, 7 }
 0x20d   : > { %25000 = vst [vmem:[#allocation89_spill] sm:$0xff] %v16535_v38  ;;  %v16543_v61 = vsel %vm1597_vm2, %v25003_v15, %v25001_v56  ;;  %v25011_v31 = vrot.slane %v25010_v13, 7  ;;  %v25014_v56 = vld [vmem:[#allocation18_spill] sm:$0xff]  ;;  %v25026_v33 = vld [vmem:[#allocation29_spill] sm:$0xff] }
 0x20e   : > { %25004 = vst [vmem:[#allocation90_spill] sm:$0xff] %v16543_v61  ;;  %v16551_v36 = vsel %vm1597_vm2, %v25007_v57, %v25005_v18  ;;  %v25015_v15 = vrot.slane %v25014_v56, 7  ;;  %v25018_v18 = vrot.slane %v24808_v50, 7  ;;  %v25043_v50 = vrot.slane %v15829_v1, 1 }
 0x20f   : > { %25008 = vst [vmem:[#allocation91_spill] sm:$0xff] %v16551_v36  ;;  %v16559_v38 = vsel %vm1597_vm2, %v25011_v31, %v25009_v23  ;;  %v25020_v36 = vrot.slane %v24913_v39, 7  ;;  %v25021_v23 = vrot.slane %v16006_v32, 7  ;;  %v25025_v39 = vld [vmem:[#allocation14_spill] sm:$0xff]  ;;  %v25045_v32 = vrot.slane %v15838_v63, 1 }
 0x210   : > { %25012 = vst [vmem:[#allocation92_spill] sm:$0xff] %v16559_v38  ;;  %v16567_v61 = vsel %vm1597_vm2, %v25015_v15, %v25013_v45  ;;  %v16575_v57 = vsel %vm1597_vm2, %v25018_v18, %v25017_v20  ;;  %v25023_v38 = vld [vmem:[#allocation25_spill] sm:$0xff]  ;;  %v25036_v20 = vrot.slane %v15820_v2, 1  ;;  %v25037_v18 = vrot.slane %v15817_v27, 1 }
 0x211   : > { %25016 = vst [vmem:[#allocation93_spill] sm:$0xff] %v16567_v61  ;;  %25019 = vst [vmem:[#allocation94_spill] sm:$0xff] %v16575_v57  ;;  %v16583_v31 = vsel %vm1597_vm2, %v25021_v23, %v25020_v36  ;;  %v25039_v36 = vrot.slane %v15826_v43, 1  ;;  %v25040_v23 = vrot.slane %v15823_v30, 1  ;;  %v25042_v61 = vrot.slane %v15832_v59, 1 }
 0x212   : > { %25022 = vst [vmem:[#allocation95_spill] sm:$0xff] %v16583_v31  ;;  %v25024_v31 = vld [vmem:[#allocation12_spill] sm:$0xff]  ;;  %v16656_v57 = vsel %vm1726_vm3, %v25037_v18, %v25036_v20  ;;  %v25046_v20 = vrot.slane %v15835_v51, 1 }
 0x213   : > { %25038 = vst [vmem:[#allocation25_spill] sm:$0xff] %v16656_v57  ;;  %v16664_v45 = vsel %vm1726_vm3, %v25040_v23, %v25039_v36  ;;  %v16672_v15 = vsel %vm1726_vm3, %v25043_v50, %v25042_v61  ;;  %v25048_v57 = vrot.slane %v15844_v5, 1  ;;  %v25049_v36 = vrot.slane %v15841_v14, 1 }
 0x214   : > { %25041 = vst [vmem:[#allocation96_spill] sm:$0xff] %v16664_v45  ;;  %25044 = vst [vmem:[#allocation97_spill] sm:$0xff] %v16672_v15  ;;  %v16680_v18 = vsel %vm1726_vm3, %v25046_v20, %v25045_v32  ;;  %v25051_v45 = vrot.slane %v15850_v19, 1  ;;  %v25052_v50 = vrot.slane %v15847_v54, 1  ;;  %v25054_v15 = vrot.slane %v15856_v11, 1 }
 0x215   : > { %25047 = vst [vmem:[#allocation98_spill] sm:$0xff] %v16680_v18  ;;  %v16688_v23 = vsel %vm1726_vm3, %v25049_v36, %v25048_v57  ;;  %v25055_v32 = vrot.slane %v15853_v34, 1  ;;  %v25057_v18 = vrot.slane %v15862_v10, 1  ;;  %v25058_v57 = vrot.slane %v15859_v17, 1 }
 0x216   : > { %25050 = vst [vmem:[#allocation99_spill] sm:$0xff] %v16688_v23  ;;  %v16696_v61 = vsel %vm1726_vm3, %v25052_v50, %v25051_v45  ;;  %v25060_v23 = vrot.slane %v15868_v37, 1  ;;  %v25061_v45 = vrot.slane %v15865_v44, 1 }
 0x217   : > { %25053 = vst [vmem:[#allocation100_spill] sm:$0xff] %v16696_v61  ;;  %v16704_v20 = vsel %vm1726_vm3, %v25055_v32, %v25054_v15  ;;  %v16712_v36 = vsel %vm1726_vm3, %v25058_v57, %v25057_v18  ;;  %v25063_v61 = vrot.slane %v25023_v38, 1  ;;  %v25064_v15 = vrot.slane %v15871_v42, 1 }
 0x218   : > { %25056 = vst [vmem:[#allocation101_spill] sm:$0xff] %v16704_v20  ;;  %25059 = vst [vmem:[#allocation102_spill] sm:$0xff] %v16712_v36  ;;  %v16720_v50 = vsel %vm1726_vm3, %v25061_v45, %v25060_v23  ;;  %v25066_v20 = vrot.slane %v15880_v58, 1  ;;  %v25067_v18 = vrot.slane %v15877_v41, 1  ;;  %v25069_v36 = vrot.slane %v24950_v26, 1 }
 0x219   : > { %25062 = vst [vmem:[#allocation103_spill] sm:$0xff] %v16720_v50  ;;  %v16728_v32 = vsel %vm1726_vm3, %v25064_v15, %v25063_v61  ;;  %v25070_v23 = vrot.slane %v15883_v3, 1  ;;  %v25072_v50 = vrot.slane %v15892_v25, 1  ;;  %v25073_v61 = vrot.slane %v15889_v6, 1 }
 0x21a   : > { %25065 = vst [vmem:[#allocation104_spill] sm:$0xff] %v16728_v32  ;;  %v16736_v57 = vsel %vm1726_vm3, %v25067_v18, %v25066_v20  ;;  %v25075_v32 = vrot.slane %v15898_v28, 1  ;;  %v25076_v20 = vrot.slane %v24849_v8, 1 }
 0x21b   : > { %25068 = vst [vmem:[#allocation105_spill] sm:$0xff] %v16736_v57  ;;  %v16744_v45 = vsel %vm1726_vm3, %v25070_v23, %v25069_v36  ;;  %v16752_v15 = vsel %vm1726_vm3, %v25073_v61, %v25072_v50  ;;  %v25078_v57 = vrot.slane %v15904_v0, 1  ;;  %v25079_v36 = vrot.slane %v15901_v40, 1 }
 0x21c   : > { %25071 = vst [vmem:[#allocation106_spill] sm:$0xff] %v16744_v45  ;;  %25074 = vst [vmem:[#allocation107_spill] sm:$0xff] %v16752_v15  ;;  %v16760_v18 = vsel %vm1726_vm3, %v25076_v20, %v25075_v32  ;;  %v25081_v45 = vrot.slane %v15910_v4, 1  ;;  %v25082_v50 = vrot.slane %v15907_v12, 1  ;;  %v25084_v15 = vrot.slane %v15916_v48, 1 }
 0x21d   : > { %25077 = vst [vmem:[#allocation108_spill] sm:$0xff] %v16760_v18  ;;  %v16768_v23 = vsel %vm1726_vm3, %v25079_v36, %v25078_v57  ;;  %v25085_v32 = vrot.slane %v15913_v16, 1  ;;  %v25087_v18 = vrot.slane %v15922_v46, 1  ;;  %v25088_v57 = vrot.slane %v15919_v62, 1 }
 0x21e   : > { %25080 = vst [vmem:[#allocation109_spill] sm:$0xff] %v16768_v23  ;;  %v16776_v61 = vsel %vm1726_vm3, %v25082_v50, %v25081_v45  ;;  %v25090_v23 = vrot.slane %v25024_v31, 1  ;;  %v25091_v45 = vrot.slane %v15925_v24, 1 }
 0x21f   : > { %25083 = vst [vmem:[#allocation110_spill] sm:$0xff] %v16776_v61  ;;  %v16784_v20 = vsel %vm1726_vm3, %v25085_v32, %v25084_v15  ;;  %v16792_v36 = vsel %vm1726_vm3, %v25088_v57, %v25087_v18  ;;  %v25093_v61 = vrot.slane %v25025_v39, 1  ;;  %v25094_v15 = vrot.slane %v15931_v29, 1 }
 0x220   : > { %25086 = vst [vmem:[#allocation111_spill] sm:$0xff] %v16784_v20  ;;  %25089 = vst [vmem:[#allocation112_spill] sm:$0xff] %v16792_v36  ;;  %v16800_v50 = vsel %vm1726_vm3, %v25091_v45, %v25090_v23  ;;  %v25096_v20 = vrot.slane %v25026_v33, 1  ;;  %v25097_v18 = vrot.slane %v15937_v7, 1  ;;  %v25099_v36 = vrot.slane %v25027_v55, 1  ;;  %v25100_v23 = vld [vmem:[#allocation30_spill] sm:$0xff] }
 0x221   : > { %25092 = vst [vmem:[#allocation113_spill] sm:$0xff] %v16800_v50  ;;  %v16808_v32 = vsel %vm1726_vm3, %v25094_v15, %v25093_v61  ;;  %v25101_v45 = vrot.slane %v25100_v23, 1  ;;  %v25103_v39 = vrot.slane %v25028_v47, 1  ;;  %v25104_v61 = vld [vmem:[#allocation32_spill] sm:$0xff]  ;;  %v25107_v33 = vrot.slane %v25029_v22, 1 }
 0x222   : > { %25095 = vst [vmem:[#allocation114_spill] sm:$0xff] %v16808_v32  ;;  %v16816_v57 = vsel %vm1726_vm3, %v25097_v18, %v25096_v20  ;;  %v25105_v15 = vrot.slane %v25104_v61, 1  ;;  %v25108_v20 = vld [vmem:[#allocation34_spill] sm:$0xff]  ;;  %v25111_v55 = vrot.slane %v25030_v9, 1  ;;  %v25115_v47 = vrot.slane %v25031_v52, 1 }
 0x223   : > { %25098 = vst [vmem:[#allocation115_spill] sm:$0xff] %v16816_v57  ;;  %v16824_v50 = vsel %vm1726_vm3, %v25101_v45, %v25099_v36  ;;  %v25109_v18 = vrot.slane %v25108_v20, 1  ;;  %v25112_v36 = vld [vmem:[#allocation36_spill] sm:$0xff]  ;;  %v25119_v22 = vrot.slane %v25032_v21, 1  ;;  %v25123_v9 = vrot.slane %v25033_v53, 1 }
 0x224   : > { %25102 = vst [vmem:[#allocation116_spill] sm:$0xff] %v16824_v50  ;;  %v16832_v32 = vsel %vm1726_vm3, %v25105_v15, %v25103_v39  ;;  %v25113_v45 = vrot.slane %v25112_v36, 1  ;;  %v25116_v39 = vld [vmem:[#allocation5_spill] sm:$0xff]  ;;  %v25127_v52 = vrot.slane %v25010_v13, 1  ;;  %v25131_v21 = vrot.slane %v25014_v56, 1 }
 0x225   : > { %25106 = vst [vmem:[#allocation117_spill] sm:$0xff] %v16832_v32  ;;  %v16840_v57 = vsel %vm1726_vm3, %v25109_v18, %v25107_v33  ;;  %v25117_v15 = vrot.slane %v25116_v39, 1  ;;  %v25120_v33 = vld [vmem:[#allocation7_spill] sm:$0xff]  ;;  %v25135_v53 = vrot.slane %v25034_v49, 1  ;;  %v25139_v13 = vrot.slane %v25035_v60, 1 }
 0x226   : > { %25110 = vst [vmem:[#allocation118_spill] sm:$0xff] %v16840_v57  ;;  %v16848_v50 = vsel %vm1726_vm3, %v25113_v45, %v25111_v55  ;;  %v25121_v18 = vrot.slane %v25120_v33, 1  ;;  %v25124_v55 = vld [vmem:[#allocation8_spill] sm:$0xff]  ;;  %v25143_v56 = vrot.slane %v15817_v27, 1 }
 0x227   : > { %25114 = vst [vmem:[#allocation119_spill] sm:$0xff] %v16848_v50  ;;  %v16856_v32 = vsel %vm1726_vm3, %v25117_v15, %v25115_v47  ;;  %v25125_v45 = vrot.slane %v25124_v55, 1  ;;  %v25128_v47 = vld [vmem:[#allocation11_spill] sm:$0xff] }
 0x228   : > { %25118 = vst [vmem:[#allocation120_spill] sm:$0xff] %v16856_v32  ;;  %v16864_v57 = vsel %vm1726_vm3, %v25121_v18, %v25119_v22  ;;  %v25129_v15 = vrot.slane %v25128_v47, 1  ;;  %v25132_v22 = vld [vmem:[#allocation15_spill] sm:$0xff] }
 0x229   : > { %25122 = vst [vmem:[#allocation121_spill] sm:$0xff] %v16864_v57  ;;  %v16872_v50 = vsel %vm1726_vm3, %v25125_v45, %v25123_v9  ;;  %v25133_v18 = vrot.slane %v25132_v22, 1  ;;  %v25136_v9 = vld [vmem:[#allocation16_spill] sm:$0xff] }
 0x22a   : > { %25126 = vst [vmem:[#allocation122_spill] sm:$0xff] %v16872_v50  ;;  %v16880_v32 = vsel %vm1726_vm3, %v25129_v15, %v25127_v52  ;;  %v25137_v45 = vrot.slane %v25136_v9, 1  ;;  %v25140_v52 = vld [vmem:[#allocation17_spill] sm:$0xff] }
 0x22b   : > { %25130 = vst [vmem:[#allocation123_spill] sm:$0xff] %v16880_v32  ;;  %v16888_v57 = vsel %vm1726_vm3, %v25133_v18, %v25131_v21  ;;  %v25141_v15 = vrot.slane %v25140_v52, 1  ;;  %v25144_v21 = vrot.slane %v15820_v2, 1 }
 0x22c   : > { %25134 = vst [vmem:[#allocation124_spill] sm:$0xff] %v16888_v57  ;;  %v16896_v50 = vsel %vm1726_vm3, %v25137_v45, %v25135_v53  ;;  %v25146_v57 = vrot.slane %v15823_v30, 1  ;;  %v25147_v53 = vrot.slane %v15826_v43, 1 }
 0x22d   : > { %25138 = vst [vmem:[#allocation125_spill] sm:$0xff] %v16896_v50  ;;  %v16904_v32 = vsel %vm1726_vm3, %v25141_v15, %v25139_v13  ;;  %v16912_v18 = vsel %vm1726_vm3, %v25144_v21, %v25143_v56  ;;  %v25149_v50 = vrot.slane %v15829_v1, 1  ;;  %v25150_v13 = vrot.slane %v15832_v59, 1 }
 0x22e   : > { %25142 = vst [vmem:[#allocation126_spill] sm:$0xff] %v16904_v32  ;;  %25145 = vst [vmem:[#allocation127_spill] sm:$0xff] %v16912_v18  ;;  %v16920_v45 = vsel %vm1726_vm3, %v25147_v53, %v25146_v57  ;;  %v25152_v32 = vrot.slane %v15835_v51, 1  ;;  %v25153_v56 = vrot.slane %v15838_v63, 1  ;;  %v25155_v18 = vrot.slane %v15841_v14, 1 }
 0x22f   : > { %25148 = vst [vmem:[#allocation128_spill] sm:$0xff] %v16920_v45  ;;  %v16928_v15 = vsel %vm1726_vm3, %v25150_v13, %v25149_v50  ;;  %v25156_v57 = vrot.slane %v15844_v5, 1  ;;  %v25158_v45 = vrot.slane %v15847_v54, 1  ;;  %v25159_v50 = vrot.slane %v15850_v19, 1 }
 0x230   : > { %25151 = vst [vmem:[#allocation129_spill] sm:$0xff] %v16928_v15  ;;  %v16936_v21 = vsel %vm1726_vm3, %v25153_v56, %v25152_v32  ;;  %v25161_v15 = vrot.slane %v15853_v34, 1  ;;  %v25162_v32 = vrot.slane %v15856_v11, 1 }
 0x231   : > { %25154 = vst [vmem:[#allocation130_spill] sm:$0xff] %v16936_v21  ;;  %v16944_v53 = vsel %vm1726_vm3, %v25156_v57, %v25155_v18  ;;  %v16952_v13 = vsel %vm1726_vm3, %v25159_v50, %v25158_v45  ;;  %v25164_v21 = vrot.slane %v15859_v17, 1  ;;  %v25165_v18 = vrot.slane %v15862_v10, 1 }
 0x232   : > { %25157 = vst [vmem:[#allocation131_spill] sm:$0xff] %v16944_v53  ;;  %25160 = vst [vmem:[#allocation132_spill] sm:$0xff] %v16952_v13  ;;  %v16960_v56 = vsel %vm1726_vm3, %v25162_v32, %v25161_v15  ;;  %v25167_v53 = vrot.slane %v15865_v44, 1  ;;  %v25168_v45 = vrot.slane %v15868_v37, 1  ;;  %v25170_v13 = vrot.slane %v15871_v42, 1 }
 0x233   : > { %25163 = vst [vmem:[#allocation133_spill] sm:$0xff] %v16960_v56  ;;  %v16968_v57 = vsel %vm1726_vm3, %v25165_v18, %v25164_v21  ;;  %v25171_v15 = vrot.slane %v25023_v38, 1  ;;  %v25173_v56 = vrot.slane %v15877_v41, 1  ;;  %v25174_v21 = vrot.slane %v15880_v58, 1 }
 0x234   : > { %25166 = vst [vmem:[#allocation134_spill] sm:$0xff] %v16968_v57  ;;  %v16976_v50 = vsel %vm1726_vm3, %v25168_v45, %v25167_v53  ;;  %v25176_v57 = vrot.slane %v15883_v3, 1  ;;  %v25177_v53 = vrot.slane %v24950_v26, 1 }
 0x235   : > { %25169 = vst [vmem:[#allocation135_spill] sm:$0xff] %v16976_v50  ;;  %v16984_v32 = vsel %vm1726_vm3, %v25171_v15, %v25170_v13  ;;  %v16992_v18 = vsel %vm1726_vm3, %v25174_v21, %v25173_v56  ;;  %v25179_v50 = vrot.slane %v15889_v6, 1  ;;  %v25180_v13 = vrot.slane %v15892_v25, 1 }
 0x236   : > { %25172 = vst [vmem:[#allocation136_spill] sm:$0xff] %v16984_v32  ;;  %25175 = vst [vmem:[#allocation137_spill] sm:$0xff] %v16992_v18  ;;  %v17000_v45 = vsel %vm1726_vm3, %v25177_v53, %v25176_v57  ;;  %v25182_v32 = vrot.slane %v24849_v8, 1  ;;  %v25183_v56 = vrot.slane %v15898_v28, 1  ;;  %v25185_v18 = vrot.slane %v15901_v40, 1 }
 0x237   : > { %25178 = vst [vmem:[#allocation138_spill] sm:$0xff] %v17000_v45  ;;  %v17008_v15 = vsel %vm1726_vm3, %v25180_v13, %v25179_v50  ;;  %v25186_v57 = vrot.slane %v15904_v0, 1  ;;  %v25188_v45 = vrot.slane %v15907_v12, 1  ;;  %v25189_v50 = vrot.slane %v15910_v4, 1 }
 0x238   : > { %25181 = vst [vmem:[#allocation139_spill] sm:$0xff] %v17008_v15  ;;  %v17016_v21 = vsel %vm1726_vm3, %v25183_v56, %v25182_v32  ;;  %v25191_v15 = vrot.slane %v15913_v16, 1  ;;  %v25192_v32 = vrot.slane %v15916_v48, 1 }
 0x239   : > { %25184 = vst [vmem:[#allocation140_spill] sm:$0xff] %v17016_v21  ;;  %v17024_v53 = vsel %vm1726_vm3, %v25186_v57, %v25185_v18  ;;  %v17032_v13 = vsel %vm1726_vm3, %v25189_v50, %v25188_v45  ;;  %v25194_v21 = vrot.slane %v15919_v62, 1  ;;  %v25195_v18 = vrot.slane %v15922_v46, 1 }
 0x23a   : > { %25187 = vst [vmem:[#allocation141_spill] sm:$0xff] %v17024_v53  ;;  %25190 = vst [vmem:[#allocation142_spill] sm:$0xff] %v17032_v13  ;;  %v17040_v56 = vsel %vm1726_vm3, %v25192_v32, %v25191_v15  ;;  %v25197_v53 = vrot.slane %v15925_v24, 1  ;;  %v25198_v45 = vrot.slane %v25024_v31, 1  ;;  %v25200_v13 = vrot.slane %v15931_v29, 1  ;;  %v25201_v15 = vld [vmem:[#allocation14_spill] sm:$0xff] }
 0x23b   : > { %25193 = vst [vmem:[#allocation143_spill] sm:$0xff] %v17040_v56  ;;  %v17048_v57 = vsel %vm1726_vm3, %v25195_v18, %v25194_v21  ;;  %v25202_v32 = vrot.slane %v25201_v15, 1  ;;  %v25204_v46 = vrot.slane %v15937_v7, 1  ;;  %v25205_v21 = vld [vmem:[#allocation29_spill] sm:$0xff]  ;;  %v25208_v31 = vrot.slane %v25100_v23, 1  ;;  %v25272_v23 = vld [vmem:[#allocation26_spill] sm:$0xff] }
 0x23c   : > { %25196 = vst [vmem:[#allocation144_spill] sm:$0xff] %v17048_v57  ;;  %v17056_v50 = vsel %vm1726_vm3, %v25198_v45, %v25197_v53  ;;  %v25206_v18 = vrot.slane %v25205_v21, 1  ;;  %v25209_v53 = vld [vmem:[#allocation31_spill] sm:$0xff]  ;;  %v25212_v15 = vrot.slane %v25104_v61, 1  ;;  %v25216_v21 = vrot.slane %v25108_v20, 1  ;;  %v25268_v20 = vld [vmem:[#allocation74_spill] sm:$0xff] }
 0x23d   : > { %25199 = vst [vmem:[#allocation145_spill] sm:$0xff] %v17056_v50  ;;  %v17064_v56 = vsel %vm1726_vm3, %v25202_v32, %v25200_v13  ;;  %v25210_v45 = vrot.slane %v25209_v53, 1  ;;  %v25213_v13 = vld [vmem:[#allocation33_spill] sm:$0xff]  ;;  %v25220_v53 = vrot.slane %v25112_v36, 1  ;;  %v25270_v61 = vld [vmem:[#allocation75_spill] sm:$0xff] }
 0x23e   : > { %25203 = vst [vmem:[#allocation146_spill] sm:$0xff] %v17064_v56  ;;  %v17072_v57 = vsel %vm1726_vm3, %v25206_v18, %v25204_v46  ;;  %v25214_v32 = vrot.slane %v25213_v13, 1  ;;  %v25217_v46 = vld [vmem:[#allocation35_spill] sm:$0xff]  ;;  %v25224_v13 = vrot.slane %v25116_v39, 1  ;;  %v25264_v39 = vld [vmem:[#allocation72_spill] sm:$0xff]  ;;  %v25266_v36 = vld [vmem:[#allocation73_spill] sm:$0xff] }
 0x23f   : > { %25207 = vst [vmem:[#allocation147_spill] sm:$0xff] %v17072_v57  ;;  %v17080_v50 = vsel %vm1726_vm3, %v25210_v45, %v25208_v31  ;;  %v25218_v18 = vrot.slane %v25217_v46, 1  ;;  %v25221_v31 = vld [vmem:[#allocation37_spill] sm:$0xff]  ;;  %v25228_v46 = vrot.slane %v25120_v33, 1  ;;  %v25261_v33 = vld [vmem:[#allocation39_spill] sm:$0xff] }
 0x240   : > { %25211 = vst [vmem:[#allocation148_spill] sm:$0xff] %v17080_v50  ;;  %v17088_v56 = vsel %vm1726_vm3, %v25214_v32, %v25212_v15  ;;  %v25222_v45 = vrot.slane %v25221_v31, 1  ;;  %v25225_v15 = vld [vmem:[#allocation6_spill] sm:$0xff]  ;;  %v25232_v31 = vrot.slane %v25124_v55, 1 }
 0x241   : > { %25215 = vst [vmem:[#allocation149_spill] sm:$0xff] %v17088_v56  ;;  %v17096_v57 = vsel %vm1726_vm3, %v25218_v18, %v25216_v21  ;;  %v25226_v32 = vrot.slane %v25225_v15, 1  ;;  %v25229_v21 = vld [vmem:[#allocation9_spill] sm:$0xff]  ;;  %v25236_v15 = vrot.slane %v25128_v47, 1  ;;  %v25256_v47 = vld [vmem:[#allocation68_spill] sm:$0xff] }
 0x242   : > { %25219 = vst [vmem:[#allocation150_spill] sm:$0xff] %v17096_v57  ;;  %v17104_v50 = vsel %vm1726_vm3, %v25222_v45, %v25220_v53  ;;  %v25230_v18 = vrot.slane %v25229_v21, 1  ;;  %v25233_v53 = vld [vmem:[#allocation10_spill] sm:$0xff]  ;;  %v25240_v21 = vrot.slane %v25132_v22, 1  ;;  %v25254_v22 = vld [vmem:[#allocation67_spill] sm:$0xff] }
 0x243   : > { %25223 = vst [vmem:[#allocation151_spill] sm:$0xff] %v17104_v50  ;;  %v17112_v56 = vsel %vm1726_vm3, %v25226_v32, %v25224_v13  ;;  %v25234_v45 = vrot.slane %v25233_v53, 1  ;;  %v25237_v13 = vld [vmem:[#allocation13_spill] sm:$0xff]  ;;  %v25244_v53 = vrot.slane %v25136_v9, 1 }
 0x244   : > { %25227 = vst [vmem:[#allocation152_spill] sm:$0xff] %v17112_v56  ;;  %v17120_v57 = vsel %vm1726_vm3, %v25230_v18, %v25228_v46  ;;  %v25238_v32 = vrot.slane %v25237_v13, 1  ;;  %v25241_v46 = vld [vmem:[#allocation18_spill] sm:$0xff] }
 0x245   : > { %25231 = vst [vmem:[#allocation153_spill] sm:$0xff] %v17120_v57  ;;  %v17128_v50 = vsel %vm1726_vm3, %v25234_v45, %v25232_v31  ;;  %v25242_v18 = vrot.slane %v25241_v46, 1  ;;  %v25245_v31 = vrot.slane %v25034_v49, 1  ;;  %v25251_v46 = vld [vmem:[#allocation21_spill] sm:$0xff]  ;;  %v25255_v49 = vld [vmem:[#allocation23_spill] sm:$0xff] }
 0x246   : > { %25235 = vst [vmem:[#allocation154_spill] sm:$0xff] %v17128_v50  ;;  %v17136_v56 = vsel %vm1726_vm3, %v25238_v32, %v25236_v15  ;;  %v25247_v50 = vrot.slane %v25140_v52, 1  ;;  %v25248_v15 = vrot.slane %v25035_v60, 1  ;;  %v1793_v13 = vpack.c.bf16 %v25255_v49, %v25254_v22  ;;  %v25259_v52 = vld [vmem:[#allocation38_spill] sm:$0xff]  ;;  %v25269_v49 = vld [vmem:[#allocation43_spill] sm:$0xff] }
 0x247   : > { %25239 = vst [vmem:[#allocation155_spill] sm:$0xff] %v17136_v56  ;;  %v17144_v57 = vsel %vm1726_vm3, %v25242_v18, %v25240_v21  ;;  %v17152_v45 = vsel %vm1726_vm3, %v25245_v31, %v25244_v53  ;;  %v25250_v56 = vld [vmem:[#allocation65_spill] sm:$0xff]  ;;  %v25252_v18 = vld [vmem:[#allocation66_spill] sm:$0xff]  ;;  %v25257_v53 = vld [vmem:[#allocation24_spill] sm:$0xff]  ;;  %v1800_v22 = vpack.c.bf16 %v25269_v49, %v25268_v20 }
 0x248   : > { %25243 = vst [vmem:[#allocation156_spill] sm:$0xff] %v17144_v57  ;;  %25246 = vst [vmem:[#allocation157_spill] sm:$0xff] %v17152_v45  ;;  %v17160_v32 = vsel %vm1726_vm3, %v25248_v15, %v25247_v50  ;;  %v1791_v21 = vpack.c.bf16 %v25251_v46, %v25250_v56  ;;  %v25253_v57 = vld [vmem:[#allocation22_spill] sm:$0xff]  ;;  %v1794_v31 = vpack.c.bf16 %v25257_v53, %v25256_v47  ;;  %v25258_v45 = vld [vmem:[#allocation69_spill] sm:$0xff] }
 0x249   : > { %25249 = vst [vmem:[#allocation158_spill] sm:$0xff] %v17160_v32  ;;  %v1792_v9 = vpack.c.bf16 %v25253_v57, %v25252_v18  ;;  %v1795_v55 = vpack.c.bf16 %v25259_v52, %v25258_v45  ;;  %v25260_v60 = vld [vmem:[#allocation70_spill] sm:$0xff]  ;;  %v25262_v50 = vld [vmem:[#allocation71_spill] sm:$0xff]  ;;  %v25263_v15 = vld [vmem:[#allocation40_spill] sm:$0xff] }
 0x24a   : > { %v1796_v35 = vpack.c.bf16 %v25261_v33, %v25260_v60  ;;  %v1797_v32 = vpack.c.bf16 %v25263_v15, %v25262_v50  ;;  %v25265_v56 = vld [vmem:[#allocation41_spill] sm:$0xff]  ;;  %v25267_v57 = vld [vmem:[#allocation42_spill] sm:$0xff]  ;;  %v25271_v47 = vld [vmem:[#allocation44_spill] sm:$0xff]  ;;  %1823 = vst.msk [vmem:[#allocation2] sm:$0xff] %vm927_vm1, %v1791_v21 }
 0x24b   : > { %v1798_v46 = vpack.c.bf16 %v25265_v56, %v25264_v39  ;;  %v1799_v18 = vpack.c.bf16 %v25267_v57, %v25266_v36  ;;  %v1801_v53 = vpack.c.bf16 %v25271_v47, %v25270_v61  ;;  %v25273_v52 = vld [vmem:[#allocation45_spill] sm:$0xff]  ;;  %1824 = vst.msk [vmem:[#allocation2 + $0x8] sm:$0xff] %vm927_vm1, %v1792_v9  ;;  %1825 = vst.msk [vmem:[#allocation2 + $0x10] sm:$0xff] %vm927_vm1, %v1793_v13  ;;  %v25274_v60 = vld [vmem:[#allocation76_spill] sm:$0xff] }
 0x24c   : > { %v1802_v45 = vpack.c.bf16 %v25273_v52, %v25272_v23  ;;  %1826 = vst.msk [vmem:[#allocation2 + $0x18] sm:$0xff] %vm927_vm1, %v1794_v31  ;;  %v25275_v39 = vld [vmem:[#allocation46_spill] sm:$0xff]  ;;  %v25276_v33 = vld [vmem:[#allocation77_spill] sm:$0xff]  ;;  %v25277_v50 = vld [vmem:[#allocation27_spill] sm:$0xff] }
 0x24d   : > { %v1803_v36 = vpack.c.bf16 %v25275_v39, %v25274_v60  ;;  %v1804_v20 = vpack.c.bf16 %v25277_v50, %v25276_v33  ;;  %v25278_v15 = vld [vmem:[#allocation78_spill] sm:$0xff]  ;;  %v25279_v56 = vld [vmem:[#allocation47_spill] sm:$0xff]  ;;  %v25281_v49 = vld [vmem:[#allocation48_spill] sm:$0xff]  ;;  %1827 = vst.msk [vmem:[#allocation2 + $0x20] sm:$0xff] %vm927_vm1, %v1795_v55 }
 0x24e   : > { %v1805_v61 = vpack.c.bf16 %v25279_v56, %v25278_v15  ;;  %v25280_v57 = vld [vmem:[#allocation79_spill] sm:$0xff]  ;;  %1828 = vst.msk [vmem:[#allocation2 + $0x28] sm:$0xff] %vm927_vm1, %v1796_v35  ;;  %1829 = vst.msk [vmem:[#allocation2 + $0x30] sm:$0xff] %vm927_vm1, %v1797_v32  ;;  %v25282_v9 = vld [vmem:[#allocation80_spill] sm:$0xff] }
 0x24f   : > { %v1806_v23 = vpack.c.bf16 %v25281_v49, %v25280_v57  ;;  %1830 = vst.msk [vmem:[#allocation2 + $0x38] sm:$0xff] %vm927_vm1, %v1798_v46  ;;  %v25283_v13 = vld [vmem:[#allocation49_spill] sm:$0xff]  ;;  %v25285_v47 = vld [vmem:[#allocation50_spill] sm:$0xff]  ;;  %v25287_v39 = vld [vmem:[#allocation51_spill] sm:$0xff] }
 0x250   : > { %v1807_v21 = vpack.c.bf16 %v25283_v13, %v25282_v9  ;;  %v25284_v31 = vld [vmem:[#allocation81_spill] sm:$0xff]  ;;  %v25286_v60 = vld [vmem:[#allocation82_spill] sm:$0xff]  ;;  %v25288_v50 = vld [vmem:[#allocation83_spill] sm:$0xff]  ;;  %1831 = vst.msk [vmem:[#allocation2 + $0x40] sm:$0xff] %vm927_vm1, %v1799_v18 }
 0x251   : > { %v1808_v52 = vpack.c.bf16 %v25285_v47, %v25284_v31  ;;  %v1809_v33 = vpack.c.bf16 %v25287_v39, %v25286_v60  ;;  %v25289_v15 = vld [vmem:[#allocation52_spill] sm:$0xff]  ;;  %1832 = vst.msk [vmem:[#allocation2 + $0x48] sm:$0xff] %vm927_vm1, %v1800_v22  ;;  %1833 = vst.msk [vmem:[#allocation2 + $0x50] sm:$0xff] %vm927_vm1, %v1801_v53  ;;  %v25291_v32 = vld [vmem:[#allocation53_spill] sm:$0xff] }
 0x252   : > { %v1810_v56 = vpack.c.bf16 %v25289_v15, %v25288_v50  ;;  %1834 = vst.msk [vmem:[#allocation2 + $0x58] sm:$0xff] %vm927_vm1, %v1802_v45  ;;  %v25290_v55 = vld [vmem:[#allocation84_spill] sm:$0xff]  ;;  %v25292_v46 = vld [vmem:[#allocation85_spill] sm:$0xff]  ;;  %v25293_v57 = vld [vmem:[#allocation54_spill] sm:$0xff] }
 0x253   : > { %v1811_v35 = vpack.c.bf16 %v25291_v32, %v25290_v55  ;;  %v1812_v49 = vpack.c.bf16 %v25293_v57, %v25292_v46  ;;  %v25294_v9 = vld [vmem:[#allocation86_spill] sm:$0xff]  ;;  %v25295_v13 = vld [vmem:[#allocation55_spill] sm:$0xff]  ;;  %v25297_v60 = vld [vmem:[#allocation56_spill] sm:$0xff]  ;;  %1835 = vst.msk [vmem:[#allocation2 + $0x60] sm:$0xff] %vm927_vm1, %v1803_v36 }
 0x254   : > { %v1813_v31 = vpack.c.bf16 %v25295_v13, %v25294_v9  ;;  %v25296_v47 = vld [vmem:[#allocation87_spill] sm:$0xff]  ;;  %1836 = vst.msk [vmem:[#allocation2 + $0x68] sm:$0xff] %vm927_vm1, %v1804_v20  ;;  %1837 = vst.msk [vmem:[#allocation2 + $0x70] sm:$0xff] %vm927_vm1, %v1805_v61  ;;  %v25298_v18 = vld [vmem:[#allocation88_spill] sm:$0xff] }
 0x255   : > { %v1814_v39 = vpack.c.bf16 %v25297_v60, %v25296_v47  ;;  %1838 = vst.msk [vmem:[#allocation2 + $0x78] sm:$0xff] %vm927_vm1, %v1806_v23  ;;  %v25299_v22 = vld [vmem:[#allocation57_spill] sm:$0xff]  ;;  %v25301_v50 = vld [vmem:[#allocation58_spill] sm:$0xff]  ;;  %v25303_v32 = vld [vmem:[#allocation59_spill] sm:$0xff] }
 0x256   : > { %v1815_v53 = vpack.c.bf16 %v25299_v22, %v25298_v18  ;;  %v25300_v45 = vld [vmem:[#allocation89_spill] sm:$0xff]  ;;  %v25302_v55 = vld [vmem:[#allocation90_spill] sm:$0xff]  ;;  %v25304_v57 = vld [vmem:[#allocation91_spill] sm:$0xff]  ;;  %1839 = vst.msk [vmem:[#allocation2 + $0x80] sm:$0xff] %vm927_vm1, %v1807_v21  ;;  %v1855_v21 = vpack.c.bf16 %v15820_v2, %v15817_v27  ;;  %v1859_v27 = vpack.c.bf16 %v15844_v5, %v15841_v14  ;;  %v1860_v2 = vpack.c.bf16 %v15850_v19, %v15847_v54 }
 0x257   : > { %v1816_v15 = vpack.c.bf16 %v25301_v50, %v25300_v45  ;;  %v1817_v46 = vpack.c.bf16 %v25303_v32, %v25302_v55  ;;  %v25305_v9 = vld [vmem:[#allocation60_spill] sm:$0xff]  ;;  %1840 = vst.msk [vmem:[#allocation2 + $0x88] sm:$0xff] %vm927_vm1, %v1808_v52  ;;  %1841 = vst.msk [vmem:[#allocation2 + $0x90] sm:$0xff] %vm927_vm1, %v1809_v33  ;;  %v25307_v20 = vld [vmem:[#allocation61_spill] sm:$0xff]  ;;  %v1856_v52 = vpack.c.bf16 %v15826_v43, %v15823_v30 }
 0x258   : > { %v1818_v13 = vpack.c.bf16 %v25305_v9, %v25304_v57  ;;  %1842 = vst.msk [vmem:[#allocation2 + $0x98] sm:$0xff] %vm927_vm1, %v1810_v56  ;;  %v25306_v36 = vld [vmem:[#allocation92_spill] sm:$0xff]  ;;  %v25308_v23 = vld [vmem:[#allocation93_spill] sm:$0xff]  ;;  %v25309_v47 = vld [vmem:[#allocation62_spill] sm:$0xff]  ;;  %v1857_v33 = vpack.c.bf16 %v15832_v59, %v15829_v1  ;;  %v1858_v56 = vpack.c.bf16 %v15838_v63, %v15835_v51  ;;  %v1861_v1 = vpack.c.bf16 %v15856_v11, %v15853_v34 }
 0x259   : > { %v1819_v61 = vpack.c.bf16 %v25307_v20, %v25306_v36  ;;  %v1820_v60 = vpack.c.bf16 %v25309_v47, %v25308_v23  ;;  %v25310_v18 = vld [vmem:[#allocation94_spill] sm:$0xff]  ;;  %v25311_v22 = vld [vmem:[#allocation63_spill] sm:$0xff]  ;;  %v25313_v55 = vld [vmem:[#allocation64_spill] sm:$0xff]  ;;  %1843 = vst.msk [vmem:[#allocation2 + $0xa0] sm:$0xff] %vm927_vm1, %v1811_v35  ;;  %v1862_v30 = vpack.c.bf16 %v15862_v10, %v15859_v17  ;;  %v1863_v43 = vpack.c.bf16 %v15868_v37, %v15865_v44 }
 0x25a   : > { %v1821_v45 = vpack.c.bf16 %v25311_v22, %v25310_v18  ;;  %v25312_v50 = vld [vmem:[#allocation95_spill] sm:$0xff]  ;;  %1844 = vst.msk [vmem:[#allocation2 + $0xa8] sm:$0xff] %vm927_vm1, %v1812_v49  ;;  %1845 = vst.msk [vmem:[#allocation2 + $0xb0] sm:$0xff] %vm927_vm1, %v1813_v31  ;;  %v1864_v59 = vpack.c.bf16 %v25023_v38, %v15871_v42  ;;  %v1865_v51 = vpack.c.bf16 %v15880_v58, %v15877_v41  ;;  %v25314_v11 = vld [vmem:[#allocation28_spill] sm:$0xff] }
 0x25b   : > { %v1822_v32 = vpack.c.bf16 %v25313_v55, %v25312_v50  ;;  %1846 = vst.msk [vmem:[#allocation2 + $0xb8] sm:$0xff] %vm927_vm1, %v1814_v39  ;;  %1847 = vst.msk [vmem:[#allocation2 + $0xc0] sm:$0xff] %vm927_vm1, %v1815_v53  ;;  %v1866_v63 = vpack.c.bf16 %v24950_v26, %v15883_v3  ;;  %v1867_v14 = vpack.c.bf16 %v15892_v25, %v15889_v6  ;;  %v25315_v10 = vld [vmem:[#allocation12_spill] sm:$0xff]  ;;  %v25316_v37 = vld [vmem:[#allocation14_spill] sm:$0xff] }
 0x25c   : > { %1848 = vst.msk [vmem:[#allocation2 + $0xc8] sm:$0xff] %vm927_vm1, %v1816_v15  ;;  %1849 = vst.msk [vmem:[#allocation2 + $0xd0] sm:$0xff] %vm927_vm1, %v1817_v46  ;;  %v1868_v5 = vpack.c.bf16 %v15898_v28, %v24849_v8  ;;  %v1869_v54 = vpack.c.bf16 %v15904_v0, %v15901_v40  ;;  %v1870_v19 = vpack.c.bf16 %v15910_v4, %v15907_v12  ;;  %v25317_v41 = vld [vmem:[#allocation29_spill] sm:$0xff]  ;;  %v25318_v3 = vld [vmem:[#allocation30_spill] sm:$0xff] }
 0x25d   : > { %1850 = vst.msk [vmem:[#allocation2 + $0xd8] sm:$0xff] %vm927_vm1, %v1818_v13  ;;  %1851 = vst.msk [vmem:[#allocation2 + $0xe0] sm:$0xff] %vm927_vm1, %v1819_v61  ;;  %v1871_v34 = vpack.c.bf16 %v15916_v48, %v15913_v16  ;;  %v1872_v17 = vpack.c.bf16 %v25314_v11, %v15919_v62  ;;  %v1873_v44 = vpack.c.bf16 %v25315_v10, %v15925_v24  ;;  %v25319_v6 = vld [vmem:[#allocation31_spill] sm:$0xff]  ;;  %v25320_v28 = vld [vmem:[#allocation32_spill] sm:$0xff] }
 0x25e   : > { %1852 = vst.msk [vmem:[#allocation2 + $0xe8] sm:$0xff] %vm927_vm1, %v1820_v60  ;;  %1853 = vst.msk [vmem:[#allocation2 + $0xf0] sm:$0xff] %vm927_vm1, %v1821_v45  ;;  %v1874_v42 = vpack.c.bf16 %v25316_v37, %v15931_v29  ;;  %v1875_v58 = vpack.c.bf16 %v25317_v41, %v15937_v7  ;;  %v1876_v25 = vpack.c.bf16 %v25319_v6, %v25318_v3  ;;  %v25321_v40 = vld [vmem:[#allocation33_spill] sm:$0xff]  ;;  %v25322_v12 = vld [vmem:[#allocation34_spill] sm:$0xff] }
 0x25f   : > { %1854 = vst.msk [vmem:[#allocation2 + $0xf8] sm:$0xff] %vm927_vm1, %v1822_v32  ;;  %1887 = vst.msk [vmem:[#allocation3] sm:$0xff] %vm927_vm1, %v1855_v21  ;;  %v1877_v0 = vpack.c.bf16 %v25321_v40, %v25320_v28  ;;  %v25323_v4 = vld [vmem:[#allocation35_spill] sm:$0xff]  ;;  %v25324_v48 = vld [vmem:[#allocation36_spill] sm:$0xff] }
 0x260   : > { %1888 = vst.msk [vmem:[#allocation3 + $0x8] sm:$0xff] %vm927_vm1, %v1856_v52  ;;  %1889 = vst.msk [vmem:[#allocation3 + $0x10] sm:$0xff] %vm927_vm1, %v1857_v33  ;;  %v1878_v16 = vpack.c.bf16 %v25323_v4, %v25322_v12  ;;  %v25325_v62 = vld [vmem:[#allocation37_spill] sm:$0xff]  ;;  %v25327_v7 = vld [vmem:[#allocation6_spill] sm:$0xff] }
 0x261   : > { %1890 = vst.msk [vmem:[#allocation3 + $0x18] sm:$0xff] %vm927_vm1, %v1858_v56  ;;  %1891 = vst.msk [vmem:[#allocation3 + $0x20] sm:$0xff] %vm927_vm1, %v1859_v27  ;;  %v1879_v24 = vpack.c.bf16 %v25325_v62, %v25324_v48  ;;  %v25326_v29 = vld [vmem:[#allocation5_spill] sm:$0xff]  ;;  %v25328_v26 = vld [vmem:[#allocation7_spill] sm:$0xff] }
 0x262   : > { %1892 = vst.msk [vmem:[#allocation3 + $0x28] sm:$0xff] %vm927_vm1, %v1860_v2  ;;  %1893 = vst.msk [vmem:[#allocation3 + $0x30] sm:$0xff] %vm927_vm1, %v1861_v1  ;;  %v1880_v8 = vpack.c.bf16 %v25327_v7, %v25326_v29  ;;  %v25329_v38 = vld [vmem:[#allocation9_spill] sm:$0xff]  ;;  %v25330_v49 = vld [vmem:[#allocation8_spill] sm:$0xff] }
 0x263   : > { %1894 = vst.msk [vmem:[#allocation3 + $0x38] sm:$0xff] %vm927_vm1, %v1862_v30  ;;  %1895 = vst.msk [vmem:[#allocation3 + $0x40] sm:$0xff] %vm927_vm1, %v1863_v43  ;;  %v1881_v35 = vpack.c.bf16 %v25329_v38, %v25328_v26  ;;  %v25331_v31 = vld [vmem:[#allocation10_spill] sm:$0xff]  ;;  %v25332_v53 = vld [vmem:[#allocation11_spill] sm:$0xff] }
 0x264   : > { %1896 = vst.msk [vmem:[#allocation3 + $0x48] sm:$0xff] %vm927_vm1, %v1864_v59  ;;  %1897 = vst.msk [vmem:[#allocation3 + $0x50] sm:$0xff] %vm927_vm1, %v1865_v51  ;;  %v1882_v39 = vpack.c.bf16 %v25331_v31, %v25330_v49  ;;  %v25333_v15 = vld [vmem:[#allocation13_spill] sm:$0xff]  ;;  %v25334_v57 = vld [vmem:[#allocation15_spill] sm:$0xff] }
 0x265   : > { %1898 = vst.msk [vmem:[#allocation3 + $0x58] sm:$0xff] %vm927_vm1, %v1866_v63  ;;  %1899 = vst.msk [vmem:[#allocation3 + $0x60] sm:$0xff] %vm927_vm1, %v1867_v14  ;;  %v1883_v46 = vpack.c.bf16 %v25333_v15, %v25332_v53  ;;  %v25335_v9 = vld [vmem:[#allocation18_spill] sm:$0xff]  ;;  %v25336_v36 = vld [vmem:[#allocation16_spill] sm:$0xff] }
 0x266   : > { %1900 = vst.msk [vmem:[#allocation3 + $0x68] sm:$0xff] %vm927_vm1, %v1868_v5  ;;  %1901 = vst.msk [vmem:[#allocation3 + $0x70] sm:$0xff] %vm927_vm1, %v1869_v54  ;;  %v1884_v13 = vpack.c.bf16 %v25335_v9, %v25334_v57  ;;  %v25337_v20 = vld [vmem:[#allocation19_spill] sm:$0xff]  ;;  %v25338_v23 = vld [vmem:[#allocation17_spill] sm:$0xff] }
 0x267   : > { %1902 = vst.msk [vmem:[#allocation3 + $0x78] sm:$0xff] %vm927_vm1, %v1870_v19  ;;  %1903 = vst.msk [vmem:[#allocation3 + $0x80] sm:$0xff] %vm927_vm1, %v1871_v34  ;;  %v1885_v61 = vpack.c.bf16 %v25337_v20, %v25336_v36  ;;  %v25339_v47 = vld [vmem:[#allocation20_spill] sm:$0xff]  ;;  %v25340_v18 = vld [vmem:[#allocation25_spill] sm:$0xff] }
 0x268   : > { %1904 = vst.msk [vmem:[#allocation3 + $0x88] sm:$0xff] %vm927_vm1, %v1872_v17  ;;  %1905 = vst.msk [vmem:[#allocation3 + $0x90] sm:$0xff] %vm927_vm1, %v1873_v44  ;;  %v1886_v60 = vpack.c.bf16 %v25339_v47, %v25338_v23  ;;  %v25341_v22 = vld [vmem:[#allocation127_spill] sm:$0xff]  ;;  %v25342_v50 = vld [vmem:[#allocation96_spill] sm:$0xff] }
 0x269   : > { %1906 = vst.msk [vmem:[#allocation3 + $0x98] sm:$0xff] %vm927_vm1, %v1874_v42  ;;  %1907 = vst.msk [vmem:[#allocation3 + $0xa0] sm:$0xff] %vm927_vm1, %v1875_v58  ;;  %v1919_v45 = vpack.c.bf16 %v25341_v22, %v25340_v18  ;;  %v25343_v55 = vld [vmem:[#allocation128_spill] sm:$0xff]  ;;  %v25344_v21 = vld [vmem:[#allocation97_spill] sm:$0xff] }
 0x26a   : > { %1908 = vst.msk [vmem:[#allocation3 + $0xa8] sm:$0xff] %vm927_vm1, %v1876_v25  ;;  %1909 = vst.msk [vmem:[#allocation3 + $0xb0] sm:$0xff] %vm927_vm1, %v1877_v0  ;;  %v1920_v32 = vpack.c.bf16 %v25343_v55, %v25342_v50  ;;  %v25345_v52 = vld [vmem:[#allocation129_spill] sm:$0xff]  ;;  %v25346_v56 = vld [vmem:[#allocation98_spill] sm:$0xff] }
 0x26b   : > { %1910 = vst.msk [vmem:[#allocation3 + $0xb8] sm:$0xff] %vm927_vm1, %v1878_v16  ;;  %1911 = vst.msk [vmem:[#allocation3 + $0xc0] sm:$0xff] %vm927_vm1, %v1879_v24  ;;  %v1921_v33 = vpack.c.bf16 %v25345_v52, %v25344_v21  ;;  %v25347_v27 = vld [vmem:[#allocation130_spill] sm:$0xff]  ;;  %v25348_v1 = vld [vmem:[#allocation99_spill] sm:$0xff] }
 0x26c   : > { %1912 = vst.msk [vmem:[#allocation3 + $0xc8] sm:$0xff] %vm927_vm1, %v1880_v8  ;;  %1913 = vst.msk [vmem:[#allocation3 + $0xd0] sm:$0xff] %vm927_vm1, %v1881_v35  ;;  %v1922_v2 = vpack.c.bf16 %v25347_v27, %v25346_v56  ;;  %v25349_v30 = vld [vmem:[#allocation131_spill] sm:$0xff]  ;;  %v25350_v59 = vld [vmem:[#allocation100_spill] sm:$0xff] }
 0x26d   : > { %1914 = vst.msk [vmem:[#allocation3 + $0xd8] sm:$0xff] %vm927_vm1, %v1882_v39  ;;  %1915 = vst.msk [vmem:[#allocation3 + $0xe0] sm:$0xff] %vm927_vm1, %v1883_v46  ;;  %v1923_v43 = vpack.c.bf16 %v25349_v30, %v25348_v1  ;;  %v25351_v51 = vld [vmem:[#allocation132_spill] sm:$0xff]  ;;  %v25352_v14 = vld [vmem:[#allocation101_spill] sm:$0xff] }
 0x26e   : > { %1916 = vst.msk [vmem:[#allocation3 + $0xe8] sm:$0xff] %vm927_vm1, %v1884_v13  ;;  %1917 = vst.msk [vmem:[#allocation3 + $0xf0] sm:$0xff] %vm927_vm1, %v1885_v61  ;;  %v1924_v63 = vpack.c.bf16 %v25351_v51, %v25350_v59  ;;  %v25353_v5 = vld [vmem:[#allocation133_spill] sm:$0xff]  ;;  %v25354_v19 = vld [vmem:[#allocation102_spill] sm:$0xff] }
 0x26f   : > { %1918 = vst.msk [vmem:[#allocation3 + $0xf8] sm:$0xff] %vm927_vm1, %v1886_v60  ;;  %v1925_v54 = vpack.c.bf16 %v25353_v5, %v25352_v14  ;;  %v25355_v34 = vld [vmem:[#allocation134_spill] sm:$0xff]  ;;  %v25356_v17 = vld [vmem:[#allocation103_spill] sm:$0xff]  ;;  %v25358_v37 = vld [vmem:[#allocation104_spill] sm:$0xff] }
 0x270   : > { %v1926_v11 = vpack.c.bf16 %v25355_v34, %v25354_v19  ;;  %v25357_v10 = vld [vmem:[#allocation135_spill] sm:$0xff]  ;;  %v25359_v42 = vld [vmem:[#allocation136_spill] sm:$0xff]  ;;  %v25360_v58 = vld [vmem:[#allocation105_spill] sm:$0xff]  ;;  %1951 = vst.msk [vmem:[#allocation4] sm:$0xff] %vm927_vm1, %v1919_v45 }
 0x271   : > { %v1927_v44 = vpack.c.bf16 %v25357_v10, %v25356_v17  ;;  %v1928_v41 = vpack.c.bf16 %v25359_v42, %v25358_v37  ;;  %v25361_v3 = vld [vmem:[#allocation137_spill] sm:$0xff]  ;;  %v25362_v25 = vld [vmem:[#allocation106_spill] sm:$0xff]  ;;  %1952 = vst.msk [vmem:[#allocation4 + $0x8] sm:$0xff] %vm927_vm1, %v1920_v32  ;;  %1953 = vst.msk [vmem:[#allocation4 + $0x10] sm:$0xff] %vm927_vm1, %v1921_v33 }
 0x272   : > { %v1929_v6 = vpack.c.bf16 %v25361_v3, %v25360_v58  ;;  %v25363_v28 = vld [vmem:[#allocation138_spill] sm:$0xff]  ;;  %1954 = vst.msk [vmem:[#allocation4 + $0x18] sm:$0xff] %vm927_vm1, %v1922_v2  ;;  %v25364_v0 = vld [vmem:[#allocation107_spill] sm:$0xff]  ;;  %v25366_v16 = vld [vmem:[#allocation108_spill] sm:$0xff] }
 0x273   : > { %v1930_v40 = vpack.c.bf16 %v25363_v28, %v25362_v25  ;;  %v25365_v12 = vld [vmem:[#allocation139_spill] sm:$0xff]  ;;  %v25367_v48 = vld [vmem:[#allocation140_spill] sm:$0xff]  ;;  %v25368_v24 = vld [vmem:[#allocation109_spill] sm:$0xff]  ;;  %1955 = vst.msk [vmem:[#allocation4 + $0x20] sm:$0xff] %vm927_vm1, %v1923_v43 }
 0x274   : > { %v1931_v4 = vpack.c.bf16 %v25365_v12, %v25364_v0  ;;  %v1932_v62 = vpack.c.bf16 %v25367_v48, %v25366_v16  ;;  %v25369_v29 = vld [vmem:[#allocation141_spill] sm:$0xff]  ;;  %v25370_v8 = vld [vmem:[#allocation110_spill] sm:$0xff]  ;;  %1956 = vst.msk [vmem:[#allocation4 + $0x28] sm:$0xff] %vm927_vm1, %v1924_v63  ;;  %1957 = vst.msk [vmem:[#allocation4 + $0x30] sm:$0xff] %vm927_vm1, %v1925_v54 }
 0x275   : > { %v1933_v7 = vpack.c.bf16 %v25369_v29, %v25368_v24  ;;  %v25371_v26 = vld [vmem:[#allocation142_spill] sm:$0xff]  ;;  %1958 = vst.msk [vmem:[#allocation4 + $0x38] sm:$0xff] %vm927_vm1, %v1926_v11  ;;  %v25372_v35 = vld [vmem:[#allocation111_spill] sm:$0xff]  ;;  %v25374_v39 = vld [vmem:[#allocation112_spill] sm:$0xff] }
 0x276   : > { %v1934_v38 = vpack.c.bf16 %v25371_v26, %v25370_v8  ;;  %v25373_v49 = vld [vmem:[#allocation143_spill] sm:$0xff]  ;;  %v25375_v53 = vld [vmem:[#allocation144_spill] sm:$0xff]  ;;  %v25376_v46 = vld [vmem:[#allocation113_spill] sm:$0xff]  ;;  %1959 = vst.msk [vmem:[#allocation4 + $0x40] sm:$0xff] %vm927_vm1, %v1927_v44 }
 0x277   : > { %v1935_v31 = vpack.c.bf16 %v25373_v49, %v25372_v35  ;;  %v1936_v15 = vpack.c.bf16 %v25375_v53, %v25374_v39  ;;  %v25377_v57 = vld [vmem:[#allocation145_spill] sm:$0xff]  ;;  %v25378_v13 = vld [vmem:[#allocation114_spill] sm:$0xff]  ;;  %1960 = vst.msk [vmem:[#allocation4 + $0x48] sm:$0xff] %vm927_vm1, %v1928_v41  ;;  %1961 = vst.msk [vmem:[#allocation4 + $0x50] sm:$0xff] %vm927_vm1, %v1929_v6 }
 0x278   : > { %v1937_v9 = vpack.c.bf16 %v25377_v57, %v25376_v46  ;;  %v25379_v36 = vld [vmem:[#allocation146_spill] sm:$0xff]  ;;  %1962 = vst.msk [vmem:[#allocation4 + $0x58] sm:$0xff] %vm927_vm1, %v1930_v40  ;;  %v25380_v61 = vld [vmem:[#allocation115_spill] sm:$0xff]  ;;  %v25382_v60 = vld [vmem:[#allocation116_spill] sm:$0xff] }
 0x279   : > { %v1938_v20 = vpack.c.bf16 %v25379_v36, %v25378_v13  ;;  %v25381_v23 = vld [vmem:[#allocation147_spill] sm:$0xff]  ;;  %v25383_v18 = vld [vmem:[#allocation148_spill] sm:$0xff]  ;;  %v25384_v45 = vld [vmem:[#allocation117_spill] sm:$0xff]  ;;  %1963 = vst.msk [vmem:[#allocation4 + $0x60] sm:$0xff] %vm927_vm1, %v1931_v4 }
 0x27a   : > { %v1939_v47 = vpack.c.bf16 %v25381_v23, %v25380_v61  ;;  %v1940_v22 = vpack.c.bf16 %v25383_v18, %v25382_v60  ;;  %v25385_v50 = vld [vmem:[#allocation149_spill] sm:$0xff]  ;;  %v25386_v32 = vld [vmem:[#allocation118_spill] sm:$0xff]  ;;  %1964 = vst.msk [vmem:[#allocation4 + $0x68] sm:$0xff] %vm927_vm1, %v1932_v62  ;;  %1965 = vst.msk [vmem:[#allocation4 + $0x70] sm:$0xff] %vm927_vm1, %v1933_v7 }
 0x27b   : > { %v1941_v55 = vpack.c.bf16 %v25385_v50, %v25384_v45  ;;  %v25387_v21 = vld [vmem:[#allocation150_spill] sm:$0xff]  ;;  %1966 = vst.msk [vmem:[#allocation4 + $0x78] sm:$0xff] %vm927_vm1, %v1934_v38  ;;  %v25388_v33 = vld [vmem:[#allocation119_spill] sm:$0xff]  ;;  %v25390_v2 = vld [vmem:[#allocation120_spill] sm:$0xff] }
 0x27c   : > { %v1942_v52 = vpack.c.bf16 %v25387_v21, %v25386_v32  ;;  %v25389_v56 = vld [vmem:[#allocation151_spill] sm:$0xff]  ;;  %v25391_v1 = vld [vmem:[#allocation152_spill] sm:$0xff]  ;;  %v25392_v43 = vld [vmem:[#allocation121_spill] sm:$0xff]  ;;  %1967 = vst.msk [vmem:[#allocation4 + $0x80] sm:$0xff] %vm927_vm1, %v1935_v31 }
 0x27d   : > { %v1943_v27 = vpack.c.bf16 %v25389_v56, %v25388_v33  ;;  %v1944_v30 = vpack.c.bf16 %v25391_v1, %v25390_v2  ;;  %v25393_v59 = vld [vmem:[#allocation153_spill] sm:$0xff]  ;;  %v25394_v63 = vld [vmem:[#allocation122_spill] sm:$0xff]  ;;  %1968 = vst.msk [vmem:[#allocation4 + $0x88] sm:$0xff] %vm927_vm1, %v1936_v15  ;;  %1969 = vst.msk [vmem:[#allocation4 + $0x90] sm:$0xff] %vm927_vm1, %v1937_v9 }
 0x27e   : > { %v1945_v51 = vpack.c.bf16 %v25393_v59, %v25392_v43  ;;  %v25395_v14 = vld [vmem:[#allocation154_spill] sm:$0xff]  ;;  %1970 = vst.msk [vmem:[#allocation4 + $0x98] sm:$0xff] %vm927_vm1, %v1938_v20  ;;  %v25396_v54 = vld [vmem:[#allocation123_spill] sm:$0xff]  ;;  %v25398_v11 = vld [vmem:[#allocation124_spill] sm:$0xff] }
 0x27f   : > { %v1946_v5 = vpack.c.bf16 %v25395_v14, %v25394_v63  ;;  %v25397_v19 = vld [vmem:[#allocation155_spill] sm:$0xff]  ;;  %v25399_v17 = vld [vmem:[#allocation156_spill] sm:$0xff]  ;;  %v25400_v44 = vld [vmem:[#allocation125_spill] sm:$0xff]  ;;  %1971 = vst.msk [vmem:[#allocation4 + $0xa0] sm:$0xff] %vm927_vm1, %v1939_v47 }
 0x280   : > { %v1947_v34 = vpack.c.bf16 %v25397_v19, %v25396_v54  ;;  %v1948_v10 = vpack.c.bf16 %v25399_v17, %v25398_v11  ;;  %v25401_v37 = vld [vmem:[#allocation157_spill] sm:$0xff]  ;;  %v25402_v41 = vld [vmem:[#allocation126_spill] sm:$0xff]  ;;  %1972 = vst.msk [vmem:[#allocation4 + $0xa8] sm:$0xff] %vm927_vm1, %v1940_v22  ;;  %1973 = vst.msk [vmem:[#allocation4 + $0xb0] sm:$0xff] %vm927_vm1, %v1941_v55 }
 0x281   : > { %v1949_v42 = vpack.c.bf16 %v25401_v37, %v25400_v44  ;;  %v25403_v58 = vld [vmem:[#allocation158_spill] sm:$0xff]  ;;  %1974 = vst.msk [vmem:[#allocation4 + $0xb8] sm:$0xff] %vm927_vm1, %v1942_v52  ;;  %1975 = vst.msk [vmem:[#allocation4 + $0xc0] sm:$0xff] %vm927_vm1, %v1943_v27 }
 0x282   : > { %v1950_v3 = vpack.c.bf16 %v25403_v58, %v25402_v41  ;;  %1976 = vst.msk [vmem:[#allocation4 + $0xc8] sm:$0xff] %vm927_vm1, %v1944_v30  ;;  %1977 = vst.msk [vmem:[#allocation4 + $0xd0] sm:$0xff] %vm927_vm1, %v1945_v51 }
 0x283   : > { %1978 = vst.msk [vmem:[#allocation4 + $0xd8] sm:$0xff] %vm927_vm1, %v1946_v5  ;;  %1979 = vst.msk [vmem:[#allocation4 + $0xe0] sm:$0xff] %vm927_vm1, %v1947_v34 }
 0x284   : > { %1980 = vst.msk [vmem:[#allocation4 + $0xe8] sm:$0xff] %vm927_vm1, %v1948_v10  ;;  %1981 = vst.msk [vmem:[#allocation4 + $0xf0] sm:$0xff] %vm927_vm1, %v1949_v42 }
 0x285   : > { %1982 = vst.msk [vmem:[#allocation4 + $0xf8] sm:$0xff] %vm927_vm1, %v1950_v3 }
 0x286 PF: > { %p1983_p7 = scmp.ge.s32.totalorder %s14325_s25, 1  ;;  %p1984_p8 = scmp.le.s32.totalorder %s14325_s25, 15 }
 0x288   : > { %p1985_p9 = pnand %p1984_p8, %p1983_p7 }
 0x28a   : > { %1988 = sbr.rel (%p1985_p9) target bundleno = 1746 (0x6d2), region = 56 }
 0x291   : > { %v14206_v6 = vld [vmem:[%s14333_s30 + $0x20] sm:$0xff]   ;;  %v14208_v28 = vld [vmem:[%s14333_s30 + $0x28] sm:$0xff]   ;;  %v14210_v0 = vld [vmem:[%s14333_s30 + $0x30] sm:$0xff]   ;;  %vm2126_vm4 = vcmask 523264   ;;  %s18348_s21 = scalar_lea.vmem %s24271_s4, %s14325_s25  ;;  %s6125_s26 = scalar_lea.vmem %s24272_s5, %s14325_s25 }
 0x292   : > { %v17454_v25 = vld [vmem:[%s14333_s30 + $0x80] sm:$0xff]   ;;  %12984 = vmatprep.subr.bf16.mxu1 %v14206_v6  ;;  %v17459_v40 = vld [vmem:[%s14333_s30 + $0x88] sm:$0xff]   ;;  %v17465_v12 = vld [vmem:[%s14333_s30 + $0x90] sm:$0xff]   ;;  %s6127_s29 = scalar_lea.vmem %s24273_s6, %s14325_s25 }
 0x293   : > { %13272 = vmatprep.subr.bf16.mxu0 %v17454_v25  ;;  %12985 = vmatpush3.bf16.msra.mxu1 %v14206_v6  ;;  %25404 = vst [vmem:[#allocation159_spill] sm:$0xff] %v17459_v40  ;;  %25405 = vst [vmem:[#allocation160_spill] sm:$0xff] %v17465_v12  ;;  %v14212_v4 = vld [vmem:[%s14333_s30 + $0x38] sm:$0xff]   ;;  %v17471_v48 = vld [vmem:[#allocation3] sm:$0xff] }
 0x294   : > { %13273 = vmatpush3.bf16.msra.mxu0 %v17454_v25  ;;  %12986 = vmatprep.subr.bf16.mxu1 %v14208_v28  ;;  %v17469_v16 = vld [vmem:[#allocation3 + $0x78] sm:$0xff]  ;;  %25407 = vst [vmem:[#allocation162_spill] sm:$0xff] %v17471_v48  ;;  %v14214_v24 = vld [vmem:[%s14333_s30] sm:$0xff]   ;;  %v17486_v7 = vld [vmem:[#allocation3 + $0x8] sm:$0xff] }
 0x295   : > { %13274 = vmatprep.subr.bf16.mxu0 %v17459_v40  ;;  %25406 = vst [vmem:[#allocation161_spill] sm:$0xff] %v17469_v16  ;;  %v17475_v62 = vld [vmem:[%s14333_s30 + $0x98] sm:$0xff]   ;;  %12992 = vmatprep.mubr.msk.bf16.mxu1 %vm2126_vm4, %v17469_v16  ;;  %v14215_v29 = vld [vmem:[%s14333_s30 + $0xa0] sm:$0xff]   ;;  %v17488_v8 = vld [vmem:[#allocation3 + $0x10] sm:$0xff] }
 0x296   : > { %25408 = vst [vmem:[#allocation163_spill] sm:$0xff] %v17475_v62  ;;  %13280 = vmatprep.mubr.msk.bf16.mxu0 %vm2126_vm4, %v17471_v48  ;;  %v14216_v26 = vld [vmem:[%s14333_s30 + $0xa8] sm:$0xff]   ;;  %v14218_v35 = vld [vmem:[%s14333_s30 + $0xb0] sm:$0xff]   ;;  %v17502_v31 = vld [vmem:[#allocation3 + $0x18] sm:$0xff] }
 0x297   : > { %12987 = vmatpush3.bf16.msra.mxu1 %v14208_v28  ;;  %v14217_v38 = vld [vmem:[%s14333_s30 + $0x8] sm:$0xff]   ;;  %v14220_v49 = vld [vmem:[%s14333_s30 + $0x10] sm:$0xff]   ;;  %v17504_v39 = vld [vmem:[#allocation3 + $0x20] sm:$0xff] }
 0x298   : > { %13275 = vmatpush3.bf16.msra.mxu0 %v17459_v40  ;;  %12988 = vmatprep.subr.bf16.mxu1 %v14210_v0  ;;  %v14219_v53 = vld [vmem:[%s14333_s30 + $0xb8] sm:$0xff]   ;;  %v14221_v46 = vld [vmem:[%s14333_s30 + $0xc0] sm:$0xff]   ;;  %v17517_v57 = vld [vmem:[#allocation3 + $0x28] sm:$0xff] }
 0x299   : > { %13276 = vmatprep.subr.bf16.mxu0 %v17465_v12  ;;  %v14222_v15 = vld [vmem:[%s14333_s30 + $0x18] sm:$0xff]   ;;  %v17519_v9 = vld [vmem:[#allocation3 + $0x30] sm:$0xff]  ;;  %v17528_v13 = vld [vmem:[%s14333_s30 + $0x40] sm:$0xff]  }
 0x29a   : > { %v17533_v36 = vld [vmem:[#allocation3 + $0x38] sm:$0xff]  ;;  %v17535_v20 = vld [vmem:[#allocation3 + $0x40] sm:$0xff]  ;;  %v17545_v61 = vld [vmem:[#allocation3 + $0x48] sm:$0xff] }
 0x29b   : > { %12989 = vmatpush3.bf16.msra.mxu1 %v14210_v0  ;;  %v17547_v23 = vld [vmem:[#allocation3 + $0x50] sm:$0xff]  ;;  %v17557_v47 = vld [vmem:[#allocation3 + $0x58] sm:$0xff]  ;;  %v17559_v60 = vld [vmem:[#allocation3 + $0x60] sm:$0xff] }
 0x29c   : > { %13277 = vmatpush3.bf16.msra.mxu0 %v17465_v12  ;;  %12990 = vmatprep.subr.bf16.mxu1 %v14212_v4  ;;  %25409 = vst [vmem:[#allocation164_spill] sm:$0xff] %v17559_v60  ;;  %v17569_v18 = vld [vmem:[#allocation3 + $0x68] sm:$0xff]  ;;  %v17571_v22 = vld [vmem:[#allocation3 + $0x70] sm:$0xff]  ;;  %v17581_v45 = vld [vmem:[#allocation3 + $0xf8] sm:$0xff] }
 0x29d   : > { %13278 = vmatprep.subr.bf16.mxu0 %v17475_v62  ;;  %25410 = vst [vmem:[#allocation165_spill] sm:$0xff] %v17569_v18  ;;  %25411 = vst [vmem:[#allocation166_spill] sm:$0xff] %v17571_v22  ;;  %v17583_v50 = vld [vmem:[#allocation4] sm:$0xff]  ;;  %v17595_v32 = vld [vmem:[#allocation4 + $0x8] sm:$0xff] }
 0x29e   : > { %25412 = vst [vmem:[#allocation167_spill] sm:$0xff] %v17581_v45  ;;  %v17593_v55 = vld [vmem:[#allocation3 + $0x80] sm:$0xff]  ;;  %v17597_v21 = vld [vmem:[#allocation3 + $0x88] sm:$0xff]  ;;  %v17599_v52 = vld [vmem:[#allocation4 + $0x10] sm:$0xff] }
 0x29f   : > { %12991 = vmatpush3.bf16.msra.mxu1 %v14212_v4  ;;  %25413 = vst [vmem:[#allocation168_spill] sm:$0xff] %v17593_v55  ;;  %25414 = vst [vmem:[#allocation169_spill] sm:$0xff] %v17597_v21  ;;  %v14223_v33 = vld [vmem:[%s14333_s30 + $0xc8] sm:$0xff]   ;;  %v14225_v56 = vld [vmem:[%s14333_s30 + $0xd0] sm:$0xff]  }
 0x2a0   : > { %13279 = vmatpush3.bf16.msra.mxu0 %v17475_v62  ;;  %13056 = vmatprep.subr.bf16.mxu1 %v14214_v24  ;;  %v17611_v27 = vld [vmem:[#allocation3 + $0x90] sm:$0xff]  ;;  %v17613_v2 = vld [vmem:[#allocation4 + $0x18] sm:$0xff]  ;;  %v17617_v30 = vld [vmem:[#allocation4 + $0x20] sm:$0xff] }
 0x2a1   : > { %13344 = vmatprep.subr.bf16.mxu0 %v14215_v29  ;;  %25415 = vst [vmem:[#allocation170_spill] sm:$0xff] %v17611_v27  ;;  %v17615_v1 = vld [vmem:[#allocation3 + $0x98] sm:$0xff]  ;;  %v17629_v59 = vld [vmem:[%s14333_s30 + $0xe0] sm:$0xff]   ;;  %v17633_v63 = vld [vmem:[#allocation4 + $0x28] sm:$0xff] }
 0x2a2   : > { %12993 = vmatmul.mubr.msk.bf16.vlgmr.msra.gmra.mrb[0].mxu1 %vm2126_vm4, %v17471_v48  ;;  %25416 = vst [vmem:[#allocation171_spill] sm:$0xff] %v17615_v1  ;;  %v14227_v43 = vld [vmem:[%s14333_s30 + $0xd8] sm:$0xff]   ;;  %v17631_v51 = vld [vmem:[#allocation3 + $0xa0] sm:$0xff]  ;;  %v17635_v14 = vld [vmem:[#allocation3 + $0xa8] sm:$0xff] }
 0x2a3   : > { %13281 = vmatmul.mubr.msk.bf16.vlgmr.msra.gmra.mrb[0].mxu0 %vm2126_vm4, %v17486_v7  ;;  %13057 = vmatpush3.bf16.msra.mxu1 %v14214_v24  ;;  %25417 = vst [vmem:[#allocation172_spill] sm:$0xff] %v17631_v51  ;;  %25418 = vst [vmem:[#allocation173_spill] sm:$0xff] %v17635_v14  ;;  %v17637_v5 = vld [vmem:[#allocation4 + $0x30] sm:$0xff]  ;;  %v17650_v19 = vld [vmem:[#allocation4 + $0x38] sm:$0xff] }
 0x2a4   : > { %13345 = vmatpush3.bf16.msra.mxu0 %v14215_v29  ;;  %12996 = vmatprep.mubr.msk.bf16.mxu1 %vm2126_vm4, %v17486_v7  ;;  %v17648_v54 = vld [vmem:[#allocation3 + $0xb0] sm:$0xff]  ;;  %v17652_v34 = vld [vmem:[#allocation3 + $0xb8] sm:$0xff]  ;;  %v17654_v11 = vld [vmem:[#allocation4 + $0x40] sm:$0xff] }
 0x2a5   : > { %13284 = vmatprep.mubr.msk.bf16.mxu0 %vm2126_vm4, %v17488_v8  ;;  %13346 = vmatprep.subr.bf16.mxu0 %v14216_v26  ;;  %25419 = vst [vmem:[#allocation174_spill] sm:$0xff] %v17648_v54  ;;  %25420 = vst [vmem:[#allocation175_spill] sm:$0xff] %v17652_v34  ;;  %v17664_v17 = vld [vmem:[#allocation3 + $0xc0] sm:$0xff]  ;;  %v17666_v10 = vld [vmem:[#allocation4 + $0x48] sm:$0xff] }
 0x2a6   : > { %13058 = vmatprep.subr.bf16.mxu1 %v14217_v38  ;;  %25421 = vst [vmem:[#allocation176_spill] sm:$0xff] %v17664_v17  ;;  %v17668_v44 = vld [vmem:[#allocation3 + $0xc8] sm:$0xff]  ;;  %v17670_v37 = vld [vmem:[#allocation4 + $0x50] sm:$0xff]  ;;  %v17682_v41 = vld [vmem:[#allocation4 + $0x58] sm:$0xff] }
 0x2a7   : > { %13059 = vmatpush3.bf16.msra.mxu1 %v14217_v38  ;;  %25422 = vst [vmem:[#allocation177_spill] sm:$0xff] %v17668_v44  ;;  %v17680_v42 = vld [vmem:[#allocation3 + $0xd0] sm:$0xff]  ;;  %v17684_v58 = vld [vmem:[#allocation3 + $0xd8] sm:$0xff]  ;;  %v17686_v3 = vld [vmem:[#allocation4 + $0x60] sm:$0xff] }
 0x2a8   : > { %13347 = vmatpush3.bf16.msra.mxu0 %v14216_v26  ;;  %13060 = vmatprep.subr.bf16.mxu1 %v14220_v49  ;;  %25423 = vst [vmem:[#allocation178_spill] sm:$0xff] %v17680_v42  ;;  %25424 = vst [vmem:[#allocation179_spill] sm:$0xff] %v17684_v58  ;;  %v17696_v6 = vld [vmem:[#allocation3 + $0xe0] sm:$0xff]  ;;  %v17698_v28 = vld [vmem:[#allocation4 + $0x68] sm:$0xff] }
 0x2a9   : > { %13348 = vmatprep.subr.bf16.mxu0 %v14218_v35  ;;  %25425 = vst [vmem:[#allocation180_spill] sm:$0xff] %v17696_v6  ;;  %v17700_v0 = vld [vmem:[#allocation3 + $0xe8] sm:$0xff]  ;;  %v17702_v4 = vld [vmem:[#allocation4 + $0x70] sm:$0xff]  ;;  %v17714_v29 = vld [vmem:[#allocation4 + $0x78] sm:$0xff] }
 0x2aa   : > { %12997 = vmatmul.mubr.msk.bf16.gmra.mrb[4].mxu1 %vm2126_vm4, %v17488_v8  ;;  %25426 = vst [vmem:[#allocation181_spill] sm:$0xff] %v17700_v0  ;;  %v17712_v24 = vld [vmem:[#allocation3 + $0xf0] sm:$0xff]  ;;  %25428 = vst [vmem:[#allocation183_spill] sm:$0xff] %v17714_v29  ;;  %v17716_v26 = vld [vmem:[#allocation2 + $0x78] sm:$0xff] }
 0x2ab   : > { %13285 = vmatmul.mubr.msk.bf16.gmra.mrb[4].mxu0 %vm2126_vm4, %v17502_v31  ;;  %13000 = vmatprep.mubr.msk.bf16.mxu1 %vm2126_vm4, %v17502_v31  ;;  %25427 = vst [vmem:[#allocation182_spill] sm:$0xff] %v17712_v24  ;;  %25429 = vst [vmem:[#allocation184_spill] sm:$0xff] %v17716_v26  ;;  %v17718_v38 = vld [vmem:[#allocation4 + $0x80] sm:$0xff]  ;;  %v17806_v62 = vld [vmem:[#allocation4 + $0xd0] sm:$0xff] }
 0x2ac   : > { %13288 = vmatprep.mubr.msk.bf16.mxu0 %vm2126_vm4, %v17504_v39  ;;  %13349 = vmatpush3.bf16.msra.mxu0 %v14218_v35  ;;  %25430 = vst [vmem:[#allocation185_spill] sm:$0xff] %v17718_v38  ;;  %v17728_v35 = vld [vmem:[#allocation2] sm:$0xff]  ;;  %25437 = vst [vmem:[#allocation192_spill] sm:$0xff] %v17806_v62  ;;  %v17820_v12 = vld [vmem:[#allocation2 + $0x58] sm:$0xff] }
 0x2ad   : > { %13350 = vmatprep.subr.bf16.mxu0 %v14219_v53  ;;  %13061 = vmatpush3.bf16.msra.mxu1 %v14220_v49  ;;  %v17730_v49 = vld [vmem:[#allocation4 + $0x88] sm:$0xff]  ;;  %25440 = vst [vmem:[#allocation195_spill] sm:$0xff] %v17820_v12  ;;  %v17822_v40 = vld [vmem:[#allocation4 + $0xe0] sm:$0xff]  ;;  %v17838_v48 = vld [vmem:[#allocation4 + $0xf0] sm:$0xff] }
 0x2ae   : > { %13062 = vmatprep.subr.bf16.mxu1 %v14222_v15  ;;  %25441 = vst [vmem:[#allocation196_spill] sm:$0xff] %v17822_v40  ;;  %25444 = vst [vmem:[#allocation199_spill] sm:$0xff] %v17838_v48 }
 0x2b0   : > { %13351 = vmatpush3.bf16.msra.mxu0 %v14219_v53  ;;  %v17732_v53 = vld [vmem:[#allocation2 + $0x8] sm:$0xff] }
 0x2b1   : > { %13416 = vmatprep.subr.bf16.mxu0 %v14221_v46  ;;  %13063 = vmatpush3.bf16.msra.mxu1 %v14222_v15  ;;  %25431 = vst [vmem:[#allocation186_spill] sm:$0xff] %v17732_v53  ;;  %v17734_v15 = vld [vmem:[#allocation4 + $0x90] sm:$0xff] }
 0x2b2   : > { %13001 = vmatmul.mubr.msk.bf16.gmra.mrb[8].mxu1 %vm2126_vm4, %v17504_v39  ;;  %13128 = vmatprep.subr.bf16.mxu1 %v17528_v13 }
 0x2b3   : > { %13289 = vmatmul.mubr.msk.bf16.gmra.mrb[8].mxu0 %vm2126_vm4, %v17517_v57  ;;  %13004 = vmatprep.mubr.msk.bf16.mxu1 %vm2126_vm4, %v17517_v57 }
 0x2b4   : > { %13292 = vmatprep.mubr.msk.bf16.mxu0 %vm2126_vm4, %v17519_v9 }
 0x2ba   : > { %13005 = vmatmul.mubr.msk.bf16.gmra.mrb[12].mxu1 %vm2126_vm4, %v17519_v9 }
 0x2bb   : > { %13293 = vmatmul.mubr.msk.bf16.gmra.mrb[12].mxu0 %vm2126_vm4, %v17533_v36  ;;  %13008 = vmatprep.mubr.msk.bf16.mxu1 %vm2126_vm4, %v17533_v36 }
 0x2bc   : > { %13296 = vmatprep.mubr.msk.bf16.mxu0 %vm2126_vm4, %v17535_v20 }
 0x2c2   : > { %13009 = vmatmul.mubr.msk.bf16.gmra.mrb[16].mxu1 %vm2126_vm4, %v17535_v20 }
 0x2c3   : > { %13297 = vmatmul.mubr.msk.bf16.gmra.mrb[16].mxu0 %vm2126_vm4, %v17545_v61  ;;  %13012 = vmatprep.mubr.msk.bf16.mxu1 %vm2126_vm4, %v17545_v61 }
 0x2c4   : > { %13300 = vmatprep.mubr.msk.bf16.mxu0 %vm2126_vm4, %v17547_v23 }
 0x2ca   : > { %13013 = vmatmul.mubr.msk.bf16.gmra.mrb[20].mxu1 %vm2126_vm4, %v17547_v23 }
 0x2cb   : > { %13301 = vmatmul.mubr.msk.bf16.gmra.mrb[20].mxu0 %vm2126_vm4, %v17557_v47  ;;  %13016 = vmatprep.mubr.msk.bf16.mxu1 %vm2126_vm4, %v17557_v47 }
 0x2cc   : > { %13304 = vmatprep.mubr.msk.bf16.mxu0 %vm2126_vm4, %v17559_v60 }
 0x2d2   : > { %13017 = vmatmul.mubr.msk.bf16.gmra.mrb[24].mxu1 %vm2126_vm4, %v17559_v60  ;;  %v17879_v60 = vld [vmem:[#allocation2 + $0x98] sm:$0xff] }
 0x2d3   : > { %13305 = vmatmul.mubr.msk.bf16.gmra.mrb[24].mxu0 %vm2126_vm4, %v17569_v18  ;;  %13020 = vmatprep.mubr.msk.bf16.mxu1 %vm2126_vm4, %v17569_v18  ;;  %v14231_v18 = vld [vmem:[%s14333_s30 + $0xe8] sm:$0xff]  }
 0x2d4   : > { %13308 = vmatprep.mubr.msk.bf16.mxu0 %vm2126_vm4, %v17571_v22 }
 0x2da   : > { %13021 = vmatmul.mubr.msk.bf16.gmra.mrb[28].mxu1 %vm2126_vm4, %v17571_v22  ;;  %v17850_v22 = vld [vmem:[#allocation4 + $0xf8] sm:$0xff] }
 0x2db   : > { %13309 = vmatmul.mubr.msk.bf16.gmra.mrb[28].mxu0 %vm2126_vm4, %v17469_v16  ;;  %13024 = vmatprep.mubr.msk.bf16.mxu1 %vm2126_vm4, %v17581_v45  ;;  %v17753_v45 = vld [vmem:[#allocation4 + $0xa0] sm:$0xff]  ;;  %v17848_v16 = vld [vmem:[#allocation2 + $0x70] sm:$0xff]  ;;  %25446 = vst [vmem:[#allocation201_spill] sm:$0xff] %v17850_v22 }
 0x2dc   : > { %13352 = vmatprep.mubr.msk.bf16.mxu0 %vm2126_vm4, %v17583_v50  ;;  %25445 = vst [vmem:[#allocation200_spill] sm:$0xff] %v17848_v16 }
 0x2e2   : > { %13025 = vmatmul.mubr.msk.bf16.gmra.mrb[32].mxu1 %vm2126_vm4, %v17593_v55  ;;  %v17751_v55 = vld [vmem:[#allocation2 + $0x18] sm:$0xff] }
 0x2e3   : > { %13353 = vmatmul.mubr.msk.bf16.vlgmr.msra.gmra.mrb[0].mxu0 %vm2126_vm4, %v17595_v32  ;;  %13028 = vmatprep.mubr.msk.bf16.mxu1 %vm2126_vm4, %v17597_v21  ;;  %25432 = vst [vmem:[#allocation187_spill] sm:$0xff] %v17751_v55  ;;  %v17836_v21 = vld [vmem:[#allocation2 + $0x68] sm:$0xff] }
 0x2e4   : > { %13417 = vmatpush3.bf16.msra.mxu0 %v14221_v46  ;;  %13356 = vmatprep.mubr.msk.bf16.mxu0 %vm2126_vm4, %v17599_v52  ;;  %v14226_v46 = vld [vmem:[%s14333_s30 + $0x48] sm:$0xff]  }
 0x2e5   : > { %13418 = vmatprep.subr.bf16.mxu0 %v14223_v33 }
 0x2e8   : > { %13419 = vmatpush3.bf16.msra.mxu0 %v14223_v33  ;;  %v14228_v33 = vld [vmem:[%s14333_s30 + $0x50] sm:$0xff]  }
 0x2e9   : > { %13420 = vmatprep.subr.bf16.mxu0 %v14225_v56 }
 0x2ea   : > { %13029 = vmatmul.mubr.msk.bf16.gmra.mrb[36].mxu1 %vm2126_vm4, %v17611_v27  ;;  %v17834_v27 = vld [vmem:[#allocation4 + $0xe8] sm:$0xff] }
 0x2eb   : > { %13357 = vmatmul.mubr.msk.bf16.gmra.mrb[4].mxu0 %vm2126_vm4, %v17613_v2  ;;  %13032 = vmatprep.mubr.msk.bf16.mxu1 %vm2126_vm4, %v17615_v1  ;;  %v17832_v1 = vld [vmem:[#allocation2 + $0x60] sm:$0xff]  ;;  %25443 = vst [vmem:[#allocation198_spill] sm:$0xff] %v17834_v27 }
 0x2ec   : > { %13360 = vmatprep.mubr.msk.bf16.mxu0 %vm2126_vm4, %v17617_v30  ;;  %13421 = vmatpush3.bf16.msra.mxu0 %v14225_v56  ;;  %v17747_v56 = vld [vmem:[#allocation2 + $0x10] sm:$0xff]  ;;  %25442 = vst [vmem:[#allocation197_spill] sm:$0xff] %v17832_v1 }
 0x2ed   : > { %13422 = vmatprep.subr.bf16.mxu0 %v14227_v43 }
 0x2f0   : > { %13423 = vmatpush3.bf16.msra.mxu0 %v14227_v43  ;;  %v17749_v43 = vld [vmem:[#allocation4 + $0x98] sm:$0xff] }
 0x2f1   : > { %13488 = vmatprep.subr.bf16.mxu0 %v17629_v59 }
 0x2f2   : > { %13033 = vmatmul.mubr.msk.bf16.gmra.mrb[40].mxu1 %vm2126_vm4, %v17631_v51  ;;  %v17818_v51 = vld [vmem:[#allocation4 + $0xd8] sm:$0xff] }
 0x2f3   : > { %13361 = vmatmul.mubr.msk.bf16.gmra.mrb[8].mxu0 %vm2126_vm4, %v17633_v63  ;;  %13036 = vmatprep.mubr.msk.bf16.mxu1 %vm2126_vm4, %v17635_v14  ;;  %v17816_v14 = vld [vmem:[#allocation2 + $0x50] sm:$0xff]  ;;  %25439 = vst [vmem:[#allocation194_spill] sm:$0xff] %v17818_v51 }
 0x2f4   : > { %13364 = vmatprep.mubr.msk.bf16.mxu0 %vm2126_vm4, %v17637_v5  ;;  %25438 = vst [vmem:[#allocation193_spill] sm:$0xff] %v17816_v14 }
 0x2fa   : > { %13037 = vmatmul.mubr.msk.bf16.gmra.mrb[44].mxu1 %vm2126_vm4, %v17648_v54  ;;  %v17804_v54 = vld [vmem:[#allocation2 + $0x48] sm:$0xff] }
 0x2fb   : > { %13365 = vmatmul.mubr.msk.bf16.gmra.mrb[12].mxu0 %vm2126_vm4, %v17650_v19  ;;  %13040 = vmatprep.mubr.msk.bf16.mxu1 %vm2126_vm4, %v17652_v34  ;;  %v17802_v34 = vld [vmem:[#allocation4 + $0xc8] sm:$0xff] }
 0x2fc   : > { %13368 = vmatprep.mubr.msk.bf16.mxu0 %vm2126_vm4, %v17654_v11 }
 0x302   : > { %13041 = vmatmul.mubr.msk.bf16.gmra.mrb[48].mxu1 %vm2126_vm4, %v17664_v17  ;;  %v17800_v17 = vld [vmem:[#allocation2 + $0x40] sm:$0xff] }
 0x303   : > { %13369 = vmatmul.mubr.msk.bf16.gmra.mrb[16].mxu0 %vm2126_vm4, %v17666_v10  ;;  %13044 = vmatprep.mubr.msk.bf16.mxu1 %vm2126_vm4, %v17668_v44  ;;  %v17790_v44 = vld [vmem:[#allocation4 + $0xc0] sm:$0xff]  ;;  %25436 = vst [vmem:[#allocation191_spill] sm:$0xff] %v17800_v17 }
 0x304   : > { %13372 = vmatprep.mubr.msk.bf16.mxu0 %vm2126_vm4, %v17670_v37 }
 0x30a   : > { %13045 = vmatmul.mubr.msk.bf16.gmra.mrb[52].mxu1 %vm2126_vm4, %v17680_v42  ;;  %v17786_v42 = vld [vmem:[#allocation4 + $0xb8] sm:$0xff] }
 0x30b   : > { %13373 = vmatmul.mubr.msk.bf16.gmra.mrb[20].mxu0 %vm2126_vm4, %v17682_v41  ;;  %13048 = vmatprep.mubr.msk.bf16.mxu1 %vm2126_vm4, %v17684_v58  ;;  %v17773_v58 = vld [vmem:[#allocation4 + $0xb0] sm:$0xff] }
 0x30c   : > { %13376 = vmatprep.mubr.msk.bf16.mxu0 %vm2126_vm4, %v17686_v3 }
 0x312   : > { %13049 = vmatmul.mubr.msk.bf16.gmra.mrb[56].mxu1 %vm2126_vm4, %v17696_v6  ;;  %v17771_v6 = vld [vmem:[#allocation2 + $0x28] sm:$0xff] }
 0x313   : > { %13377 = vmatmul.mubr.msk.bf16.gmra.mrb[24].mxu0 %vm2126_vm4, %v17698_v28  ;;  %13052 = vmatprep.mubr.msk.bf16.mxu1 %vm2126_vm4, %v17700_v0  ;;  %v17769_v0 = vld [vmem:[#allocation4 + $0xa8] sm:$0xff]  ;;  %25433 = vst [vmem:[#allocation188_spill] sm:$0xff] %v17771_v6 }
 0x314   : > { %13380 = vmatprep.mubr.msk.bf16.mxu0 %vm2126_vm4, %v17702_v4 }
 0x31a   : > { %13053 = vmatmul.mubr.msk.bf16.gmra.mrb[60].mxu1 %vm2126_vm4, %v17712_v24  ;;  %v17767_v24 = vld [vmem:[#allocation2 + $0x20] sm:$0xff] }
 0x31b   : > { %13381 = vmatmul.mubr.msk.bf16.gmra.mrb[28].mxu0 %vm2126_vm4, %v17714_v29  ;;  %13064 = vmatprep.mubr.msk.bf16.mxu1 %vm2126_vm4, %v17716_v26 }
 0x31c   : > { %13384 = vmatprep.mubr.msk.bf16.mxu0 %vm2126_vm4, %v17718_v38 }
 0x322   : > { %13065 = vmatmul.mubr.msk.bf16.vlgmr.msra.gmra.mrb[0].mxu1 %vm2126_vm4, %v17728_v35 }
 0x323   : > { %13385 = vmatmul.mubr.msk.bf16.gmra.mrb[32].mxu0 %vm2126_vm4, %v17730_v49  ;;  %13129 = vmatpush3.bf16.msra.mxu1 %v17528_v13  ;;  %v14230_v13 = vld [vmem:[%s14333_s30 + $0x58] sm:$0xff]  }
 0x324   : > { %13068 = vmatprep.mubr.msk.bf16.mxu1 %vm2126_vm4, %v17732_v53  ;;  %13388 = vmatprep.mubr.msk.bf16.mxu0 %vm2126_vm4, %v17734_v15 }
 0x325   : > { %13130 = vmatprep.subr.bf16.mxu1 %v14226_v46 }
 0x327   : > { %13131 = vmatpush3.bf16.msra.mxu1 %v14226_v46  ;;  %v17765_v46 = vld [vmem:[%s14333_s30 + $0x60] sm:$0xff]  }
 0x328   : > { %13132 = vmatprep.subr.bf16.mxu1 %v14228_v33 }
 0x32a   : > { %13069 = vmatmul.mubr.msk.bf16.gmra.mrb[4].mxu1 %vm2126_vm4, %v17747_v56 }
 0x32b   : > { %13389 = vmatmul.mubr.msk.bf16.gmra.mrb[36].mxu0 %vm2126_vm4, %v17749_v43  ;;  %13072 = vmatprep.mubr.msk.bf16.mxu1 %vm2126_vm4, %v17751_v55 }
 0x32c   : > { %13392 = vmatprep.mubr.msk.bf16.mxu0 %vm2126_vm4, %v17753_v45  ;;  %13133 = vmatpush3.bf16.msra.mxu1 %v14228_v33  ;;  %v17784_v33 = vld [vmem:[#allocation2 + $0x30] sm:$0xff] }
 0x32d   : > { %13134 = vmatprep.subr.bf16.mxu1 %v14230_v13  ;;  %25434 = vst [vmem:[#allocation189_spill] sm:$0xff] %v17784_v33 }
 0x330   : > { %13135 = vmatpush3.bf16.msra.mxu1 %v14230_v13  ;;  %v17788_v13 = vld [vmem:[#allocation2 + $0x38] sm:$0xff] }
 0x331   : > { %13200 = vmatprep.subr.bf16.mxu1 %v17765_v46  ;;  %25435 = vst [vmem:[#allocation190_spill] sm:$0xff] %v17788_v13 }
 0x332   : > { %13073 = vmatmul.mubr.msk.bf16.gmra.mrb[8].mxu1 %vm2126_vm4, %v17767_v24 }
 0x333   : > { %13393 = vmatmul.mubr.msk.bf16.gmra.mrb[40].mxu0 %vm2126_vm4, %v17769_v0  ;;  %13076 = vmatprep.mubr.msk.bf16.mxu1 %vm2126_vm4, %v17771_v6 }
 0x334   : > { %13396 = vmatprep.mubr.msk.bf16.mxu0 %vm2126_vm4, %v17773_v58 }
 0x33a   : > { %13077 = vmatmul.mubr.msk.bf16.gmra.mrb[12].mxu1 %vm2126_vm4, %v17784_v33 }
 0x33b   : > { %13397 = vmatmul.mubr.msk.bf16.gmra.mrb[44].mxu0 %vm2126_vm4, %v17786_v42  ;;  %13080 = vmatprep.mubr.msk.bf16.mxu1 %vm2126_vm4, %v17788_v13 }
 0x33c   : > { %13400 = vmatprep.mubr.msk.bf16.mxu0 %vm2126_vm4, %v17790_v44 }
 0x342   : > { %13081 = vmatmul.mubr.msk.bf16.gmra.mrb[16].mxu1 %vm2126_vm4, %v17800_v17 }
 0x343   : > { %13401 = vmatmul.mubr.msk.bf16.gmra.mrb[48].mxu0 %vm2126_vm4, %v17802_v34  ;;  %13084 = vmatprep.mubr.msk.bf16.mxu1 %vm2126_vm4, %v17804_v54 }
 0x344   : > { %13404 = vmatprep.mubr.msk.bf16.mxu0 %vm2126_vm4, %v17806_v62  ;;  %v14235_v62 = vld [vmem:[%s14333_s30 + $0xf8] sm:$0xff]  }
 0x34a   : > { %13085 = vmatmul.mubr.msk.bf16.gmra.mrb[20].mxu1 %vm2126_vm4, %v17816_v14 }
 0x34b   : > { %13405 = vmatmul.mubr.msk.bf16.gmra.mrb[52].mxu0 %vm2126_vm4, %v17818_v51  ;;  %13088 = vmatprep.mubr.msk.bf16.mxu1 %vm2126_vm4, %v17820_v12  ;;  %v17877_v51 = vld [vmem:[#allocation2 + $0x90] sm:$0xff] }
 0x34c   : > { %13408 = vmatprep.mubr.msk.bf16.mxu0 %vm2126_vm4, %v17822_v40  ;;  %v17852_v40 = vld [vmem:[#allocation2 + $0xf8] sm:$0xff] }
 0x352   : > { %13089 = vmatmul.mubr.msk.bf16.gmra.mrb[24].mxu1 %vm2126_vm4, %v17832_v1 }
 0x353   : > { %13409 = vmatmul.mubr.msk.bf16.gmra.mrb[56].mxu0 %vm2126_vm4, %v17834_v27  ;;  %13092 = vmatprep.mubr.msk.bf16.mxu1 %vm2126_vm4, %v17836_v21  ;;  %v17864_v27 = vld [vmem:[#allocation2 + $0x88] sm:$0xff] }
 0x354   : > { %13412 = vmatprep.mubr.msk.bf16.mxu0 %vm2126_vm4, %v17838_v48  ;;  %v17862_v48 = vld [vmem:[#allocation2 + $0x80] sm:$0xff] }
 0x35a   : > { %13093 = vmatmul.mubr.msk.bf16.gmra.mrb[28].mxu1 %vm2126_vm4, %v17848_v16 }
 0x35b   : > { %13413 = vmatmul.mubr.msk.bf16.gmra.mrb[60].mxu0 %vm2126_vm4, %v17850_v22  ;;  %13096 = vmatprep.mubr.msk.bf16.mxu1 %vm2126_vm4, %v17852_v40 }
 0x35c   : > { %13424 = vmatprep.mubr.msk.bf16.mxu0 %vm2126_vm4, %v17732_v53  ;;  %v14233_v53 = vld [vmem:[%s14333_s30 + $0xf0] sm:$0xff]  }
 0x362   : > { %13097 = vmatmul.mubr.msk.bf16.gmra.mrb[32].mxu1 %vm2126_vm4, %v17862_v48 }
 0x363   : > { %13425 = vmatmul.mubr.msk.bf16.vlgmr.msra.gmra.mrb[0].mxu0 %vm2126_vm4, %v17747_v56  ;;  %13100 = vmatprep.mubr.msk.bf16.mxu1 %vm2126_vm4, %v17864_v27 }
 0x364   : > { %13489 = vmatpush3.bf16.msra.mxu0 %v17629_v59  ;;  %13428 = vmatprep.mubr.msk.bf16.mxu0 %vm2126_vm4, %v17751_v55  ;;  %v17891_v59 = vld [vmem:[%s14333_s30 + $0x100] sm:$0xff]  }
 0x365   : > { %13490 = vmatprep.subr.bf16.mxu0 %v14231_v18  ;;  %v17893_v55 = vld [vmem:[#allocation2 + $0xa0] sm:$0xff] }
 0x368   : > { %13491 = vmatpush3.bf16.msra.mxu0 %v14231_v18  ;;  %v17895_v18 = vld [vmem:[#allocation2 + $0xa8] sm:$0xff] }
 0x369   : > { %13492 = vmatprep.subr.bf16.mxu0 %v14233_v53 }
 0x36a   : > { %13101 = vmatmul.mubr.msk.bf16.gmra.mrb[36].mxu1 %vm2126_vm4, %v17877_v51 }
 0x36b   : > { %13429 = vmatmul.mubr.msk.bf16.gmra.mrb[4].mxu0 %vm2126_vm4, %v17767_v24  ;;  %13104 = vmatprep.mubr.msk.bf16.mxu1 %vm2126_vm4, %v17879_v60 }
 0x36c   : > { %13432 = vmatprep.mubr.msk.bf16.mxu0 %vm2126_vm4, %v17771_v6  ;;  %13493 = vmatpush3.bf16.msra.mxu0 %v14233_v53  ;;  %v17906_v53 = vld [vmem:[#allocation2 + $0xb0] sm:$0xff]  ;;  %v17908_v6 = vld [vmem:[#allocation2 + $0xb8] sm:$0xff] }
 0x36d   : > { %13494 = vmatprep.subr.bf16.mxu0 %v14235_v62 }
 0x370   : > { %13495 = vmatpush3.bf16.msra.mxu0 %v14235_v62  ;;  %v17918_v62 = vld [vmem:[#allocation2 + $0xc0] sm:$0xff] }
 0x371   : > { %13560 = vmatprep.subr.bf16.mxu0 %v17891_v59 }
 0x372   : > { %13105 = vmatmul.mubr.msk.bf16.gmra.mrb[40].mxu1 %vm2126_vm4, %v17893_v55 }
 0x373   : > { %13433 = vmatmul.mubr.msk.bf16.gmra.mrb[8].mxu0 %vm2126_vm4, %v17784_v33  ;;  %13108 = vmatprep.mubr.msk.bf16.mxu1 %vm2126_vm4, %v17895_v18  ;;  %v17920_v33 = vld [vmem:[#allocation2 + $0xc8] sm:$0xff] }
 0x374   : > { %13436 = vmatprep.mubr.msk.bf16.mxu0 %vm2126_vm4, %v17788_v13  ;;  %v17932_v13 = vld [vmem:[#allocation2 + $0xd8] sm:$0xff] }
 0x37a   : > { %13109 = vmatmul.mubr.msk.bf16.gmra.mrb[44].mxu1 %vm2126_vm4, %v17906_v53 }
 0x37b   : > { %13437 = vmatmul.mubr.msk.bf16.gmra.mrb[12].mxu0 %vm2126_vm4, %v17800_v17  ;;  %13112 = vmatprep.mubr.msk.bf16.mxu1 %vm2126_vm4, %v17908_v6  ;;  %v17930_v17 = vld [vmem:[#allocation2 + $0xd0] sm:$0xff] }
 0x37c   : > { %13440 = vmatprep.mubr.msk.bf16.mxu0 %vm2126_vm4, %v17804_v54 }
 0x382   : > { %13113 = vmatmul.mubr.msk.bf16.gmra.mrb[48].mxu1 %vm2126_vm4, %v17918_v62 }
 0x383   : > { %13441 = vmatmul.mubr.msk.bf16.gmra.mrb[16].mxu0 %vm2126_vm4, %v17816_v14  ;;  %13116 = vmatprep.mubr.msk.bf16.mxu1 %vm2126_vm4, %v17920_v33  ;;  %v17942_v14 = vld [vmem:[#allocation2 + $0xe0] sm:$0xff] }
 0x384   : > { %13444 = vmatprep.mubr.msk.bf16.mxu0 %vm2126_vm4, %v17820_v12  ;;  %v17944_v12 = vld [vmem:[#allocation2 + $0xe8] sm:$0xff] }
 0x38a   : > { %13117 = vmatmul.mubr.msk.bf16.gmra.mrb[52].mxu1 %vm2126_vm4, %v17930_v17 }
 0x38b   : > { %13445 = vmatmul.mubr.msk.bf16.gmra.mrb[20].mxu0 %vm2126_vm4, %v17832_v1  ;;  %13120 = vmatprep.mubr.msk.bf16.mxu1 %vm2126_vm4, %v17932_v13  ;;  %v17954_v1 = vld [vmem:[#allocation2 + $0xf0] sm:$0xff] }
 0x38c   : > { %13448 = vmatprep.mubr.msk.bf16.mxu0 %vm2126_vm4, %v17836_v21 }
 0x392   : > { %13121 = vmatmul.mubr.msk.bf16.gmra.mrb[56].mxu1 %vm2126_vm4, %v17942_v14 }
 0x393   : > { %13449 = vmatmul.mubr.msk.bf16.gmra.mrb[24].mxu0 %vm2126_vm4, %v17848_v16  ;;  %13124 = vmatprep.mubr.msk.bf16.mxu1 %vm2126_vm4, %v17944_v12  ;;  %v14234_v16 = vld [vmem:[%s14333_s30 + $0x68] sm:$0xff]  }
 0x394   : > { %13452 = vmatprep.mubr.msk.bf16.mxu0 %vm2126_vm4, %v17716_v26  ;;  %v14236_v26 = vld [vmem:[%s14333_s30 + $0x70] sm:$0xff]  }
 0x39a   : > { %13125 = vmatmul.mubr.msk.bf16.gmra.mrb[60].mxu1 %vm2126_vm4, %v17954_v1 }
 0x39b   : > { %13453 = vmatmul.mubr.msk.bf16.gmra.mrb[28].mxu0 %vm2126_vm4, %v17728_v35  ;;  %13136 = vmatprep.mubr.msk.bf16.mxu1 %vm2126_vm4, %v17714_v29  ;;  %v14238_v29 = vld [vmem:[%s14333_s30 + $0x78] sm:$0xff]  }
 0x39c   : > { %13456 = vmatprep.mubr.msk.bf16.mxu0 %vm2126_vm4, %v17864_v27 }
 0x3a2   : > { %13137 = vmatmul.mubr.msk.bf16.vlgmr.msra.gmra.mrb[0].mxu1 %vm2126_vm4, %v17583_v50 }
 0x3a3   : > { %13457 = vmatmul.mubr.msk.bf16.gmra.mrb[32].mxu0 %vm2126_vm4, %v17877_v51  ;;  %13201 = vmatpush3.bf16.msra.mxu1 %v17765_v46  ;;  %v25458_v46 = vld [vmem:[#allocation186_spill] sm:$0xff] }
 0x3a4   : > { %13140 = vmatprep.mubr.msk.bf16.mxu1 %vm2126_vm4, %v17595_v32  ;;  %13460 = vmatprep.mubr.msk.bf16.mxu0 %vm2126_vm4, %v17879_v60 }
 0x3a5   : > { %13202 = vmatprep.subr.bf16.mxu1 %v14234_v16 }
 0x3a7   : > { %13203 = vmatpush3.bf16.msra.mxu1 %v14234_v16  ;;  %v14239_v16 = vld [vmem:[%s14333_s30 + $0x108] sm:$0xff]  }
 0x3a8   : > { %13204 = vmatprep.subr.bf16.mxu1 %v14236_v26 }
 0x3aa   : > { %13141 = vmatmul.mubr.msk.bf16.gmra.mrb[4].mxu1 %vm2126_vm4, %v17599_v52 }
 0x3ab   : > { %13461 = vmatmul.mubr.msk.bf16.gmra.mrb[36].mxu0 %vm2126_vm4, %v17893_v55  ;;  %13144 = vmatprep.mubr.msk.bf16.mxu1 %vm2126_vm4, %v17613_v2 }
 0x3ac   : > { %13464 = vmatprep.mubr.msk.bf16.mxu0 %vm2126_vm4, %v17895_v18  ;;  %13205 = vmatpush3.bf16.msra.mxu1 %v14236_v26  ;;  %v25457_v26 = vld [vmem:[#allocation169_spill] sm:$0xff] }
 0x3ad   : > { %13206 = vmatprep.subr.bf16.mxu1 %v14238_v29 }
 0x3b0   : > { %13207 = vmatpush3.bf16.msra.mxu1 %v14238_v29  ;;  %v14240_v29 = vld [vmem:[%s14333_s30 + $0x110] sm:$0xff]  }
 0x3b1   : > { %13634 = vmatprep.subr.bf16.mxu1 %v17454_v25 }
 0x3b2   : > { %13145 = vmatmul.mubr.msk.bf16.gmra.mrb[8].mxu1 %vm2126_vm4, %v17617_v30 }
 0x3b3   : > { %13465 = vmatmul.mubr.msk.bf16.gmra.mrb[40].mxu0 %vm2126_vm4, %v17906_v53  ;;  %13148 = vmatprep.mubr.msk.bf16.mxu1 %vm2126_vm4, %v17633_v63 }
 0x3b4   : > { %13468 = vmatprep.mubr.msk.bf16.mxu0 %vm2126_vm4, %v17908_v6 }
 0x3ba   : > { %13149 = vmatmul.mubr.msk.bf16.gmra.mrb[12].mxu1 %vm2126_vm4, %v17637_v5 }
 0x3bb   : > { %13469 = vmatmul.mubr.msk.bf16.gmra.mrb[44].mxu0 %vm2126_vm4, %v17918_v62  ;;  %13152 = vmatprep.mubr.msk.bf16.mxu1 %vm2126_vm4, %v17650_v19 }
 0x3bc   : > { %13472 = vmatprep.mubr.msk.bf16.mxu0 %vm2126_vm4, %v17920_v33 }
 0x3c2   : > { %13153 = vmatmul.mubr.msk.bf16.gmra.mrb[16].mxu1 %vm2126_vm4, %v17654_v11 }
 0x3c3   : > { %13473 = vmatmul.mubr.msk.bf16.gmra.mrb[48].mxu0 %vm2126_vm4, %v17930_v17  ;;  %13156 = vmatprep.mubr.msk.bf16.mxu1 %vm2126_vm4, %v17666_v10 }
 0x3c4   : > { %13476 = vmatprep.mubr.msk.bf16.mxu0 %vm2126_vm4, %v17932_v13 }
 0x3ca   : > { %13157 = vmatmul.mubr.msk.bf16.gmra.mrb[20].mxu1 %vm2126_vm4, %v17670_v37 }
 0x3cb   : > { %13477 = vmatmul.mubr.msk.bf16.gmra.mrb[52].mxu0 %vm2126_vm4, %v17942_v14  ;;  %13160 = vmatprep.mubr.msk.bf16.mxu1 %vm2126_vm4, %v17682_v41 }
 0x3cc   : > { %13480 = vmatprep.mubr.msk.bf16.mxu0 %vm2126_vm4, %v17944_v12 }
 0x3d2   : > { %13161 = vmatmul.mubr.msk.bf16.gmra.mrb[24].mxu1 %vm2126_vm4, %v17686_v3 }
 0x3d3   : > { %13481 = vmatmul.mubr.msk.bf16.gmra.mrb[56].mxu0 %vm2126_vm4, %v17954_v1  ;;  %13164 = vmatprep.mubr.msk.bf16.mxu1 %vm2126_vm4, %v17698_v28 }
 0x3d4   : > { %13484 = vmatprep.mubr.msk.bf16.mxu0 %vm2126_vm4, %v17852_v40 }
 0x3da   : > { %13165 = vmatmul.mubr.msk.bf16.gmra.mrb[28].mxu1 %vm2126_vm4, %v17702_v4 }
 0x3db   : > { %13485 = vmatmul.mubr.msk.bf16.gmra.mrb[60].mxu0 %vm2126_vm4, %v17862_v48  ;;  %13168 = vmatprep.mubr.msk.bf16.mxu1 %vm2126_vm4, %v17850_v22  ;;  %v25484_v22 = vld [vmem:[#allocation167_spill] sm:$0xff] }
 0x3dc   : > { %13496 = vmatprep.mubr.msk.bf16.mxu0 %vm2126_vm4, %v17486_v7  ;;  %v14241_v7 = vld [vmem:[%s14333_s30 + $0x118] sm:$0xff]  }
 0x3e2   : > { %13169 = vmatmul.mubr.msk.bf16.gmra.mrb[32].mxu1 %vm2126_vm4, %v17718_v38  ;;  %v25481_v38 = vld [vmem:[#allocation181_spill] sm:$0xff] }
 0x3e3   : > { %13497 = vmatmul.mubr.msk.bf16.vlgmr.msra.gmra.mrb[0].mxu0 %vm2126_vm4, %v17488_v8  ;;  %13172 = vmatprep.mubr.msk.bf16.mxu1 %vm2126_vm4, %v17730_v49  ;;  %v25447_v8 = vld [vmem:[#allocation192_spill] sm:$0xff] }
 0x3e4   : > { %13561 = vmatpush3.bf16.msra.mxu0 %v17891_v59  ;;  %13500 = vmatprep.mubr.msk.bf16.mxu0 %vm2126_vm4, %v17502_v31  ;;  %v25448_v31 = vld [vmem:[#allocation164_spill] sm:$0xff]  ;;  %v25459_v59 = vld [vmem:[#allocation170_spill] sm:$0xff] }
 0x3e5   : > { %13562 = vmatprep.subr.bf16.mxu0 %v14239_v16 }
 0x3e8   : > { %13563 = vmatpush3.bf16.msra.mxu0 %v14239_v16  ;;  %v25460_v16 = vld [vmem:[#allocation171_spill] sm:$0xff] }
 0x3e9   : > { %13564 = vmatprep.subr.bf16.mxu0 %v14240_v29 }
 0x3ea   : > { %13173 = vmatmul.mubr.msk.bf16.gmra.mrb[36].mxu1 %vm2126_vm4, %v17734_v15 }
 0x3eb   : > { %13501 = vmatmul.mubr.msk.bf16.gmra.mrb[4].mxu0 %vm2126_vm4, %v17504_v39  ;;  %13176 = vmatprep.mubr.msk.bf16.mxu1 %vm2126_vm4, %v17749_v43  ;;  %v25449_v39 = vld [vmem:[#allocation194_spill] sm:$0xff] }
 0x3ec   : > { %13504 = vmatprep.mubr.msk.bf16.mxu0 %vm2126_vm4, %v17517_v57  ;;  %13565 = vmatpush3.bf16.msra.mxu0 %v14240_v29  ;;  %v25450_v57 = vld [vmem:[#allocation165_spill] sm:$0xff]  ;;  %v25461_v29 = vld [vmem:[#allocation159_spill] sm:$0xff] }
 0x3ed   : > { %13566 = vmatprep.subr.bf16.mxu0 %v14241_v7 }
 0x3f0   : > { %13567 = vmatpush3.bf16.msra.mxu0 %v14241_v7  ;;  %v25463_v7 = vld [vmem:[#allocation187_spill] sm:$0xff] }
 0x3f2   : > { %13177 = vmatmul.mubr.msk.bf16.gmra.mrb[40].mxu1 %vm2126_vm4, %v17753_v45 }
 0x3f3   : > { %13505 = vmatmul.mubr.msk.bf16.gmra.mrb[8].mxu0 %vm2126_vm4, %v17519_v9  ;;  %13180 = vmatprep.mubr.msk.bf16.mxu1 %vm2126_vm4, %v17769_v0  ;;  %v25451_v9 = vld [vmem:[#allocation196_spill] sm:$0xff] }
 0x3f4   : > { %13508 = vmatprep.mubr.msk.bf16.mxu0 %vm2126_vm4, %v17533_v36  ;;  %v25452_v36 = vld [vmem:[#allocation166_spill] sm:$0xff] }
 0x3fa   : > { %13181 = vmatmul.mubr.msk.bf16.gmra.mrb[44].mxu1 %vm2126_vm4, %v17773_v58 }
 0x3fb   : > { %13509 = vmatmul.mubr.msk.bf16.gmra.mrb[12].mxu0 %vm2126_vm4, %v17535_v20  ;;  %13184 = vmatprep.mubr.msk.bf16.mxu1 %vm2126_vm4, %v17786_v42  ;;  %v25453_v20 = vld [vmem:[#allocation198_spill] sm:$0xff] }
 0x3fc   : > { %13512 = vmatprep.mubr.msk.bf16.mxu0 %vm2126_vm4, %v17545_v61  ;;  %v25454_v61 = vld [vmem:[#allocation161_spill] sm:$0xff] }
 0x402   : > { %13185 = vmatmul.mubr.msk.bf16.gmra.mrb[48].mxu1 %vm2126_vm4, %v17790_v44 }
 0x403   : > { %13513 = vmatmul.mubr.msk.bf16.gmra.mrb[16].mxu0 %vm2126_vm4, %v17547_v23  ;;  %13188 = vmatprep.mubr.msk.bf16.mxu1 %vm2126_vm4, %v17802_v34  ;;  %v25455_v23 = vld [vmem:[#allocation199_spill] sm:$0xff] }
 0x404   : > { %13516 = vmatprep.mubr.msk.bf16.mxu0 %vm2126_vm4, %v17557_v47  ;;  %v25456_v47 = vld [vmem:[#allocation162_spill] sm:$0xff] }
 0x40a   : > { %13189 = vmatmul.mubr.msk.bf16.gmra.mrb[52].mxu1 %vm2126_vm4, %v25447_v8 }
 0x40b   : > { %13517 = vmatmul.mubr.msk.bf16.gmra.mrb[20].mxu0 %vm2126_vm4, %v25448_v31  ;;  %13192 = vmatprep.mubr.msk.bf16.mxu1 %vm2126_vm4, %v25449_v39  ;;  %v25464_v31 = vld [vmem:[#allocation172_spill] sm:$0xff] }
 0x40c   : > { %13520 = vmatprep.mubr.msk.bf16.mxu0 %vm2126_vm4, %v25450_v57  ;;  %v25467_v57 = vld [vmem:[#allocation188_spill] sm:$0xff] }
 0x412   : > { %13193 = vmatmul.mubr.msk.bf16.gmra.mrb[56].mxu1 %vm2126_vm4, %v25451_v9 }
 0x413   : > { %13521 = vmatmul.mubr.msk.bf16.gmra.mrb[24].mxu0 %vm2126_vm4, %v25452_v36  ;;  %13196 = vmatprep.mubr.msk.bf16.mxu1 %vm2126_vm4, %v25453_v20  ;;  %v25468_v36 = vld [vmem:[#allocation174_spill] sm:$0xff] }
 0x414   : > { %13524 = vmatprep.mubr.msk.bf16.mxu0 %vm2126_vm4, %v25454_v61  ;;  %v25469_v61 = vld [vmem:[#allocation189_spill] sm:$0xff] }
 0x41a   : > { %13197 = vmatmul.mubr.msk.bf16.gmra.mrb[60].mxu1 %vm2126_vm4, %v25455_v23  ;;  %v25486_v23 = vld [vmem:[#allocation168_spill] sm:$0xff] }
 0x41b   : > { %13525 = vmatmul.mubr.msk.bf16.gmra.mrb[28].mxu0 %vm2126_vm4, %v25456_v47  ;;  %13208 = vmatprep.mubr.msk.bf16.mxu1 %vm2126_vm4, %v17728_v35  ;;  %v25462_v35 = vld [vmem:[#allocation160_spill] sm:$0xff]  ;;  %v25470_v47 = vld [vmem:[#allocation175_spill] sm:$0xff] }
 0x41c   : > { %13528 = vmatprep.mubr.msk.bf16.mxu0 %vm2126_vm4, %v25457_v26 }
 0x422   : > { %13209 = vmatmul.mubr.msk.bf16.vlgmr.msra.gmra.mrb[0].mxu1 %vm2126_vm4, %v25458_v46  ;;  %v25472_v46 = vld [vmem:[#allocation176_spill] sm:$0xff] }
 0x423   : > { %13529 = vmatmul.mubr.msk.bf16.gmra.mrb[32].mxu0 %vm2126_vm4, %v25459_v59  ;;  %13638 = vmatpush3.bf16.msra.mxu1 %v17454_v25  ;;  %v25465_v25 = vld [vmem:[#allocation173_spill] sm:$0xff] }
 0x424   : > { %13212 = vmatprep.mubr.msk.bf16.mxu1 %vm2126_vm4, %v17747_v56  ;;  %13532 = vmatprep.mubr.msk.bf16.mxu0 %vm2126_vm4, %v25460_v16  ;;  %v25466_v56 = vld [vmem:[#allocation163_spill] sm:$0xff] }
 0x425   : > { %13635 = vmatprep.subr.bf16.mxu1 %v25461_v29 }
 0x427   : > { %13639 = vmatpush3.bf16.msra.mxu1 %v25461_v29  ;;  %v25473_v29 = vld [vmem:[#allocation191_spill] sm:$0xff] }
 0x428   : > { %13636 = vmatprep.subr.bf16.mxu1 %v25462_v35 }
 0x42a   : > { %13213 = vmatmul.mubr.msk.bf16.gmra.mrb[4].mxu1 %vm2126_vm4, %v25463_v7  ;;  %v25475_v7 = vld [vmem:[#allocation178_spill] sm:$0xff] }
 0x42b   : > { %13533 = vmatmul.mubr.msk.bf16.gmra.mrb[36].mxu0 %vm2126_vm4, %v25464_v31  ;;  %13216 = vmatprep.mubr.msk.bf16.mxu1 %vm2126_vm4, %v17767_v24  ;;  %v25471_v24 = vld [vmem:[#allocation190_spill] sm:$0xff] }
 0x42c   : > { %13536 = vmatprep.mubr.msk.bf16.mxu0 %vm2126_vm4, %v25465_v25  ;;  %13640 = vmatpush3.bf16.msra.mxu1 %v25462_v35  ;;  %v25474_v35 = vld [vmem:[#allocation177_spill] sm:$0xff] }
 0x42d   : > { %13637 = vmatprep.subr.bf16.mxu1 %v25466_v56 }
 0x430   : > { %13641 = vmatpush3.bf16.msra.mxu1 %v25466_v56  ;;  %v25476_v56 = vld [vmem:[#allocation193_spill] sm:$0xff] }
 0x432   : > { %13217 = vmatmul.mubr.msk.bf16.gmra.mrb[8].mxu1 %vm2126_vm4, %v25467_v57  ;;  %v25477_v57 = vld [vmem:[#allocation179_spill] sm:$0xff] }
 0x433   : > { %13537 = vmatmul.mubr.msk.bf16.gmra.mrb[40].mxu0 %vm2126_vm4, %v25468_v36  ;;  %13220 = vmatprep.mubr.msk.bf16.mxu1 %vm2126_vm4, %v25469_v61  ;;  %v25478_v61 = vld [vmem:[#allocation195_spill] sm:$0xff] }
 0x434   : > { %13540 = vmatprep.mubr.msk.bf16.mxu0 %vm2126_vm4, %v25470_v47 }
 0x43a   : > { %13221 = vmatmul.mubr.msk.bf16.gmra.mrb[12].mxu1 %vm2126_vm4, %v25471_v24  ;;  %v25479_v24 = vld [vmem:[#allocation180_spill] sm:$0xff] }
 0x43b   : > { %13541 = vmatmul.mubr.msk.bf16.gmra.mrb[44].mxu0 %vm2126_vm4, %v25472_v46  ;;  %13224 = vmatprep.mubr.msk.bf16.mxu1 %vm2126_vm4, %v25473_v29  ;;  %v25480_v29 = vld [vmem:[#allocation197_spill] sm:$0xff] }
 0x43c   : > { %13544 = vmatprep.mubr.msk.bf16.mxu0 %vm2126_vm4, %v25474_v35 }
 0x442   : > { %13225 = vmatmul.mubr.msk.bf16.gmra.mrb[16].mxu1 %vm2126_vm4, %v17804_v54  ;;  %v25482_v54 = vld [vmem:[#allocation182_spill] sm:$0xff] }
 0x443   : > { %13545 = vmatmul.mubr.msk.bf16.gmra.mrb[48].mxu0 %vm2126_vm4, %v25475_v7  ;;  %13228 = vmatprep.mubr.msk.bf16.mxu1 %vm2126_vm4, %v25476_v56  ;;  %v25483_v56 = vld [vmem:[#allocation200_spill] sm:$0xff] }
 0x444   : > { %13548 = vmatprep.mubr.msk.bf16.mxu0 %vm2126_vm4, %v25477_v57 }
 0x44a   : > { %13229 = vmatmul.mubr.msk.bf16.gmra.mrb[20].mxu1 %vm2126_vm4, %v25478_v61  ;;  %v25485_v61 = vld [vmem:[#allocation184_spill] sm:$0xff] }
 0x44b   : > { %13549 = vmatmul.mubr.msk.bf16.gmra.mrb[52].mxu0 %vm2126_vm4, %v25479_v24  ;;  %13232 = vmatprep.mubr.msk.bf16.mxu1 %vm2126_vm4, %v25480_v29 }
 0x44c   : > { %13552 = vmatprep.mubr.msk.bf16.mxu0 %vm2126_vm4, %v25481_v38 }
 0x452   : > { %13233 = vmatmul.mubr.msk.bf16.gmra.mrb[24].mxu1 %vm2126_vm4, %v17836_v21 }
 0x453   : > { %13553 = vmatmul.mubr.msk.bf16.gmra.mrb[56].mxu0 %vm2126_vm4, %v25482_v54  ;;  %13236 = vmatprep.mubr.msk.bf16.mxu1 %vm2126_vm4, %v25483_v56 }
 0x454   : > { %13556 = vmatprep.mubr.msk.bf16.mxu0 %vm2126_vm4, %v25484_v22 }
 0x45a   : > { %13237 = vmatmul.mubr.msk.bf16.gmra.mrb[28].mxu1 %vm2126_vm4, %v25485_v61 }
 0x45b   : > { %13557 = vmatmul.mubr.msk.bf16.gmra.mrb[60].mxu0 %vm2126_vm4, %v25486_v23  ;;  %13240 = vmatprep.mubr.msk.bf16.mxu1 %vm2126_vm4, %v17862_v48  ;;  %v25487_v48 = vld [vmem:[#allocation183_spill] sm:$0xff] }
 0x45c   : > { %13568 = vmatprep.mubr.msk.bf16.mxu0 %vm2126_vm4, %v17595_v32 }
 0x462   : > { %13241 = vmatmul.mubr.msk.bf16.gmra.mrb[32].mxu1 %vm2126_vm4, %v17864_v27 }
 0x463   : > { %13569 = vmatmul.mubr.msk.bf16.vlgmr.msra.gmra.mrb[0].mxu0 %vm2126_vm4, %v17599_v52  ;;  %13244 = vmatprep.mubr.msk.bf16.mxu1 %vm2126_vm4, %v17877_v51 }
 0x464   : > { %13572 = vmatprep.mubr.msk.bf16.mxu0 %vm2126_vm4, %v17613_v2 }
 0x46a   : > { %13245 = vmatmul.mubr.msk.bf16.gmra.mrb[36].mxu1 %vm2126_vm4, %v17879_v60  ;;  %v25490_v60 = vld [vmem:[#allocation185_spill] sm:$0xff] }
 0x46b   : > { %13573 = vmatmul.mubr.msk.bf16.gmra.mrb[4].mxu0 %vm2126_vm4, %v17617_v30  ;;  %13248 = vmatprep.mubr.msk.bf16.mxu1 %vm2126_vm4, %v17893_v55 }
 0x46c   : > { %13576 = vmatprep.mubr.msk.bf16.mxu0 %vm2126_vm4, %v17633_v63 }
 0x472   : > { %13249 = vmatmul.mubr.msk.bf16.gmra.mrb[40].mxu1 %vm2126_vm4, %v17895_v18 }
 0x473   : > { %13577 = vmatmul.mubr.msk.bf16.gmra.mrb[8].mxu0 %vm2126_vm4, %v17637_v5  ;;  %13252 = vmatprep.mubr.msk.bf16.mxu1 %vm2126_vm4, %v17906_v53 }
 0x474   : > { %13580 = vmatprep.mubr.msk.bf16.mxu0 %vm2126_vm4, %v17650_v19 }
 0x47a   : > { %13253 = vmatmul.mubr.msk.bf16.gmra.mrb[44].mxu1 %vm2126_vm4, %v17908_v6 }
 0x47b   : > { %13581 = vmatmul.mubr.msk.bf16.gmra.mrb[12].mxu0 %vm2126_vm4, %v17654_v11  ;;  %13256 = vmatprep.mubr.msk.bf16.mxu1 %vm2126_vm4, %v17918_v62 }
 0x47c   : > { %13584 = vmatprep.mubr.msk.bf16.mxu0 %vm2126_vm4, %v17666_v10 }
 0x482   : > { %13257 = vmatmul.mubr.msk.bf16.gmra.mrb[48].mxu1 %vm2126_vm4, %v17920_v33 }
 0x483   : > { %13585 = vmatmul.mubr.msk.bf16.gmra.mrb[16].mxu0 %vm2126_vm4, %v17670_v37  ;;  %13260 = vmatprep.mubr.msk.bf16.mxu1 %vm2126_vm4, %v17930_v17 }
 0x484   : > { %13588 = vmatprep.mubr.msk.bf16.mxu0 %vm2126_vm4, %v17682_v41 }
 0x48a   : > { %13261 = vmatmul.mubr.msk.bf16.gmra.mrb[52].mxu1 %vm2126_vm4, %v17932_v13 }
 0x48b   : > { %13589 = vmatmul.mubr.msk.bf16.gmra.mrb[20].mxu0 %vm2126_vm4, %v17686_v3  ;;  %13264 = vmatprep.mubr.msk.bf16.mxu1 %vm2126_vm4, %v17942_v14 }
 0x48c   : > { %13592 = vmatprep.mubr.msk.bf16.mxu0 %vm2126_vm4, %v17698_v28 }
 0x492   : > { %13265 = vmatmul.mubr.msk.bf16.gmra.mrb[56].mxu1 %vm2126_vm4, %v17944_v12  ;;  %v25489_v12 = vld [vmem:[#allocation201_spill] sm:$0xff] }
 0x493   : > { %13593 = vmatmul.mubr.msk.bf16.gmra.mrb[24].mxu0 %vm2126_vm4, %v17702_v4  ;;  %13268 = vmatprep.mubr.msk.bf16.mxu1 %vm2126_vm4, %v17954_v1 }
 0x494   : > { %13596 = vmatprep.mubr.msk.bf16.mxu0 %vm2126_vm4, %v25487_v48 }
 0x49a   : > { %13269 = vmatmul.mubr.msk.bf16.gmra.mrb[60].mxu1 %vm2126_vm4, %v17852_v40  ;;  %v25488_v40 = vld [vmem:[#allocation199_spill] sm:$0xff] }
 0x49b   : > { %13597 = vmatmul.mubr.msk.bf16.gmra.mrb[28].mxu0 %vm2126_vm4, %v17583_v50  ;;  %13312 = vmatprep.mubr.msk.bf16.mxu1 %vm2126_vm4, %v25486_v23 }
 0x49c   : > { %13600 = vmatprep.mubr.msk.bf16.mxu0 %vm2126_vm4, %v17730_v49 }
 0x4a2   : > { %13313 = vmatmul.mubr.msk.bf16.vlgmr.msra.gmra.mrb[32].mxu1 %vm2126_vm4, %v25457_v26 }
 0x4a3   : > { %13601 = vmatmul.mubr.msk.bf16.gmra.mrb[32].mxu0 %vm2126_vm4, %v17734_v15  ;;  %13316 = vmatprep.mubr.msk.bf16.mxu1 %vm2126_vm4, %v25459_v59 }
 0x4a4   : > { %13604 = vmatprep.mubr.msk.bf16.mxu0 %vm2126_vm4, %v17749_v43  ;;  %v18351_v43 = vld [vmem:[%s18348_s21] ss:$0 sm:$0xff] }
 0x4aa   : > { %13317 = vmatmul.mubr.msk.bf16.gmra.mrb[36].mxu1 %vm2126_vm4, %v25460_v16 }
 0x4ab   : > { %13605 = vmatmul.mubr.msk.bf16.gmra.mrb[36].mxu0 %vm2126_vm4, %v17753_v45  ;;  %13320 = vmatprep.mubr.msk.bf16.mxu1 %vm2126_vm4, %v25464_v31 }
 0x4ac   : > { %13608 = vmatprep.mubr.msk.bf16.mxu0 %vm2126_vm4, %v17769_v0 }
 0x4b2   : > { %13321 = vmatmul.mubr.msk.bf16.gmra.mrb[40].mxu1 %vm2126_vm4, %v25465_v25 }
 0x4b3   : > { %13609 = vmatmul.mubr.msk.bf16.gmra.mrb[40].mxu0 %vm2126_vm4, %v17773_v58  ;;  %13324 = vmatprep.mubr.msk.bf16.mxu1 %vm2126_vm4, %v25468_v36 }
 0x4b4   : > { %13612 = vmatprep.mubr.msk.bf16.mxu0 %vm2126_vm4, %v17786_v42 }
 0x4ba   : > { %13325 = vmatmul.mubr.msk.bf16.gmra.mrb[44].mxu1 %vm2126_vm4, %v25470_v47 }
 0x4bb   : > { %13613 = vmatmul.mubr.msk.bf16.gmra.mrb[44].mxu0 %vm2126_vm4, %v17790_v44  ;;  %13328 = vmatprep.mubr.msk.bf16.mxu1 %vm2126_vm4, %v25472_v46 }
 0x4bc   : > { %13616 = vmatprep.mubr.msk.bf16.mxu0 %vm2126_vm4, %v17802_v34 }
 0x4c2   : > { %13329 = vmatmul.mubr.msk.bf16.gmra.mrb[48].mxu1 %vm2126_vm4, %v25474_v35 }
 0x4c3   : > { %13617 = vmatmul.mubr.msk.bf16.gmra.mrb[48].mxu0 %vm2126_vm4, %v25447_v8  ;;  %13332 = vmatprep.mubr.msk.bf16.mxu1 %vm2126_vm4, %v25475_v7 }
 0x4c4   : > { %13620 = vmatprep.mubr.msk.bf16.mxu0 %vm2126_vm4, %v25449_v39 }
 0x4ca   : > { %13333 = vmatmul.mubr.msk.bf16.gmra.mrb[52].mxu1 %vm2126_vm4, %v25477_v57 }
 0x4cb   : > { %13621 = vmatmul.mubr.msk.bf16.gmra.mrb[52].mxu0 %vm2126_vm4, %v25451_v9  ;;  %13336 = vmatprep.mubr.msk.bf16.mxu1 %vm2126_vm4, %v25479_v24 }
 0x4cc   : > { %13624 = vmatprep.mubr.msk.bf16.mxu0 %vm2126_vm4, %v25453_v20 }
 0x4d2   : > { %13337 = vmatmul.mubr.msk.bf16.gmra.mrb[56].mxu1 %vm2126_vm4, %v25481_v38 }
 0x4d3   : > { %13625 = vmatmul.mubr.msk.bf16.gmra.mrb[56].mxu0 %vm2126_vm4, %v25488_v40  ;;  %13340 = vmatprep.mubr.msk.bf16.mxu1 %vm2126_vm4, %v25482_v54 }
 0x4d4   : > { %13628 = vmatprep.mubr.msk.bf16.mxu0 %vm2126_vm4, %v25489_v12 }
 0x4da   : > { %13341 = vmatmul.mubr.msk.bf16.gmra.mrb[60].mxu1 %vm2126_vm4, %v25484_v22 }
 0x4db   : > { %13629 = vmatmul.mubr.msk.bf16.gmra.mrb[60].mxu0 %vm2126_vm4, %v25490_v60 }
 0x4f5   : > { %v13210_v45 = vpop.f32.mrb[0].mxu1 }
 0x4f6   : > { %v3470_v50 = vpop.f32.mrb[1].mxu1 }
 0x4f7   : > { %v13211_v55 = vpop.f32.mrb[2].mxu1 }
 0x4f8   : > { %v3473_v32 = vpop.f32.mrb[3].mxu1 }
 0x4fd   : > { %v13214_v21 = vpop.f32.mrb[4].mxu1 }
 0x4fe   : > { %v3486_v52 = vpop.f32.mrb[5].mxu1 }
 0x4ff   : > { %v13215_v27 = vpop.f32.mrb[6].mxu1 }
 0x500   : > { %v3489_v2 = vpop.f32.mrb[7].mxu1 }
 0x505   : > { %v18296_v1 = vpop.f32.mrb[8].mxu1 }
 0x506   : > { %v18298_v30 = vpop.f32.mrb[9].mxu1 }
 0x507   : > { %v18300_v51 = vpop.f32.mrb[10].mxu1 }
 0x508   : > { %v18302_v63 = vpop.f32.mrb[11].mxu1 }
 0x50d   : > { %v18304_v22 = vpop.f32.mrb[12].mxu1 }
 0x50e   : > { %v18306_v14 = vpop.f32.mrb[13].mxu1 }
 0x50f   : > { %v18308_v5 = vpop.f32.mrb[14].mxu1 }
 0x510   : > { %v18310_v19 = vpop.f32.mrb[15].mxu1 }
 0x515   : > { %v18312_v34 = vpop.f32.mrb[16].mxu1 }
 0x516   : > { %v18314_v11 = vpop.f32.mrb[17].mxu1 }
 0x517   : > { %v18316_v17 = vpop.f32.mrb[18].mxu1 }
 0x518   : > { %v18318_v10 = vpop.f32.mrb[19].mxu1 }
 0x51d   : > { %v18320_v44 = vpop.f32.mrb[20].mxu1 }
 0x51e   : > { %v18322_v37 = vpop.f32.mrb[21].mxu1 }
 0x51f   : > { %v18324_v42 = vpop.f32.mrb[22].mxu1 }
 0x520   : > { %v18326_v41 = vpop.f32.mrb[23].mxu1 }
 0x525   : > { %v18328_v58 = vpop.f32.mrb[24].mxu1 }
 0x526   : > { %v18330_v3 = vpop.f32.mrb[25].mxu1 }
 0x527   : > { %v18332_v6 = vpop.f32.mrb[26].mxu1 }
 0x528   : > { %v18334_v28 = vpop.f32.mrb[27].mxu1 }
 0x52d   : > { %v18336_v0 = vpop.f32.mrb[28].mxu1 }
 0x52e   : > { %v18338_v4 = vpop.f32.mrb[29].mxu1 }
 0x52f   : > { %v18340_v38 = vpop.f32.mrb[30].mxu1 }
 0x530   : > { %v18342_v49 = vpop.f32.mrb[31].mxu1 }
 0x536   : > { %v13570_v15 = vpop.f32.mrb[0].mxu0 }
 0x537   : > { %v13642_v33 = vadd.f32 %v13570_v15, %v13210_v45  ;;  %v5400_v13 = vpop.f32.mrb[1].mxu0 }
 0x538   : > { %v13643_v18 = vadd.f32 %v5400_v13, %v3470_v50  ;;  %v13571_v53 = vpop.f32.mrb[2].mxu0 }
 0x539   : > { %v18354_v62 = vadd.f32 %v13642_v33, %v18351_v43  ;;  %v13644_v8 = vadd.f32 %v13571_v53, %v13211_v55  ;;  %v5403_v39 = vpop.f32.mrb[3].mxu0 }
 0x53a   : > { %v18357_v9 = vadd.f32 %v13643_v18, %v18351_v43  ;;  %v13645_v20 = vadd.f32 %v5403_v39, %v3473_v32 }
 0x53b   : > { %v18362_v26 = vadd.f32 %v13644_v8, %v18351_v43  ;;  %v5924_v16 = vmul.f32 %v18354_v62, %v18354_v62  ;;  %v5792_v46 = vsel %vm2126_vm4, %v18354_v62, 0.0 }
 0x53c   : > { %v5922_v23 = vmul.f32 %v18357_v9, %v18357_v9  ;;  %v18365_v59 = vadd.f32 %v13645_v20, %v18351_v43  ;;  %v5789_v31 = vsel %vm2126_vm4, %v18357_v9, 0.0 }
 0x53d   : > { %v5925_v29 = vmul.f32 %v18362_v26, %v18362_v26  ;;  %v5989_v48 = vsel %vm2126_vm4, %v5924_v16, 0.0  ;;  %v5794_v50 = vsel %vm2126_vm4, %v18362_v26, 0.0 }
 0x53e   : > { %v5790_v25 = vsel %vm2126_vm4, %v18365_v59, 0.0  ;;  %v5923_v36 = vmul.f32 %v18365_v59, %v18365_v59  ;;  %v13574_v47 = vpop.f32.mrb[4].mxu0  ;;  %v5986_v24 = vsel %vm2126_vm4, %v5922_v23, 0.0 }
 0x53f   : > { %v5791_v35 = vadd.f32 %v5790_v25, %v5789_v31  ;;  %v13646_v7 = vadd.f32 %v13574_v47, %v13214_v21  ;;  %v5416_v57 = vpop.f32.mrb[5].mxu0 }
 0x540   : > { %v5987_v54 = vsel %vm2126_vm4, %v5923_v36, 0.0  ;;  %v13647_v56 = vadd.f32 %v5416_v57, %v3486_v52  ;;  %v13575_v61 = vpop.f32.mrb[6].mxu0  ;;  %v5991_v52 = vsel %vm2126_vm4, %v5925_v29, 0.0 }
 0x541   : > { %v5793_v40 = vadd.f32 %v5792_v46, %v5791_v35  ;;  %v5988_v12 = vadd.f32 %v5987_v54, %v5986_v24  ;;  %v13648_v60 = vadd.f32 %v13575_v61, %v13215_v27  ;;  %v5419_v45 = vpop.f32.mrb[7].mxu0  ;;  %v18385_v55 = vadd.f32 %v13646_v7, %v18351_v43 }
 0x542   : > { %v18388_v32 = vadd.f32 %v13647_v56, %v18351_v43  ;;  %v13649_v21 = vadd.f32 %v5419_v45, %v3489_v2 }
 0x543   : > { %v5990_v15 = vadd.f32 %v5989_v48, %v5988_v12  ;;  %v5795_v33 = vadd.f32 %v5794_v50, %v5793_v40  ;;  %v18399_v39 = vadd.f32 %v13648_v60, %v18351_v43  ;;  %v5928_v2 = vmul.f32 %v18385_v55, %v18385_v55 }
 0x544   : > { %v5796_v13 = vsel %vm2126_vm4, %v18388_v32, 0.0  ;;  %v5926_v27 = vmul.f32 %v18388_v32, %v18388_v32  ;;  %v18396_v18 = vadd.f32 %v13649_v21, %v18351_v43  ;;  %v5800_v35 = vsel %vm2126_vm4, %v18385_v55, 0.0 }
 0x545   : > { %v5797_v53 = vadd.f32 %v5796_v13, %v5795_v33  ;;  %v5992_v8 = vadd.f32 %v5991_v52, %v5990_v15  ;;  %v5929_v24 = vmul.f32 %v18399_v39, %v18399_v39  ;;  %v5802_v48 = vsel %vm2126_vm4, %v18399_v39, 0.0 }
 0x546   : > { %v5993_v20 = vsel %vm2126_vm4, %v5926_v27, 0.0  ;;  %v5798_v23 = vsel %vm2126_vm4, %v18396_v18, 0.0  ;;  %v13578_v16 = vpop.f32.mrb[8].mxu0  ;;  %v5927_v36 = vmul.f32 %v18396_v18, %v18396_v18 }
 0x547   : > { %v5994_v31 = vadd.f32 %v5993_v20, %v5992_v8  ;;  %v5799_v25 = vadd.f32 %v5798_v23, %v5797_v53  ;;  %v13650_v47 = vadd.f32 %v13578_v16, %v18296_v1  ;;  %v5432_v46 = vpop.f32.mrb[9].mxu0  ;;  %v5999_v33 = vsel %vm2126_vm4, %v5929_v24, 0.0 }
 0x548   : > { %v13651_v7 = vadd.f32 %v5432_v46, %v18298_v30  ;;  %v13579_v57 = vpop.f32.mrb[10].mxu0  ;;  %v5995_v54 = vsel %vm2126_vm4, %v5927_v36, 0.0  ;;  %v5997_v30 = vsel %vm2126_vm4, %v5928_v2, 0.0 }
 0x549   : > { %v5801_v29 = vadd.f32 %v5800_v35, %v5799_v25  ;;  %v13652_v56 = vadd.f32 %v13579_v57, %v18300_v51  ;;  %v5435_v61 = vpop.f32.mrb[11].mxu0  ;;  %v5996_v1 = vadd.f32 %v5995_v54, %v5994_v31  ;;  %v18424_v60 = vadd.f32 %v13650_v47, %v18351_v43 }
 0x54a   : > { %v18419_v40 = vadd.f32 %v13651_v7, %v18351_v43  ;;  %v13653_v12 = vadd.f32 %v5435_v61, %v18302_v63 }
 0x54b   : > { %v5803_v45 = vadd.f32 %v5802_v48, %v5801_v29  ;;  %v5998_v50 = vadd.f32 %v5997_v30, %v5996_v1  ;;  %v18435_v63 = vadd.f32 %v13652_v56, %v18351_v43  ;;  %v5932_v20 = vmul.f32 %v18424_v60, %v18424_v60 }
 0x54c   : > { %v5804_v51 = vsel %vm2126_vm4, %v18419_v40, 0.0  ;;  %v5930_v21 = vmul.f32 %v18419_v40, %v18419_v40  ;;  %v18431_v15 = vadd.f32 %v13653_v12, %v18351_v43  ;;  %v5808_v25 = vsel %vm2126_vm4, %v18424_v60, 0.0 }
 0x54d   : > { %v5805_v52 = vadd.f32 %v5804_v51, %v5803_v45  ;;  %v6000_v13 = vadd.f32 %v5999_v33, %v5998_v50  ;;  %v5933_v7 = vmul.f32 %v18435_v63, %v18435_v63  ;;  %v6005_v48 = vsel %vm2126_vm4, %v5932_v20, 0.0 }
 0x54e   : > { %v6001_v27 = vsel %vm2126_vm4, %v5930_v21, 0.0  ;;  %v5806_v53 = vsel %vm2126_vm4, %v18431_v15, 0.0  ;;  %v5931_v8 = vmul.f32 %v18431_v15, %v18431_v15  ;;  %v13582_v2 = vpop.f32.mrb[12].mxu0 }
 0x54f   : > { %v5807_v23 = vadd.f32 %v5806_v53, %v5805_v52  ;;  %v13654_v16 = vadd.f32 %v13582_v2, %v18304_v22  ;;  %v5448_v31 = vpop.f32.mrb[13].mxu0  ;;  %v6002_v36 = vadd.f32 %v6001_v27, %v6000_v13  ;;  %v5810_v22 = vsel %vm2126_vm4, %v18435_v63, 0.0 }
 0x550   : > { %v6003_v47 = vsel %vm2126_vm4, %v5931_v8, 0.0  ;;  %v13655_v46 = vadd.f32 %v5448_v31, %v18306_v14  ;;  %v13583_v35 = vpop.f32.mrb[14].mxu0  ;;  %v6007_v50 = vsel %vm2126_vm4, %v5933_v7, 0.0 }
 0x551   : > { %v5809_v57 = vadd.f32 %v5808_v25, %v5807_v23  ;;  %v13656_v24 = vadd.f32 %v13583_v35, %v18308_v5  ;;  %v5451_v29 = vpop.f32.mrb[15].mxu0  ;;  %v6004_v54 = vadd.f32 %v6003_v47, %v6002_v36  ;;  %v18460_v14 = vadd.f32 %v13654_v16, %v18351_v43 }
 0x552   : > { %v18455_v56 = vadd.f32 %v13655_v46, %v18351_v43  ;;  %v13657_v61 = vadd.f32 %v5451_v29, %v18310_v19 }
 0x553   : > { %v5811_v1 = vadd.f32 %v5810_v22, %v5809_v57  ;;  %v6006_v12 = vadd.f32 %v6005_v48, %v6004_v54  ;;  %v18471_v19 = vadd.f32 %v13656_v24, %v18351_v43  ;;  %v5936_v53 = vmul.f32 %v18460_v14, %v18460_v14 }
 0x554   : > { %v5812_v5 = vsel %vm2126_vm4, %v18455_v56, 0.0  ;;  %v5934_v30 = vmul.f32 %v18455_v56, %v18455_v56  ;;  %v18467_v45 = vadd.f32 %v13657_v61, %v18351_v43  ;;  %v5816_v23 = vsel %vm2126_vm4, %v18460_v14, 0.0 }
 0x555   : > { %v5813_v51 = vadd.f32 %v5812_v5, %v5811_v1  ;;  %v6008_v21 = vadd.f32 %v6007_v50, %v6006_v12  ;;  %v5937_v47 = vmul.f32 %v18471_v19, %v18471_v19  ;;  %v6013_v22 = vsel %vm2126_vm4, %v5936_v53, 0.0 }
 0x556   : > { %v6009_v33 = vsel %vm2126_vm4, %v5934_v30, 0.0  ;;  %v5814_v52 = vsel %vm2126_vm4, %v18467_v45, 0.0  ;;  %v5935_v13 = vmul.f32 %v18467_v45, %v18467_v45  ;;  %v13586_v27 = vpop.f32.mrb[16].mxu0 }
 0x557   : > { %v5815_v8 = vadd.f32 %v5814_v52, %v5813_v51  ;;  %v13658_v2 = vadd.f32 %v13586_v27, %v18312_v34  ;;  %v5464_v20 = vpop.f32.mrb[17].mxu0  ;;  %v6010_v16 = vadd.f32 %v6009_v33, %v6008_v21  ;;  %v5818_v34 = vsel %vm2126_vm4, %v18471_v19, 0.0 }
 0x558   : > { %v6011_v31 = vsel %vm2126_vm4, %v5935_v13, 0.0  ;;  %v13659_v25 = vadd.f32 %v5464_v20, %v18314_v11  ;;  %v13587_v36 = vpop.f32.mrb[18].mxu0  ;;  %v6015_v12 = vsel %vm2126_vm4, %v5937_v47, 0.0 }
 0x559   : > { %v5817_v46 = vadd.f32 %v5816_v23, %v5815_v8  ;;  %v13660_v35 = vadd.f32 %v13587_v36, %v18316_v17  ;;  %v5467_v7 = vpop.f32.mrb[19].mxu0  ;;  %v6012_v57 = vadd.f32 %v6011_v31, %v6010_v16  ;;  %v18496_v11 = vadd.f32 %v13658_v2, %v18351_v43 }
 0x55a   : > { %v18491_v24 = vadd.f32 %v13659_v25, %v18351_v43  ;;  %v13661_v29 = vadd.f32 %v5467_v7, %v18318_v10 }
 0x55b   : > { %v5819_v54 = vadd.f32 %v5818_v34, %v5817_v46  ;;  %v6014_v61 = vadd.f32 %v6013_v22, %v6012_v57  ;;  %v18507_v10 = vadd.f32 %v13660_v35, %v18351_v43  ;;  %v5940_v52 = vmul.f32 %v18496_v11, %v18496_v11 }
 0x55c   : > { %v5820_v17 = vsel %vm2126_vm4, %v18491_v24, 0.0  ;;  %v5938_v48 = vmul.f32 %v18491_v24, %v18491_v24  ;;  %v18503_v1 = vadd.f32 %v13661_v29, %v18351_v43  ;;  %v5824_v8 = vsel %vm2126_vm4, %v18496_v11, 0.0 }
 0x55d   : > { %v5821_v5 = vadd.f32 %v5820_v17, %v5819_v54  ;;  %v6016_v30 = vadd.f32 %v6015_v12, %v6014_v61  ;;  %v5941_v31 = vmul.f32 %v18507_v10, %v18507_v10  ;;  %v6021_v34 = vsel %vm2126_vm4, %v5940_v52, 0.0 }
 0x55e   : > { %v6017_v50 = vsel %vm2126_vm4, %v5938_v48, 0.0  ;;  %v5822_v51 = vsel %vm2126_vm4, %v18503_v1, 0.0  ;;  %v5939_v21 = vmul.f32 %v18503_v1, %v18503_v1  ;;  %v13590_v33 = vpop.f32.mrb[20].mxu0 }
 0x55f   : > { %v5823_v13 = vadd.f32 %v5822_v51, %v5821_v5  ;;  %v13662_v27 = vadd.f32 %v13590_v33, %v18320_v44  ;;  %v5480_v53 = vpop.f32.mrb[21].mxu0  ;;  %v6018_v2 = vadd.f32 %v6017_v50, %v6016_v30  ;;  %v5826_v44 = vsel %vm2126_vm4, %v18507_v10, 0.0 }
 0x560   : > { %v6019_v20 = vsel %vm2126_vm4, %v5939_v21, 0.0  ;;  %v13663_v23 = vadd.f32 %v5480_v53, %v18322_v37  ;;  %v13591_v16 = vpop.f32.mrb[22].mxu0  ;;  %v6023_v61 = vsel %vm2126_vm4, %v5941_v31, 0.0 }
 0x561   : > { %v5825_v25 = vadd.f32 %v5824_v8, %v5823_v13  ;;  %v13664_v36 = vadd.f32 %v13591_v16, %v18324_v42  ;;  %v5483_v47 = vpop.f32.mrb[23].mxu0  ;;  %v6020_v46 = vadd.f32 %v6019_v20, %v6018_v2  ;;  %v18532_v37 = vadd.f32 %v13662_v27, %v18351_v43 }
 0x562   : > { %v18527_v35 = vadd.f32 %v13663_v23, %v18351_v43  ;;  %v13665_v7 = vadd.f32 %v5483_v47, %v18326_v41 }
 0x563   : > { %v5827_v57 = vadd.f32 %v5826_v44, %v5825_v25  ;;  %v6022_v29 = vadd.f32 %v6021_v34, %v6020_v46  ;;  %v18543_v41 = vadd.f32 %v13664_v36, %v18351_v43  ;;  %v5944_v51 = vmul.f32 %v18532_v37, %v18532_v37 }
 0x564   : > { %v5828_v42 = vsel %vm2126_vm4, %v18527_v35, 0.0  ;;  %v5942_v22 = vmul.f32 %v18527_v35, %v18527_v35  ;;  %v18539_v54 = vadd.f32 %v13665_v7, %v18351_v43  ;;  %v5832_v13 = vsel %vm2126_vm4, %v18532_v37, 0.0 }
 0x565   : > { %v5829_v17 = vadd.f32 %v5828_v42, %v5827_v57  ;;  %v6024_v48 = vadd.f32 %v6023_v61, %v6022_v29  ;;  %v5945_v20 = vmul.f32 %v18543_v41, %v18543_v41  ;;  %v6029_v44 = vsel %vm2126_vm4, %v5944_v51, 0.0 }
 0x566   : > { %v6025_v12 = vsel %vm2126_vm4, %v5942_v22, 0.0  ;;  %v5830_v5 = vsel %vm2126_vm4, %v18539_v54, 0.0  ;;  %v5943_v30 = vmul.f32 %v18539_v54, %v18539_v54  ;;  %v13594_v50 = vpop.f32.mrb[24].mxu0 }
 0x567   : > { %v5831_v21 = vadd.f32 %v5830_v5, %v5829_v17  ;;  %v13666_v33 = vadd.f32 %v13594_v50, %v18328_v58  ;;  %v5496_v52 = vpop.f32.mrb[25].mxu0  ;;  %v6026_v27 = vadd.f32 %v6025_v12, %v6024_v48  ;;  %v5834_v58 = vsel %vm2126_vm4, %v18543_v41, 0.0 }
 0x568   : > { %v6027_v53 = vsel %vm2126_vm4, %v5943_v30, 0.0  ;;  %v13667_v8 = vadd.f32 %v5496_v52, %v18330_v3  ;;  %v13595_v2 = vpop.f32.mrb[26].mxu0  ;;  %v6031_v29 = vsel %vm2126_vm4, %v5945_v20, 0.0 }
 0x569   : > { %v5833_v23 = vadd.f32 %v5832_v13, %v5831_v21  ;;  %v13668_v16 = vadd.f32 %v13595_v2, %v18332_v6  ;;  %v5499_v31 = vpop.f32.mrb[27].mxu0  ;;  %v6028_v25 = vadd.f32 %v6027_v53, %v6026_v27  ;;  %v18568_v3 = vadd.f32 %v13666_v33, %v18351_v43 }
 0x56a   : > { %v18563_v36 = vadd.f32 %v13667_v8, %v18351_v43  ;;  %v13669_v47 = vadd.f32 %v5499_v31, %v18334_v28 }
 0x56b   : > { %v5835_v46 = vadd.f32 %v5834_v58, %v5833_v23  ;;  %v6030_v7 = vadd.f32 %v6029_v44, %v6028_v25  ;;  %v18579_v28 = vadd.f32 %v13668_v16, %v18351_v43  ;;  %v5948_v5 = vmul.f32 %v18568_v3, %v18568_v3 }
 0x56c   : > { %v5836_v6 = vsel %vm2126_vm4, %v18563_v36, 0.0  ;;  %v5946_v34 = vmul.f32 %v18563_v36, %v18563_v36  ;;  %v18575_v57 = vadd.f32 %v13669_v47, %v18351_v43  ;;  %v5840_v21 = vsel %vm2126_vm4, %v18568_v3, 0.0 }
 0x56d   : > { %v5837_v42 = vadd.f32 %v5836_v6, %v5835_v46  ;;  %v6032_v22 = vadd.f32 %v6031_v29, %v6030_v7  ;;  %v5949_v53 = vmul.f32 %v18579_v28, %v18579_v28  ;;  %v6037_v58 = vsel %vm2126_vm4, %v5948_v5, 0.0 }
 0x56e   : > { %v6033_v61 = vsel %vm2126_vm4, %v5946_v34, 0.0  ;;  %v5838_v17 = vsel %vm2126_vm4, %v18575_v57, 0.0  ;;  %v5947_v48 = vmul.f32 %v18575_v57, %v18575_v57  ;;  %v13598_v12 = vpop.f32.mrb[28].mxu0 }
 0x56f   : > { %v5839_v30 = vadd.f32 %v5838_v17, %v5837_v42  ;;  %v13670_v50 = vadd.f32 %v13598_v12, %v18336_v0  ;;  %v5512_v51 = vpop.f32.mrb[29].mxu0  ;;  %v6034_v33 = vadd.f32 %v6033_v61, %v6032_v22  ;;  %v5842_v0 = vsel %vm2126_vm4, %v18579_v28, 0.0 }
 0x570   : > { %v6035_v52 = vsel %vm2126_vm4, %v5947_v48, 0.0  ;;  %v13671_v13 = vadd.f32 %v5512_v51, %v18338_v4  ;;  %v13599_v27 = vpop.f32.mrb[30].mxu0  ;;  %v6039_v7 = vsel %vm2126_vm4, %v5949_v53, 0.0 }
 0x571   : > { %v5841_v8 = vadd.f32 %v5840_v21, %v5839_v30  ;;  %v13672_v2 = vadd.f32 %v13599_v27, %v18340_v38  ;;  %v5515_v20 = vpop.f32.mrb[31].mxu0  ;;  %v6036_v23 = vadd.f32 %v6035_v52, %v6034_v33  ;;  %v18604_v4 = vadd.f32 %v13670_v50, %v18351_v43 }
 0x572   : > { %v18599_v16 = vadd.f32 %v13671_v13, %v18351_v43  ;;  %v13673_v31 = vadd.f32 %v5515_v20, %v18342_v49 }
 0x573   : > { %v5843_v25 = vadd.f32 %v5842_v0, %v5841_v8  ;;  %v6038_v47 = vadd.f32 %v6037_v58, %v6036_v23  ;;  %v18615_v49 = vadd.f32 %v13672_v2, %v18351_v43  ;;  %v5952_v12 = vmul.f32 %v18604_v4, %v18604_v4 }
 0x574   : > { %v5844_v38 = vsel %vm2126_vm4, %v18599_v16, 0.0  ;;  %v5950_v44 = vmul.f32 %v18599_v16, %v18599_v16  ;;  %v18611_v46 = vadd.f32 %v13673_v31, %v18351_v43  ;;  %v5848_v21 = vsel %vm2126_vm4, %v18604_v4, 0.0 }
 0x575   : > { %v5845_v6 = vadd.f32 %v5844_v38, %v5843_v25  ;;  %25491 = vst [vmem:[#allocation192_spill] sm:$0xff] %v18615_v49  ;;  %v13314_v34 = vpop.f32.mrb[32].mxu1  ;;  %v6040_v29 = vadd.f32 %v6039_v7, %v6038_v47  ;;  %v5953_v8 = vmul.f32 %v18615_v49, %v18615_v49  ;;  %v5850_v23 = vsel %vm2126_vm4, %v18615_v49, 0.0 }
 0x576   : > { %v6041_v42 = vsel %vm2126_vm4, %v5950_v44, 0.0  ;;  %v5846_v22 = vsel %vm2126_vm4, %v18611_v46, 0.0  ;;  %v5951_v61 = vmul.f32 %v18611_v46, %v18611_v46  ;;  %v13602_v17 = vpop.f32.mrb[32].mxu0  ;;  %v3984_v48 = vpop.f32.mrb[33].mxu1  ;;  %v6045_v47 = vsel %vm2126_vm4, %v5952_v12, 0.0 }
 0x577   : > { %v5847_v5 = vadd.f32 %v5846_v22, %v5845_v6  ;;  %v13674_v30 = vadd.f32 %v13602_v17, %v13314_v34  ;;  %v5528_v50 = vpop.f32.mrb[33].mxu0  ;;  %v13315_v51 = vpop.f32.mrb[34].mxu1  ;;  %v6042_v33 = vadd.f32 %v6041_v42, %v6040_v29  ;;  %v6047_v42 = vsel %vm2126_vm4, %v5953_v8, 0.0 }
 0x578   : > { %v6043_v52 = vsel %vm2126_vm4, %v5951_v61, 0.0  ;;  %v13675_v13 = vadd.f32 %v5528_v50, %v3984_v48  ;;  %v13603_v27 = vpop.f32.mrb[34].mxu0  ;;  %v3987_v53 = vpop.f32.mrb[35].mxu1 }
 0x579   : > { %v5849_v2 = vadd.f32 %v5848_v21, %v5847_v5  ;;  %v13676_v20 = vadd.f32 %v13603_v27, %v13315_v51  ;;  %v5531_v0 = vpop.f32.mrb[35].mxu0  ;;  %v6044_v31 = vadd.f32 %v6043_v52, %v6042_v33  ;;  %v18636_v38 = vadd.f32 %v13674_v30, %v18351_v43 }
 0x57a   : > { %v18632_v58 = vadd.f32 %v13675_v13, %v18351_v43  ;;  %v13677_v25 = vadd.f32 %v5531_v0, %v3987_v53 }
 0x57b   : > { %25493 = vst [vmem:[#allocation194_spill] sm:$0xff] %v18636_v38  ;;  %v5851_v44 = vadd.f32 %v5850_v23, %v5849_v2  ;;  %v6046_v7 = vadd.f32 %v6045_v47, %v6044_v31  ;;  %v18647_v61 = vadd.f32 %v13676_v20, %v18351_v43  ;;  %v5956_v21 = vmul.f32 %v18636_v38, %v18636_v38 }
 0x57c   : > { %25492 = vst [vmem:[#allocation164_spill] sm:$0xff] %v18632_v58  ;;  %v5852_v6 = vsel %vm2126_vm4, %v18632_v58, 0.0  ;;  %v5954_v34 = vmul.f32 %v18632_v58, %v18632_v58  ;;  %v18643_v29 = vadd.f32 %v13677_v25, %v18351_v43  ;;  %v5856_v53 = vsel %vm2126_vm4, %v18636_v38, 0.0 }
 0x57d   : > { %v5853_v22 = vadd.f32 %v5852_v6, %v5851_v44  ;;  %25495 = vst [vmem:[#allocation196_spill] sm:$0xff] %v18647_v61  ;;  %v13318_v17 = vpop.f32.mrb[36].mxu1  ;;  %v6048_v48 = vadd.f32 %v6047_v42, %v6046_v7  ;;  %v5957_v31 = vmul.f32 %v18647_v61, %v18647_v61  ;;  %v5858_v7 = vsel %vm2126_vm4, %v18647_v61, 0.0 }
 0x57e   : > { %25494 = vst [vmem:[#allocation165_spill] sm:$0xff] %v18643_v29  ;;  %v6049_v12 = vsel %vm2126_vm4, %v5954_v34, 0.0  ;;  %v5854_v5 = vsel %vm2126_vm4, %v18643_v29, 0.0  ;;  %v5955_v30 = vmul.f32 %v18643_v29, %v18643_v29  ;;  %v13606_v50 = vpop.f32.mrb[36].mxu0  ;;  %v4000_v51 = vpop.f32.mrb[37].mxu1 }
 0x57f   : > { %v5855_v33 = vadd.f32 %v5854_v5, %v5853_v22  ;;  %v13678_v52 = vadd.f32 %v13606_v50, %v13318_v17  ;;  %v5544_v13 = vpop.f32.mrb[37].mxu0  ;;  %v13319_v27 = vpop.f32.mrb[38].mxu1  ;;  %v6050_v8 = vadd.f32 %v6049_v12, %v6048_v48  ;;  %v6053_v22 = vsel %vm2126_vm4, %v5956_v21, 0.0 }
 0x580   : > { %v6051_v2 = vsel %vm2126_vm4, %v5955_v30, 0.0  ;;  %v13679_v20 = vadd.f32 %v5544_v13, %v4000_v51  ;;  %v13607_v0 = vpop.f32.mrb[38].mxu0  ;;  %v4003_v23 = vpop.f32.mrb[39].mxu1  ;;  %v6055_v51 = vsel %vm2126_vm4, %v5957_v31, 0.0 }
 0x581   : > { %v5857_v25 = vadd.f32 %v5856_v53, %v5855_v33  ;;  %v13680_v47 = vadd.f32 %v13607_v0, %v13319_v27  ;;  %v5547_v44 = vpop.f32.mrb[39].mxu0  ;;  %v6052_v6 = vadd.f32 %v6051_v2, %v6050_v8  ;;  %v18668_v17 = vadd.f32 %v13678_v52, %v18351_v43 }
 0x582   : > { %v18664_v34 = vadd.f32 %v13679_v20, %v18351_v43  ;;  %v13681_v42 = vadd.f32 %v5547_v44, %v4003_v23 }
 0x583   : > { %25497 = vst [vmem:[#allocation198_spill] sm:$0xff] %v18668_v17  ;;  %v5859_v48 = vadd.f32 %v5858_v7, %v5857_v25  ;;  %v6054_v12 = vadd.f32 %v6053_v22, %v6052_v6  ;;  %v18679_v13 = vadd.f32 %v13680_v47, %v18351_v43  ;;  %v5960_v0 = vmul.f32 %v18668_v17, %v18668_v17 }
 0x584   : > { %25496 = vst [vmem:[#allocation166_spill] sm:$0xff] %v18664_v34  ;;  %v5860_v5 = vsel %vm2126_vm4, %v18664_v34, 0.0  ;;  %v5958_v30 = vmul.f32 %v18664_v34, %v18664_v34  ;;  %v18675_v50 = vadd.f32 %v13681_v42, %v18351_v43  ;;  %v5864_v44 = vsel %vm2126_vm4, %v18668_v17, 0.0 }
 0x585   : > { %v5861_v33 = vadd.f32 %v5860_v5, %v5859_v48  ;;  %25499 = vst [vmem:[#allocation162_spill] sm:$0xff] %v18679_v13  ;;  %v13322_v21 = vpop.f32.mrb[40].mxu1  ;;  %v6056_v52 = vadd.f32 %v6055_v51, %v6054_v12  ;;  %v5961_v12 = vmul.f32 %v18679_v13, %v18679_v13 }
 0x586   : > { %25498 = vst [vmem:[#allocation161_spill] sm:$0xff] %v18675_v50  ;;  %v6057_v27 = vsel %vm2126_vm4, %v5958_v30, 0.0  ;;  %v5862_v53 = vsel %vm2126_vm4, %v18675_v50, 0.0  ;;  %v5959_v8 = vmul.f32 %v18675_v50, %v18675_v50  ;;  %v13610_v2 = vpop.f32.mrb[40].mxu0  ;;  %v4016_v20 = vpop.f32.mrb[41].mxu1 }
 0x587   : > { %v5863_v23 = vadd.f32 %v5862_v53, %v5861_v33  ;;  %v13682_v31 = vadd.f32 %v13610_v2, %v13322_v21  ;;  %v5560_v25 = vpop.f32.mrb[41].mxu0  ;;  %v13323_v47 = vpop.f32.mrb[42].mxu1  ;;  %v6058_v7 = vadd.f32 %v6057_v27, %v6056_v52  ;;  %v5866_v33 = vsel %vm2126_vm4, %v18679_v13, 0.0 }
 0x588   : > { %v6059_v6 = vsel %vm2126_vm4, %v5959_v8, 0.0  ;;  %v13683_v42 = vadd.f32 %v5560_v25, %v4016_v20  ;;  %v13611_v22 = vpop.f32.mrb[42].mxu0  ;;  %v4019_v48 = vpop.f32.mrb[43].mxu1  ;;  %v6061_v52 = vsel %vm2126_vm4, %v5960_v0, 0.0 }
 0x589   : > { %v5865_v5 = vadd.f32 %v5864_v44, %v5863_v23  ;;  %v13684_v30 = vadd.f32 %v13611_v22, %v13323_v47  ;;  %v5563_v51 = vpop.f32.mrb[43].mxu0  ;;  %v6060_v21 = vadd.f32 %v6059_v6, %v6058_v7  ;;  %v18700_v27 = vadd.f32 %v13682_v31, %v18351_v43 }
 0x58a   : > { %v18696_v53 = vadd.f32 %v13683_v42, %v18351_v43  ;;  %v13685_v2 = vadd.f32 %v5563_v51, %v4019_v48  ;;  %v6063_v44 = vsel %vm2126_vm4, %v5961_v12, 0.0 }
 0x58b   : > { %25501 = vst [vmem:[#allocation186_spill] sm:$0xff] %v18700_v27  ;;  %v5867_v8 = vadd.f32 %v5866_v33, %v5865_v5  ;;  %v6062_v20 = vadd.f32 %v6061_v52, %v6060_v21  ;;  %v18711_v6 = vadd.f32 %v13684_v30, %v18351_v43  ;;  %v5964_v33 = vmul.f32 %v18700_v27, %v18700_v27 }
 0x58c   : > { %25500 = vst [vmem:[#allocation169_spill] sm:$0xff] %v18696_v53  ;;  %v5868_v23 = vsel %vm2126_vm4, %v18696_v53, 0.0  ;;  %v5962_v25 = vmul.f32 %v18696_v53, %v18696_v53  ;;  %v18707_v47 = vadd.f32 %v13685_v2, %v18351_v43  ;;  %v5872_v52 = vsel %vm2126_vm4, %v18700_v27, 0.0 }
 0x58d   : > { %v5869_v7 = vadd.f32 %v5868_v23, %v5867_v8  ;;  %25503 = vst [vmem:[#allocation171_spill] sm:$0xff] %v18711_v6  ;;  %v13326_v0 = vpop.f32.mrb[44].mxu1  ;;  %v6064_v31 = vadd.f32 %v6063_v44, %v6062_v20 }
 0x58e   : > { %25502 = vst [vmem:[#allocation170_spill] sm:$0xff] %v18707_v47  ;;  %v6065_v42 = vsel %vm2126_vm4, %v5962_v25, 0.0  ;;  %v5870_v22 = vsel %vm2126_vm4, %v18707_v47, 0.0  ;;  %v5963_v48 = vmul.f32 %v18707_v47, %v18707_v47  ;;  %v13614_v5 = vpop.f32.mrb[44].mxu0  ;;  %v4032_v51 = vpop.f32.mrb[45].mxu1  ;;  %v5965_v47 = vmul.f32 %v18711_v6, %v18711_v6 }
 0x58f   : > { %v5871_v12 = vadd.f32 %v5870_v22, %v5869_v7  ;;  %v13686_v21 = vadd.f32 %v13614_v5, %v13326_v0  ;;  %v5576_v2 = vpop.f32.mrb[45].mxu0  ;;  %v13327_v30 = vpop.f32.mrb[46].mxu1  ;;  %v6066_v8 = vadd.f32 %v6065_v42, %v6064_v31  ;;  %v5874_v7 = vsel %vm2126_vm4, %v18711_v6, 0.0 }
 0x590   : > { %v6067_v20 = vsel %vm2126_vm4, %v5963_v48, 0.0  ;;  %v13687_v23 = vadd.f32 %v5576_v2, %v4032_v51  ;;  %v13615_v25 = vpop.f32.mrb[46].mxu0  ;;  %v4035_v44 = vpop.f32.mrb[47].mxu1  ;;  %v6069_v31 = vsel %vm2126_vm4, %v5964_v33, 0.0 }
 0x591   : > { %v5873_v53 = vadd.f32 %v5872_v52, %v5871_v12  ;;  %v13688_v13 = vadd.f32 %v13615_v25, %v13327_v30  ;;  %v5579_v17 = vpop.f32.mrb[47].mxu0  ;;  %v6068_v0 = vadd.f32 %v6067_v20, %v6066_v8  ;;  %v18732_v42 = vadd.f32 %v13686_v21, %v18351_v43 }
 0x592   : > { %v18728_v22 = vadd.f32 %v13687_v23, %v18351_v43  ;;  %v13689_v5 = vadd.f32 %v5579_v17, %v4035_v44  ;;  %v6071_v52 = vsel %vm2126_vm4, %v5965_v47, 0.0 }
 0x593   : > { %25505 = vst [vmem:[#allocation160_spill] sm:$0xff] %v18732_v42  ;;  %v5875_v48 = vadd.f32 %v5874_v7, %v5873_v53  ;;  %v6070_v51 = vadd.f32 %v6069_v31, %v6068_v0  ;;  %v18743_v17 = vadd.f32 %v13688_v13, %v18351_v43  ;;  %v5968_v7 = vmul.f32 %v18732_v42, %v18732_v42 }
 0x594   : > { %25504 = vst [vmem:[#allocation159_spill] sm:$0xff] %v18728_v22  ;;  %v5876_v12 = vsel %vm2126_vm4, %v18728_v22, 0.0  ;;  %v5966_v2 = vmul.f32 %v18728_v22, %v18728_v22  ;;  %v18739_v30 = vadd.f32 %v13689_v5, %v18351_v43  ;;  %v5880_v31 = vsel %vm2126_vm4, %v18732_v42, 0.0 }
 0x595   : > { %v5877_v8 = vadd.f32 %v5876_v12, %v5875_v48  ;;  %25507 = vst [vmem:[#allocation172_spill] sm:$0xff] %v18743_v17  ;;  %v13330_v33 = vpop.f32.mrb[48].mxu1  ;;  %v6072_v21 = vadd.f32 %v6071_v52, %v6070_v51 }
 0x596   : > { %25506 = vst [vmem:[#allocation187_spill] sm:$0xff] %v18739_v30  ;;  %v6073_v53 = vsel %vm2126_vm4, %v5966_v2, 0.0  ;;  %v5878_v20 = vsel %vm2126_vm4, %v18739_v30, 0.0  ;;  %v5967_v23 = vmul.f32 %v18739_v30, %v18739_v30  ;;  %v13618_v25 = vpop.f32.mrb[48].mxu0  ;;  %v4048_v44 = vpop.f32.mrb[49].mxu1  ;;  %v5969_v30 = vmul.f32 %v18743_v17, %v18743_v17 }
 0x597   : > { %v5879_v47 = vadd.f32 %v5878_v20, %v5877_v8  ;;  %v13690_v0 = vadd.f32 %v13618_v25, %v13330_v33  ;;  %v5592_v5 = vpop.f32.mrb[49].mxu0  ;;  %v13331_v13 = vpop.f32.mrb[50].mxu1  ;;  %v6074_v48 = vadd.f32 %v6073_v53, %v6072_v21  ;;  %v5882_v8 = vsel %vm2126_vm4, %v18743_v17, 0.0 }
 0x598   : > { %v6075_v51 = vsel %vm2126_vm4, %v5967_v23, 0.0  ;;  %v13691_v12 = vadd.f32 %v5592_v5, %v4048_v44  ;;  %v13619_v2 = vpop.f32.mrb[50].mxu0  ;;  %v4051_v52 = vpop.f32.mrb[51].mxu1  ;;  %v6077_v21 = vsel %vm2126_vm4, %v5968_v7, 0.0 }
 0x599   : > { %v5881_v22 = vadd.f32 %v5880_v31, %v5879_v47  ;;  %v13692_v6 = vadd.f32 %v13619_v2, %v13331_v13  ;;  %v5595_v27 = vpop.f32.mrb[51].mxu0  ;;  %v6076_v33 = vadd.f32 %v6075_v51, %v6074_v48  ;;  %v18764_v53 = vadd.f32 %v13690_v0, %v18351_v43 }
 0x59a   : > { %v18760_v20 = vadd.f32 %v13691_v12, %v18351_v43  ;;  %v13693_v25 = vadd.f32 %v5595_v27, %v4051_v52  ;;  %v6079_v31 = vsel %vm2126_vm4, %v5969_v30, 0.0 }
 0x59b   : > { %v5883_v23 = vadd.f32 %v5882_v8, %v5881_v22  ;;  %v6078_v44 = vadd.f32 %v6077_v21, %v6076_v33  ;;  %v18775_v27 = vadd.f32 %v13692_v6, %v18351_v43  ;;  %v5972_v8 = vmul.f32 %v18764_v53, %v18764_v53 }
 0x59c   : > { %v5884_v47 = vsel %vm2126_vm4, %v18760_v20, 0.0  ;;  %v5970_v5 = vmul.f32 %v18760_v20, %v18760_v20  ;;  %v18771_v13 = vadd.f32 %v13693_v25, %v18351_v43  ;;  %v5888_v21 = vsel %vm2126_vm4, %v18764_v53, 0.0 }
 0x59d   : > { %v5885_v48 = vadd.f32 %v5884_v47, %v5883_v23  ;;  %v13334_v7 = vpop.f32.mrb[52].mxu1  ;;  %v6080_v0 = vadd.f32 %v6079_v31, %v6078_v44  ;;  %v5973_v17 = vmul.f32 %v18775_v27, %v18775_v27 }
 0x59e   : > { %v6081_v22 = vsel %vm2126_vm4, %v5970_v5, 0.0  ;;  %v5886_v51 = vsel %vm2126_vm4, %v18771_v13, 0.0  ;;  %v5971_v12 = vmul.f32 %v18771_v13, %v18771_v13  ;;  %v13622_v2 = vpop.f32.mrb[52].mxu0  ;;  %v4064_v52 = vpop.f32.mrb[53].mxu1 }
 0x59f   : > { %v5887_v30 = vadd.f32 %v5886_v51, %v5885_v48  ;;  %v13694_v33 = vadd.f32 %v13622_v2, %v13334_v7  ;;  %v5608_v25 = vpop.f32.mrb[53].mxu0  ;;  %v13335_v6 = vpop.f32.mrb[54].mxu1  ;;  %v6082_v23 = vadd.f32 %v6081_v22, %v6080_v0  ;;  %v5890_v48 = vsel %vm2126_vm4, %v18775_v27, 0.0 }
 0x5a0   : > { %v6083_v44 = vsel %vm2126_vm4, %v5971_v12, 0.0  ;;  %v13695_v47 = vadd.f32 %v5608_v25, %v4064_v52  ;;  %v13623_v5 = vpop.f32.mrb[54].mxu0  ;;  %v4067_v31 = vpop.f32.mrb[55].mxu1  ;;  %v6085_v0 = vsel %vm2126_vm4, %v5972_v8, 0.0 }
 0x5a1   : > { %v5889_v42 = vadd.f32 %v5888_v21, %v5887_v30  ;;  %v13696_v50 = vadd.f32 %v13623_v5, %v13335_v6  ;;  %v5611_v34 = vpop.f32.mrb[55].mxu0  ;;  %v6084_v7 = vadd.f32 %v6083_v44, %v6082_v23  ;;  %v18796_v22 = vadd.f32 %v13694_v33, %v18351_v43 }
 0x5a2   : > { %v18792_v51 = vadd.f32 %v13695_v47, %v18351_v43  ;;  %v13697_v2 = vadd.f32 %v5611_v34, %v4067_v31  ;;  %v6087_v21 = vsel %vm2126_vm4, %v5973_v17, 0.0 }
 0x5a3   : > { %25508 = vst [vmem:[#allocation173_spill] sm:$0xff] %v18796_v22  ;;  %v5891_v12 = vadd.f32 %v5890_v48, %v5889_v42  ;;  %v6086_v52 = vadd.f32 %v6085_v0, %v6084_v7  ;;  %v18807_v34 = vadd.f32 %v13696_v50, %v18351_v43  ;;  %v5976_v48 = vmul.f32 %v18796_v22, %v18796_v22 }
 0x5a4   : > { %v5892_v30 = vsel %vm2126_vm4, %v18792_v51, 0.0  ;;  %v5974_v25 = vmul.f32 %v18792_v51, %v18792_v51  ;;  %v18803_v6 = vadd.f32 %v13697_v2, %v18351_v43  ;;  %v5896_v0 = vsel %vm2126_vm4, %v18796_v22, 0.0 }
 0x5a5   : > { %v5893_v23 = vadd.f32 %v5892_v30, %v5891_v12  ;;  %25510 = vst [vmem:[#allocation188_spill] sm:$0xff] %v18807_v34  ;;  %v13338_v8 = vpop.f32.mrb[56].mxu1  ;;  %v6088_v33 = vadd.f32 %v6087_v21, %v6086_v52  ;;  %v5977_v61 = vmul.f32 %v18807_v34, %v18807_v34 }
 0x5a6   : > { %25509 = vst [vmem:[#allocation163_spill] sm:$0xff] %v18803_v6  ;;  %v6089_v42 = vsel %vm2126_vm4, %v5974_v25, 0.0  ;;  %v5894_v44 = vsel %vm2126_vm4, %v18803_v6, 0.0  ;;  %v5975_v47 = vmul.f32 %v18803_v6, %v18803_v6  ;;  %v13626_v5 = vpop.f32.mrb[56].mxu0  ;;  %v4080_v31 = vpop.f32.mrb[57].mxu1 }
 0x5a7   : > { %v5895_v17 = vadd.f32 %v5894_v44, %v5893_v23  ;;  %v13698_v7 = vadd.f32 %v13626_v5, %v13338_v8  ;;  %v5624_v2 = vpop.f32.mrb[57].mxu0  ;;  %v13339_v50 = vpop.f32.mrb[58].mxu1  ;;  %v6090_v12 = vadd.f32 %v6089_v42, %v6088_v33  ;;  %v5898_v23 = vsel %vm2126_vm4, %v18807_v34, 0.0 }
 0x5a8   : > { %v6091_v52 = vsel %vm2126_vm4, %v5975_v47, 0.0  ;;  %v13699_v30 = vadd.f32 %v5624_v2, %v4080_v31  ;;  %v13627_v25 = vpop.f32.mrb[58].mxu0  ;;  %v4083_v21 = vpop.f32.mrb[59].mxu1  ;;  %v6093_v33 = vsel %vm2126_vm4, %v5976_v48, 0.0 }
 0x5a9   : > { %v5897_v38 = vadd.f32 %v5896_v0, %v5895_v17  ;;  %v13700_v29 = vadd.f32 %v13627_v25, %v13339_v50  ;;  %v5627_v58 = vpop.f32.mrb[59].mxu0  ;;  %v6092_v8 = vadd.f32 %v6091_v52, %v6090_v12  ;;  %v18828_v42 = vadd.f32 %v13698_v7, %v18351_v43 }
 0x5aa   : > { %v18824_v44 = vadd.f32 %v13699_v30, %v18351_v43  ;;  %v13701_v5 = vadd.f32 %v5627_v58, %v4083_v21  ;;  %v6095_v0 = vsel %vm2126_vm4, %v5977_v61, 0.0 }
 0x5ab   : > { %25512 = vst [vmem:[#allocation189_spill] sm:$0xff] %v18828_v42  ;;  %v5899_v47 = vadd.f32 %v5898_v23, %v5897_v38  ;;  %v6094_v31 = vadd.f32 %v6093_v33, %v6092_v8  ;;  %v18839_v58 = vadd.f32 %v13700_v29, %v18351_v43  ;;  %v5980_v23 = vmul.f32 %v18828_v42, %v18828_v42 }
 0x5ac   : > { %25511 = vst [vmem:[#allocation174_spill] sm:$0xff] %v18824_v44  ;;  %v5900_v17 = vsel %vm2126_vm4, %v18824_v44, 0.0  ;;  %v5978_v2 = vmul.f32 %v18824_v44, %v18824_v44  ;;  %v18835_v50 = vadd.f32 %v13701_v5, %v18351_v43  ;;  %v5904_v5 = vsel %vm2126_vm4, %v18828_v42, 0.0 }
 0x5ad   : > { %v5901_v12 = vadd.f32 %v5900_v17, %v5899_v47  ;;  %25514 = vst [vmem:[#allocation190_spill] sm:$0xff] %v18839_v58  ;;  %v13342_v48 = vpop.f32.mrb[60].mxu1  ;;  %v6096_v7 = vadd.f32 %v6095_v0, %v6094_v31  ;;  %v5981_v0 = vmul.f32 %v18839_v58, %v18839_v58 }
 0x5ae   : > { %25513 = vst [vmem:[#allocation175_spill] sm:$0xff] %v18835_v50  ;;  %v6097_v38 = vsel %vm2126_vm4, %v5978_v2, 0.0  ;;  %v5902_v52 = vsel %vm2126_vm4, %v18835_v50, 0.0  ;;  %v5979_v30 = vmul.f32 %v18835_v50, %v18835_v50  ;;  %v13630_v25 = vpop.f32.mrb[60].mxu0  ;;  %v4096_v21 = vpop.f32.mrb[61].mxu1 }
 0x5af   : > { %v5903_v61 = vadd.f32 %v5902_v52, %v5901_v12  ;;  %v13702_v8 = vadd.f32 %v13630_v25, %v13342_v48  ;;  %v5640_v43 = vpop.f32.mrb[61].mxu0  ;;  %v13343_v29 = vpop.f32.mrb[62].mxu1  ;;  %v6098_v33 = vadd.f32 %v6097_v38, %v6096_v7  ;;  %v5906_v12 = vsel %vm2126_vm4, %v18839_v58, 0.0  ;;  %v14244_v52 = vld [vmem:[%s18348_s21] ss:$0 sm:$0xff] }
 0x5b0   : > { %v6099_v47 = vsel %vm2126_vm4, %v5979_v30, 0.0  ;;  %v13703_v31 = vadd.f32 %v5640_v43, %v4096_v21  ;;  %v13631_v17 = vpop.f32.mrb[62].mxu0  ;;  %v4099_v2 = vpop.f32.mrb[63].mxu1  ;;  %v6101_v7 = vsel %vm2126_vm4, %v5980_v23, 0.0 }
 0x5b1   : > { %v5905_v49 = vadd.f32 %v5904_v5, %v5903_v61  ;;  %v13704_v50 = vadd.f32 %v13631_v17, %v13343_v29  ;;  %v5643_v44 = vpop.f32.mrb[63].mxu0  ;;  %v6100_v48 = vadd.f32 %v6099_v47, %v6098_v33  ;;  %v18859_v38 = vadd.f32 %v14244_v52, %v13702_v8 }
 0x5b2   : > { %v18856_v25 = vadd.f32 %v14244_v52, %v13703_v31  ;;  %v13705_v42 = vadd.f32 %v5643_v44, %v4099_v2  ;;  %v6103_v5 = vsel %vm2126_vm4, %v5981_v0, 0.0 }
 0x5b3   : > { %25516 = vst [vmem:[#allocation191_spill] sm:$0xff] %v18859_v38  ;;  %v5907_v30 = vadd.f32 %v5906_v12, %v5905_v49  ;;  %v6102_v21 = vadd.f32 %v6101_v7, %v6100_v48  ;;  %v18868_v47 = vadd.f32 %v14244_v52, %v13704_v50  ;;  %v5984_v31 = vmul.f32 %v18859_v38, %v18859_v38 }
 0x5b4   : > { %25515 = vst [vmem:[#allocation176_spill] sm:$0xff] %v18856_v25  ;;  %v5908_v43 = vsel %vm2126_vm4, %v18856_v25, 0.0  ;;  %v5982_v61 = vmul.f32 %v18856_v25, %v18856_v25  ;;  %v18865_v29 = vadd.f32 %v14244_v52, %v13705_v42  ;;  %v5912_v42 = vsel %vm2126_vm4, %v18859_v38, 0.0 }
 0x5b5   : > { %v5909_v33 = vadd.f32 %v5908_v43, %v5907_v30  ;;  %25518 = vst [vmem:[#allocation178_spill] sm:$0xff] %v18868_v47  ;;  %v6104_v44 = vadd.f32 %v6103_v5, %v6102_v21  ;;  %v5985_v0 = vmul.f32 %v18868_v47, %v18868_v47  ;;  %v5914_v48 = vsel %vm2126_vm4, %v18868_v47, 0.0 }
 0x5b6   : > { %25517 = vst [vmem:[#allocation177_spill] sm:$0xff] %v18865_v29  ;;  %v6105_v23 = vsel %vm2126_vm4, %v5982_v61, 0.0  ;;  %v5910_v49 = vsel %vm2126_vm4, %v18865_v29, 0.0  ;;  %v5983_v8 = vmul.f32 %v18865_v29, %v18865_v29  ;;  %v6109_v7 = vsel %vm2126_vm4, %v5984_v31, 0.0 }
 0x5b7   : > { %v5911_v17 = vadd.f32 %v5910_v49, %v5909_v33  ;;  %v6106_v2 = vadd.f32 %v6105_v23, %v6104_v44  ;;  %v6111_v43 = vsel %vm2126_vm4, %v5985_v0, 0.0  ;;  %v6194_v25 = vlaneseq }
 0x5b8   : > { %v6107_v50 = vsel %vm2126_vm4, %v5983_v8, 0.0 }
 0x5b9   : > { %v5913_v12 = vadd.f32 %v5912_v42, %v5911_v17  ;;  %v6108_v52 = vadd.f32 %v6107_v50, %v6106_v2  ;;  %v18890_v0 = vshrl.u32 %v6194_v25, 7 }
 0x5bb   : > { %v5915_v30 = vadd.f32 %v5914_v48, %v5913_v12  ;;  %v6110_v21 = vadd.f32 %v6109_v7, %v6108_v52  ;;  %25519 = vst [vmem:[#allocation193_spill] sm:$0xff] %v18890_v0 }
 0x5bd   : > { %v5916_v61 = vrot.slane %v5915_v30, 4  ;;  %v6112_v5 = vadd.f32 %v6111_v43, %v6110_v21 }
 0x5bf   : > { %v5917_v33 = vadd.f32 %v5916_v61, %v5915_v30  ;;  %v6113_v44 = vrot.slane %v6112_v5, 4  ;;  %v25532_v61 = vld [vmem:[#allocation166_spill] sm:$0xff] }
 0x5c1   : > { %v5918_v23 = vrot.slane %v5917_v33, 2  ;;  %v6114_v49 = vadd.f32 %v6113_v44, %v6112_v5  ;;  %v25528_v44 = vld [vmem:[#allocation165_spill] sm:$0xff]  ;;  %v25531_v5 = vld [vmem:[#allocation196_spill] sm:$0xff] }
 0x5c3   : > { %v5919_v8 = vadd.f32 %v5918_v23, %v5917_v33  ;;  %v6115_v38 = vrot.slane %v6114_v49, 2  ;;  %v25527_v23 = vld [vmem:[#allocation164_spill] sm:$0xff]  ;;  %v25530_v33 = vld [vmem:[#allocation194_spill] sm:$0xff] }
 0x5c5   : > { %v5920_v29 = vrot.slane %v5919_v8, 1  ;;  %v6116_v17 = vadd.f32 %v6115_v38, %v6114_v49  ;;  %v25526_v49 = vld [vmem:[#allocation192_spill] sm:$0xff] }
 0x5c7   : > { %v5921_v42 = vadd.f32 %v5920_v29, %v5919_v8  ;;  %v6117_v47 = vrot.slane %v6116_v17, 1  ;;  %v6126_v8 = vld [vmem:[%s6125_s26] sm:$0x1]  ;;  %v25536_v29 = vld [vmem:[#allocation169_spill] sm:$0xff] }
 0x5c9   : > { %v18886_v2 = vmul.f32 0.001953125, %v5921_v42  ;;  %v6118_v31 = vadd.f32 %v6117_v47, %v6116_v17 }
 0x5cb   : > { %v6121_v50 = vmul.f32 %v18886_v2, %v18886_v2  ;;  %v6120_v12 = vmul.f32 0.001953125, %v6118_v31  ;;  %v6160_v21 = vsub.f32 %v25526_v49, %v18886_v2  ;;  %v6161_v25 = vsub.f32 %v25527_v23, %v18886_v2  ;;  %v25533_v49 = vld [vmem:[#allocation161_spill] sm:$0xff]  ;;  %v25534_v23 = vld [vmem:[#allocation198_spill] sm:$0xff] }
 0x5cc   : > { %v6162_v47 = vsub.f32 %v25528_v44, %v18886_v2  ;;  %v6163_v38 = vsub.f32 %v25530_v33, %v18886_v2  ;;  %v6164_v30 = vsub.f32 %v25531_v5, %v18886_v2  ;;  %v6165_v52 = vsub.f32 %v25532_v61, %v18886_v2  ;;  %v25535_v44 = vld [vmem:[#allocation162_spill] sm:$0xff] }
 0x5cd   : > { %v6122_v48 = vsub.f32 %v6120_v12, %v6121_v50  ;;  %v6166_v50 = vsub.f32 %v25533_v49, %v18886_v2  ;;  %v6167_v31 = vsub.f32 %v25534_v23, %v18886_v2  ;;  %v6168_v58 = vsub.f32 %v25535_v44, %v18886_v2  ;;  %v25537_v33 = vld [vmem:[#allocation170_spill] sm:$0xff]  ;;  %v25541_v23 = vld [vmem:[#allocation159_spill] sm:$0xff] }
 0x5ce   : > { %v6169_v42 = vsub.f32 %v25536_v29, %v18886_v2  ;;  %v6170_v17 = vsub.f32 %v25537_v33, %v18886_v2  ;;  %v25538_v5 = vld [vmem:[#allocation186_spill] sm:$0xff]  ;;  %v25542_v44 = vld [vmem:[#allocation187_spill] sm:$0xff]  ;;  %v25543_v29 = vld [vmem:[#allocation160_spill] sm:$0xff] }
 0x5cf   : > { %v6123_v7 = vadd.f32 1e-05, %v6122_v48  ;;  %v6173_v48 = vsub.f32 %v25541_v23, %v18886_v2  ;;  %v6174_v34 = vsub.f32 %v25542_v44, %v18886_v2  ;;  %v6175_v22 = vsub.f32 %v25543_v29, %v18886_v2  ;;  %v25544_v33 = vld [vmem:[#allocation172_spill] sm:$0xff] }
 0x5d0   : > { %v6176_v6 = vsub.f32 %v25544_v33, %v18886_v2  ;;  %v25547_v23 = vsub.f32 %v18354_v62, %v18886_v2  ;;  %v25548_v29 = vsub.f32 %v18362_v26, %v18886_v2  ;;  %v25549_v33 = vsub.f32 %v18388_v32, %v18886_v2 }
 0x5d1   : > { %14242 = vrsqrt.f32 %v6123_v7  ;;  %v6171_v7 = vsub.f32 %v25538_v5, %v18886_v2  ;;  %v25545_v5 = vsub.f32 %v18357_v9, %v18886_v2 }
 0x5db   : > { %v14243_v43 = vpop.eup %14242 }
 0x5dc   : > { %v6193_v12 = vmul.f32 %v14243_v43, %v6126_v8  ;;  %v25539_v43 = vld [vmem:[#allocation171_spill] sm:$0xff]  ;;  %v25540_v8 = vsub.s32 0, %v18890_v0  ;;  %v25587_v0 = vld [vmem:[#allocation173_spill] sm:$0xff] }
 0x5dd   : > { %v6172_v61 = vsub.f32 %v25539_v43, %v18886_v2 }
 0x5de   : > { %v19019_v49 = vrot.slane %v6193_v12, %v25540_v8  ;;  %v25546_v12 = vsub.f32 %v18365_v59, %v18886_v2 }
 0x5e0   : > { %v19033_v43 = vmul.f32 %v19019_v49, %v25545_v5  ;;  %v19039_v8 = vmul.f32 %v19019_v49, %v25546_v12  ;;  %v19045_v44 = vmul.f32 %v19019_v49, %v25547_v23  ;;  %v19051_v9 = vmul.f32 %v19019_v49, %v25548_v29 }
 0x5e1   : > { %v19057_v59 = vmul.f32 %v19019_v49, %v25549_v33  ;;  %v25550_v5 = vsub.f32 %v18396_v18, %v18886_v2  ;;  %v25551_v12 = vsub.f32 %v18385_v55, %v18886_v2  ;;  %v25552_v23 = vsub.f32 %v18399_v39, %v18886_v2 }
 0x5e2   : > { %v25553_v29 = vsub.f32 %v18419_v40, %v18886_v2  ;;  %v25554_v33 = vsub.f32 %v18431_v15, %v18886_v2 }
 0x5e3   : > { %v19063_v62 = vmul.f32 %v19019_v49, %v25550_v5  ;;  %v19069_v26 = vmul.f32 %v19019_v49, %v25551_v12  ;;  %v19075_v32 = vmul.f32 %v19019_v49, %v25552_v23  ;;  %v25555_v5 = vsub.f32 %v18424_v60, %v18886_v2 }
 0x5e4   : > { %v19081_v18 = vmul.f32 %v19019_v49, %v25553_v29  ;;  %v19087_v55 = vmul.f32 %v19019_v49, %v25554_v33  ;;  %v25556_v12 = vsub.f32 %v18435_v63, %v18886_v2  ;;  %v25557_v23 = vsub.f32 %v18455_v56, %v18886_v2 }
 0x5e5   : > { %v19093_v39 = vmul.f32 %v19019_v49, %v25555_v5  ;;  %v25558_v29 = vsub.f32 %v18467_v45, %v18886_v2  ;;  %v25559_v33 = vsub.f32 %v18460_v14, %v18886_v2  ;;  %v25560_v5 = vsub.f32 %v18471_v19, %v18886_v2 }
 0x5e6   : > { %v19099_v40 = vmul.f32 %v19019_v49, %v25556_v12  ;;  %v19105_v15 = vmul.f32 %v19019_v49, %v25557_v23  ;;  %v25561_v12 = vsub.f32 %v18491_v24, %v18886_v2  ;;  %v25562_v23 = vsub.f32 %v18503_v1, %v18886_v2 }
 0x5e7   : > { %v19111_v60 = vmul.f32 %v19019_v49, %v25558_v29  ;;  %v19117_v63 = vmul.f32 %v19019_v49, %v25559_v33  ;;  %v19123_v56 = vmul.f32 %v19019_v49, %v25560_v5  ;;  %v25563_v29 = vsub.f32 %v18496_v11, %v18886_v2 }
 0x5e8   : > { %v19129_v45 = vmul.f32 %v19019_v49, %v25561_v12  ;;  %v19135_v14 = vmul.f32 %v19019_v49, %v25562_v23  ;;  %v25564_v33 = vsub.f32 %v18507_v10, %v18886_v2  ;;  %v25565_v5 = vsub.f32 %v18527_v35, %v18886_v2 }
 0x5e9   : > { %v19141_v19 = vmul.f32 %v19019_v49, %v25563_v29  ;;  %v25566_v12 = vsub.f32 %v18539_v54, %v18886_v2  ;;  %v25567_v23 = vsub.f32 %v18532_v37, %v18886_v2  ;;  %v25568_v29 = vsub.f32 %v18543_v41, %v18886_v2 }
 0x5ea   : > { %v19147_v24 = vmul.f32 %v19019_v49, %v25564_v33  ;;  %v19153_v1 = vmul.f32 %v19019_v49, %v25565_v5  ;;  %v25569_v33 = vsub.f32 %v18563_v36, %v18886_v2  ;;  %v25570_v5 = vsub.f32 %v18575_v57, %v18886_v2 }
 0x5eb   : > { %v19159_v11 = vmul.f32 %v19019_v49, %v25566_v12  ;;  %v19165_v10 = vmul.f32 %v19019_v49, %v25567_v23  ;;  %v19171_v35 = vmul.f32 %v19019_v49, %v25568_v29  ;;  %v25571_v12 = vsub.f32 %v18568_v3, %v18886_v2 }
 0x5ec   : > { %v19177_v54 = vmul.f32 %v19019_v49, %v25569_v33  ;;  %v19183_v37 = vmul.f32 %v19019_v49, %v25570_v5  ;;  %v25572_v23 = vsub.f32 %v18579_v28, %v18886_v2  ;;  %v25573_v29 = vsub.f32 %v18599_v16, %v18886_v2 }
 0x5ed   : > { %v19189_v41 = vmul.f32 %v19019_v49, %v25571_v12  ;;  %v25574_v33 = vsub.f32 %v18611_v46, %v18886_v2  ;;  %v25575_v5 = vsub.f32 %v18604_v4, %v18886_v2  ;;  %v19216_v12 = vmul.f32 %v19019_v49, %v6160_v21 }
 0x5ee   : > { %v19195_v36 = vmul.f32 %v19019_v49, %v25572_v23  ;;  %v19201_v57 = vmul.f32 %v19019_v49, %v25573_v29  ;;  %v19219_v16 = vmul.f32 %v19019_v49, %v6161_v25  ;;  %v19222_v23 = vmul.f32 %v19019_v49, %v6162_v47 }
 0x5ef   : > { %v19207_v3 = vmul.f32 %v19019_v49, %v25574_v33  ;;  %v19213_v28 = vmul.f32 %v19019_v49, %v25575_v5  ;;  %v19225_v46 = vmul.f32 %v19019_v49, %v6163_v38  ;;  %v19228_v29 = vmul.f32 %v19019_v49, %v6164_v30  ;;  %v19294_v5 = vld [vmem:[%s6127_s29] ss:$0 sm:$0xff] }
 0x5f0   : > { %v19231_v4 = vmul.f32 %v19019_v49, %v6165_v52  ;;  %v19234_v33 = vmul.f32 %v19019_v49, %v6166_v50  ;;  %v19237_v21 = vmul.f32 %v19019_v49, %v6167_v31  ;;  %v19240_v25 = vmul.f32 %v19019_v49, %v6168_v58 }
 0x5f1   : > { %v19247_v38 = vmul.f32 %v19019_v49, %v6169_v42  ;;  %v19250_v30 = vmul.f32 %v19019_v49, %v6170_v17  ;;  %v19253_v52 = vmul.f32 %v19019_v49, %v6171_v7  ;;  %v19256_v47 = vmul.f32 %v19019_v49, %v6172_v61 }
 0x5f2   : > { %v19259_v31 = vmul.f32 %v19019_v49, %v6173_v48  ;;  %v19262_v58 = vmul.f32 %v19019_v49, %v6174_v34  ;;  %v19265_v50 = vmul.f32 %v19019_v49, %v6175_v22  ;;  %v19268_v42 = vmul.f32 %v19019_v49, %v6176_v6 }
 0x5f3   : > { %v25576_v17 = vsub.f32 %v18760_v20, %v18886_v2  ;;  %v25577_v61 = vsub.f32 %v18771_v13, %v18886_v2  ;;  %v25578_v34 = vsub.f32 %v18764_v53, %v18886_v2  ;;  %v25580_v6 = vsub.f32 %v18775_v27, %v18886_v2 }
 0x5f4   : > { %v25582_v13 = vsub.f32 %v18792_v51, %v18886_v2  ;;  %v25588_v27 = vsub.f32 %v25587_v0, %v18886_v2 }
 0x5f5   : > { %v19274_v7 = vmul.f32 %v19019_v49, %v25576_v17  ;;  %v19280_v48 = vmul.f32 %v19019_v49, %v25577_v61  ;;  %v19286_v22 = vmul.f32 %v19019_v49, %v25578_v34  ;;  %v19292_v20 = vmul.f32 %v19019_v49, %v25580_v6  ;;  %v25584_v61 = vld [vmem:[#allocation163_spill] sm:$0xff] }
 0x5f6   : > { %v19300_v17 = vmul.f32 %v19019_v49, %v25582_v13  ;;  %v25585_v53 = vsub.f32 %v25584_v61, %v18886_v2  ;;  %v19312_v6 = vmul.f32 %v19019_v49, %v25588_v27  ;;  %v25593_v13 = vld [vmem:[#allocation174_spill] sm:$0xff]  ;;  %v25599_v27 = vld [vmem:[#allocation189_spill] sm:$0xff] }
 0x5f7   : > { %25579 = vst [vmem:[#allocation179_spill] sm:$0xff] %v19286_v22  ;;  %25581 = vst [vmem:[#allocation195_spill] sm:$0xff] %v19292_v20  ;;  %v25590_v20 = vld [vmem:[#allocation188_spill] sm:$0xff] }
 0x5f8   : > { %25583 = vst [vmem:[#allocation180_spill] sm:$0xff] %v19300_v17  ;;  %v19306_v34 = vmul.f32 %v19019_v49, %v25585_v53  ;;  %25589 = vst [vmem:[#allocation181_spill] sm:$0xff] %v19312_v6  ;;  %v25591_v22 = vsub.f32 %v25590_v20, %v18886_v2  ;;  %v25594_v17 = vsub.f32 %v25593_v13, %v18886_v2  ;;  %v25596_v53 = vld [vmem:[#allocation175_spill] sm:$0xff] }
 0x5f9   : > { %v25600_v6 = vsub.f32 %v25599_v27, %v18886_v2 }
 0x5fa   : > { %25586 = vst [vmem:[#allocation197_spill] sm:$0xff] %v19306_v34  ;;  %v19318_v51 = vmul.f32 %v19019_v49, %v25591_v22  ;;  %v19324_v61 = vmul.f32 %v19019_v49, %v25594_v17  ;;  %v25597_v34 = vsub.f32 %v25596_v53, %v18886_v2  ;;  %v25602_v22 = vld [vmem:[#allocation190_spill] sm:$0xff]  ;;  %v25605_v17 = vld [vmem:[#allocation176_spill] sm:$0xff] }
 0x5fb   : > { %v19336_v20 = vmul.f32 %v19019_v49, %v25600_v6  ;;  %v25609_v6 = vld [vmem:[#allocation191_spill] sm:$0xff] }
 0x5fc   : > { %25592 = vst [vmem:[#allocation182_spill] sm:$0xff] %v19318_v51  ;;  %25595 = vst [vmem:[#allocation200_spill] sm:$0xff] %v19324_v61  ;;  %v19330_v0 = vmul.f32 %v19019_v49, %v25597_v34  ;;  %v25603_v51 = vsub.f32 %v25602_v22, %v18886_v2  ;;  %v25606_v61 = vsub.f32 %v25605_v17, %v18886_v2  ;;  %v25607_v34 = vld [vmem:[#allocation177_spill] sm:$0xff] }
 0x5fd   : > { %25601 = vst [vmem:[#allocation184_spill] sm:$0xff] %v19336_v20  ;;  %v25610_v20 = vsub.f32 %v25609_v6, %v18886_v2 }
 0x5fe   : > { %25598 = vst [vmem:[#allocation167_spill] sm:$0xff] %v19330_v0  ;;  %v19342_v13 = vmul.f32 %v19019_v49, %v25603_v51  ;;  %v19348_v53 = vmul.f32 %v19019_v49, %v25606_v61  ;;  %v25608_v0 = vsub.f32 %v25607_v34, %v18886_v2  ;;  %v25611_v51 = vld [vmem:[#allocation178_spill] sm:$0xff]  ;;  %v19370_v61 = vadd.f32 %v19294_v5, %v19033_v43 }
 0x5ff   : > { %v19360_v22 = vmul.f32 %v19019_v49, %v25610_v20  ;;  %v19378_v34 = vadd.f32 %v19294_v5, %v19045_v44  ;;  %v19382_v20 = vadd.f32 %v19294_v5, %v19051_v9  ;;  %v19394_v43 = vadd.f32 %v19294_v5, %v19069_v26  ;;  %v25619_v6 = vld [vmem:[#allocation180_spill] sm:$0xff] }
 0x600   : > { %25604 = vst [vmem:[#allocation168_spill] sm:$0xff] %v19342_v13  ;;  %v19354_v27 = vmul.f32 %v19019_v49, %v25608_v0  ;;  %v25612_v13 = vsub.f32 %v25611_v51, %v18886_v2  ;;  %v19374_v0 = vadd.f32 %v19294_v5, %v19039_v8  ;;  %v19386_v2 = vadd.f32 %v19294_v5, %v19057_v59 }
 0x601   : > { %v19398_v8 = vadd.f32 %v19294_v5, %v19075_v32  ;;  %v19402_v44 = vadd.f32 %v19294_v5, %v19081_v18  ;;  %v19406_v9 = vadd.f32 %v19294_v5, %v19087_v55  ;;  %v19410_v59 = vadd.f32 %v19294_v5, %v19093_v39  ;;  %v25621_v51 = vld [vmem:[#allocation197_spill] sm:$0xff] }
 0x602   : > { %v19366_v17 = vmul.f32 %v19019_v49, %v25612_v13  ;;  %v19390_v49 = vadd.f32 %v19294_v5, %v19063_v62  ;;  %v19414_v62 = vadd.f32 %v19294_v5, %v19099_v40  ;;  %v19418_v26 = vadd.f32 %v19294_v5, %v19105_v15  ;;  %v25617_v13 = vld [vmem:[#allocation195_spill] sm:$0xff] }
 0x603   : > { %v19422_v32 = vadd.f32 %v19294_v5, %v19111_v60  ;;  %v19426_v18 = vadd.f32 %v19294_v5, %v19117_v63  ;;  %v19430_v55 = vadd.f32 %v19294_v5, %v19123_v56  ;;  %v19434_v39 = vadd.f32 %v19294_v5, %v19129_v45 }
 0x604   : > { %v19438_v40 = vadd.f32 %v19294_v5, %v19135_v14  ;;  %v19442_v15 = vadd.f32 %v19294_v5, %v19141_v19  ;;  %v19446_v60 = vadd.f32 %v19294_v5, %v19147_v24  ;;  %v19450_v63 = vadd.f32 %v19294_v5, %v19153_v1 }
 0x605   : > { %v19454_v56 = vadd.f32 %v19294_v5, %v19159_v11  ;;  %v19458_v45 = vadd.f32 %v19294_v5, %v19165_v10  ;;  %v19462_v14 = vadd.f32 %v19294_v5, %v19171_v35  ;;  %v19466_v19 = vadd.f32 %v19294_v5, %v19177_v54 }
 0x606   : > { %v19470_v24 = vadd.f32 %v19294_v5, %v19183_v37  ;;  %v19474_v1 = vadd.f32 %v19294_v5, %v19189_v41  ;;  %v19478_v11 = vadd.f32 %v19294_v5, %v19195_v36  ;;  %v19482_v10 = vadd.f32 %v19294_v5, %v19201_v57 }
 0x607   : > { %v19486_v35 = vadd.f32 %v19294_v5, %v19207_v3  ;;  %v19490_v54 = vadd.f32 %v19294_v5, %v19213_v28  ;;  %v19494_v37 = vadd.f32 %v19294_v5, %v19216_v12  ;;  %v19498_v41 = vadd.f32 %v19294_v5, %v19219_v16 }
 0x608   : > { %v19502_v36 = vadd.f32 %v19294_v5, %v19222_v23  ;;  %v19506_v57 = vadd.f32 %v19294_v5, %v19225_v46  ;;  %v19510_v3 = vadd.f32 %v19294_v5, %v19228_v29  ;;  %v19514_v28 = vadd.f32 %v19294_v5, %v19231_v4 }
 0x609   : > { %v19518_v12 = vadd.f32 %v19294_v5, %v19234_v33  ;;  %v19522_v16 = vadd.f32 %v19294_v5, %v19237_v21  ;;  %v19526_v23 = vadd.f32 %v19294_v5, %v19240_v25  ;;  %v19530_v46 = vadd.f32 %v19294_v5, %v19247_v38 }
 0x60a   : > { %v19534_v29 = vadd.f32 %v19294_v5, %v19250_v30  ;;  %v19538_v4 = vadd.f32 %v19294_v5, %v19253_v52  ;;  %v19542_v33 = vadd.f32 %v19294_v5, %v19256_v47  ;;  %v19546_v21 = vadd.f32 %v19294_v5, %v19259_v31  ;;  %v25615_v31 = vld [vmem:[#allocation179_spill] sm:$0xff] }
 0x60b   : > { %v19550_v25 = vadd.f32 %v19294_v5, %v19262_v58  ;;  %v19554_v38 = vadd.f32 %v19294_v5, %v19265_v50  ;;  %v19558_v30 = vadd.f32 %v19294_v5, %v19268_v42  ;;  %v19562_v52 = vadd.f32 %v19294_v5, %v19274_v7 }
 0x60c   : > { %v19566_v47 = vadd.f32 %v19294_v5, %v19280_v48  ;;  %v19570_v58 = vadd.f32 %v19294_v5, %v25615_v31  ;;  %v19574_v50 = vadd.f32 %v19294_v5, %v25617_v13  ;;  %v19578_v42 = vadd.f32 %v19294_v5, %v25619_v6 }
 0x60d   : > { %25613 = vst [vmem:[#allocation183_spill] sm:$0xff] %v19562_v52  ;;  %v19582_v7 = vadd.f32 %v19294_v5, %v25621_v51  ;;  %v25623_v52 = vld [vmem:[#allocation181_spill] sm:$0xff] }
 0x60e   : > { %25614 = vst [vmem:[#allocation199_spill] sm:$0xff] %v19566_v47  ;;  %25616 = vst [vmem:[#allocation201_spill] sm:$0xff] %v19570_v58  ;;  %v19586_v48 = vadd.f32 %v19294_v5, %v25623_v52  ;;  %v25624_v47 = vld [vmem:[#allocation182_spill] sm:$0xff]  ;;  %v25625_v58 = vld [vmem:[#allocation200_spill] sm:$0xff] }
 0x60f   : > { %25618 = vst [vmem:[#allocation185_spill] sm:$0xff] %v19574_v50  ;;  %25620 = vst [vmem:[#allocation192_spill] sm:$0xff] %v19578_v42  ;;  %v19590_v31 = vadd.f32 %v19294_v5, %v25624_v47  ;;  %v19594_v13 = vadd.f32 %v19294_v5, %v25625_v58  ;;  %v25626_v50 = vld [vmem:[#allocation167_spill] sm:$0xff]  ;;  %v25627_v42 = vld [vmem:[#allocation184_spill] sm:$0xff]  ;;  %v19610_v47 = vadd.f32 %v19294_v5, %v19348_v53  ;;  %v19631_v53 = vmax.f32 %v19378_v34, 0.0 }
 0x610   : > { %25622 = vst [vmem:[#allocation164_spill] sm:$0xff] %v19582_v7  ;;  %v19598_v6 = vadd.f32 %v19294_v5, %v25626_v50  ;;  %v19602_v51 = vadd.f32 %v19294_v5, %v25627_v42  ;;  %v25629_v7 = vld [vmem:[#allocation168_spill] sm:$0xff]  ;;  %v19614_v58 = vadd.f32 %v19294_v5, %v19354_v27  ;;  %v19618_v50 = vadd.f32 %v19294_v5, %v19360_v22 }
 0x611   : > { %v19606_v52 = vadd.f32 %v19294_v5, %v25629_v7  ;;  %v19622_v42 = vadd.f32 %v19294_v5, %v19366_v17  ;;  %v19628_v7 = vmax.f32 %v19374_v0, 0.0  ;;  %v19634_v27 = vmax.f32 %v19382_v20, 0.0 }
 0x612   : > { %25628 = vst [vmem:[#allocation165_spill] sm:$0xff] %v19602_v51  ;;  %25630 = vst [vmem:[#allocation194_spill] sm:$0xff] %v19614_v58  ;;  %v19625_v51 = vmax.f32 %v19370_v61, 0.0  ;;  %v19637_v58 = vmax.f32 %v19386_v2, 0.0  ;;  %v19640_v22 = vmax.f32 %v19390_v49, 0.0  ;;  %v19643_v5 = vmax.f32 %v19394_v43, 0.0 }
 0x613   : > { %v19646_v17 = vmax.f32 %v19398_v8, 0.0  ;;  %v19649_v61 = vmax.f32 %v19402_v44, 0.0  ;;  %v19652_v0 = vmax.f32 %v19406_v9, 0.0  ;;  %v19655_v34 = vmax.f32 %v19410_v59, 0.0 }
 0x614   : > { %v19658_v20 = vmax.f32 %v19414_v62, 0.0  ;;  %v19661_v2 = vmax.f32 %v19418_v26, 0.0  ;;  %v19664_v49 = vmax.f32 %v19422_v32, 0.0  ;;  %v19667_v43 = vmax.f32 %v19426_v18, 0.0 }
 0x615   : > { %v19670_v8 = vmax.f32 %v19430_v55, 0.0  ;;  %v19673_v44 = vmax.f32 %v19434_v39, 0.0  ;;  %v19676_v9 = vmax.f32 %v19438_v40, 0.0  ;;  %v19679_v59 = vmax.f32 %v19442_v15, 0.0 }
 0x616   : > { %v19682_v62 = vmax.f32 %v19446_v60, 0.0  ;;  %v19685_v26 = vmax.f32 %v19450_v63, 0.0  ;;  %v19688_v32 = vmax.f32 %v19454_v56, 0.0  ;;  %v19691_v18 = vmax.f32 %v19458_v45, 0.0 }
 0x617   : > { %v19694_v55 = vmax.f32 %v19462_v14, 0.0  ;;  %v19697_v39 = vmax.f32 %v19466_v19, 0.0  ;;  %v19700_v40 = vmax.f32 %v19470_v24, 0.0  ;;  %v19703_v15 = vmax.f32 %v19474_v1, 0.0 }
 0x618   : > { %25631 = vst [vmem:[#allocation196_spill] sm:$0xff] %v19682_v62  ;;  %v19706_v60 = vmax.f32 %v19478_v11, 0.0  ;;  %v19709_v63 = vmax.f32 %v19482_v10, 0.0  ;;  %v19712_v56 = vmax.f32 %v19486_v35, 0.0  ;;  %v19715_v45 = vmax.f32 %v19490_v54, 0.0 }
 0x619   : > { %25632 = vst [vmem:[#allocation166_spill] sm:$0xff] %v19694_v55  ;;  %25633 = vst [vmem:[#allocation161_spill] sm:$0xff] %v19703_v15  ;;  %v19718_v14 = vmax.f32 %v19494_v37, 0.0  ;;  %v19721_v19 = vmax.f32 %v19498_v41, 0.0  ;;  %v19724_v24 = vmax.f32 %v19502_v36, 0.0  ;;  %v19727_v1 = vmax.f32 %v19506_v57, 0.0 }
 0x61a   : > { %v19730_v11 = vmax.f32 %v19510_v3, 0.0  ;;  %v19733_v10 = vmax.f32 %v19514_v28, 0.0  ;;  %v19736_v35 = vmax.f32 %v19518_v12, 0.0  ;;  %v19739_v54 = vmax.f32 %v19522_v16, 0.0  ;;  %v25668_v15 = vld [vmem:[#allocation193_spill] sm:$0xff] }
 0x61b   : > { %v19742_v37 = vmax.f32 %v19526_v23, 0.0  ;;  %v19745_v41 = vmax.f32 %v19530_v46, 0.0  ;;  %v19748_v36 = vmax.f32 %v19534_v29, 0.0  ;;  %v19751_v57 = vmax.f32 %v19538_v4, 0.0  ;;  %v25644_v46 = vld [vmem:[#allocation183_spill] sm:$0xff] }
 0x61c   : > { %25634 = vst [vmem:[#allocation198_spill] sm:$0xff] %v19730_v11  ;;  %25635 = vst [vmem:[#allocation162_spill] sm:$0xff] %v19736_v35  ;;  %v19754_v3 = vmax.f32 %v19542_v33, 0.0  ;;  %v19757_v28 = vmax.f32 %v19546_v21, 0.0  ;;  %v19760_v12 = vmax.f32 %v19550_v25, 0.0  ;;  %v19763_v16 = vmax.f32 %v19554_v38, 0.0 }
 0x61d   : > { %25636 = vst [vmem:[#allocation169_spill] sm:$0xff] %v19742_v37  ;;  %25637 = vst [vmem:[#allocation170_spill] sm:$0xff] %v19748_v36  ;;  %v19766_v23 = vmax.f32 %v19558_v30, 0.0  ;;  %v19769_v29 = vmax.f32 %v25644_v46, 0.0  ;;  %v25646_v4 = vld [vmem:[#allocation199_spill] sm:$0xff]  ;;  %v25648_v33 = vld [vmem:[#allocation201_spill] sm:$0xff] }
 0x61e   : > { %25638 = vst [vmem:[#allocation186_spill] sm:$0xff] %v19751_v57  ;;  %25639 = vst [vmem:[#allocation171_spill] sm:$0xff] %v19754_v3  ;;  %v19772_v36 = vmax.f32 %v25646_v4, 0.0  ;;  %v19775_v3 = vmax.f32 %v25648_v33, 0.0  ;;  %v25650_v21 = vld [vmem:[#allocation185_spill] sm:$0xff]  ;;  %v25652_v25 = vld [vmem:[#allocation192_spill] sm:$0xff] }
 0x61f   : > { %25640 = vst [vmem:[#allocation159_spill] sm:$0xff] %v19757_v28  ;;  %25641 = vst [vmem:[#allocation187_spill] sm:$0xff] %v19760_v12  ;;  %v19778_v37 = vmax.f32 %v25650_v21, 0.0  ;;  %v19781_v12 = vmax.f32 %v25652_v25, 0.0  ;;  %v25654_v38 = vld [vmem:[#allocation164_spill] sm:$0xff]  ;;  %v19787_v30 = vmax.f32 %v19586_v48, 0.0 }
 0x620   : > { %25642 = vst [vmem:[#allocation160_spill] sm:$0xff] %v19763_v16  ;;  %25643 = vst [vmem:[#allocation172_spill] sm:$0xff] %v19766_v23  ;;  %v19784_v35 = vmax.f32 %v25654_v38, 0.0  ;;  %v19790_v46 = vmax.f32 %v19590_v31, 0.0  ;;  %v19793_v4 = vmax.f32 %v19594_v13, 0.0  ;;  %v19796_v33 = vmax.f32 %v19598_v6, 0.0 }
 0x621   : > { %25645 = vst [vmem:[#allocation163_spill] sm:$0xff] %v19769_v29  ;;  %25647 = vst [vmem:[#allocation173_spill] sm:$0xff] %v19772_v36  ;;  %v25660_v21 = vld [vmem:[#allocation165_spill] sm:$0xff]  ;;  %v19802_v25 = vmax.f32 %v19606_v52, 0.0  ;;  %v19805_v38 = vmax.f32 %v19610_v47, 0.0  ;;  %v25664_v48 = vld [vmem:[#allocation194_spill] sm:$0xff] }
 0x622   : > { %25649 = vst [vmem:[#allocation188_spill] sm:$0xff] %v19775_v3  ;;  %25651 = vst [vmem:[#allocation174_spill] sm:$0xff] %v19778_v37  ;;  %v19799_v37 = vmax.f32 %v25660_v21, 0.0  ;;  %v19811_v31 = vmax.f32 %v19618_v50, 0.0  ;;  %v19814_v13 = vmax.f32 %v19622_v42, 0.0  ;;  %vm6460_vm5 = vcmp.lt.s32.totalorder %v25668_v15, 1 }
 0x623   : > { %25653 = vst [vmem:[#allocation175_spill] sm:$0xff] %v19781_v12  ;;  %25655 = vst [vmem:[#allocation189_spill] sm:$0xff] %v19784_v35  ;;  %v19808_v35 = vmax.f32 %v25664_v48, 0.0  ;;  %v25676_v29 = vmov %v19796_v33  ;;  %v25677_v16 = vmov %v19802_v25  ;;  %v25680_v48 = vrot.slane %v19625_v51, 7 }
 0x624   : > { %25656 = vst [vmem:[#allocation190_spill] sm:$0xff] %v19787_v30  ;;  %25657 = vst [vmem:[#allocation176_spill] sm:$0xff] %v19790_v46  ;;  %v25682_v42 = vrot.slane %v19634_v27, 7  ;;  %v25683_v6 = vrot.slane %v19631_v53, 7  ;;  %v25685_v52 = vrot.slane %v19640_v22, 7  ;;  %v25686_v47 = vrot.slane %v19637_v58, 7 }
 0x625   : > { %25658 = vst [vmem:[#allocation177_spill] sm:$0xff] %v19793_v4  ;;  %25659 = vst [vmem:[#allocation191_spill] sm:$0xff] %v19796_v33  ;;  %v25672_v4 = vld [vmem:[#allocation171_spill] sm:$0xff]  ;;  %v25678_v28 = vmov %v19808_v35  ;;  %vm6589_vm6 = vcmp.lt.s32.totalorder %v25668_v15, 7 }
 0x626   : > { %25661 = vst [vmem:[#allocation178_spill] sm:$0xff] %v19799_v37  ;;  %25662 = vst [vmem:[#allocation179_spill] sm:$0xff] %v19802_v25  ;;  %v25671_v37 = vld [vmem:[#allocation170_spill] sm:$0xff]  ;;  %v25673_v30 = vld [vmem:[#allocation187_spill] sm:$0xff]  ;;  %v25679_v25 = vrot.slane %v19628_v7, 7  ;;  %v19895_v21 = vsel %vm6460_vm5, %v25683_v6, %v25682_v42  ;;  %v19903_v33 = vsel %vm6460_vm5, %v25686_v47, %v25685_v52  ;;  %v25692_v6 = vrot.slane %v19649_v61, 7 }
 0x627   : > { %25663 = vst [vmem:[#allocation195_spill] sm:$0xff] %v19805_v38  ;;  %25665 = vst [vmem:[#allocation180_spill] sm:$0xff] %v19808_v35  ;;  %v25670_v38 = vld [vmem:[#allocation169_spill] sm:$0xff]  ;;  %v25688_v35 = vrot.slane %v19646_v17, 7  ;;  %v25695_v52 = vrot.slane %v19655_v34, 7 }
 0x628   : > { %25666 = vst [vmem:[#allocation197_spill] sm:$0xff] %v19811_v31  ;;  %25667 = vst [vmem:[#allocation181_spill] sm:$0xff] %v19814_v13  ;;  %v25669_v31 = vld [vmem:[#allocation162_spill] sm:$0xff]  ;;  %v19887_v50 = vsel %vm6460_vm5, %v25680_v48, %v25679_v25  ;;  %v25689_v25 = vrot.slane %v19643_v5, 7 }
 0x629   : > { %v25674_v12 = vld [vmem:[#allocation174_spill] sm:$0xff]  ;;  %25681 = vst [vmem:[#allocation182_spill] sm:$0xff] %v19887_v50  ;;  %25684 = vst [vmem:[#allocation200_spill] sm:$0xff] %v19895_v21  ;;  %v25691_v50 = vrot.slane %v19652_v0, 7  ;;  %v25694_v21 = vrot.slane %v19658_v20, 7 }
 0x62a   : > { %v25675_v3 = vld [vmem:[#allocation189_spill] sm:$0xff]  ;;  %25687 = vst [vmem:[#allocation167_spill] sm:$0xff] %v19903_v33  ;;  %v19911_v48 = vsel %vm6460_vm5, %v25689_v25, %v25688_v35  ;;  %v25697_v33 = vrot.slane %v19664_v49, 7  ;;  %v25698_v35 = vrot.slane %v19661_v2, 7 }
 0x62b   : > { %25690 = vst [vmem:[#allocation184_spill] sm:$0xff] %v19911_v48  ;;  %v19919_v42 = vsel %vm6460_vm5, %v25692_v6, %v25691_v50  ;;  %v19927_v47 = vsel %vm6460_vm5, %v25695_v52, %v25694_v21  ;;  %v25700_v48 = vrot.slane %v19670_v8, 7  ;;  %v25701_v50 = vrot.slane %v19667_v43, 7 }
 0x62c   : > { %25693 = vst [vmem:[#allocation168_spill] sm:$0xff] %v19919_v42  ;;  %25696 = vst [vmem:[#allocation183_spill] sm:$0xff] %v19927_v47  ;;  %v19935_v25 = vsel %vm6460_vm5, %v25698_v35, %v25697_v33  ;;  %v25703_v42 = vrot.slane %v19676_v9, 7  ;;  %v25704_v21 = vrot.slane %v19673_v44, 7  ;;  %v25706_v47 = vrot.slane %v19682_v62, 7 }
 0x62d   : > { %25699 = vst [vmem:[#allocation199_spill] sm:$0xff] %v19935_v25  ;;  %v19943_v6 = vsel %vm6460_vm5, %v25701_v50, %v25700_v48  ;;  %v25707_v33 = vrot.slane %v19679_v59, 7  ;;  %v25709_v25 = vrot.slane %v19688_v32, 7  ;;  %v25710_v48 = vrot.slane %v19685_v26, 7 }
 0x62e   : > { %25702 = vst [vmem:[#allocation201_spill] sm:$0xff] %v19943_v6  ;;  %v19951_v52 = vsel %vm6460_vm5, %v25704_v21, %v25703_v42  ;;  %v25712_v6 = vrot.slane %v19694_v55, 7  ;;  %v25713_v42 = vrot.slane %v19691_v18, 7  ;;  %v25722_v55 = vrot.slane %v19712_v56, 7 }
 0x62f   : > { %25705 = vst [vmem:[#allocation185_spill] sm:$0xff] %v19951_v52  ;;  %v19959_v35 = vsel %vm6460_vm5, %v25707_v33, %v25706_v47  ;;  %v19967_v50 = vsel %vm6460_vm5, %v25710_v48, %v25709_v25  ;;  %v25715_v52 = vrot.slane %v19700_v40, 7  ;;  %v25716_v47 = vrot.slane %v19697_v39, 7  ;;  %v25719_v25 = vld [vmem:[#allocation161_spill] sm:$0xff] }
 0x630   : > { %25708 = vst [vmem:[#allocation192_spill] sm:$0xff] %v19959_v35  ;;  %25711 = vst [vmem:[#allocation164_spill] sm:$0xff] %v19967_v50  ;;  %v19975_v21 = vsel %vm6460_vm5, %v25713_v42, %v25712_v6  ;;  %v25718_v35 = vrot.slane %v19706_v60, 7  ;;  %v25720_v48 = vrot.slane %v25719_v25, 7  ;;  %v25723_v6 = vrot.slane %v19709_v63, 7 }
 0x631   : > { %25714 = vst [vmem:[#allocation165_spill] sm:$0xff] %v19975_v21  ;;  %v19983_v33 = vsel %vm6460_vm5, %v25716_v47, %v25715_v52  ;;  %v25725_v21 = vrot.slane %v19718_v14, 7  ;;  %v25726_v52 = vrot.slane %v19715_v45, 7 }
 0x632   : > { %25717 = vst [vmem:[#allocation194_spill] sm:$0xff] %v19983_v33  ;;  %v19991_v50 = vsel %vm6460_vm5, %v25720_v48, %v25718_v35  ;;  %v19999_v42 = vsel %vm6460_vm5, %v25723_v6, %v25722_v55  ;;  %v25728_v33 = vrot.slane %v19724_v24, 7  ;;  %v25729_v35 = vrot.slane %v19721_v19, 7 }
 0x633   : > { %25721 = vst [vmem:[#allocation193_spill] sm:$0xff] %v19991_v50  ;;  %25724 = vst [vmem:[#allocation161_spill] sm:$0xff] %v19999_v42  ;;  %v20007_v47 = vsel %vm6460_vm5, %v25726_v52, %v25725_v21  ;;  %v25731_v50 = vrot.slane %v19730_v11, 7  ;;  %v25732_v55 = vrot.slane %v19727_v1, 7  ;;  %v25734_v42 = vrot.slane %v25669_v31, 7 }
 0x634   : > { %25727 = vst [vmem:[#allocation202_spill] sm:$0xff] %v20007_v47  ;;  %v20015_v48 = vsel %vm6460_vm5, %v25729_v35, %v25728_v33  ;;  %v25735_v21 = vrot.slane %v19733_v10, 7  ;;  %v25737_v47 = vrot.slane %v25670_v38, 7  ;;  %v25738_v33 = vrot.slane %v19739_v54, 7 }
 0x635   : > { %25730 = vst [vmem:[#allocation203_spill] sm:$0xff] %v20015_v48  ;;  %v20023_v6 = vsel %vm6460_vm5, %v25732_v55, %v25731_v50  ;;  %v25740_v48 = vrot.slane %v25671_v37, 7  ;;  %v25741_v50 = vrot.slane %v19745_v41, 7  ;;  %v25750_v37 = vrot.slane %v19766_v23, 7 }
 0x636   : > { %25733 = vst [vmem:[#allocation204_spill] sm:$0xff] %v20023_v6  ;;  %v20031_v52 = vsel %vm6460_vm5, %v25735_v21, %v25734_v42  ;;  %v20039_v35 = vsel %vm6460_vm5, %v25738_v33, %v25737_v47  ;;  %v25743_v6 = vrot.slane %v25672_v4, 7  ;;  %v25744_v42 = vrot.slane %v19751_v57, 7  ;;  %v25747_v47 = vld [vmem:[#allocation159_spill] sm:$0xff] }
 0x637   : > { %25736 = vst [vmem:[#allocation205_spill] sm:$0xff] %v20031_v52  ;;  %25739 = vst [vmem:[#allocation206_spill] sm:$0xff] %v20039_v35  ;;  %v20047_v55 = vsel %vm6460_vm5, %v25741_v50, %v25740_v48  ;;  %v25746_v52 = vrot.slane %v25673_v30, 7  ;;  %v25748_v33 = vrot.slane %v25747_v47, 7  ;;  %v25751_v48 = vld [vmem:[#allocation160_spill] sm:$0xff]  ;;  %v25754_v4 = vrot.slane %v19772_v36, 7 }
 0x638   : > { %25742 = vst [vmem:[#allocation207_spill] sm:$0xff] %v20047_v55  ;;  %v20055_v21 = vsel %vm6460_vm5, %v25744_v42, %v25743_v6  ;;  %v25752_v50 = vrot.slane %v25751_v48, 7  ;;  %v25755_v6 = vld [vmem:[#allocation163_spill] sm:$0xff]  ;;  %v25758_v30 = vrot.slane %v25674_v12, 7  ;;  %v25762_v23 = vrot.slane %v25675_v3, 7 }
 0x639   : > { %25745 = vst [vmem:[#allocation208_spill] sm:$0xff] %v20055_v21  ;;  %v20063_v35 = vsel %vm6460_vm5, %v25748_v33, %v25746_v52  ;;  %v25756_v42 = vrot.slane %v25755_v6, 7  ;;  %v25759_v52 = vld [vmem:[#allocation188_spill] sm:$0xff]  ;;  %v25766_v36 = vrot.slane %v19790_v46, 7  ;;  %v25770_v12 = vrot.slane %v25676_v29, 7 }
 0x63a   : > { %25749 = vst [vmem:[#allocation209_spill] sm:$0xff] %v20063_v35  ;;  %v20071_v55 = vsel %vm6460_vm5, %v25752_v50, %v25750_v37  ;;  %v25760_v33 = vrot.slane %v25759_v52, 7  ;;  %v25763_v37 = vld [vmem:[#allocation175_spill] sm:$0xff]  ;;  %v25774_v3 = vrot.slane %v25677_v16, 7  ;;  %v25778_v46 = vrot.slane %v25678_v28, 7 }
 0x63b   : > { %25753 = vst [vmem:[#allocation210_spill] sm:$0xff] %v20071_v55  ;;  %v20079_v21 = vsel %vm6460_vm5, %v25756_v42, %v25754_v4  ;;  %v25764_v50 = vrot.slane %v25763_v37, 7  ;;  %v25767_v4 = vld [vmem:[#allocation190_spill] sm:$0xff]  ;;  %v25782_v29 = vrot.slane %v19814_v13, 7  ;;  %v25786_v16 = vrot.slane %v19625_v51, 7 }
 0x63c   : > { %25757 = vst [vmem:[#allocation211_spill] sm:$0xff] %v20079_v21  ;;  %v20087_v35 = vsel %vm6460_vm5, %v25760_v33, %v25758_v30  ;;  %v25768_v42 = vrot.slane %v25767_v4, 7  ;;  %v25771_v30 = vld [vmem:[#allocation177_spill] sm:$0xff] }
 0x63d   : > { %25761 = vst [vmem:[#allocation212_spill] sm:$0xff] %v20087_v35  ;;  %v20095_v55 = vsel %vm6460_vm5, %v25764_v50, %v25762_v23  ;;  %v25772_v33 = vrot.slane %v25771_v30, 7  ;;  %v25775_v23 = vld [vmem:[#allocation178_spill] sm:$0xff] }
 0x63e   : > { %25765 = vst [vmem:[#allocation213_spill] sm:$0xff] %v20095_v55  ;;  %v20103_v21 = vsel %vm6460_vm5, %v25768_v42, %v25766_v36  ;;  %v25776_v50 = vrot.slane %v25775_v23, 7  ;;  %v25779_v36 = vld [vmem:[#allocation195_spill] sm:$0xff] }
 0x63f   : > { %25769 = vst [vmem:[#allocation214_spill] sm:$0xff] %v20103_v21  ;;  %v20111_v35 = vsel %vm6460_vm5, %v25772_v33, %v25770_v12  ;;  %v25780_v42 = vrot.slane %v25779_v36, 7  ;;  %v25783_v12 = vld [vmem:[#allocation197_spill] sm:$0xff] }
 0x640   : > { %25773 = vst [vmem:[#allocation215_spill] sm:$0xff] %v20111_v35  ;;  %v20119_v55 = vsel %vm6460_vm5, %v25776_v50, %v25774_v3  ;;  %v25784_v33 = vrot.slane %v25783_v12, 7  ;;  %v25787_v3 = vrot.slane %v19628_v7, 7 }
 0x641   : > { %25777 = vst [vmem:[#allocation216_spill] sm:$0xff] %v20119_v55  ;;  %v20127_v21 = vsel %vm6460_vm5, %v25780_v42, %v25778_v46  ;;  %v25789_v55 = vrot.slane %v19631_v53, 7  ;;  %v25790_v46 = vrot.slane %v19634_v27, 7 }
 0x642   : > { %25781 = vst [vmem:[#allocation217_spill] sm:$0xff] %v20127_v21  ;;  %v20135_v35 = vsel %vm6460_vm5, %v25784_v33, %v25782_v29  ;;  %v20143_v50 = vsel %vm6460_vm5, %v25787_v3, %v25786_v16  ;;  %v25792_v21 = vrot.slane %v19637_v58, 7  ;;  %v25793_v29 = vrot.slane %v19640_v22, 7 }
 0x643   : > { %25785 = vst [vmem:[#allocation218_spill] sm:$0xff] %v20135_v35  ;;  %25788 = vst [vmem:[#allocation219_spill] sm:$0xff] %v20143_v50  ;;  %v20151_v42 = vsel %vm6460_vm5, %v25790_v46, %v25789_v55  ;;  %v25795_v35 = vrot.slane %v19643_v5, 7  ;;  %v25796_v16 = vrot.slane %v19646_v17, 7  ;;  %v25798_v50 = vrot.slane %v19649_v61, 7 }
 0x644   : > { %25791 = vst [vmem:[#allocation220_spill] sm:$0xff] %v20151_v42  ;;  %v20159_v33 = vsel %vm6460_vm5, %v25793_v29, %v25792_v21  ;;  %v25799_v55 = vrot.slane %v19652_v0, 7  ;;  %v25801_v42 = vrot.slane %v19655_v34, 7  ;;  %v25802_v21 = vrot.slane %v19658_v20, 7 }
 0x645   : > { %25794 = vst [vmem:[#allocation221_spill] sm:$0xff] %v20159_v33  ;;  %v20167_v3 = vsel %vm6460_vm5, %v25796_v16, %v25795_v35  ;;  %v25804_v33 = vrot.slane %v19661_v2, 7  ;;  %v25805_v35 = vrot.slane %v19664_v49, 7 }
 0x646   : > { %25797 = vst [vmem:[#allocation222_spill] sm:$0xff] %v20167_v3  ;;  %v20175_v46 = vsel %vm6460_vm5, %v25799_v55, %v25798_v50  ;;  %v20183_v29 = vsel %vm6460_vm5, %v25802_v21, %v25801_v42  ;;  %v25807_v3 = vrot.slane %v19667_v43, 7  ;;  %v25808_v50 = vrot.slane %v19670_v8, 7 }
 0x647   : > { %25800 = vst [vmem:[#allocation223_spill] sm:$0xff] %v20175_v46  ;;  %25803 = vst [vmem:[#allocation224_spill] sm:$0xff] %v20183_v29  ;;  %v20191_v16 = vsel %vm6460_vm5, %v25805_v35, %v25804_v33  ;;  %v25810_v46 = vrot.slane %v19673_v44, 7  ;;  %v25811_v42 = vrot.slane %v19676_v9, 7  ;;  %v25813_v29 = vrot.slane %v19679_v59, 7 }
 0x648   : > { %25806 = vst [vmem:[#allocation225_spill] sm:$0xff] %v20191_v16  ;;  %v20199_v55 = vsel %vm6460_vm5, %v25808_v50, %v25807_v3  ;;  %v25814_v33 = vrot.slane %v19682_v62, 7  ;;  %v25816_v16 = vrot.slane %v19685_v26, 7  ;;  %v25817_v3 = vrot.slane %v19688_v32, 7 }
 0x649   : > { %25809 = vst [vmem:[#allocation226_spill] sm:$0xff] %v20199_v55  ;;  %v20207_v21 = vsel %vm6460_vm5, %v25811_v42, %v25810_v46  ;;  %v25819_v55 = vrot.slane %v19691_v18, 7  ;;  %v25820_v46 = vld [vmem:[#allocation166_spill] sm:$0xff]  ;;  %v25823_v62 = vrot.slane %v19697_v39, 7 }
 0x64a   : > { %25812 = vst [vmem:[#allocation227_spill] sm:$0xff] %v20207_v21  ;;  %v20215_v35 = vsel %vm6460_vm5, %v25814_v33, %v25813_v29  ;;  %v20223_v50 = vsel %vm6460_vm5, %v25817_v3, %v25816_v16  ;;  %v25821_v42 = vrot.slane %v25820_v46, 7  ;;  %v25824_v29 = vrot.slane %v19700_v40, 7 }
 0x64b   : > { %25815 = vst [vmem:[#allocation228_spill] sm:$0xff] %v20215_v35  ;;  %25818 = vst [vmem:[#allocation229_spill] sm:$0xff] %v20223_v50  ;;  %v25826_v35 = vrot.slane %v25719_v25, 7  ;;  %v25827_v16 = vrot.slane %v19706_v60, 7  ;;  %v25829_v50 = vrot.slane %v19709_v63, 7 }
 0x64c   : > { %v20231_v21 = vsel %vm6460_vm5, %v25821_v42, %v25819_v55  ;;  %v20239_v33 = vsel %vm6460_vm5, %v25824_v29, %v25823_v62  ;;  %v25830_v55 = vrot.slane %v19712_v56, 7  ;;  %v25833_v62 = vrot.slane %v19718_v14, 7 }
 0x64d   : > { %25822 = vst [vmem:[#allocation166_spill] sm:$0xff] %v20231_v21  ;;  %25825 = vst [vmem:[#allocation230_spill] sm:$0xff] %v20239_v33  ;;  %v20247_v3 = vsel %vm6460_vm5, %v25827_v16, %v25826_v35  ;;  %v25832_v21 = vrot.slane %v19715_v45, 7  ;;  %v25835_v33 = vrot.slane %v19721_v19, 7  ;;  %v25836_v35 = vrot.slane %v19724_v24, 7 }
 0x64e   : > { %25828 = vst [vmem:[#allocation231_spill] sm:$0xff] %v20247_v3  ;;  %v20255_v42 = vsel %vm6460_vm5, %v25830_v55, %v25829_v50  ;;  %v25838_v3 = vrot.slane %v19727_v1, 7  ;;  %v25839_v50 = vrot.slane %v19730_v11, 7 }
 0x64f   : > { %25831 = vst [vmem:[#allocation232_spill] sm:$0xff] %v20255_v42  ;;  %v20263_v29 = vsel %vm6460_vm5, %v25833_v62, %v25832_v21  ;;  %v20271_v16 = vsel %vm6460_vm5, %v25836_v35, %v25835_v33  ;;  %v25841_v42 = vrot.slane %v19733_v10, 7  ;;  %v25842_v21 = vrot.slane %v25669_v31, 7 }
 0x650   : > { %25834 = vst [vmem:[#allocation233_spill] sm:$0xff] %v20263_v29  ;;  %25837 = vst [vmem:[#allocation234_spill] sm:$0xff] %v20271_v16  ;;  %v20279_v55 = vsel %vm6460_vm5, %v25839_v50, %v25838_v3  ;;  %v25844_v29 = vrot.slane %v19739_v54, 7  ;;  %v25845_v33 = vrot.slane %v25670_v38, 7  ;;  %v25847_v16 = vrot.slane %v19745_v41, 7  ;;  %v25848_v3 = vld [vmem:[#allocation170_spill] sm:$0xff] }
 0x651   : > { %25840 = vst [vmem:[#allocation235_spill] sm:$0xff] %v20279_v55  ;;  %v20287_v62 = vsel %vm6460_vm5, %v25842_v21, %v25841_v42  ;;  %v25849_v50 = vrot.slane %v25848_v3, 7  ;;  %v25851_v31 = vrot.slane %v19751_v57, 7  ;;  %v25852_v42 = vld [vmem:[#allocation171_spill] sm:$0xff]  ;;  %v25855_v38 = vrot.slane %v25747_v47, 7 }
 0x652   : > { %25843 = vst [vmem:[#allocation236_spill] sm:$0xff] %v20287_v62  ;;  %v20295_v35 = vsel %vm6460_vm5, %v25845_v33, %v25844_v29  ;;  %v25853_v21 = vrot.slane %v25852_v42, 7  ;;  %v25856_v29 = vld [vmem:[#allocation187_spill] sm:$0xff]  ;;  %v25859_v3 = vrot.slane %v25751_v48, 7  ;;  %v25863_v42 = vrot.slane %v25755_v6, 7  ;;  %v25902_v6 = vld [vmem:[#allocation189_spill] sm:$0xff] }
 0x653   : > { %25846 = vst [vmem:[#allocation237_spill] sm:$0xff] %v20295_v35  ;;  %v20303_v55 = vsel %vm6460_vm5, %v25849_v50, %v25847_v16  ;;  %v25857_v33 = vrot.slane %v25856_v29, 7  ;;  %v25860_v16 = vld [vmem:[#allocation172_spill] sm:$0xff]  ;;  %v25867_v29 = vrot.slane %v25759_v52, 7  ;;  %v25901_v52 = vld [vmem:[#allocation174_spill] sm:$0xff]  ;;  %v25904_v47 = vmov %v25678_v28 }
 0x654   : > { %25850 = vst [vmem:[#allocation238_spill] sm:$0xff] %v20303_v55  ;;  %v20311_v62 = vsel %vm6460_vm5, %v25853_v21, %v25851_v31  ;;  %v25861_v50 = vrot.slane %v25860_v16, 7  ;;  %v25864_v31 = vld [vmem:[#allocation173_spill] sm:$0xff]  ;;  %v25871_v16 = vrot.slane %v25763_v37, 7  ;;  %v25903_v48 = vld [vmem:[#allocation176_spill] sm:$0xff]  ;;  %v25905_v57 = vmov %v19814_v13 }
 0x655   : > { %25854 = vst [vmem:[#allocation239_spill] sm:$0xff] %v20311_v62  ;;  %v20319_v35 = vsel %vm6460_vm5, %v25857_v33, %v25855_v38  ;;  %v25865_v21 = vrot.slane %v25864_v31, 7  ;;  %v25868_v38 = vld [vmem:[#allocation174_spill] sm:$0xff]  ;;  %v25875_v31 = vrot.slane %v25767_v4, 7  ;;  %v25899_v4 = vld [vmem:[#allocation172_spill] sm:$0xff]  ;;  %v25900_v37 = vld [vmem:[#allocation173_spill] sm:$0xff] }
 0x656   : > { %25858 = vst [vmem:[#allocation240_spill] sm:$0xff] %v20319_v35  ;;  %v20327_v55 = vsel %vm6460_vm5, %v25861_v50, %v25859_v3  ;;  %v25869_v33 = vrot.slane %v25868_v38, 7  ;;  %v25872_v3 = vld [vmem:[#allocation189_spill] sm:$0xff]  ;;  %v25879_v38 = vrot.slane %v25771_v30, 7  ;;  %v25898_v30 = vld [vmem:[#allocation187_spill] sm:$0xff] }
 0x657   : > { %25862 = vst [vmem:[#allocation241_spill] sm:$0xff] %v20327_v55  ;;  %v20335_v62 = vsel %vm6460_vm5, %v25865_v21, %v25863_v42  ;;  %v25873_v50 = vrot.slane %v25872_v3, 7  ;;  %v25876_v42 = vld [vmem:[#allocation176_spill] sm:$0xff]  ;;  %v25883_v3 = vrot.slane %v25775_v23, 7  ;;  %v25897_v23 = vld [vmem:[#allocation171_spill] sm:$0xff] }
 0x658   : > { %25866 = vst [vmem:[#allocation242_spill] sm:$0xff] %v20335_v62  ;;  %v20343_v35 = vsel %vm6460_vm5, %v25869_v33, %v25867_v29  ;;  %v25877_v21 = vrot.slane %v25876_v42, 7  ;;  %v25880_v29 = vld [vmem:[#allocation191_spill] sm:$0xff]  ;;  %v25887_v42 = vrot.slane %v25779_v36, 7  ;;  %v25896_v36 = vld [vmem:[#allocation170_spill] sm:$0xff] }
 0x659   : > { %25870 = vst [vmem:[#allocation243_spill] sm:$0xff] %v20343_v35  ;;  %v20351_v55 = vsel %vm6460_vm5, %v25873_v50, %v25871_v16  ;;  %v25881_v33 = vrot.slane %v25880_v29, 7  ;;  %v25884_v16 = vld [vmem:[#allocation179_spill] sm:$0xff] }
 0x65a   : > { %25874 = vst [vmem:[#allocation244_spill] sm:$0xff] %v20351_v55  ;;  %v20359_v62 = vsel %vm6460_vm5, %v25877_v21, %v25875_v31  ;;  %v25885_v50 = vrot.slane %v25884_v16, 7  ;;  %v25888_v31 = vrot.slane %v25678_v28, 7  ;;  %v25913_v28 = vrot.slane %v19637_v58, 1 }
 0x65b   : > { %25878 = vst [vmem:[#allocation245_spill] sm:$0xff] %v20359_v62  ;;  %v20367_v35 = vsel %vm6460_vm5, %v25881_v33, %v25879_v38  ;;  %v25890_v62 = vrot.slane %v25783_v12, 7  ;;  %v25891_v38 = vrot.slane %v19814_v13, 7  ;;  %v25895_v12 = vld [vmem:[#allocation169_spill] sm:$0xff]  ;;  %v25915_v13 = vrot.slane %v19646_v17, 1 }
 0x65c   : > { %25882 = vst [vmem:[#allocation246_spill] sm:$0xff] %v20367_v35  ;;  %v20375_v55 = vsel %vm6460_vm5, %v25885_v50, %v25883_v3  ;;  %v20383_v21 = vsel %vm6460_vm5, %v25888_v31, %v25887_v42  ;;  %v25893_v35 = vld [vmem:[#allocation196_spill] sm:$0xff]  ;;  %v25906_v42 = vrot.slane %v19628_v7, 1  ;;  %v25907_v31 = vrot.slane %v19625_v51, 1 }
 0x65d   : > { %25886 = vst [vmem:[#allocation247_spill] sm:$0xff] %v20375_v55  ;;  %25889 = vst [vmem:[#allocation248_spill] sm:$0xff] %v20383_v21  ;;  %v20391_v33 = vsel %vm6460_vm5, %v25891_v38, %v25890_v62  ;;  %v25909_v62 = vrot.slane %v19634_v27, 1  ;;  %v25910_v38 = vrot.slane %v19631_v53, 1  ;;  %v25912_v55 = vrot.slane %v19640_v22, 1 }
 0x65e   : > { %25892 = vst [vmem:[#allocation249_spill] sm:$0xff] %v20391_v33  ;;  %v25894_v33 = vld [vmem:[#allocation162_spill] sm:$0xff]  ;;  %v20464_v21 = vsel %vm6589_vm6, %v25907_v31, %v25906_v42  ;;  %v25916_v42 = vrot.slane %v19643_v5, 1 }
 0x65f   : > { %25908 = vst [vmem:[#allocation196_spill] sm:$0xff] %v20464_v21  ;;  %v20472_v3 = vsel %vm6589_vm6, %v25910_v38, %v25909_v62  ;;  %v20480_v50 = vsel %vm6589_vm6, %v25913_v28, %v25912_v55  ;;  %v25918_v21 = vrot.slane %v19652_v0, 1  ;;  %v25919_v62 = vrot.slane %v19649_v61, 1 }
 0x660   : > { %25911 = vst [vmem:[#allocation250_spill] sm:$0xff] %v20472_v3  ;;  %25914 = vst [vmem:[#allocation251_spill] sm:$0xff] %v20480_v50  ;;  %v20488_v31 = vsel %vm6589_vm6, %v25916_v42, %v25915_v13  ;;  %v25921_v3 = vrot.slane %v19658_v20, 1  ;;  %v25922_v28 = vrot.slane %v19655_v34, 1  ;;  %v25924_v50 = vrot.slane %v19664_v49, 1 }
 0x661   : > { %25917 = vst [vmem:[#allocation252_spill] sm:$0xff] %v20488_v31  ;;  %v20496_v38 = vsel %vm6589_vm6, %v25919_v62, %v25918_v21  ;;  %v25925_v13 = vrot.slane %v19661_v2, 1  ;;  %v25927_v31 = vrot.slane %v19670_v8, 1  ;;  %v25928_v21 = vrot.slane %v19667_v43, 1 }
 0x662   : > { %25920 = vst [vmem:[#allocation253_spill] sm:$0xff] %v20496_v38  ;;  %v20504_v55 = vsel %vm6589_vm6, %v25922_v28, %v25921_v3  ;;  %v25930_v38 = vrot.slane %v19676_v9, 1  ;;  %v25931_v3 = vrot.slane %v19673_v44, 1 }
 0x663   : > { %25923 = vst [vmem:[#allocation254_spill] sm:$0xff] %v20504_v55  ;;  %v20512_v42 = vsel %vm6589_vm6, %v25925_v13, %v25924_v50  ;;  %v20520_v62 = vsel %vm6589_vm6, %v25928_v21, %v25927_v31  ;;  %v25933_v55 = vrot.slane %v25893_v35, 1  ;;  %v25934_v50 = vrot.slane %v19679_v59, 1 }
 0x664   : > { %25926 = vst [vmem:[#allocation255_spill] sm:$0xff] %v20512_v42  ;;  %25929 = vst [vmem:[#allocation256_spill] sm:$0xff] %v20520_v62  ;;  %v20528_v28 = vsel %vm6589_vm6, %v25931_v3, %v25930_v38  ;;  %v25936_v42 = vrot.slane %v19688_v32, 1  ;;  %v25937_v31 = vrot.slane %v19685_v26, 1  ;;  %v25939_v62 = vrot.slane %v25820_v46, 1 }
 0x665   : > { %25932 = vst [vmem:[#allocation257_spill] sm:$0xff] %v20528_v28  ;;  %v20536_v13 = vsel %vm6589_vm6, %v25934_v50, %v25933_v55  ;;  %v25940_v38 = vrot.slane %v19691_v18, 1  ;;  %v25942_v28 = vrot.slane %v19700_v40, 1  ;;  %v25943_v55 = vrot.slane %v19697_v39, 1 }
 0x666   : > { %25935 = vst [vmem:[#allocation258_spill] sm:$0xff] %v20536_v13  ;;  %v20544_v21 = vsel %vm6589_vm6, %v25937_v31, %v25936_v42  ;;  %v25945_v13 = vrot.slane %v19706_v60, 1  ;;  %v25946_v42 = vrot.slane %v25719_v25, 1 }
 0x667   : > { %25938 = vst [vmem:[#allocation259_spill] sm:$0xff] %v20544_v21  ;;  %v20552_v3 = vsel %vm6589_vm6, %v25940_v38, %v25939_v62  ;;  %v20560_v50 = vsel %vm6589_vm6, %v25943_v55, %v25942_v28  ;;  %v25948_v21 = vrot.slane %v19712_v56, 1  ;;  %v25949_v62 = vrot.slane %v19709_v63, 1 }
 0x668   : > { %25941 = vst [vmem:[#allocation260_spill] sm:$0xff] %v20552_v3  ;;  %25944 = vst [vmem:[#allocation261_spill] sm:$0xff] %v20560_v50  ;;  %v20568_v31 = vsel %vm6589_vm6, %v25946_v42, %v25945_v13  ;;  %v25951_v3 = vrot.slane %v19718_v14, 1  ;;  %v25952_v28 = vrot.slane %v19715_v45, 1  ;;  %v25954_v50 = vrot.slane %v19724_v24, 1 }
 0x669   : > { %25947 = vst [vmem:[#allocation262_spill] sm:$0xff] %v20568_v31  ;;  %v20576_v38 = vsel %vm6589_vm6, %v25949_v62, %v25948_v21  ;;  %v25955_v13 = vrot.slane %v19721_v19, 1  ;;  %v25957_v31 = vrot.slane %v19730_v11, 1  ;;  %v25958_v21 = vrot.slane %v19727_v1, 1 }
 0x66a   : > { %25950 = vst [vmem:[#allocation263_spill] sm:$0xff] %v20576_v38  ;;  %v20584_v55 = vsel %vm6589_vm6, %v25952_v28, %v25951_v3  ;;  %v25960_v38 = vrot.slane %v25894_v33, 1  ;;  %v25961_v3 = vrot.slane %v19733_v10, 1 }
 0x66b   : > { %25953 = vst [vmem:[#allocation264_spill] sm:$0xff] %v20584_v55  ;;  %v20592_v42 = vsel %vm6589_vm6, %v25955_v13, %v25954_v50  ;;  %v20600_v62 = vsel %vm6589_vm6, %v25958_v21, %v25957_v31  ;;  %v25963_v55 = vrot.slane %v25895_v12, 1  ;;  %v25964_v50 = vrot.slane %v19739_v54, 1 }
 0x66c   : > { %25956 = vst [vmem:[#allocation265_spill] sm:$0xff] %v20592_v42  ;;  %25959 = vst [vmem:[#allocation266_spill] sm:$0xff] %v20600_v62  ;;  %v20608_v28 = vsel %vm6589_vm6, %v25961_v3, %v25960_v38  ;;  %v25966_v42 = vrot.slane %v25896_v36, 1  ;;  %v25967_v31 = vrot.slane %v19745_v41, 1  ;;  %v25969_v62 = vrot.slane %v25897_v23, 1  ;;  %v25970_v38 = vld [vmem:[#allocation186_spill] sm:$0xff] }
 0x66d   : > { %25962 = vst [vmem:[#allocation267_spill] sm:$0xff] %v20608_v28  ;;  %v20616_v13 = vsel %vm6589_vm6, %v25964_v50, %v25963_v55  ;;  %v25971_v3 = vrot.slane %v25970_v38, 1  ;;  %v25973_v12 = vrot.slane %v25898_v30, 1  ;;  %v25974_v55 = vld [vmem:[#allocation159_spill] sm:$0xff]  ;;  %v25977_v36 = vrot.slane %v25899_v4, 1 }
 0x66e   : > { %25965 = vst [vmem:[#allocation268_spill] sm:$0xff] %v20616_v13  ;;  %v20624_v21 = vsel %vm6589_vm6, %v25967_v31, %v25966_v42  ;;  %v25975_v50 = vrot.slane %v25974_v55, 1  ;;  %v25978_v42 = vld [vmem:[#allocation160_spill] sm:$0xff]  ;;  %v25981_v23 = vrot.slane %v25900_v37, 1  ;;  %v25985_v30 = vrot.slane %v25901_v52, 1 }
 0x66f   : > { %25968 = vst [vmem:[#allocation269_spill] sm:$0xff] %v20624_v21  ;;  %v20632_v28 = vsel %vm6589_vm6, %v25971_v3, %v25969_v62  ;;  %v25979_v31 = vrot.slane %v25978_v42, 1  ;;  %v25982_v62 = vld [vmem:[#allocation163_spill] sm:$0xff]  ;;  %v25989_v4 = vrot.slane %v25902_v6, 1  ;;  %v25993_v37 = vrot.slane %v25903_v48, 1 }
 0x670   : > { %25972 = vst [vmem:[#allocation270_spill] sm:$0xff] %v20632_v28  ;;  %v20640_v13 = vsel %vm6589_vm6, %v25975_v50, %v25973_v12  ;;  %v25983_v3 = vrot.slane %v25982_v62, 1  ;;  %v25986_v12 = vld [vmem:[#allocation188_spill] sm:$0xff]  ;;  %v25997_v52 = vrot.slane %v25880_v29, 1  ;;  %v26001_v6 = vrot.slane %v25884_v16, 1 }
 0x671   : > { %25976 = vst [vmem:[#allocation271_spill] sm:$0xff] %v20640_v13  ;;  %v20648_v21 = vsel %vm6589_vm6, %v25979_v31, %v25977_v36  ;;  %v25987_v50 = vrot.slane %v25986_v12, 1  ;;  %v25990_v36 = vld [vmem:[#allocation175_spill] sm:$0xff]  ;;  %v26005_v48 = vrot.slane %v25904_v47, 1  ;;  %v26009_v29 = vrot.slane %v25905_v57, 1 }
 0x672   : > { %25980 = vst [vmem:[#allocation272_spill] sm:$0xff] %v20648_v21  ;;  %v20656_v28 = vsel %vm6589_vm6, %v25983_v3, %v25981_v23  ;;  %v25991_v31 = vrot.slane %v25990_v36, 1  ;;  %v25994_v23 = vld [vmem:[#allocation190_spill] sm:$0xff]  ;;  %v26013_v16 = vrot.slane %v19625_v51, 1 }
 0x673   : > { %25984 = vst [vmem:[#allocation273_spill] sm:$0xff] %v20656_v28  ;;  %v20664_v13 = vsel %vm6589_vm6, %v25987_v50, %v25985_v30  ;;  %v25995_v3 = vrot.slane %v25994_v23, 1  ;;  %v25998_v30 = vld [vmem:[#allocation177_spill] sm:$0xff] }
 0x674   : > { %25988 = vst [vmem:[#allocation274_spill] sm:$0xff] %v20664_v13  ;;  %v20672_v21 = vsel %vm6589_vm6, %v25991_v31, %v25989_v4  ;;  %v25999_v50 = vrot.slane %v25998_v30, 1  ;;  %v26002_v4 = vld [vmem:[#allocation178_spill] sm:$0xff] }
 0x675   : > { %25992 = vst [vmem:[#allocation275_spill] sm:$0xff] %v20672_v21  ;;  %v20680_v28 = vsel %vm6589_vm6, %v25995_v3, %v25993_v37  ;;  %v26003_v31 = vrot.slane %v26002_v4, 1  ;;  %v26006_v37 = vld [vmem:[#allocation195_spill] sm:$0xff] }
 0x676   : > { %25996 = vst [vmem:[#allocation276_spill] sm:$0xff] %v20680_v28  ;;  %v20688_v13 = vsel %vm6589_vm6, %v25999_v50, %v25997_v52  ;;  %v26007_v3 = vrot.slane %v26006_v37, 1  ;;  %v26010_v52 = vld [vmem:[#allocation197_spill] sm:$0xff] }
 0x677   : > { %26000 = vst [vmem:[#allocation277_spill] sm:$0xff] %v20688_v13  ;;  %v20696_v21 = vsel %vm6589_vm6, %v26003_v31, %v26001_v6  ;;  %v26011_v50 = vrot.slane %v26010_v52, 1  ;;  %v26014_v6 = vrot.slane %v19628_v7, 1 }
 0x678   : > { %26004 = vst [vmem:[#allocation278_spill] sm:$0xff] %v20696_v21  ;;  %v20704_v28 = vsel %vm6589_vm6, %v26007_v3, %v26005_v48  ;;  %v26016_v21 = vrot.slane %v19631_v53, 1  ;;  %v26017_v48 = vrot.slane %v19634_v27, 1 }
 0x679   : > { %26008 = vst [vmem:[#allocation279_spill] sm:$0xff] %v20704_v28  ;;  %v20712_v13 = vsel %vm6589_vm6, %v26011_v50, %v26009_v29  ;;  %v20720_v31 = vsel %vm6589_vm6, %v26014_v6, %v26013_v16  ;;  %v26019_v28 = vrot.slane %v19637_v58, 1  ;;  %v26020_v29 = vrot.slane %v19640_v22, 1 }
 0x67a   : > { %26012 = vst [vmem:[#allocation280_spill] sm:$0xff] %v20712_v13  ;;  %26015 = vst [vmem:[#allocation281_spill] sm:$0xff] %v20720_v31  ;;  %v20728_v3 = vsel %vm6589_vm6, %v26017_v48, %v26016_v21  ;;  %v26022_v13 = vrot.slane %v19643_v5, 1  ;;  %v26023_v16 = vrot.slane %v19646_v17, 1  ;;  %v26025_v31 = vrot.slane %v19649_v61, 1 }
 0x67b   : > { %26018 = vst [vmem:[#allocation282_spill] sm:$0xff] %v20728_v3  ;;  %v20736_v50 = vsel %vm6589_vm6, %v26020_v29, %v26019_v28  ;;  %v26026_v21 = vrot.slane %v19652_v0, 1  ;;  %v26028_v3 = vrot.slane %v19655_v34, 1  ;;  %v26029_v28 = vrot.slane %v19658_v20, 1 }
 0x67c   : > { %26021 = vst [vmem:[#allocation283_spill] sm:$0xff] %v20736_v50  ;;  %v20744_v6 = vsel %vm6589_vm6, %v26023_v16, %v26022_v13  ;;  %v26031_v50 = vrot.slane %v19661_v2, 1  ;;  %v26032_v13 = vrot.slane %v19664_v49, 1 }
 0x67d   : > { %26024 = vst [vmem:[#allocation284_spill] sm:$0xff] %v20744_v6  ;;  %v20752_v48 = vsel %vm6589_vm6, %v26026_v21, %v26025_v31  ;;  %v20760_v29 = vsel %vm6589_vm6, %v26029_v28, %v26028_v3  ;;  %v26034_v6 = vrot.slane %v19667_v43, 1  ;;  %v26035_v31 = vrot.slane %v19670_v8, 1 }
 0x67e   : > { %26027 = vst [vmem:[#allocation285_spill] sm:$0xff] %v20752_v48  ;;  %26030 = vst [vmem:[#allocation286_spill] sm:$0xff] %v20760_v29  ;;  %v20768_v16 = vsel %vm6589_vm6, %v26032_v13, %v26031_v50  ;;  %v26037_v48 = vrot.slane %v19673_v44, 1  ;;  %v26038_v3 = vrot.slane %v19676_v9, 1  ;;  %v26040_v29 = vrot.slane %v19679_v59, 1 }
 0x67f   : > { %26033 = vst [vmem:[#allocation287_spill] sm:$0xff] %v20768_v16  ;;  %v20776_v21 = vsel %vm6589_vm6, %v26035_v31, %v26034_v6  ;;  %v26041_v50 = vrot.slane %v25893_v35, 1  ;;  %v26043_v16 = vrot.slane %v19685_v26, 1  ;;  %v26044_v6 = vrot.slane %v19688_v32, 1 }
 0x680   : > { %26036 = vst [vmem:[#allocation288_spill] sm:$0xff] %v20776_v21  ;;  %v20784_v28 = vsel %vm6589_vm6, %v26038_v3, %v26037_v48  ;;  %v26046_v21 = vrot.slane %v19691_v18, 1  ;;  %v26047_v48 = vrot.slane %v25820_v46, 1 }
 0x681   : > { %26039 = vst [vmem:[#allocation289_spill] sm:$0xff] %v20784_v28  ;;  %v20792_v13 = vsel %vm6589_vm6, %v26041_v50, %v26040_v29  ;;  %v20800_v31 = vsel %vm6589_vm6, %v26044_v6, %v26043_v16  ;;  %v26049_v28 = vrot.slane %v19697_v39, 1  ;;  %v26050_v29 = vrot.slane %v19700_v40, 1 }
 0x682   : > { %26042 = vst [vmem:[#allocation290_spill] sm:$0xff] %v20792_v13  ;;  %26045 = vst [vmem:[#allocation291_spill] sm:$0xff] %v20800_v31  ;;  %v20808_v3 = vsel %vm6589_vm6, %v26047_v48, %v26046_v21  ;;  %v26052_v13 = vrot.slane %v25719_v25, 1  ;;  %v26053_v16 = vrot.slane %v19706_v60, 1  ;;  %v26055_v31 = vrot.slane %v19709_v63, 1 }
 0x683   : > { %26048 = vst [vmem:[#allocation292_spill] sm:$0xff] %v20808_v3  ;;  %v20816_v50 = vsel %vm6589_vm6, %v26050_v29, %v26049_v28  ;;  %v26056_v21 = vrot.slane %v19712_v56, 1  ;;  %v26058_v3 = vrot.slane %v19715_v45, 1  ;;  %v26059_v28 = vrot.slane %v19718_v14, 1 }
 0x684   : > { %26051 = vst [vmem:[#allocation293_spill] sm:$0xff] %v20816_v50  ;;  %v20824_v6 = vsel %vm6589_vm6, %v26053_v16, %v26052_v13  ;;  %v26061_v50 = vrot.slane %v19721_v19, 1  ;;  %v26062_v13 = vrot.slane %v19724_v24, 1 }
 0x685   : > { %26054 = vst [vmem:[#allocation294_spill] sm:$0xff] %v20824_v6  ;;  %v20832_v48 = vsel %vm6589_vm6, %v26056_v21, %v26055_v31  ;;  %v20840_v29 = vsel %vm6589_vm6, %v26059_v28, %v26058_v3  ;;  %v26064_v6 = vrot.slane %v19727_v1, 1  ;;  %v26065_v31 = vrot.slane %v19730_v11, 1 }
 0x686   : > { %26057 = vst [vmem:[#allocation295_spill] sm:$0xff] %v20832_v48  ;;  %26060 = vst [vmem:[#allocation296_spill] sm:$0xff] %v20840_v29  ;;  %v20848_v16 = vsel %vm6589_vm6, %v26062_v13, %v26061_v50  ;;  %v26067_v48 = vrot.slane %v19733_v10, 1  ;;  %v26068_v3 = vrot.slane %v25894_v33, 1  ;;  %v26070_v29 = vrot.slane %v19739_v54, 1  ;;  %v26071_v50 = vld [vmem:[#allocation169_spill] sm:$0xff] }
 0x687   : > { %26063 = vst [vmem:[#allocation297_spill] sm:$0xff] %v20848_v16  ;;  %v20856_v21 = vsel %vm6589_vm6, %v26065_v31, %v26064_v6  ;;  %v26072_v13 = vrot.slane %v26071_v50, 1  ;;  %v26074_v11 = vrot.slane %v19745_v41, 1  ;;  %v26075_v6 = vld [vmem:[#allocation170_spill] sm:$0xff]  ;;  %v26078_v33 = vrot.slane %v25970_v38, 1 }
 0x688   : > { %26066 = vst [vmem:[#allocation298_spill] sm:$0xff] %v20856_v21  ;;  %v20864_v28 = vsel %vm6589_vm6, %v26068_v3, %v26067_v48  ;;  %v26076_v31 = vrot.slane %v26075_v6, 1  ;;  %v26079_v48 = vld [vmem:[#allocation171_spill] sm:$0xff]  ;;  %v26082_v50 = vrot.slane %v25974_v55, 1  ;;  %v26086_v6 = vrot.slane %v25978_v42, 1  ;;  %v26138_v42 = vld [vmem:[#allocation228_spill] sm:$0xff] }
 0x689   : > { %26069 = vst [vmem:[#allocation299_spill] sm:$0xff] %v20864_v28  ;;  %v20872_v16 = vsel %vm6589_vm6, %v26072_v13, %v26070_v29  ;;  %v26080_v3 = vrot.slane %v26079_v48, 1  ;;  %v26083_v29 = vld [vmem:[#allocation187_spill] sm:$0xff]  ;;  %v26090_v48 = vrot.slane %v25982_v62, 1  ;;  %v26140_v55 = vld [vmem:[#allocation229_spill] sm:$0xff]  ;;  %v26142_v38 = vld [vmem:[#allocation166_spill] sm:$0xff] }
 0x68a   : > { %26073 = vst [vmem:[#allocation300_spill] sm:$0xff] %v20872_v16  ;;  %v20880_v21 = vsel %vm6589_vm6, %v26076_v31, %v26074_v11  ;;  %v26084_v13 = vrot.slane %v26083_v29, 1  ;;  %v26087_v11 = vld [vmem:[#allocation172_spill] sm:$0xff]  ;;  %v26094_v29 = vrot.slane %v25986_v12, 1  ;;  %v26134_v12 = vld [vmem:[#allocation226_spill] sm:$0xff]  ;;  %v26136_v62 = vld [vmem:[#allocation227_spill] sm:$0xff] }
 0x68b   : > { %26077 = vst [vmem:[#allocation301_spill] sm:$0xff] %v20880_v21  ;;  %v20888_v28 = vsel %vm6589_vm6, %v26080_v3, %v26078_v33  ;;  %v26088_v31 = vrot.slane %v26087_v11, 1  ;;  %v26091_v33 = vld [vmem:[#allocation173_spill] sm:$0xff]  ;;  %v26098_v11 = vrot.slane %v25990_v36, 1  ;;  %v26131_v36 = vld [vmem:[#allocation183_spill] sm:$0xff] }
 0x68c   : > { %26081 = vst [vmem:[#allocation302_spill] sm:$0xff] %v20888_v28  ;;  %v20896_v16 = vsel %vm6589_vm6, %v26084_v13, %v26082_v50  ;;  %v26092_v3 = vrot.slane %v26091_v33, 1  ;;  %v26095_v50 = vld [vmem:[#allocation174_spill] sm:$0xff]  ;;  %v26102_v33 = vrot.slane %v25994_v23, 1 }
 0x68d   : > { %26085 = vst [vmem:[#allocation303_spill] sm:$0xff] %v20896_v16  ;;  %v20904_v21 = vsel %vm6589_vm6, %v26088_v31, %v26086_v6  ;;  %v26096_v13 = vrot.slane %v26095_v50, 1  ;;  %v26099_v6 = vld [vmem:[#allocation189_spill] sm:$0xff]  ;;  %v26106_v50 = vrot.slane %v25998_v30, 1  ;;  %v26126_v30 = vld [vmem:[#allocation222_spill] sm:$0xff] }
 0x68e   : > { %26089 = vst [vmem:[#allocation304_spill] sm:$0xff] %v20904_v21  ;;  %v20912_v28 = vsel %vm6589_vm6, %v26092_v3, %v26090_v48  ;;  %v26100_v31 = vrot.slane %v26099_v6, 1  ;;  %v26103_v48 = vld [vmem:[#allocation176_spill] sm:$0xff]  ;;  %v26110_v6 = vrot.slane %v26002_v4, 1  ;;  %v26124_v4 = vld [vmem:[#allocation221_spill] sm:$0xff] }
 0x68f   : > { %26093 = vst [vmem:[#allocation305_spill] sm:$0xff] %v20912_v28  ;;  %v20920_v16 = vsel %vm6589_vm6, %v26096_v13, %v26094_v29  ;;  %v26104_v3 = vrot.slane %v26103_v48, 1  ;;  %v26107_v29 = vld [vmem:[#allocation191_spill] sm:$0xff]  ;;  %v26114_v48 = vrot.slane %v26006_v37, 1 }
 0x690   : > { %26097 = vst [vmem:[#allocation306_spill] sm:$0xff] %v20920_v16  ;;  %v20928_v21 = vsel %vm6589_vm6, %v26100_v31, %v26098_v11  ;;  %v26108_v13 = vrot.slane %v26107_v29, 1  ;;  %v26111_v11 = vld [vmem:[#allocation179_spill] sm:$0xff] }
 0x691   : > { %26101 = vst [vmem:[#allocation307_spill] sm:$0xff] %v20928_v21  ;;  %v20936_v28 = vsel %vm6589_vm6, %v26104_v3, %v26102_v33  ;;  %v26112_v31 = vrot.slane %v26111_v11, 1  ;;  %v26115_v33 = vrot.slane %v25904_v47, 1  ;;  %v26121_v11 = vld [vmem:[#allocation182_spill] sm:$0xff]  ;;  %v26125_v47 = vld [vmem:[#allocation167_spill] sm:$0xff] }
 0x692   : > { %26105 = vst [vmem:[#allocation308_spill] sm:$0xff] %v20936_v28  ;;  %v20944_v16 = vsel %vm6589_vm6, %v26108_v13, %v26106_v50  ;;  %v26117_v28 = vrot.slane %v26010_v52, 1  ;;  %v26118_v50 = vrot.slane %v25905_v57, 1  ;;  %v6656_v29 = vpack.c.bf16 %v26125_v47, %v26124_v4  ;;  %v26129_v52 = vld [vmem:[#allocation168_spill] sm:$0xff] }
 0x693   : > { %26109 = vst [vmem:[#allocation309_spill] sm:$0xff] %v20944_v16  ;;  %v20952_v21 = vsel %vm6589_vm6, %v26112_v31, %v26110_v6  ;;  %v20960_v3 = vsel %vm6589_vm6, %v26115_v33, %v26114_v48  ;;  %v26120_v16 = vld [vmem:[#allocation219_spill] sm:$0xff]  ;;  %v26122_v31 = vld [vmem:[#allocation220_spill] sm:$0xff] }
 0x694   : > { %26113 = vst [vmem:[#allocation310_spill] sm:$0xff] %v20952_v21  ;;  %26116 = vst [vmem:[#allocation311_spill] sm:$0xff] %v20960_v3  ;;  %v20968_v13 = vsel %vm6589_vm6, %v26118_v50, %v26117_v28  ;;  %v6654_v6 = vpack.c.bf16 %v26121_v11, %v26120_v16  ;;  %v26123_v21 = vld [vmem:[#allocation200_spill] sm:$0xff]  ;;  %v26128_v3 = vld [vmem:[#allocation223_spill] sm:$0xff] }
 0x695   : > { %26119 = vst [vmem:[#allocation312_spill] sm:$0xff] %v20968_v13  ;;  %v6655_v37 = vpack.c.bf16 %v26123_v21, %v26122_v31  ;;  %v26127_v48 = vld [vmem:[#allocation184_spill] sm:$0xff]  ;;  %v6658_v23 = vpack.c.bf16 %v26129_v52, %v26128_v3  ;;  %v26132_v28 = vld [vmem:[#allocation225_spill] sm:$0xff]  ;;  %v26133_v50 = vld [vmem:[#allocation199_spill] sm:$0xff] }
 0x696   : > { %v6657_v33 = vpack.c.bf16 %v26127_v48, %v26126_v30  ;;  %v26130_v57 = vld [vmem:[#allocation224_spill] sm:$0xff]  ;;  %v6660_v13 = vpack.c.bf16 %v26133_v50, %v26132_v28  ;;  %v26135_v16 = vld [vmem:[#allocation201_spill] sm:$0xff]  ;;  %6686 = vst.msk [vmem:[#allocation2] sm:$0xff] %vm2126_vm4, %v6654_v6  ;;  %6688 = vst.msk [vmem:[#allocation2 + $0x10] sm:$0xff] %vm2126_vm4, %v6656_v29 }
 0x697   : > { %v6659_v15 = vpack.c.bf16 %v26131_v36, %v26130_v57  ;;  %v6661_v11 = vpack.c.bf16 %v26135_v16, %v26134_v12  ;;  %v26137_v21 = vld [vmem:[#allocation185_spill] sm:$0xff]  ;;  %v26139_v47 = vld [vmem:[#allocation192_spill] sm:$0xff]  ;;  %6687 = vst.msk [vmem:[#allocation2 + $0x8] sm:$0xff] %vm2126_vm4, %v6655_v37  ;;  %v26144_v57 = vld [vmem:[#allocation230_spill] sm:$0xff] }
 0x698   : > { %v6662_v31 = vpack.c.bf16 %v26137_v21, %v26136_v62  ;;  %v6663_v4 = vpack.c.bf16 %v26139_v47, %v26138_v42  ;;  %v26141_v30 = vld [vmem:[#allocation164_spill] sm:$0xff]  ;;  %v26143_v52 = vld [vmem:[#allocation165_spill] sm:$0xff]  ;;  %6689 = vst.msk [vmem:[#allocation2 + $0x18] sm:$0xff] %vm2126_vm4, %v6657_v33  ;;  %v26145_v12 = vld [vmem:[#allocation194_spill] sm:$0xff] }
 0x699   : > { %v6664_v48 = vpack.c.bf16 %v26141_v30, %v26140_v55  ;;  %v6665_v3 = vpack.c.bf16 %v26143_v52, %v26142_v38  ;;  %v6666_v62 = vpack.c.bf16 %v26145_v12, %v26144_v57  ;;  %v26146_v36 = vld [vmem:[#allocation231_spill] sm:$0xff]  ;;  %v26147_v28 = vld [vmem:[#allocation193_spill] sm:$0xff]  ;;  %v26148_v50 = vld [vmem:[#allocation232_spill] sm:$0xff]  ;;  %6690 = vst.msk [vmem:[#allocation2 + $0x20] sm:$0xff] %vm2126_vm4, %v6658_v23 }
 0x69a   : > { %v6667_v42 = vpack.c.bf16 %v26147_v28, %v26146_v36  ;;  %v26149_v16 = vld [vmem:[#allocation161_spill] sm:$0xff]  ;;  %v26151_v47 = vld [vmem:[#allocation202_spill] sm:$0xff]  ;;  %6691 = vst.msk [vmem:[#allocation2 + $0x28] sm:$0xff] %vm2126_vm4, %v6659_v15  ;;  %6692 = vst.msk [vmem:[#allocation2 + $0x30] sm:$0xff] %vm2126_vm4, %v6660_v13 }
 0x69b   : > { %v6668_v55 = vpack.c.bf16 %v26149_v16, %v26148_v50  ;;  %v26150_v21 = vld [vmem:[#allocation233_spill] sm:$0xff]  ;;  %6693 = vst.msk [vmem:[#allocation2 + $0x38] sm:$0xff] %vm2126_vm4, %v6661_v11  ;;  %v26152_v37 = vld [vmem:[#allocation234_spill] sm:$0xff]  ;;  %v26153_v29 = vld [vmem:[#allocation203_spill] sm:$0xff] }
 0x69c   : > { %v6669_v38 = vpack.c.bf16 %v26151_v47, %v26150_v21  ;;  %v6670_v6 = vpack.c.bf16 %v26153_v29, %v26152_v37  ;;  %v26154_v33 = vld [vmem:[#allocation235_spill] sm:$0xff]  ;;  %v26155_v30 = vld [vmem:[#allocation204_spill] sm:$0xff]  ;;  %v26157_v12 = vld [vmem:[#allocation205_spill] sm:$0xff]  ;;  %6694 = vst.msk [vmem:[#allocation2 + $0x40] sm:$0xff] %vm2126_vm4, %v6662_v31 }
 0x69d   : > { %v6671_v52 = vpack.c.bf16 %v26155_v30, %v26154_v33  ;;  %v26156_v57 = vld [vmem:[#allocation236_spill] sm:$0xff]  ;;  %v26158_v28 = vld [vmem:[#allocation237_spill] sm:$0xff]  ;;  %v26159_v50 = vld [vmem:[#allocation206_spill] sm:$0xff]  ;;  %6695 = vst.msk [vmem:[#allocation2 + $0x48] sm:$0xff] %vm2126_vm4, %v6663_v4 }
 0x69e   : > { %v6672_v36 = vpack.c.bf16 %v26157_v12, %v26156_v57  ;;  %v6673_v16 = vpack.c.bf16 %v26159_v50, %v26158_v28  ;;  %6696 = vst.msk [vmem:[#allocation2 + $0x50] sm:$0xff] %vm2126_vm4, %v6664_v48  ;;  %6697 = vst.msk [vmem:[#allocation2 + $0x58] sm:$0xff] %vm2126_vm4, %v6665_v3  ;;  %v26160_v23 = vld [vmem:[#allocation238_spill] sm:$0xff]  ;;  %v26161_v13 = vld [vmem:[#allocation207_spill] sm:$0xff] }
 0x69f   : > { %v6674_v15 = vpack.c.bf16 %v26161_v13, %v26160_v23  ;;  %v26162_v11 = vld [vmem:[#allocation239_spill] sm:$0xff]  ;;  %v26163_v21 = vld [vmem:[#allocation208_spill] sm:$0xff]  ;;  %v26165_v29 = vld [vmem:[#allocation209_spill] sm:$0xff]  ;;  %6698 = vst.msk [vmem:[#allocation2 + $0x60] sm:$0xff] %vm2126_vm4, %v6666_v62 }
 0x6a0   : > { %v6675_v47 = vpack.c.bf16 %v26163_v21, %v26162_v11  ;;  %v26164_v37 = vld [vmem:[#allocation240_spill] sm:$0xff]  ;;  %v26166_v30 = vld [vmem:[#allocation241_spill] sm:$0xff]  ;;  %v26167_v57 = vld [vmem:[#allocation210_spill] sm:$0xff]  ;;  %6699 = vst.msk [vmem:[#allocation2 + $0x68] sm:$0xff] %vm2126_vm4, %v6667_v42 }
 0x6a1   : > { %v6676_v33 = vpack.c.bf16 %v26165_v29, %v26164_v37  ;;  %v6677_v12 = vpack.c.bf16 %v26167_v57, %v26166_v30  ;;  %6700 = vst.msk [vmem:[#allocation2 + $0x70] sm:$0xff] %vm2126_vm4, %v6668_v55  ;;  %6701 = vst.msk [vmem:[#allocation2 + $0x78] sm:$0xff] %vm2126_vm4, %v6669_v38  ;;  %v26168_v31 = vld [vmem:[#allocation242_spill] sm:$0xff]  ;;  %v26169_v4 = vld [vmem:[#allocation211_spill] sm:$0xff] }
 0x6a2   : > { %v6678_v48 = vpack.c.bf16 %v26169_v4, %v26168_v31  ;;  %v26170_v3 = vld [vmem:[#allocation243_spill] sm:$0xff]  ;;  %v26171_v28 = vld [vmem:[#allocation212_spill] sm:$0xff]  ;;  %v26173_v13 = vld [vmem:[#allocation213_spill] sm:$0xff]  ;;  %6702 = vst.msk [vmem:[#allocation2 + $0x80] sm:$0xff] %vm2126_vm4, %v6670_v6  ;;  %v6718_v6 = vpack.c.bf16 %v19628_v7, %v19625_v51  ;;  %v6722_v51 = vpack.c.bf16 %v19652_v0, %v19649_v61  ;;  %v6723_v7 = vpack.c.bf16 %v19658_v20, %v19655_v34 }
 0x6a3   : > { %v6679_v50 = vpack.c.bf16 %v26171_v28, %v26170_v3  ;;  %v26172_v23 = vld [vmem:[#allocation244_spill] sm:$0xff]  ;;  %v26174_v21 = vld [vmem:[#allocation245_spill] sm:$0xff]  ;;  %v26175_v37 = vld [vmem:[#allocation214_spill] sm:$0xff]  ;;  %6703 = vst.msk [vmem:[#allocation2 + $0x88] sm:$0xff] %vm2126_vm4, %v6671_v52  ;;  %v6719_v52 = vpack.c.bf16 %v19634_v27, %v19631_v53  ;;  %v6725_v53 = vpack.c.bf16 %v19670_v8, %v19667_v43  ;;  %v6726_v27 = vpack.c.bf16 %v19676_v9, %v19673_v44 }
 0x6a4   : > { %v6680_v11 = vpack.c.bf16 %v26173_v13, %v26172_v23  ;;  %v6681_v29 = vpack.c.bf16 %v26175_v37, %v26174_v21  ;;  %6704 = vst.msk [vmem:[#allocation2 + $0x90] sm:$0xff] %vm2126_vm4, %v6672_v36  ;;  %6705 = vst.msk [vmem:[#allocation2 + $0x98] sm:$0xff] %vm2126_vm4, %v6673_v16  ;;  %v26176_v62 = vld [vmem:[#allocation246_spill] sm:$0xff]  ;;  %v26177_v42 = vld [vmem:[#allocation215_spill] sm:$0xff]  ;;  %v6720_v36 = vpack.c.bf16 %v19640_v22, %v19637_v58 }
 0x6a5   : > { %v6682_v55 = vpack.c.bf16 %v26177_v42, %v26176_v62  ;;  %v26178_v38 = vld [vmem:[#allocation247_spill] sm:$0xff]  ;;  %v26179_v30 = vld [vmem:[#allocation216_spill] sm:$0xff]  ;;  %v26181_v4 = vld [vmem:[#allocation217_spill] sm:$0xff]  ;;  %6706 = vst.msk [vmem:[#allocation2 + $0xa0] sm:$0xff] %vm2126_vm4, %v6674_v15  ;;  %v6721_v16 = vpack.c.bf16 %v19646_v17, %v19643_v5  ;;  %v6724_v58 = vpack.c.bf16 %v19664_v49, %v19661_v2  ;;  %v6727_v22 = vpack.c.bf16 %v25893_v35, %v19679_v59 }
 0x6a6   : > { %v6683_v57 = vpack.c.bf16 %v26179_v30, %v26178_v38  ;;  %v26180_v31 = vld [vmem:[#allocation248_spill] sm:$0xff]  ;;  %v26182_v28 = vld [vmem:[#allocation249_spill] sm:$0xff]  ;;  %v26183_v23 = vld [vmem:[#allocation218_spill] sm:$0xff]  ;;  %6707 = vst.msk [vmem:[#allocation2 + $0xa8] sm:$0xff] %vm2126_vm4, %v6675_v47  ;;  %v6728_v5 = vpack.c.bf16 %v19688_v32, %v19685_v26  ;;  %v6729_v17 = vpack.c.bf16 %v25820_v46, %v19691_v18  ;;  %v6730_v61 = vpack.c.bf16 %v19700_v40, %v19697_v39 }
 0x6a7   : > { %v6684_v3 = vpack.c.bf16 %v26181_v4, %v26180_v31  ;;  %v6685_v13 = vpack.c.bf16 %v26183_v23, %v26182_v28  ;;  %6708 = vst.msk [vmem:[#allocation2 + $0xb0] sm:$0xff] %vm2126_vm4, %v6676_v33  ;;  %6709 = vst.msk [vmem:[#allocation2 + $0xb8] sm:$0xff] %vm2126_vm4, %v6677_v12  ;;  %v6731_v0 = vpack.c.bf16 %v19706_v60, %v25719_v25  ;;  %v26184_v49 = vld [vmem:[#allocation198_spill] sm:$0xff]  ;;  %v26186_v9 = vld [vmem:[#allocation169_spill] sm:$0xff] }
 0x6a8   : > { %6710 = vst.msk [vmem:[#allocation2 + $0xc0] sm:$0xff] %vm2126_vm4, %v6678_v48  ;;  %6711 = vst.msk [vmem:[#allocation2 + $0xc8] sm:$0xff] %vm2126_vm4, %v6679_v50  ;;  %v6732_v34 = vpack.c.bf16 %v19712_v56, %v19709_v63  ;;  %v6733_v20 = vpack.c.bf16 %v19718_v14, %v19715_v45  ;;  %v6734_v2 = vpack.c.bf16 %v19724_v24, %v19721_v19  ;;  %v26185_v8 = vld [vmem:[#allocation162_spill] sm:$0xff]  ;;  %v26189_v39 = vld [vmem:[#allocation171_spill] sm:$0xff] }
 0x6a9   : > { %6712 = vst.msk [vmem:[#allocation2 + $0xd0] sm:$0xff] %vm2126_vm4, %v6680_v11  ;;  %6713 = vst.msk [vmem:[#allocation2 + $0xd8] sm:$0xff] %vm2126_vm4, %v6681_v29  ;;  %v6735_v43 = vpack.c.bf16 %v26184_v49, %v19727_v1  ;;  %v6736_v44 = vpack.c.bf16 %v26185_v8, %v19733_v10  ;;  %v6737_v59 = vpack.c.bf16 %v26186_v9, %v19739_v54  ;;  %v26187_v26 = vld [vmem:[#allocation170_spill] sm:$0xff]  ;;  %v26190_v60 = vld [vmem:[#allocation159_spill] sm:$0xff] }
 0x6aa   : > { %6714 = vst.msk [vmem:[#allocation2 + $0xe0] sm:$0xff] %vm2126_vm4, %v6682_v55  ;;  %6715 = vst.msk [vmem:[#allocation2 + $0xe8] sm:$0xff] %vm2126_vm4, %v6683_v57  ;;  %v6738_v32 = vpack.c.bf16 %v26187_v26, %v19745_v41  ;;  %v26188_v18 = vld [vmem:[#allocation186_spill] sm:$0xff]  ;;  %v26191_v63 = vld [vmem:[#allocation187_spill] sm:$0xff] }
 0x6ab   : > { %6716 = vst.msk [vmem:[#allocation2 + $0xf0] sm:$0xff] %vm2126_vm4, %v6684_v3  ;;  %6717 = vst.msk [vmem:[#allocation2 + $0xf8] sm:$0xff] %vm2126_vm4, %v6685_v13  ;;  %v6739_v40 = vpack.c.bf16 %v26189_v39, %v26188_v18  ;;  %v6740_v56 = vpack.c.bf16 %v26191_v63, %v26190_v60  ;;  %v26192_v45 = vld [vmem:[#allocation160_spill] sm:$0xff]  ;;  %v26194_v24 = vld [vmem:[#allocation163_spill] sm:$0xff] }
 0x6ac   : > { %6750 = vst.msk [vmem:[#allocation3] sm:$0xff] %vm2126_vm4, %v6718_v6  ;;  %6751 = vst.msk [vmem:[#allocation3 + $0x8] sm:$0xff] %vm2126_vm4, %v6719_v52  ;;  %v26193_v14 = vld [vmem:[#allocation172_spill] sm:$0xff]  ;;  %v26195_v1 = vld [vmem:[#allocation173_spill] sm:$0xff] }
 0x6ad   : > { %6752 = vst.msk [vmem:[#allocation3 + $0x10] sm:$0xff] %vm2126_vm4, %v6720_v36  ;;  %6753 = vst.msk [vmem:[#allocation3 + $0x18] sm:$0xff] %vm2126_vm4, %v6721_v16  ;;  %v6741_v19 = vpack.c.bf16 %v26193_v14, %v26192_v45  ;;  %v6742_v10 = vpack.c.bf16 %v26195_v1, %v26194_v24  ;;  %v26196_v54 = vld [vmem:[#allocation188_spill] sm:$0xff]  ;;  %v26197_v41 = vld [vmem:[#allocation174_spill] sm:$0xff] }
 0x6ae   : > { %6754 = vst.msk [vmem:[#allocation3 + $0x20] sm:$0xff] %vm2126_vm4, %v6722_v51  ;;  %6755 = vst.msk [vmem:[#allocation3 + $0x28] sm:$0xff] %vm2126_vm4, %v6723_v7  ;;  %v6743_v25 = vpack.c.bf16 %v26197_v41, %v26196_v54  ;;  %v26198_v46 = vld [vmem:[#allocation175_spill] sm:$0xff]  ;;  %v26199_v35 = vld [vmem:[#allocation189_spill] sm:$0xff] }
 0x6af   : > { %6756 = vst.msk [vmem:[#allocation3 + $0x30] sm:$0xff] %vm2126_vm4, %v6724_v58  ;;  %6757 = vst.msk [vmem:[#allocation3 + $0x38] sm:$0xff] %vm2126_vm4, %v6725_v53  ;;  %v6744_v15 = vpack.c.bf16 %v26199_v35, %v26198_v46  ;;  %v26200_v47 = vld [vmem:[#allocation190_spill] sm:$0xff]  ;;  %v26201_v33 = vld [vmem:[#allocation176_spill] sm:$0xff] }
 0x6b0   : > { %6758 = vst.msk [vmem:[#allocation3 + $0x40] sm:$0xff] %vm2126_vm4, %v6726_v27  ;;  %6759 = vst.msk [vmem:[#allocation3 + $0x48] sm:$0xff] %vm2126_vm4, %v6727_v22  ;;  %v6745_v12 = vpack.c.bf16 %v26201_v33, %v26200_v47  ;;  %v26202_v48 = vld [vmem:[#allocation177_spill] sm:$0xff]  ;;  %v26203_v50 = vld [vmem:[#allocation191_spill] sm:$0xff] }
 0x6b1   : > { %6760 = vst.msk [vmem:[#allocation3 + $0x50] sm:$0xff] %vm2126_vm4, %v6728_v5  ;;  %6761 = vst.msk [vmem:[#allocation3 + $0x58] sm:$0xff] %vm2126_vm4, %v6729_v17  ;;  %v6746_v11 = vpack.c.bf16 %v26203_v50, %v26202_v48  ;;  %v26204_v21 = vld [vmem:[#allocation178_spill] sm:$0xff]  ;;  %v26205_v37 = vld [vmem:[#allocation179_spill] sm:$0xff] }
 0x6b2   : > { %6762 = vst.msk [vmem:[#allocation3 + $0x60] sm:$0xff] %vm2126_vm4, %v6730_v61  ;;  %6763 = vst.msk [vmem:[#allocation3 + $0x68] sm:$0xff] %vm2126_vm4, %v6731_v0  ;;  %v6747_v29 = vpack.c.bf16 %v26205_v37, %v26204_v21  ;;  %v26206_v62 = vld [vmem:[#allocation195_spill] sm:$0xff]  ;;  %v26207_v42 = vld [vmem:[#allocation180_spill] sm:$0xff] }
 0x6b3   : > { %6764 = vst.msk [vmem:[#allocation3 + $0x70] sm:$0xff] %vm2126_vm4, %v6732_v34  ;;  %6765 = vst.msk [vmem:[#allocation3 + $0x78] sm:$0xff] %vm2126_vm4, %v6733_v20  ;;  %v6748_v55 = vpack.c.bf16 %v26207_v42, %v26206_v62  ;;  %v26208_v38 = vld [vmem:[#allocation197_spill] sm:$0xff]  ;;  %v26210_v31 = vld [vmem:[#allocation196_spill] sm:$0xff] }
 0x6b4   : > { %6766 = vst.msk [vmem:[#allocation3 + $0x80] sm:$0xff] %vm2126_vm4, %v6734_v2  ;;  %6767 = vst.msk [vmem:[#allocation3 + $0x88] sm:$0xff] %vm2126_vm4, %v6735_v43  ;;  %v26209_v30 = vld [vmem:[#allocation181_spill] sm:$0xff]  ;;  %v26212_v28 = vld [vmem:[#allocation250_spill] sm:$0xff] }
 0x6b5   : > { %6768 = vst.msk [vmem:[#allocation3 + $0x90] sm:$0xff] %vm2126_vm4, %v6736_v44  ;;  %6769 = vst.msk [vmem:[#allocation3 + $0x98] sm:$0xff] %vm2126_vm4, %v6737_v59  ;;  %v6749_v57 = vpack.c.bf16 %v26209_v30, %v26208_v38  ;;  %v26211_v4 = vld [vmem:[#allocation281_spill] sm:$0xff]  ;;  %v26213_v23 = vld [vmem:[#allocation282_spill] sm:$0xff] }
 0x6b6   : > { %6770 = vst.msk [vmem:[#allocation3 + $0xa0] sm:$0xff] %vm2126_vm4, %v6738_v32  ;;  %6771 = vst.msk [vmem:[#allocation3 + $0xa8] sm:$0xff] %vm2126_vm4, %v6739_v40  ;;  %v6782_v3 = vpack.c.bf16 %v26211_v4, %v26210_v31  ;;  %v6783_v13 = vpack.c.bf16 %v26213_v23, %v26212_v28  ;;  %v26214_v6 = vld [vmem:[#allocation251_spill] sm:$0xff]  ;;  %v26216_v16 = vld [vmem:[#allocation252_spill] sm:$0xff] }
 0x6b7   : > { %6772 = vst.msk [vmem:[#allocation3 + $0xb0] sm:$0xff] %vm2126_vm4, %v6740_v56  ;;  %6773 = vst.msk [vmem:[#allocation3 + $0xb8] sm:$0xff] %vm2126_vm4, %v6741_v19  ;;  %v26215_v52 = vld [vmem:[#allocation283_spill] sm:$0xff]  ;;  %v26217_v51 = vld [vmem:[#allocation284_spill] sm:$0xff] }
 0x6b8   : > { %6774 = vst.msk [vmem:[#allocation3 + $0xc0] sm:$0xff] %vm2126_vm4, %v6742_v10  ;;  %6775 = vst.msk [vmem:[#allocation3 + $0xc8] sm:$0xff] %vm2126_vm4, %v6743_v25  ;;  %v6784_v36 = vpack.c.bf16 %v26215_v52, %v26214_v6  ;;  %v6785_v7 = vpack.c.bf16 %v26217_v51, %v26216_v16  ;;  %v26218_v58 = vld [vmem:[#allocation253_spill] sm:$0xff]  ;;  %v26220_v22 = vld [vmem:[#allocation254_spill] sm:$0xff] }
 0x6b9   : > { %6776 = vst.msk [vmem:[#allocation3 + $0xd0] sm:$0xff] %vm2126_vm4, %v6744_v15  ;;  %6777 = vst.msk [vmem:[#allocation3 + $0xd8] sm:$0xff] %vm2126_vm4, %v6745_v12  ;;  %v26219_v53 = vld [vmem:[#allocation285_spill] sm:$0xff]  ;;  %v26221_v5 = vld [vmem:[#allocation286_spill] sm:$0xff] }
 0x6ba   : > { %6778 = vst.msk [vmem:[#allocation3 + $0xe0] sm:$0xff] %vm2126_vm4, %v6746_v11  ;;  %6779 = vst.msk [vmem:[#allocation3 + $0xe8] sm:$0xff] %vm2126_vm4, %v6747_v29  ;;  %v6786_v27 = vpack.c.bf16 %v26219_v53, %v26218_v58  ;;  %v6787_v17 = vpack.c.bf16 %v26221_v5, %v26220_v22  ;;  %v26222_v61 = vld [vmem:[#allocation255_spill] sm:$0xff]  ;;  %v26224_v20 = vld [vmem:[#allocation256_spill] sm:$0xff] }
 0x6bb   : > { %6780 = vst.msk [vmem:[#allocation3 + $0xf0] sm:$0xff] %vm2126_vm4, %v6748_v55  ;;  %6781 = vst.msk [vmem:[#allocation3 + $0xf8] sm:$0xff] %vm2126_vm4, %v6749_v57  ;;  %v26223_v0 = vld [vmem:[#allocation287_spill] sm:$0xff]  ;;  %v26225_v2 = vld [vmem:[#allocation288_spill] sm:$0xff] }
 0x6bc   : > { %v6788_v34 = vpack.c.bf16 %v26223_v0, %v26222_v61  ;;  %v6789_v49 = vpack.c.bf16 %v26225_v2, %v26224_v20  ;;  %v26226_v43 = vld [vmem:[#allocation257_spill] sm:$0xff]  ;;  %v26228_v9 = vld [vmem:[#allocation258_spill] sm:$0xff]  ;;  %v26230_v32 = vld [vmem:[#allocation259_spill] sm:$0xff]  ;;  %6814 = vst.msk [vmem:[#allocation4] sm:$0xff] %vm2126_vm4, %v6782_v3 }
 0x6bd   : > { %v26227_v8 = vld [vmem:[#allocation289_spill] sm:$0xff]  ;;  %v26229_v59 = vld [vmem:[#allocation290_spill] sm:$0xff]  ;;  %v26231_v18 = vld [vmem:[#allocation291_spill] sm:$0xff]  ;;  %6815 = vst.msk [vmem:[#allocation4 + $0x8] sm:$0xff] %vm2126_vm4, %v6783_v13 }
 0x6be   : > { %v6790_v44 = vpack.c.bf16 %v26227_v8, %v26226_v43  ;;  %v6791_v26 = vpack.c.bf16 %v26229_v59, %v26228_v9  ;;  %v6792_v39 = vpack.c.bf16 %v26231_v18, %v26230_v32  ;;  %v26232_v40 = vld [vmem:[#allocation260_spill] sm:$0xff]  ;;  %6816 = vst.msk [vmem:[#allocation4 + $0x10] sm:$0xff] %vm2126_vm4, %v6784_v36  ;;  %6817 = vst.msk [vmem:[#allocation4 + $0x18] sm:$0xff] %vm2126_vm4, %v6785_v7  ;;  %v26234_v56 = vld [vmem:[#allocation261_spill] sm:$0xff] }
 0x6bf   : > { %v26233_v60 = vld [vmem:[#allocation292_spill] sm:$0xff]  ;;  %v26235_v45 = vld [vmem:[#allocation293_spill] sm:$0xff]  ;;  %v26236_v19 = vld [vmem:[#allocation262_spill] sm:$0xff]  ;;  %6818 = vst.msk [vmem:[#allocation4 + $0x20] sm:$0xff] %vm2126_vm4, %v6786_v27 }
 0x6c0   : > { %v6793_v63 = vpack.c.bf16 %v26233_v60, %v26232_v40  ;;  %v6794_v14 = vpack.c.bf16 %v26235_v45, %v26234_v56  ;;  %v26237_v24 = vld [vmem:[#allocation294_spill] sm:$0xff]  ;;  %v26238_v10 = vld [vmem:[#allocation263_spill] sm:$0xff]  ;;  %v26240_v25 = vld [vmem:[#allocation264_spill] sm:$0xff]  ;;  %6819 = vst.msk [vmem:[#allocation4 + $0x28] sm:$0xff] %vm2126_vm4, %v6787_v17 }
 0x6c1   : > { %v6795_v1 = vpack.c.bf16 %v26237_v24, %v26236_v19  ;;  %v26239_v54 = vld [vmem:[#allocation295_spill] sm:$0xff]  ;;  %v26241_v46 = vld [vmem:[#allocation296_spill] sm:$0xff]  ;;  %6820 = vst.msk [vmem:[#allocation4 + $0x30] sm:$0xff] %vm2126_vm4, %v6788_v34  ;;  %6821 = vst.msk [vmem:[#allocation4 + $0x38] sm:$0xff] %vm2126_vm4, %v6789_v49 }
 0x6c2   : > { %v6796_v41 = vpack.c.bf16 %v26239_v54, %v26238_v10  ;;  %v6797_v35 = vpack.c.bf16 %v26241_v46, %v26240_v25  ;;  %v26242_v15 = vld [vmem:[#allocation265_spill] sm:$0xff]  ;;  %v26244_v12 = vld [vmem:[#allocation266_spill] sm:$0xff]  ;;  %v26246_v11 = vld [vmem:[#allocation267_spill] sm:$0xff]  ;;  %6822 = vst.msk [vmem:[#allocation4 + $0x40] sm:$0xff] %vm2126_vm4, %v6790_v44 }
 0x6c3   : > { %v26243_v47 = vld [vmem:[#allocation297_spill] sm:$0xff]  ;;  %v26245_v48 = vld [vmem:[#allocation298_spill] sm:$0xff]  ;;  %v26247_v21 = vld [vmem:[#allocation299_spill] sm:$0xff]  ;;  %6823 = vst.msk [vmem:[#allocation4 + $0x48] sm:$0xff] %vm2126_vm4, %v6791_v26 }
 0x6c4   : > { %v6798_v33 = vpack.c.bf16 %v26243_v47, %v26242_v15  ;;  %v6799_v50 = vpack.c.bf16 %v26245_v48, %v26244_v12  ;;  %v6800_v37 = vpack.c.bf16 %v26247_v21, %v26246_v11  ;;  %v26248_v29 = vld [vmem:[#allocation268_spill] sm:$0xff]  ;;  %6824 = vst.msk [vmem:[#allocation4 + $0x50] sm:$0xff] %vm2126_vm4, %v6792_v39  ;;  %6825 = vst.msk [vmem:[#allocation4 + $0x58] sm:$0xff] %vm2126_vm4, %v6793_v63  ;;  %v26250_v55 = vld [vmem:[#allocation269_spill] sm:$0xff] }
 0x6c5   : > { %v26249_v62 = vld [vmem:[#allocation300_spill] sm:$0xff]  ;;  %v26251_v38 = vld [vmem:[#allocation301_spill] sm:$0xff]  ;;  %v26252_v57 = vld [vmem:[#allocation270_spill] sm:$0xff]  ;;  %6826 = vst.msk [vmem:[#allocation4 + $0x60] sm:$0xff] %vm2126_vm4, %v6794_v14 }
 0x6c6   : > { %v6801_v42 = vpack.c.bf16 %v26249_v62, %v26248_v29  ;;  %v6802_v30 = vpack.c.bf16 %v26251_v38, %v26250_v55  ;;  %v26253_v31 = vld [vmem:[#allocation302_spill] sm:$0xff]  ;;  %v26254_v3 = vld [vmem:[#allocation271_spill] sm:$0xff]  ;;  %v26256_v13 = vld [vmem:[#allocation272_spill] sm:$0xff]  ;;  %6827 = vst.msk [vmem:[#allocation4 + $0x68] sm:$0xff] %vm2126_vm4, %v6795_v1 }
 0x6c7   : > { %v6803_v4 = vpack.c.bf16 %v26253_v31, %v26252_v57  ;;  %v26255_v28 = vld [vmem:[#allocation303_spill] sm:$0xff]  ;;  %v26257_v6 = vld [vmem:[#allocation304_spill] sm:$0xff]  ;;  %6828 = vst.msk [vmem:[#allocation4 + $0x70] sm:$0xff] %vm2126_vm4, %v6796_v41  ;;  %6829 = vst.msk [vmem:[#allocation4 + $0x78] sm:$0xff] %vm2126_vm4, %v6797_v35 }
 0x6c8   : > { %v6804_v23 = vpack.c.bf16 %v26255_v28, %v26254_v3  ;;  %v6805_v52 = vpack.c.bf16 %v26257_v6, %v26256_v13  ;;  %v26258_v36 = vld [vmem:[#allocation273_spill] sm:$0xff]  ;;  %v26260_v7 = vld [vmem:[#allocation274_spill] sm:$0xff]  ;;  %v26262_v27 = vld [vmem:[#allocation275_spill] sm:$0xff]  ;;  %6830 = vst.msk [vmem:[#allocation4 + $0x80] sm:$0xff] %vm2126_vm4, %v6798_v33 }
 0x6c9   : > { %v26259_v16 = vld [vmem:[#allocation305_spill] sm:$0xff]  ;;  %v26261_v58 = vld [vmem:[#allocation306_spill] sm:$0xff]  ;;  %v26263_v22 = vld [vmem:[#allocation307_spill] sm:$0xff]  ;;  %6831 = vst.msk [vmem:[#allocation4 + $0x88] sm:$0xff] %vm2126_vm4, %v6799_v50 }
 0x6ca   : > { %v6806_v51 = vpack.c.bf16 %v26259_v16, %v26258_v36  ;;  %v6807_v53 = vpack.c.bf16 %v26261_v58, %v26260_v7  ;;  %v6808_v5 = vpack.c.bf16 %v26263_v22, %v26262_v27  ;;  %v26264_v17 = vld [vmem:[#allocation276_spill] sm:$0xff]  ;;  %6832 = vst.msk [vmem:[#allocation4 + $0x90] sm:$0xff] %vm2126_vm4, %v6800_v37  ;;  %6833 = vst.msk [vmem:[#allocation4 + $0x98] sm:$0xff] %vm2126_vm4, %v6801_v42  ;;  %v26266_v34 = vld [vmem:[#allocation277_spill] sm:$0xff] }
 0x6cb   : > { %v26265_v61 = vld [vmem:[#allocation308_spill] sm:$0xff]  ;;  %v26267_v20 = vld [vmem:[#allocation309_spill] sm:$0xff]  ;;  %v26268_v49 = vld [vmem:[#allocation278_spill] sm:$0xff]  ;;  %6834 = vst.msk [vmem:[#allocation4 + $0xa0] sm:$0xff] %vm2126_vm4, %v6802_v30 }
 0x6cc   : > { %v6809_v0 = vpack.c.bf16 %v26265_v61, %v26264_v17  ;;  %v6810_v2 = vpack.c.bf16 %v26267_v20, %v26266_v34  ;;  %v26269_v43 = vld [vmem:[#allocation310_spill] sm:$0xff]  ;;  %v26270_v44 = vld [vmem:[#allocation279_spill] sm:$0xff]  ;;  %v26272_v26 = vld [vmem:[#allocation280_spill] sm:$0xff]  ;;  %6835 = vst.msk [vmem:[#allocation4 + $0xa8] sm:$0xff] %vm2126_vm4, %v6803_v4 }
 0x6cd   : > { %v6811_v8 = vpack.c.bf16 %v26269_v43, %v26268_v49  ;;  %v26271_v9 = vld [vmem:[#allocation311_spill] sm:$0xff]  ;;  %v26273_v32 = vld [vmem:[#allocation312_spill] sm:$0xff]  ;;  %6836 = vst.msk [vmem:[#allocation4 + $0xb0] sm:$0xff] %vm2126_vm4, %v6804_v23  ;;  %6837 = vst.msk [vmem:[#allocation4 + $0xb8] sm:$0xff] %vm2126_vm4, %v6805_v52 }
 0x6ce   : > { %v6812_v59 = vpack.c.bf16 %v26271_v9, %v26270_v44  ;;  %v6813_v18 = vpack.c.bf16 %v26273_v32, %v26272_v26  ;;  %6838 = vst.msk [vmem:[#allocation4 + $0xc0] sm:$0xff] %vm2126_vm4, %v6806_v51  ;;  %6839 = vst.msk [vmem:[#allocation4 + $0xc8] sm:$0xff] %vm2126_vm4, %v6807_v53 }
 0x6cf   : > { %6840 = vst.msk [vmem:[#allocation4 + $0xd0] sm:$0xff] %vm2126_vm4, %v6808_v5  ;;  %6841 = vst.msk [vmem:[#allocation4 + $0xd8] sm:$0xff] %vm2126_vm4, %v6809_v0 }
 0x6d0   : > { %6842 = vst.msk [vmem:[#allocation4 + $0xe0] sm:$0xff] %vm2126_vm4, %v6810_v2  ;;  %6843 = vst.msk [vmem:[#allocation4 + $0xe8] sm:$0xff] %vm2126_vm4, %v6811_v8 }
 0x6d1   : > { %6844 = vst.msk [vmem:[#allocation4 + $0xf0] sm:$0xff] %vm2126_vm4, %v6812_v59  ;;  %6845 = vst.msk [vmem:[#allocation4 + $0xf8] sm:$0xff] %vm2126_vm4, %v6813_v18 }
 0x6d2 PF: > { %p12542_p10 = scmp.ne.s32.totalorder %s14325_s25, 16 }
 0x6d3   : > { %v6850_v39 = vld [vmem:[#allocation2] sm:$0xff] (!%p12542_p10)  ;;  %v6851_v40 = vld [vmem:[#allocation2 + $0x8] sm:$0xff] (!%p12542_p10)  ;;  %v6865_v60 = vld [vmem:[#allocation2 + $0x78] sm:$0xff] (!%p12542_p10)  ;;  %vm8271_vm7 = vcmask (!%p12542_p10), 523264   ;;  %vm11680_vm8 = vcmask (!%p12542_p10), 130112   ;;  %vm11687_vm9 = vcmask (!%p12542_p10), 195712  }
 0x6d4   : > { %6849 = sbr.rel (%p12542_p10) target bundleno = 2403 (0x963), region = 60  ;;  %v21259_v63 = vunpack.c.l.bf16 (!%p12542_p10), %v6850_v39  ;;  %v21261_v56 = vunpack.c.l.bf16 (!%p12542_p10), %v6851_v40  ;;  %v21263_v45 = vunpack.c.l.bf16 (!%p12542_p10), %v6865_v60  ;;  %v6946_v14 = vld [vmem:[#allocation3] sm:$0xff] (!%p12542_p10)  ;;  %v6947_v19 = vld [vmem:[#allocation3 + $0x8] sm:$0xff] (!%p12542_p10)  ;;  %v6961_v24 = vld [vmem:[#allocation3 + $0x78] sm:$0xff] (!%p12542_p10)  ;;  %v21265_v1 = vunpack.c.h.bf16 (!%p12542_p10), %v6850_v39 }
 0x6d5   : > { %v21267_v10 = vunpack.c.l.bf16 (!%p12542_p10), %v6946_v14  ;;  %v21269_v54 = vunpack.c.l.bf16 (!%p12542_p10), %v6947_v19  ;;  %v21271_v41 = vunpack.c.l.bf16 (!%p12542_p10), %v6961_v24  ;;  %v7042_v25 = vld [vmem:[#allocation4] sm:$0xff] (!%p12542_p10)  ;;  %v7043_v46 = vld [vmem:[#allocation4 + $0x8] sm:$0xff] (!%p12542_p10)  ;;  %v7057_v35 = vld [vmem:[#allocation4 + $0x78] sm:$0xff] (!%p12542_p10)  ;;  %v21273_v15 = vunpack.c.h.bf16 (!%p12542_p10), %v6851_v40 }
 0x6d6   : > { %v21275_v47 = vunpack.c.l.bf16 (!%p12542_p10), %v7042_v25  ;;  %v21277_v33 = vunpack.c.l.bf16 (!%p12542_p10), %v7043_v46  ;;  %v21279_v12 = vunpack.c.l.bf16 (!%p12542_p10), %v7057_v35  ;;  %v21284_v48 = vld [vmem:[%s24270_s3] ss:$0 sm:$0xff] (!%p12542_p10)  ;;  %v21289_v50 = vld [vmem:[%s24270_s3 + $0x1] ss:$0 sm:$0xff] (!%p12542_p10)  ;;  %v21294_v11 = vld [vmem:[%s24270_s3 + $0x2] ss:$0 sm:$0xff] (!%p12542_p10)  ;;  %v21296_v21 = vunpack.c.h.bf16 (!%p12542_p10), %v6865_v60 }
 0x6d7   : > { %v7143_v37 = vmul.f32 (!%p12542_p10), %v21284_v48, %v21263_v45  ;;  %v7212_v29 = vmul.f32 (!%p12542_p10), %v21289_v50, %v21271_v41  ;;  %v21305_v62 = vld [vmem:[%s24270_s3 + $0x3] ss:$0 sm:$0xff] (!%p12542_p10)  ;;  %v21310_v42 = vld [vmem:[%s24270_s3 + $0x4] ss:$0 sm:$0xff] (!%p12542_p10)  ;;  %v21315_v55 = vld [vmem:[%s24270_s3 + $0x5] ss:$0 sm:$0xff] (!%p12542_p10)  ;;  %v7145_v38 = vmul.f32 (!%p12542_p10), %v21284_v48, %v21259_v63  ;;  %v7214_v30 = vmul.f32 (!%p12542_p10), %v21289_v50, %v21267_v10 }
 0x6d8   : > { %v7281_v57 = vmul.f32 (!%p12542_p10), %v21294_v11, %v21279_v12  ;;  %v7350_v31 = vmul.f32 (!%p12542_p10), %v21305_v62, %v21259_v63  ;;  %v7419_v4 = vmul.f32 (!%p12542_p10), %v21310_v42, %v21267_v10  ;;  %v7488_v3 = vmul.f32 (!%p12542_p10), %v21315_v55, %v21275_v47  ;;  %v21332_v28 = vld [vmem:[%s24270_s3 + $0x6] ss:$0 sm:$0xff] (!%p12542_p10)  ;;  %v21337_v23 = vld [vmem:[%s24270_s3 + $0x7] ss:$0 sm:$0xff] (!%p12542_p10)  ;;  %v21342_v13 = vld [vmem:[%s24270_s3 + $0x8] ss:$0 sm:$0xff] (!%p12542_p10) }
 0x6d9   : > { %v7557_v6 = vmul.f32 (!%p12542_p10), %v21332_v28, %v21261_v56  ;;  %v7626_v52 = vmul.f32 (!%p12542_p10), %v21337_v23, %v21269_v54  ;;  %v7695_v36 = vmul.f32 (!%p12542_p10), %v21342_v13, %v21277_v33  ;;  %v7759_v16 = vadd.f32 (!%p12542_p10), %v7212_v29, %v7143_v37  ;;  %v6852_v51 = vld [vmem:[#allocation2 + $0x10] sm:$0xff] (!%p12542_p10) }
 0x6da   : > { %v6948_v7 = vld [vmem:[#allocation3 + $0x10] sm:$0xff] (!%p12542_p10)  ;;  %v7823_v53 = vadd.f32 (!%p12542_p10), %v7350_v31, %v7281_v57  ;;  %v7887_v27 = vadd.f32 (!%p12542_p10), %v7488_v3, %v7419_v4  ;;  %v21350_v22 = vunpack.c.l.bf16 (!%p12542_p10), %v6852_v51  ;;  %v7283_v0 = vmul.f32 (!%p12542_p10), %v21294_v11, %v21275_v47 }
 0x6db   : > { %v7044_v58 = vld [vmem:[#allocation4 + $0x10] sm:$0xff]  ;;  %v21352_v5 = vunpack.c.l.bf16 %v6948_v7  ;;  %v7951_v17 = vadd.f32 %v7626_v52, %v7557_v6  ;;  %v7352_v34 = vmul.f32 %v21305_v62, %v21261_v56  ;;  %v7421_v2 = vmul.f32 %v21310_v42, %v21269_v54 }
 0x6dc   : > { %v21354_v61 = vunpack.c.l.bf16 %v7044_v58  ;;  %v8015_v20 = vadd.f32 %v7823_v53, %v7759_v16  ;;  %v7490_v49 = vmul.f32 %v21315_v55, %v21277_v33  ;;  %v7559_v43 = vmul.f32 %v21332_v28, %v21350_v22 }
 0x6dd   : > { %v8079_v8 = vadd.f32 %v7951_v17, %v7887_v27  ;;  %v7628_v44 = vmul.f32 %v21337_v23, %v21352_v5  ;;  %v7761_v59 = vadd.f32 %v7214_v30, %v7145_v38  ;;  %v7825_v26 = vadd.f32 %v7352_v34, %v7283_v0 }
 0x6de   : > { %v7697_v9 = vmul.f32 %v21342_v13, %v21354_v61  ;;  %v7889_v32 = vadd.f32 %v7490_v49, %v7421_v2  ;;  %v21370_v18 = vunpack.c.h.bf16 %v6946_v14  ;;  %v21372_v39 = vunpack.c.h.bf16 %v6947_v19 }
 0x6df   : > { %v8143_v40 = vadd.f32 %v8079_v8, %v8015_v20  ;;  %v7953_v60 = vadd.f32 %v7628_v44, %v7559_v43  ;;  %v21374_v37 = vunpack.c.h.bf16 %v6961_v24  ;;  %v21376_v29 = vunpack.c.h.bf16 %v7042_v25 }
 0x6e0   : > { %v8017_v57 = vadd.f32 %v7825_v26, %v7761_v59  ;;  %v21378_v31 = vunpack.c.h.bf16 %v7043_v46  ;;  %v21380_v4 = vunpack.c.h.bf16 %v7057_v35  ;;  %v7144_v38 = vmul.f32 %v21284_v48, %v21296_v21  ;;  %v6853_v26 = vld [vmem:[#allocation2 + $0x18] sm:$0xff] }
 0x6e1   : > { %v8207_v30 = vadd.f32 %v8143_v40, %v7695_v36  ;;  %v8081_v3 = vadd.f32 %v7953_v60, %v7889_v32  ;;  %v7213_v14 = vmul.f32 %v21289_v50, %v21374_v37  ;;  %v7351_v19 = vmul.f32 %v21305_v62, %v21265_v1  ;;  %v7045_v40 = vld [vmem:[#allocation4 + $0x18] sm:$0xff] }
 0x6e2   : > { %v7282_v24 = vmul.f32 %v21294_v11, %v21380_v4  ;;  %v7420_v25 = vmul.f32 %v21310_v42, %v21370_v18  ;;  %v7489_v46 = vmul.f32 %v21315_v55, %v21376_v29  ;;  %v7558_v35 = vmul.f32 %v21332_v28, %v21273_v15 }
 0x6e3   : > { %v8272_v6 = vsel %vm8271_vm7, %v8207_v30, 0.0  ;;  %v8145_v52 = vadd.f32 %v8081_v3, %v8017_v57  ;;  %v7627_v36 = vmul.f32 %v21337_v23, %v21372_v39  ;;  %v7696_v16 = vmul.f32 %v21342_v13, %v21378_v31 }
 0x6e4   : > { %8273 = vadd.xlane.f32.xlu0 %v8272_v6  ;;  %v7760_v53 = vadd.f32 %v7213_v14, %v7144_v38  ;;  %v7824_v27 = vadd.f32 %v7351_v19, %v7282_v24  ;;  %v7888_v17 = vadd.f32 %v7489_v46, %v7420_v25  ;;  %v21401_v0 = vunpack.c.h.bf16 %v6852_v51 }
 0x6e5   : > { %v8209_v34 = vadd.f32 %v8145_v52, %v7697_v9  ;;  %v7952_v20 = vadd.f32 %v7627_v36, %v7558_v35  ;;  %v21403_v2 = vunpack.c.h.bf16 %v6948_v7  ;;  %v21405_v49 = vunpack.c.h.bf16 %v7044_v58  ;;  %v6949_v9 = vld [vmem:[#allocation3 + $0x18] sm:$0xff] }
 0x6e6   : > { %v8016_v43 = vadd.f32 %v7824_v27, %v7760_v53  ;;  %v7146_v8 = vmul.f32 %v21284_v48, %v21265_v1  ;;  %v7215_v44 = vmul.f32 %v21289_v50, %v21370_v18  ;;  %v7284_v59 = vmul.f32 %v21294_v11, %v21376_v29 }
 0x6e7   : > { %v8278_v51 = vsel %vm8271_vm7, %v8209_v34, 0.0  ;;  %v8080_v32 = vadd.f32 %v7952_v20, %v7888_v17  ;;  %v7353_v7 = vmul.f32 %v21305_v62, %v21273_v15  ;;  %v7422_v58 = vmul.f32 %v21310_v42, %v21372_v39 }
 0x6e8   : > { %8279 = vadd.xlane.f32.xlu1 %v8278_v51  ;;  %v7491_v60 = vmul.f32 %v21315_v55, %v21378_v31  ;;  %v7560_v57 = vmul.f32 %v21332_v28, %v21401_v0  ;;  %v7629_v38 = vmul.f32 %v21337_v23, %v21403_v2  ;;  %v7698_v30 = vmul.f32 %v21342_v13, %v21405_v49 }
 0x6e9   : > { %v8144_v3 = vadd.f32 %v8080_v32, %v8016_v43  ;;  %v7762_v14 = vadd.f32 %v7215_v44, %v7146_v8  ;;  %v7826_v19 = vadd.f32 %v7353_v7, %v7284_v59  ;;  %v21426_v24 = vunpack.c.l.bf16 %v6853_v26 }
 0x6ea   : > { %v7890_v25 = vadd.f32 %v7491_v60, %v7422_v58  ;;  %v7954_v46 = vadd.f32 %v7629_v38, %v7560_v57  ;;  %v21428_v35 = vunpack.c.l.bf16 %v6949_v9  ;;  %v21430_v6 = vunpack.c.l.bf16 %v7045_v40 }
 0x6eb   : > { %v8208_v52 = vadd.f32 %v8144_v3, %v7696_v16  ;;  %v8018_v36 = vadd.f32 %v7826_v19, %v7762_v14  ;;  %v7147_v53 = vmul.f32 %v21284_v48, %v21261_v56  ;;  %v7216_v27 = vmul.f32 %v21289_v50, %v21269_v54 }
 0x6ec   : > { %v8082_v17 = vadd.f32 %v7954_v46, %v7890_v25  ;;  %v7285_v34 = vmul.f32 %v21294_v11, %v21277_v33  ;;  %v7354_v20 = vmul.f32 %v21305_v62, %v21350_v22  ;;  %v7423_v43 = vmul.f32 %v21310_v42, %v21352_v5 }
 0x6ed   : > { %v8275_v8 = vsel %vm8271_vm7, %v8208_v52, 0.0  ;;  %v7492_v16 = vmul.f32 %v21315_v55, %v21354_v61  ;;  %v7561_v56 = vmul.f32 %v21332_v28, %v21426_v24  ;;  %v7630_v54 = vmul.f32 %v21337_v23, %v21428_v35  ;;  %v6854_v52 = vld [vmem:[#allocation2 + $0x20] sm:$0xff] }
 0x6ee   : > { %8276 = vadd.xlane.f32.xlu0 %v8275_v8  ;;  %v8146_v44 = vadd.f32 %v8082_v17, %v8018_v36  ;;  %v7699_v33 = vmul.f32 %v21342_v13, %v21430_v6  ;;  %v7763_v59 = vadd.f32 %v7216_v27, %v7147_v53  ;;  %v7827_v51 = vadd.f32 %v7354_v20, %v7285_v34 }
 0x6ef   : > { %v7891_v32 = vadd.f32 %v7492_v16, %v7423_v43  ;;  %v7955_v7 = vadd.f32 %v7630_v54, %v7561_v56  ;;  %v21451_v58 = vunpack.c.h.bf16 %v6853_v26  ;;  %v21453_v60 = vunpack.c.h.bf16 %v6949_v9  ;;  %v6950_v9 = vld [vmem:[#allocation3 + $0x20] sm:$0xff] }
 0x6f0   : > { %v8210_v57 = vadd.f32 %v8146_v44, %v7698_v30  ;;  %v8019_v38 = vadd.f32 %v7827_v51, %v7763_v59  ;;  %v21455_v3 = vunpack.c.h.bf16 %v7045_v40  ;;  %v7148_v14 = vmul.f32 %v21284_v48, %v21273_v15 }
 0x6f1   : > { %v8083_v19 = vadd.f32 %v7955_v7, %v7891_v32  ;;  %v7217_v25 = vmul.f32 %v21289_v50, %v21372_v39  ;;  %v7286_v46 = vmul.f32 %v21294_v11, %v21378_v31  ;;  %v7355_v26 = vmul.f32 %v21305_v62, %v21401_v0  ;;  %v7046_v39 = vld [vmem:[#allocation4 + $0x20] sm:$0xff] }
 0x6f2   : > { %v8281_v30 = vsel %vm8271_vm7, %v8210_v57, 0.0  ;;  %v7424_v40 = vmul.f32 %v21310_v42, %v21403_v2  ;;  %v7493_v15 = vmul.f32 %v21315_v55, %v21405_v49  ;;  %v7562_v36 = vmul.f32 %v21332_v28, %v21451_v58 }
 0x6f3   : > { %8282 = vadd.xlane.f32.xlu1 %v8281_v30  ;;  %v8147_v53 = vadd.f32 %v8083_v19, %v8019_v38  ;;  %v7631_v31 = vmul.f32 %v21337_v23, %v21453_v60  ;;  %v7700_v27 = vmul.f32 %v21342_v13, %v21455_v3  ;;  %v7764_v17 = vadd.f32 %v7217_v25, %v7148_v14 }
 0x6f4   : > { %v7828_v34 = vadd.f32 %v7355_v26, %v7286_v46  ;;  %v7892_v20 = vadd.f32 %v7493_v15, %v7424_v40  ;;  %v21476_v43 = vunpack.c.l.bf16 %v6854_v52  ;;  %v21478_v8 = vunpack.c.l.bf16 %v6950_v9 }
 0x6f5   : > { %v8211_v16 = vadd.f32 %v8147_v53, %v7699_v33  ;;  %v7956_v56 = vadd.f32 %v7631_v31, %v7562_v36  ;;  %v21480_v54 = vunpack.c.l.bf16 %v7046_v39  ;;  %v7149_v44 = vmul.f32 %v21284_v48, %v21350_v22 }
 0x6f6   : > { %v8020_v59 = vadd.f32 %v7828_v34, %v7764_v17  ;;  %v7218_v51 = vmul.f32 %v21289_v50, %v21352_v5  ;;  %v7287_v32 = vmul.f32 %v21294_v11, %v21354_v61  ;;  %v7356_v7 = vmul.f32 %v21305_v62, %v21426_v24 }
 0x6f7   : > { %v8284_v57 = vsel %vm8271_vm7, %v8211_v16, 0.0  ;;  %v8084_v38 = vadd.f32 %v7956_v56, %v7892_v20  ;;  %v7425_v33 = vmul.f32 %v21310_v42, %v21428_v35  ;;  %v7494_v14 = vmul.f32 %v21315_v55, %v21430_v6  ;;  %v6855_v56 = vld [vmem:[#allocation2 + $0x28] sm:$0xff] }
 0x6f8   : > { %8285 = vadd.xlane.f32.xlu0 %v8284_v57  ;;  %v7563_v22 = vmul.f32 %v21332_v28, %v21476_v43  ;;  %v7632_v5 = vmul.f32 %v21337_v23, %v21478_v8  ;;  %v7701_v61 = vmul.f32 %v21342_v13, %v21480_v54  ;;  %v7765_v19 = vadd.f32 %v7218_v51, %v7149_v44 }
 0x6f9   : > { %v8148_v25 = vadd.f32 %v8084_v38, %v8020_v59  ;;  %v7829_v46 = vadd.f32 %v7356_v7, %v7287_v32  ;;  %v7893_v26 = vadd.f32 %v7494_v14, %v7425_v33  ;;  %v21501_v30 = vunpack.c.h.bf16 %v6854_v52 }
 0x6fa   : > { %v7957_v40 = vadd.f32 %v7632_v5, %v7563_v22  ;;  %v21503_v15 = vunpack.c.h.bf16 %v6950_v9  ;;  %v21505_v36 = vunpack.c.h.bf16 %v7046_v39  ;;  %v7150_v53 = vmul.f32 %v21284_v48, %v21401_v0  ;;  %v6951_v0 = vld [vmem:[#allocation3 + $0x28] sm:$0xff] }
 0x6fb   : > { %v8212_v31 = vadd.f32 %v8148_v25, %v7700_v27  ;;  %v8021_v17 = vadd.f32 %v7829_v46, %v7765_v19  ;;  %v7219_v34 = vmul.f32 %v21289_v50, %v21403_v2  ;;  %v7288_v20 = vmul.f32 %v21294_v11, %v21405_v49  ;;  %v7047_v27 = vld [vmem:[#allocation4 + $0x28] sm:$0xff] }
 0x6fc   : > { %v8085_v16 = vadd.f32 %v7957_v40, %v7893_v26  ;;  %v7357_v52 = vmul.f32 %v21305_v62, %v21451_v58  ;;  %v7426_v9 = vmul.f32 %v21310_v42, %v21453_v60  ;;  %v7495_v39 = vmul.f32 %v21315_v55, %v21455_v3 }
 0x6fd   : > { %v8287_v44 = vsel %vm8271_vm7, %v8212_v31, 0.0  ;;  %v7564_v2 = vmul.f32 %v21332_v28, %v21501_v30  ;;  %v7633_v49 = vmul.f32 %v21337_v23, %v21503_v15  ;;  %v7702_v59 = vmul.f32 %v21342_v13, %v21505_v36 }
 0x6fe   : > { %8288 = vadd.xlane.f32.xlu1 %v8287_v44  ;;  %v8149_v51 = vadd.f32 %v8085_v16, %v8021_v17  ;;  %v7766_v32 = vadd.f32 %v7219_v34, %v7150_v53  ;;  %v7830_v7 = vadd.f32 %v7357_v52, %v7288_v20  ;;  %v7894_v57 = vadd.f32 %v7495_v39, %v7426_v9 }
 0x6ff   : > { %v7958_v38 = vadd.f32 %v7633_v49, %v7564_v2  ;;  %v21526_v33 = vunpack.c.l.bf16 %v6855_v56  ;;  %v21528_v14 = vunpack.c.l.bf16 %v6951_v0  ;;  %v21530_v22 = vunpack.c.l.bf16 %v7047_v27 }
 0x700   : > { %v8213_v5 = vadd.f32 %v8149_v51, %v7701_v61  ;;  %v8022_v19 = vadd.f32 %v7830_v7, %v7766_v32  ;;  %v7151_v25 = vmul.f32 %v21284_v48, %v21426_v24  ;;  %v7220_v46 = vmul.f32 %v21289_v50, %v21428_v35 }
 0x701   : > { %v8086_v26 = vadd.f32 %v7958_v38, %v7894_v57  ;;  %v7289_v40 = vmul.f32 %v21294_v11, %v21430_v6  ;;  %v7358_v53 = vmul.f32 %v21305_v62, %v21476_v43  ;;  %v7427_v31 = vmul.f32 %v21310_v42, %v21478_v8 }
 0x702   : > { %v8290_v17 = vsel %vm8271_vm7, %v8213_v5, 0.0  ;;  %v7496_v61 = vmul.f32 %v21315_v55, %v21480_v54  ;;  %v7565_v24 = vmul.f32 %v21332_v28, %v21526_v33  ;;  %v7634_v35 = vmul.f32 %v21337_v23, %v21528_v14  ;;  %v6856_v5 = vld [vmem:[#allocation2 + $0x30] sm:$0xff] }
 0x703   : > { %8291 = vadd.xlane.f32.xlu0 %v8290_v17  ;;  %v8150_v34 = vadd.f32 %v8086_v26, %v8022_v19  ;;  %v7703_v6 = vmul.f32 %v21342_v13, %v21530_v22  ;;  %v7767_v20 = vadd.f32 %v7220_v46, %v7151_v25  ;;  %v7831_v16 = vadd.f32 %v7358_v53, %v7289_v40 }
 0x704   : > { %v7895_v52 = vadd.f32 %v7496_v61, %v7427_v31  ;;  %v7959_v9 = vadd.f32 %v7634_v35, %v7565_v24  ;;  %v21551_v39 = vunpack.c.h.bf16 %v6855_v56  ;;  %v21553_v44 = vunpack.c.h.bf16 %v6951_v0  ;;  %v6952_v0 = vld [vmem:[#allocation3 + $0x30] sm:$0xff] }
 0x705   : > { %v8214_v2 = vadd.f32 %v8150_v34, %v7702_v59  ;;  %v8023_v49 = vadd.f32 %v7831_v16, %v7767_v20  ;;  %v21555_v51 = vunpack.c.h.bf16 %v7047_v27  ;;  %v7152_v32 = vmul.f32 %v21284_v48, %v21451_v58 }
 0x706   : > { %v8087_v7 = vadd.f32 %v7959_v9, %v7895_v52  ;;  %v7221_v57 = vmul.f32 %v21289_v50, %v21453_v60  ;;  %v7290_v38 = vmul.f32 %v21294_v11, %v21455_v3  ;;  %v7359_v56 = vmul.f32 %v21305_v62, %v21501_v30  ;;  %v7048_v60 = vld [vmem:[#allocation4 + $0x30] sm:$0xff] }
 0x707   : > { %v8293_v59 = vsel %vm8271_vm7, %v8214_v2, 0.0  ;;  %v7428_v27 = vmul.f32 %v21310_v42, %v21503_v15  ;;  %v7497_v58 = vmul.f32 %v21315_v55, %v21505_v36  ;;  %v7566_v19 = vmul.f32 %v21332_v28, %v21551_v39 }
 0x708   : > { %8294 = vadd.xlane.f32.xlu1 %v8293_v59  ;;  %v8151_v25 = vadd.f32 %v8087_v7, %v8023_v49  ;;  %v7635_v3 = vmul.f32 %v21337_v23, %v21553_v44  ;;  %v7704_v46 = vmul.f32 %v21342_v13, %v21555_v51  ;;  %v7768_v26 = vadd.f32 %v7221_v57, %v7152_v32 }
 0x709   : > { %v7832_v40 = vadd.f32 %v7359_v56, %v7290_v38  ;;  %v7896_v53 = vadd.f32 %v7497_v58, %v7428_v27  ;;  %v21576_v31 = vunpack.c.l.bf16 %v6856_v5  ;;  %v21578_v17 = vunpack.c.l.bf16 %v6952_v0 }
 0x70a   : > { %v8215_v61 = vadd.f32 %v8151_v25, %v7703_v6  ;;  %v7960_v24 = vadd.f32 %v7635_v3, %v7566_v19  ;;  %v21580_v35 = vunpack.c.l.bf16 %v7048_v60  ;;  %v7153_v34 = vmul.f32 %v21284_v48, %v21476_v43 }
 0x70b   : > { %v8024_v20 = vadd.f32 %v7832_v40, %v7768_v26  ;;  %v7222_v16 = vmul.f32 %v21289_v50, %v21478_v8  ;;  %v7291_v52 = vmul.f32 %v21294_v11, %v21480_v54  ;;  %v7360_v9 = vmul.f32 %v21305_v62, %v21526_v33 }
 0x70c   : > { %v8296_v2 = vsel %vm8271_vm7, %v8215_v61, 0.0  ;;  %v8088_v49 = vadd.f32 %v7960_v24, %v7896_v53  ;;  %v7429_v6 = vmul.f32 %v21310_v42, %v21528_v14  ;;  %v7498_v32 = vmul.f32 %v21315_v55, %v21530_v22  ;;  %v6857_v24 = vld [vmem:[#allocation2 + $0x38] sm:$0xff] }
 0x70d   : > { %8297 = vadd.xlane.f32.xlu0 %v8296_v2  ;;  %v7567_v43 = vmul.f32 %v21332_v28, %v21576_v31  ;;  %v7636_v8 = vmul.f32 %v21337_v23, %v21578_v17  ;;  %v7705_v54 = vmul.f32 %v21342_v13, %v21580_v35  ;;  %v7769_v7 = vadd.f32 %v7222_v16, %v7153_v34 }
 0x70e   : > { %v8152_v57 = vadd.f32 %v8088_v49, %v8024_v20  ;;  %v7833_v38 = vadd.f32 %v7360_v9, %v7291_v52  ;;  %v7897_v56 = vadd.f32 %v7498_v32, %v7429_v6  ;;  %v21601_v59 = vunpack.c.h.bf16 %v6856_v5 }
 0x70f   : > { %v7961_v27 = vadd.f32 %v7636_v8, %v7567_v43  ;;  %v21603_v58 = vunpack.c.h.bf16 %v6952_v0  ;;  %v21605_v19 = vunpack.c.h.bf16 %v7048_v60  ;;  %v7154_v25 = vmul.f32 %v21284_v48, %v21501_v30  ;;  %v6953_v30 = vld [vmem:[#allocation3 + $0x38] sm:$0xff] }
 0x710   : > { %v8216_v3 = vadd.f32 %v8152_v57, %v7704_v46  ;;  %v8025_v26 = vadd.f32 %v7833_v38, %v7769_v7  ;;  %v7223_v40 = vmul.f32 %v21289_v50, %v21503_v15  ;;  %v7292_v53 = vmul.f32 %v21294_v11, %v21505_v36  ;;  %v7049_v46 = vld [vmem:[#allocation4 + $0x38] sm:$0xff] }
 0x711   : > { %v8089_v61 = vadd.f32 %v7961_v27, %v7897_v56  ;;  %v7361_v5 = vmul.f32 %v21305_v62, %v21551_v39  ;;  %v7430_v0 = vmul.f32 %v21310_v42, %v21553_v44  ;;  %v7499_v60 = vmul.f32 %v21315_v55, %v21555_v51 }
 0x712   : > { %v8299_v34 = vsel %vm8271_vm7, %v8216_v3, 0.0  ;;  %v7568_v15 = vmul.f32 %v21332_v28, %v21601_v59  ;;  %v7637_v36 = vmul.f32 %v21337_v23, %v21603_v58  ;;  %v7706_v20 = vmul.f32 %v21342_v13, %v21605_v19 }
 0x713   : > { %8300 = vadd.xlane.f32.xlu1 %v8299_v34  ;;  %v8153_v16 = vadd.f32 %v8089_v61, %v8025_v26  ;;  %v7770_v52 = vadd.f32 %v7223_v40, %v7154_v25  ;;  %v7834_v9 = vadd.f32 %v7361_v5, %v7292_v53  ;;  %v7898_v2 = vadd.f32 %v7499_v60, %v7430_v0 }
 0x714   : > { %v7962_v49 = vadd.f32 %v7637_v36, %v7568_v15  ;;  %v21626_v6 = vunpack.c.l.bf16 %v6857_v24  ;;  %v21628_v32 = vunpack.c.l.bf16 %v6953_v30  ;;  %v21630_v43 = vunpack.c.l.bf16 %v7049_v46 }
 0x715   : > { %v8217_v8 = vadd.f32 %v8153_v16, %v7705_v54  ;;  %v8026_v7 = vadd.f32 %v7834_v9, %v7770_v52  ;;  %v7155_v57 = vmul.f32 %v21284_v48, %v21526_v33  ;;  %v7224_v38 = vmul.f32 %v21289_v50, %v21528_v14 }
 0x716   : > { %v8090_v56 = vadd.f32 %v7962_v49, %v7898_v2  ;;  %v7293_v27 = vmul.f32 %v21294_v11, %v21530_v22  ;;  %v7362_v25 = vmul.f32 %v21305_v62, %v21576_v31  ;;  %v7431_v3 = vmul.f32 %v21310_v42, %v21578_v17 }
 0x717   : > { %v8302_v26 = vsel %vm8271_vm7, %v8217_v8, 0.0  ;;  %v7500_v54 = vmul.f32 %v21315_v55, %v21580_v35  ;;  %v7569_v33 = vmul.f32 %v21332_v28, %v21626_v6  ;;  %v7638_v14 = vmul.f32 %v21337_v23, %v21628_v32  ;;  %v6858_v8 = vld [vmem:[#allocation2 + $0x40] sm:$0xff] }
 0x718   : > { %8303 = vadd.xlane.f32.xlu0 %v8302_v26  ;;  %v8154_v40 = vadd.f32 %v8090_v56, %v8026_v7  ;;  %v7707_v22 = vmul.f32 %v21342_v13, %v21630_v43  ;;  %v7771_v53 = vadd.f32 %v7224_v38, %v7155_v57  ;;  %v7835_v61 = vadd.f32 %v7362_v25, %v7293_v27 }
 0x719   : > { %v7899_v5 = vadd.f32 %v7500_v54, %v7431_v3  ;;  %v7963_v0 = vadd.f32 %v7638_v14, %v7569_v33  ;;  %v21651_v60 = vunpack.c.h.bf16 %v6857_v24  ;;  %v21653_v34 = vunpack.c.h.bf16 %v6953_v30  ;;  %v6954_v30 = vld [vmem:[#allocation3 + $0x40] sm:$0xff] }
 0x71a   : > { %v8218_v15 = vadd.f32 %v8154_v40, %v7706_v20  ;;  %v8027_v36 = vadd.f32 %v7835_v61, %v7771_v53  ;;  %v21655_v16 = vunpack.c.h.bf16 %v7049_v46  ;;  %v7156_v52 = vmul.f32 %v21284_v48, %v21551_v39 }
 0x71b   : > { %v8091_v9 = vadd.f32 %v7963_v0, %v7899_v5  ;;  %v7225_v2 = vmul.f32 %v21289_v50, %v21553_v44  ;;  %v7294_v49 = vmul.f32 %v21294_v11, %v21555_v51  ;;  %v7363_v24 = vmul.f32 %v21305_v62, %v21601_v59  ;;  %v7050_v44 = vld [vmem:[#allocation4 + $0x40] sm:$0xff] }
 0x71c   : > { %v8305_v20 = vsel %vm8271_vm7, %v8218_v15, 0.0  ;;  %v7432_v46 = vmul.f32 %v21310_v42, %v21603_v58  ;;  %v7501_v39 = vmul.f32 %v21315_v55, %v21605_v19  ;;  %v7570_v7 = vmul.f32 %v21332_v28, %v21651_v60 }
 0x71d   : > { %8306 = vadd.xlane.f32.xlu1 %v8305_v20  ;;  %v8155_v57 = vadd.f32 %v8091_v9, %v8027_v36  ;;  %v7639_v51 = vmul.f32 %v21337_v23, %v21653_v34  ;;  %v7708_v38 = vmul.f32 %v21342_v13, %v21655_v16  ;;  %v7772_v56 = vadd.f32 %v7225_v2, %v7156_v52 }
 0x71e   : > { %v7836_v27 = vadd.f32 %v7363_v24, %v7294_v49  ;;  %v7900_v25 = vadd.f32 %v7501_v39, %v7432_v46  ;;  %v21676_v3 = vunpack.c.l.bf16 %v6858_v8  ;;  %v21678_v26 = vunpack.c.l.bf16 %v6954_v30 }
 0x71f   : > { %v8219_v54 = vadd.f32 %v8155_v57, %v7707_v22  ;;  %v7964_v33 = vadd.f32 %v7639_v51, %v7570_v7  ;;  %v21680_v14 = vunpack.c.l.bf16 %v7050_v44  ;;  %v7157_v40 = vmul.f32 %v21284_v48, %v21576_v31 }
 0x720   : > { %v8028_v53 = vadd.f32 %v7836_v27, %v7772_v56  ;;  %v7226_v61 = vmul.f32 %v21289_v50, %v21578_v17  ;;  %v7295_v5 = vmul.f32 %v21294_v11, %v21580_v35  ;;  %v7364_v0 = vmul.f32 %v21305_v62, %v21626_v6 }
 0x721   : > { %v8308_v15 = vsel %vm8271_vm7, %v8219_v54, 0.0  ;;  %v8092_v36 = vadd.f32 %v7964_v33, %v7900_v25  ;;  %v7433_v22 = vmul.f32 %v21310_v42, %v21628_v32  ;;  %v7502_v52 = vmul.f32 %v21315_v55, %v21630_v43  ;;  %v6859_v33 = vld [vmem:[#allocation2 + $0x48] sm:$0xff] }
 0x722   : > { %8309 = vadd.xlane.f32.xlu0 %v8308_v15  ;;  %v7571_v31 = vmul.f32 %v21332_v28, %v21676_v3  ;;  %v7640_v17 = vmul.f32 %v21337_v23, %v21678_v26  ;;  %v7709_v35 = vmul.f32 %v21342_v13, %v21680_v14  ;;  %v7773_v9 = vadd.f32 %v7226_v61, %v7157_v40 }
 0x723   : > { %v8156_v2 = vadd.f32 %v8092_v36, %v8028_v53  ;;  %v7837_v49 = vadd.f32 %v7364_v0, %v7295_v5  ;;  %v7901_v24 = vadd.f32 %v7502_v52, %v7433_v22  ;;  %v21701_v20 = vunpack.c.h.bf16 %v6858_v8 }
 0x724   : > { %v7965_v46 = vadd.f32 %v7640_v17, %v7571_v31  ;;  %v21703_v39 = vunpack.c.h.bf16 %v6954_v30  ;;  %v21705_v7 = vunpack.c.h.bf16 %v7050_v44  ;;  %v7158_v57 = vmul.f32 %v21284_v48, %v21601_v59  ;;  %v6955_v59 = vld [vmem:[#allocation3 + $0x48] sm:$0xff] }
 0x725   : > { %v8220_v51 = vadd.f32 %v8156_v2, %v7708_v38  ;;  %v8029_v56 = vadd.f32 %v7837_v49, %v7773_v9  ;;  %v7227_v27 = vmul.f32 %v21289_v50, %v21603_v58  ;;  %v7296_v25 = vmul.f32 %v21294_v11, %v21605_v19  ;;  %v7051_v38 = vld [vmem:[#allocation4 + $0x48] sm:$0xff] }
 0x726   : > { %v8093_v54 = vadd.f32 %v7965_v46, %v7901_v24  ;;  %v7365_v8 = vmul.f32 %v21305_v62, %v21651_v60  ;;  %v7434_v30 = vmul.f32 %v21310_v42, %v21653_v34  ;;  %v7503_v44 = vmul.f32 %v21315_v55, %v21655_v16 }
 0x727   : > { %v8311_v40 = vsel %vm8271_vm7, %v8220_v51, 0.0  ;;  %v7572_v58 = vmul.f32 %v21332_v28, %v21701_v20  ;;  %v7641_v19 = vmul.f32 %v21337_v23, %v21703_v39  ;;  %v7710_v53 = vmul.f32 %v21342_v13, %v21705_v7 }
 0x728   : > { %8312 = vadd.xlane.f32.xlu1 %v8311_v40  ;;  %v8157_v61 = vadd.f32 %v8093_v54, %v8029_v56  ;;  %v7774_v5 = vadd.f32 %v7227_v27, %v7158_v57  ;;  %v7838_v0 = vadd.f32 %v7365_v8, %v7296_v25  ;;  %v7902_v15 = vadd.f32 %v7503_v44, %v7434_v30 }
 0x729   : > { %v7966_v36 = vadd.f32 %v7641_v19, %v7572_v58  ;;  %v21726_v22 = vunpack.c.l.bf16 %v6859_v33  ;;  %v21728_v52 = vunpack.c.l.bf16 %v6955_v59  ;;  %v21730_v31 = vunpack.c.l.bf16 %v7051_v38 }
 0x72a   : > { %v8221_v17 = vadd.f32 %v8157_v61, %v7709_v35  ;;  %v8030_v9 = vadd.f32 %v7838_v0, %v7774_v5  ;;  %v7159_v2 = vmul.f32 %v21284_v48, %v21626_v6  ;;  %v7228_v49 = vmul.f32 %v21289_v50, %v21628_v32 }
 0x72b   : > { %v8094_v24 = vadd.f32 %v7966_v36, %v7902_v15  ;;  %v7297_v46 = vmul.f32 %v21294_v11, %v21630_v43  ;;  %v7366_v57 = vmul.f32 %v21305_v62, %v21676_v3  ;;  %v7435_v51 = vmul.f32 %v21310_v42, %v21678_v26 }
 0x72c   : > { %v8314_v56 = vsel %vm8271_vm7, %v8221_v17, 0.0  ;;  %v7504_v35 = vmul.f32 %v21315_v55, %v21680_v14  ;;  %v7573_v6 = vmul.f32 %v21332_v28, %v21726_v22  ;;  %v7642_v32 = vmul.f32 %v21337_v23, %v21728_v52  ;;  %v6860_v17 = vld [vmem:[#allocation2 + $0x50] sm:$0xff] }
 0x72d   : > { %8315 = vadd.xlane.f32.xlu0 %v8314_v56  ;;  %v8158_v27 = vadd.f32 %v8094_v24, %v8030_v9  ;;  %v7711_v43 = vmul.f32 %v21342_v13, %v21730_v31  ;;  %v7775_v25 = vadd.f32 %v7228_v49, %v7159_v2  ;;  %v7839_v54 = vadd.f32 %v7366_v57, %v7297_v46 }
 0x72e   : > { %v7903_v8 = vadd.f32 %v7504_v35, %v7435_v51  ;;  %v7967_v30 = vadd.f32 %v7642_v32, %v7573_v6  ;;  %v21751_v44 = vunpack.c.h.bf16 %v6859_v33  ;;  %v21753_v40 = vunpack.c.h.bf16 %v6955_v59  ;;  %v6956_v59 = vld [vmem:[#allocation3 + $0x50] sm:$0xff] }
 0x72f   : > { %v8222_v58 = vadd.f32 %v8158_v27, %v7710_v53  ;;  %v8031_v19 = vadd.f32 %v7839_v54, %v7775_v25  ;;  %v21755_v61 = vunpack.c.h.bf16 %v7051_v38  ;;  %v7160_v5 = vmul.f32 %v21284_v48, %v21651_v60 }
 0x730   : > { %v8095_v0 = vadd.f32 %v7967_v30, %v7903_v8  ;;  %v7229_v15 = vmul.f32 %v21289_v50, %v21653_v34  ;;  %v7298_v36 = vmul.f32 %v21294_v11, %v21655_v16  ;;  %v7367_v33 = vmul.f32 %v21305_v62, %v21701_v20  ;;  %v7052_v34 = vld [vmem:[#allocation4 + $0x50] sm:$0xff] }
 0x731   : > { %v8317_v53 = vsel %vm8271_vm7, %v8222_v58, 0.0  ;;  %v7436_v38 = vmul.f32 %v21310_v42, %v21703_v39  ;;  %v7505_v60 = vmul.f32 %v21315_v55, %v21705_v7  ;;  %v7574_v9 = vmul.f32 %v21332_v28, %v21751_v44 }
 0x732   : > { %8318 = vadd.xlane.f32.xlu1 %v8317_v53  ;;  %v8159_v2 = vadd.f32 %v8095_v0, %v8031_v19  ;;  %v7643_v16 = vmul.f32 %v21337_v23, %v21753_v40  ;;  %v7712_v49 = vmul.f32 %v21342_v13, %v21755_v61  ;;  %v7776_v24 = vadd.f32 %v7229_v15, %v7160_v5 }
 0x733   : > { %v7840_v46 = vadd.f32 %v7367_v33, %v7298_v36  ;;  %v7904_v57 = vadd.f32 %v7505_v60, %v7436_v38  ;;  %v21776_v51 = vunpack.c.l.bf16 %v6860_v17  ;;  %v21778_v56 = vunpack.c.l.bf16 %v6956_v59 }
 0x734   : > { %v8223_v35 = vadd.f32 %v8159_v2, %v7711_v43  ;;  %v7968_v6 = vadd.f32 %v7643_v16, %v7574_v9  ;;  %v21780_v32 = vunpack.c.l.bf16 %v7052_v34  ;;  %v7161_v27 = vmul.f32 %v21284_v48, %v21676_v3 }
 0x735   : > { %v8032_v25 = vadd.f32 %v7840_v46, %v7776_v24  ;;  %v7230_v54 = vmul.f32 %v21289_v50, %v21678_v26  ;;  %v7299_v8 = vmul.f32 %v21294_v11, %v21680_v14  ;;  %v7368_v30 = vmul.f32 %v21305_v62, %v21726_v22 }
 0x736   : > { %v8320_v58 = vsel %vm8271_vm7, %v8223_v35, 0.0  ;;  %v8096_v19 = vadd.f32 %v7968_v6, %v7904_v57  ;;  %v7437_v43 = vmul.f32 %v21310_v42, %v21728_v52  ;;  %v7506_v5 = vmul.f32 %v21315_v55, %v21730_v31  ;;  %v6861_v6 = vld [vmem:[#allocation2 + $0x58] sm:$0xff] }
 0x737   : > { %8321 = vadd.xlane.f32.xlu0 %v8320_v58  ;;  %v7575_v3 = vmul.f32 %v21332_v28, %v21776_v51  ;;  %v7644_v26 = vmul.f32 %v21337_v23, %v21778_v56  ;;  %v7713_v14 = vmul.f32 %v21342_v13, %v21780_v32  ;;  %v7777_v0 = vadd.f32 %v7230_v54, %v7161_v27 }
 0x738   : > { %v8160_v15 = vadd.f32 %v8096_v19, %v8032_v25  ;;  %v7841_v36 = vadd.f32 %v7368_v30, %v7299_v8  ;;  %v7905_v33 = vadd.f32 %v7506_v5, %v7437_v43  ;;  %v21801_v53 = vunpack.c.h.bf16 %v6860_v17 }
 0x739   : > { %v7969_v38 = vadd.f32 %v7644_v26, %v7575_v3  ;;  %v21803_v60 = vunpack.c.h.bf16 %v6956_v59  ;;  %v21805_v9 = vunpack.c.h.bf16 %v7052_v34  ;;  %v7162_v2 = vmul.f32 %v21284_v48, %v21701_v20  ;;  %v6957_v20 = vld [vmem:[#allocation3 + $0x58] sm:$0xff] }
 0x73a   : > { %v8224_v16 = vadd.f32 %v8160_v15, %v7712_v49  ;;  %v8033_v24 = vadd.f32 %v7841_v36, %v7777_v0  ;;  %v7231_v46 = vmul.f32 %v21289_v50, %v21703_v39  ;;  %v7300_v57 = vmul.f32 %v21294_v11, %v21705_v7  ;;  %v7053_v49 = vld [vmem:[#allocation4 + $0x58] sm:$0xff] }
 0x73b   : > { %v8097_v35 = vadd.f32 %v7969_v38, %v7905_v33  ;;  %v7369_v17 = vmul.f32 %v21305_v62, %v21751_v44  ;;  %v7438_v59 = vmul.f32 %v21310_v42, %v21753_v40  ;;  %v7507_v34 = vmul.f32 %v21315_v55, %v21755_v61 }
 0x73c   : > { %v8323_v27 = vsel %vm8271_vm7, %v8224_v16, 0.0  ;;  %v7576_v39 = vmul.f32 %v21332_v28, %v21801_v53  ;;  %v7645_v7 = vmul.f32 %v21337_v23, %v21803_v60  ;;  %v7714_v25 = vmul.f32 %v21342_v13, %v21805_v9 }
 0x73d   : > { %8324 = vadd.xlane.f32.xlu1 %v8323_v27  ;;  %v8161_v54 = vadd.f32 %v8097_v35, %v8033_v24  ;;  %v7778_v8 = vadd.f32 %v7231_v46, %v7162_v2  ;;  %v7842_v30 = vadd.f32 %v7369_v17, %v7300_v57  ;;  %v7906_v58 = vadd.f32 %v7507_v34, %v7438_v59 }
 0x73e   : > { %v7970_v19 = vadd.f32 %v7645_v7, %v7576_v39  ;;  %v21826_v43 = vunpack.c.l.bf16 %v6861_v6  ;;  %v21828_v5 = vunpack.c.l.bf16 %v6957_v20  ;;  %v21830_v3 = vunpack.c.l.bf16 %v7053_v49 }
 0x73f   : > { %v8225_v26 = vadd.f32 %v8161_v54, %v7713_v14  ;;  %v8034_v0 = vadd.f32 %v7842_v30, %v7778_v8  ;;  %v7163_v15 = vmul.f32 %v21284_v48, %v21726_v22  ;;  %v7232_v36 = vmul.f32 %v21289_v50, %v21728_v52 }
 0x740   : > { %v8098_v33 = vadd.f32 %v7970_v19, %v7906_v58  ;;  %v7301_v38 = vmul.f32 %v21294_v11, %v21730_v31  ;;  %v7370_v2 = vmul.f32 %v21305_v62, %v21776_v51  ;;  %v7439_v16 = vmul.f32 %v21310_v42, %v21778_v56 }
 0x741   : > { %v8326_v24 = vsel %vm8271_vm7, %v8225_v26, 0.0  ;;  %v7508_v14 = vmul.f32 %v21315_v55, %v21780_v32  ;;  %v7577_v22 = vmul.f32 %v21332_v28, %v21826_v43  ;;  %v7646_v52 = vmul.f32 %v21337_v23, %v21828_v5  ;;  %v6862_v26 = vld [vmem:[#allocation2 + $0x60] sm:$0xff] }
 0x742   : > { %8327 = vadd.xlane.f32.xlu0 %v8326_v24  ;;  %v8162_v46 = vadd.f32 %v8098_v33, %v8034_v0  ;;  %v7715_v31 = vmul.f32 %v21342_v13, %v21830_v3  ;;  %v7779_v57 = vadd.f32 %v7232_v36, %v7163_v15  ;;  %v7843_v35 = vadd.f32 %v7370_v2, %v7301_v38  ;;  %v21892_v2 = vld [vmem:[%s24270_s3 + $0x1] ss:$0 sm:$0xff]  ;;  %v21899_v24 = vld [vmem:[%s24270_s3 + $0x2] ss:$0 sm:$0xff] }
 0x743   : > { %v7907_v17 = vadd.f32 %v7508_v14, %v7439_v16  ;;  %v7971_v59 = vadd.f32 %v7646_v52, %v7577_v22  ;;  %v21851_v34 = vunpack.c.h.bf16 %v6861_v6  ;;  %v21853_v27 = vunpack.c.h.bf16 %v6957_v20  ;;  %v6958_v20 = vld [vmem:[#allocation3 + $0x60] sm:$0xff] }
 0x744   : > { %v8226_v39 = vadd.f32 %v8162_v46, %v7714_v25  ;;  %v8035_v7 = vadd.f32 %v7843_v35, %v7779_v57  ;;  %v21855_v54 = vunpack.c.h.bf16 %v7053_v49  ;;  %v7164_v8 = vmul.f32 %v21284_v48, %v21751_v44  ;;  %v21928_v35 = vld [vmem:[%s24270_s3 + $0x6] ss:$0 sm:$0xff] }
 0x745   : > { %v8099_v30 = vadd.f32 %v7971_v59, %v7907_v17  ;;  %v7233_v58 = vmul.f32 %v21289_v50, %v21753_v40  ;;  %v7302_v19 = vmul.f32 %v21294_v11, %v21755_v61  ;;  %v7371_v6 = vmul.f32 %v21305_v62, %v21801_v53  ;;  %v7054_v50 = vld [vmem:[#allocation4 + $0x60] sm:$0xff] }
 0x746   : > { %v8329_v25 = vsel %vm8271_vm7, %v8226_v39, 0.0  ;;  %v7440_v49 = vmul.f32 %v21310_v42, %v21803_v60  ;;  %v7509_v48 = vmul.f32 %v21315_v55, %v21805_v9  ;;  %v7578_v44 = vmul.f32 %v21332_v28, %v21851_v34  ;;  %v21885_v28 = vld [vmem:[%s24270_s3] ss:$0 sm:$0xff]  ;;  %v21935_v59 = vld [vmem:[%s24270_s3 + $0x7] ss:$0 sm:$0xff] }
 0x747   : > { %8330 = vadd.xlane.f32.xlu1 %v8329_v25  ;;  %v8163_v40 = vadd.f32 %v8099_v30, %v8035_v7  ;;  %v7647_v11 = vmul.f32 %v21337_v23, %v21853_v27  ;;  %v7716_v62 = vmul.f32 %v21342_v13, %v21855_v54  ;;  %v7780_v61 = vadd.f32 %v7233_v58, %v7164_v8  ;;  %v21942_v7 = vld [vmem:[%s24270_s3 + $0x8] ss:$0 sm:$0xff] }
 0x748   : > { %v7844_v0 = vadd.f32 %v7371_v6, %v7302_v19  ;;  %v7908_v15 = vadd.f32 %v7509_v48, %v7440_v49  ;;  %v21876_v36 = vunpack.c.l.bf16 %v6862_v26  ;;  %v21878_v42 = vunpack.c.l.bf16 %v6958_v20 }
 0x749   : > { %v8227_v55 = vadd.f32 %v8163_v40, %v7715_v31  ;;  %v7972_v33 = vadd.f32 %v7647_v11, %v7578_v44  ;;  %v21880_v38 = vunpack.c.l.bf16 %v7054_v50  ;;  %v7165_v23 = vmul.f32 %v21885_v28, %v21776_v51  ;;  %v21906_v51 = vld [vmem:[%s24270_s3 + $0x3] ss:$0 sm:$0xff] }
 0x74a   : > { %v8036_v13 = vadd.f32 %v7844_v0, %v7780_v61  ;;  %v7234_v16 = vmul.f32 %v21892_v2, %v21778_v56  ;;  %v7303_v14 = vmul.f32 %v21899_v24, %v21780_v32  ;;  %v7372_v22 = vmul.f32 %v21906_v51, %v21826_v43  ;;  %v21914_v56 = vld [vmem:[%s24270_s3 + $0x4] ss:$0 sm:$0xff]  ;;  %v21921_v32 = vld [vmem:[%s24270_s3 + $0x5] ss:$0 sm:$0xff] }
 0x74b   : > { %v8332_v52 = vsel %vm8271_vm7, %v8227_v55, 0.0  ;;  %v8100_v46 = vadd.f32 %v7972_v33, %v7908_v15  ;;  %v7441_v31 = vmul.f32 %v21914_v56, %v21828_v5  ;;  %v7510_v57 = vmul.f32 %v21921_v32, %v21830_v3  ;;  %v6863_v55 = vld [vmem:[#allocation2 + $0x68] sm:$0xff] }
 0x74c   : > { %8333 = vadd.xlane.f32.xlu0 %v8332_v52  ;;  %v7579_v17 = vmul.f32 %v21928_v35, %v21876_v36  ;;  %v7648_v39 = vmul.f32 %v21935_v59, %v21878_v42  ;;  %v7717_v8 = vmul.f32 %v21942_v7, %v21880_v38  ;;  %v7781_v30 = vadd.f32 %v7234_v16, %v7165_v23 }
 0x74d   : > { %v8164_v58 = vadd.f32 %v8100_v46, %v8036_v13  ;;  %v7845_v19 = vadd.f32 %v7372_v22, %v7303_v14  ;;  %v7909_v6 = vadd.f32 %v7510_v57, %v7441_v31  ;;  %v21946_v25 = vunpack.c.h.bf16 %v6862_v26 }
 0x74e   : > { %v7973_v49 = vadd.f32 %v7648_v39, %v7579_v17  ;;  %v21948_v48 = vunpack.c.h.bf16 %v6958_v20  ;;  %v21950_v44 = vunpack.c.h.bf16 %v7054_v50  ;;  %v7166_v40 = vmul.f32 %v21885_v28, %v21801_v53  ;;  %v6959_v53 = vld [vmem:[#allocation3 + $0x68] sm:$0xff] }
 0x74f   : > { %v8228_v11 = vadd.f32 %v8164_v58, %v7716_v62  ;;  %v8037_v61 = vadd.f32 %v7845_v19, %v7781_v30  ;;  %v7235_v0 = vmul.f32 %v21892_v2, %v21803_v60  ;;  %v7304_v15 = vmul.f32 %v21899_v24, %v21805_v9  ;;  %v7055_v62 = vld [vmem:[#allocation4 + $0x68] sm:$0xff]  ;;  %v8464_v60 = vld [vmem:[%s24271_s4 + $0x10] sm:$0x1] }
 0x750   : > { %v8101_v33 = vadd.f32 %v7973_v49, %v7909_v6  ;;  %v7373_v26 = vmul.f32 %v21906_v51, %v21851_v34  ;;  %v7442_v20 = vmul.f32 %v21914_v56, %v21853_v27  ;;  %v7511_v50 = vmul.f32 %v21921_v32, %v21855_v54  ;;  %14155 = vpush %v8464_v60 }
 0x751   : > { %v8335_v23 = vsel %vm8271_vm7, %v8228_v11, 0.0  ;;  %v7580_v9 = vmul.f32 %v21928_v35, %v21946_v25  ;;  %v7649_v13 = vmul.f32 %v21935_v59, %v21948_v48  ;;  %v7718_v16 = vmul.f32 %v21942_v7, %v21950_v44 }
 0x752   : > { %8336 = vadd.xlane.f32.xlu1 %v8335_v23  ;;  %v8165_v14 = vadd.f32 %v8101_v33, %v8037_v61  ;;  %v7782_v22 = vadd.f32 %v7235_v0, %v7166_v40  ;;  %v7846_v52 = vadd.f32 %v7373_v26, %v7304_v15  ;;  %v7910_v46 = vadd.f32 %v7511_v50, %v7442_v20 }
 0x753   : > { %v7974_v31 = vadd.f32 %v7649_v13, %v7580_v9  ;;  %v21974_v57 = vunpack.c.l.bf16 %v6863_v55  ;;  %v21976_v17 = vunpack.c.l.bf16 %v6959_v53  ;;  %v21978_v39 = vunpack.c.l.bf16 %v7055_v62 }
 0x754   : > { %v8229_v30 = vadd.f32 %v8165_v14, %v7717_v8  ;;  %v8038_v58 = vadd.f32 %v7846_v52, %v7782_v22  ;;  %v7167_v19 = vmul.f32 %v21885_v28, %v21826_v43  ;;  %v7236_v6 = vmul.f32 %v21892_v2, %v21828_v5 }
 0x755   : > { %v8102_v49 = vadd.f32 %v7974_v31, %v7910_v46  ;;  %v7305_v40 = vmul.f32 %v21899_v24, %v21830_v3  ;;  %v7374_v11 = vmul.f32 %v21906_v51, %v21876_v36  ;;  %v7443_v61 = vmul.f32 %v21914_v56, %v21878_v42 }
 0x756   : > { %v8338_v0 = vsel %vm8271_vm7, %v8229_v30, 0.0  ;;  %v7512_v8 = vmul.f32 %v21921_v32, %v21880_v38  ;;  %v7581_v43 = vmul.f32 %v21928_v35, %v21974_v57  ;;  %v7650_v5 = vmul.f32 %v21935_v59, %v21976_v17  ;;  %v6864_v30 = vld [vmem:[#allocation2 + $0x70] sm:$0xff] }
 0x757   : > { %8339 = vadd.xlane.f32.xlu0 %v8338_v0  ;;  %v8166_v15 = vadd.f32 %v8102_v49, %v8038_v58  ;;  %v7719_v3 = vmul.f32 %v21942_v7, %v21978_v39  ;;  %v7783_v33 = vadd.f32 %v7236_v6, %v7167_v19  ;;  %v7847_v26 = vadd.f32 %v7374_v11, %v7305_v40 }
 0x758   : > { %v7911_v20 = vadd.f32 %v7512_v8, %v7443_v61  ;;  %v7975_v50 = vadd.f32 %v7650_v5, %v7581_v43  ;;  %v21999_v60 = vunpack.c.h.bf16 %v6863_v55  ;;  %v22001_v23 = vunpack.c.h.bf16 %v6959_v53  ;;  %v6960_v53 = vld [vmem:[#allocation3 + $0x70] sm:$0xff] }
 0x759   : > { %v8230_v9 = vadd.f32 %v8166_v15, %v7718_v16  ;;  %v8039_v13 = vadd.f32 %v7847_v26, %v7783_v33  ;;  %v22003_v14 = vunpack.c.h.bf16 %v7055_v62  ;;  %v7168_v22 = vmul.f32 %v21885_v28, %v21851_v34 }
 0x75a   : > { %v8103_v52 = vadd.f32 %v7975_v50, %v7911_v20  ;;  %v7237_v46 = vmul.f32 %v21892_v2, %v21853_v27  ;;  %v7306_v31 = vmul.f32 %v21899_v24, %v21855_v54  ;;  %v7375_v55 = vmul.f32 %v21906_v51, %v21946_v25  ;;  %v7056_v27 = vld [vmem:[#allocation4 + $0x70] sm:$0xff] }
 0x75b   : > { %v8341_v16 = vsel %vm8271_vm7, %v8230_v9, 0.0  ;;  %v7444_v62 = vmul.f32 %v21914_v56, %v21948_v48  ;;  %v7513_v34 = vmul.f32 %v21921_v32, %v21950_v44  ;;  %v7582_v58 = vmul.f32 %v21928_v35, %v21999_v60 }
 0x75c   : > { %8342 = vadd.xlane.f32.xlu1 %v8341_v16  ;;  %v8167_v19 = vadd.f32 %v8103_v52, %v8039_v13  ;;  %v7651_v54 = vmul.f32 %v21935_v59, %v22001_v23  ;;  %v7720_v6 = vmul.f32 %v21942_v7, %v22003_v14  ;;  %v7784_v49 = vadd.f32 %v7237_v46, %v7168_v22 }
 0x75d   : > { %v7848_v40 = vadd.f32 %v7375_v55, %v7306_v31  ;;  %v7912_v11 = vadd.f32 %v7513_v34, %v7444_v62  ;;  %v22024_v61 = vunpack.c.l.bf16 %v6864_v30  ;;  %v22026_v0 = vunpack.c.l.bf16 %v6960_v53 }
 0x75e   : > { %v8231_v8 = vadd.f32 %v8167_v19, %v7719_v3  ;;  %v7976_v43 = vadd.f32 %v7651_v54, %v7582_v58  ;;  %v22028_v5 = vunpack.c.l.bf16 %v7056_v27  ;;  %v7169_v15 = vmul.f32 %v21885_v28, %v21876_v36 }
 0x75f   : > { %v8040_v33 = vadd.f32 %v7848_v40, %v7784_v49  ;;  %v7238_v26 = vmul.f32 %v21892_v2, %v21878_v42  ;;  %v7307_v20 = vmul.f32 %v21899_v24, %v21880_v38  ;;  %v7376_v50 = vmul.f32 %v21906_v51, %v21974_v57 }
 0x760   : > { %v8344_v9 = vsel %vm8271_vm7, %v8231_v8, 0.0  ;;  %v8104_v13 = vadd.f32 %v7976_v43, %v7912_v11  ;;  %v7445_v3 = vmul.f32 %v21914_v56, %v21976_v17  ;;  %v7514_v22 = vmul.f32 %v21921_v32, %v21978_v39 }
 0x761   : > { %8345 = vadd.xlane.f32.xlu0 %v8344_v9  ;;  %v7583_v36 = vmul.f32 %v21928_v35, %v22024_v61  ;;  %v7652_v42 = vmul.f32 %v21935_v59, %v22026_v0  ;;  %v7721_v38 = vmul.f32 %v21942_v7, %v22028_v5  ;;  %v7785_v52 = vadd.f32 %v7238_v26, %v7169_v15 }
 0x762   : > { %v8168_v46 = vadd.f32 %v8104_v13, %v8040_v33  ;;  %v7849_v31 = vadd.f32 %v7376_v50, %v7307_v20  ;;  %v7913_v55 = vadd.f32 %v7514_v22, %v7445_v3  ;;  %v22049_v16 = vunpack.c.h.bf16 %v6864_v30 }
 0x763   : > { %v7977_v62 = vadd.f32 %v7652_v42, %v7583_v36  ;;  %v22051_v34 = vunpack.c.h.bf16 %v6960_v53  ;;  %v22053_v58 = vunpack.c.h.bf16 %v7056_v27  ;;  %v7170_v19 = vmul.f32 %v21885_v28, %v21946_v25 }
 0x764   : > { %v8232_v54 = vadd.f32 %v8168_v46, %v7720_v6  ;;  %v8041_v49 = vadd.f32 %v7849_v31, %v7785_v52  ;;  %v7239_v40 = vmul.f32 %v21892_v2, %v21948_v48  ;;  %v7308_v11 = vmul.f32 %v21899_v24, %v21950_v44 }
 0x765   : > { %v8105_v8 = vadd.f32 %v7977_v62, %v7913_v55  ;;  %v7377_v30 = vmul.f32 %v21906_v51, %v21999_v60  ;;  %v7446_v53 = vmul.f32 %v21914_v56, %v22001_v23  ;;  %v7515_v27 = vmul.f32 %v21921_v32, %v22003_v14 }
 0x766   : > { %v8347_v25 = vsel %vm8271_vm7, %v8232_v54, 0.0  ;;  %v7584_v6 = vmul.f32 %v21928_v35, %v22049_v16  ;;  %v7653_v48 = vmul.f32 %v21935_v59, %v22051_v34  ;;  %v7722_v44 = vmul.f32 %v21942_v7, %v22053_v58 }
 0x767   : > { %8348 = vadd.xlane.f32.xlu1 %v8347_v25  ;;  %v8169_v43 = vadd.f32 %v8105_v8, %v8041_v49  ;;  %v7786_v15 = vadd.f32 %v7239_v40, %v7170_v19  ;;  %v7850_v33 = vadd.f32 %v7377_v30, %v7308_v11  ;;  %v7914_v26 = vadd.f32 %v7515_v27, %v7446_v53 }
 0x768   : > { %v7978_v20 = vadd.f32 %v7653_v48, %v7584_v6  ;;  %v7171_v50 = vmul.f32 %v21885_v28, %v21974_v57  ;;  %v7240_v9 = vmul.f32 %v21892_v2, %v21976_v17  ;;  %v7309_v13 = vmul.f32 %v21899_v24, %v21978_v39 }
 0x769   : > { %v8233_v3 = vadd.f32 %v8169_v43, %v7721_v38  ;;  %v8042_v22 = vadd.f32 %v7850_v33, %v7786_v15  ;;  %v7378_v36 = vmul.f32 %v21906_v51, %v22024_v61  ;;  %v7447_v42 = vmul.f32 %v21914_v56, %v22026_v0 }
 0x76a   : > { %v8106_v52 = vadd.f32 %v7978_v20, %v7914_v26  ;;  %v7516_v46 = vmul.f32 %v21921_v32, %v22028_v5  ;;  %v7585_v57 = vmul.f32 %v21928_v35, %v21263_v45  ;;  %v7654_v17 = vmul.f32 %v21935_v59, %v21271_v41 }
 0x76b   : > { %v8350_v39 = vsel %vm8271_vm7, %v8233_v3, 0.0  ;;  %v7723_v38 = vmul.f32 %v21942_v7, %v21279_v12  ;;  %v7787_v31 = vadd.f32 %v7240_v9, %v7171_v50  ;;  %v7851_v55 = vadd.f32 %v7378_v36, %v7309_v13 }
 0x76c   : > { %8351 = vadd.xlane.f32.xlu0 %v8350_v39  ;;  %v8170_v62 = vadd.f32 %v8106_v52, %v8042_v22  ;;  %v7915_v19 = vadd.f32 %v7516_v46, %v7447_v42  ;;  %v7979_v54 = vadd.f32 %v7654_v17, %v7585_v57  ;;  %v7172_v49 = vmul.f32 %v21885_v28, %v21999_v60 }
 0x76d   : > { %v8043_v40 = vadd.f32 %v7851_v55, %v7787_v31  ;;  %v7241_v11 = vmul.f32 %v21892_v2, %v22001_v23  ;;  %v7310_v8 = vmul.f32 %v21899_v24, %v22003_v14  ;;  %v7379_v30 = vmul.f32 %v21906_v51, %v22049_v16 }
 0x76e   : > { %v8234_v53 = vadd.f32 %v8170_v62, %v7722_v44  ;;  %v8107_v27 = vadd.f32 %v7979_v54, %v7915_v19  ;;  %v7448_v25 = vmul.f32 %v21914_v56, %v22051_v34  ;;  %v7517_v6 = vmul.f32 %v21921_v32, %v22053_v58  ;;  %v6866_v54 = vld [vmem:[#allocation2 + $0x80] sm:$0xff] }
 0x76f   : > { %v7586_v60 = vmul.f32 %v21928_v35, %v21296_v21  ;;  %v7655_v23 = vmul.f32 %v21935_v59, %v21374_v37  ;;  %v7724_v14 = vmul.f32 %v21942_v7, %v21380_v4  ;;  %v7788_v48 = vadd.f32 %v7241_v11, %v7172_v49  ;;  %v6881_v49 = vld [vmem:[#allocation2 + $0xf8] sm:$0xff]  ;;  %v6962_v11 = vld [vmem:[#allocation3 + $0x80] sm:$0xff] }
 0x770   : > { %v8353_v43 = vsel %vm8271_vm7, %v8234_v53, 0.0  ;;  %v8171_v44 = vadd.f32 %v8107_v27, %v8043_v40  ;;  %v7852_v15 = vadd.f32 %v7379_v30, %v7310_v8  ;;  %v7916_v33 = vadd.f32 %v7517_v6, %v7448_v25  ;;  %v6963_v8 = vld [vmem:[#allocation3 + $0x88] sm:$0xff]  ;;  %v6977_v27 = vld [vmem:[#allocation3 + $0xf8] sm:$0xff]  ;;  %v7058_v25 = vld [vmem:[#allocation4 + $0x80] sm:$0xff] }
 0x771   : > { %8354 = vadd.xlane.f32.xlu1 %v8353_v43  ;;  %v7980_v26 = vadd.f32 %v7655_v23, %v7586_v60  ;;  %v7173_v20 = vmul.f32 %v21885_v28, %v22024_v61  ;;  %v7242_v50 = vmul.f32 %v21892_v2, %v22026_v0  ;;  %v7311_v9 = vmul.f32 %v21899_v24, %v22028_v5  ;;  %v7059_v6 = vld [vmem:[#allocation4 + $0x88] sm:$0xff] }
 0x772   : > { %v8235_v13 = vadd.f32 %v8171_v44, %v7723_v38  ;;  %v8044_v3 = vadd.f32 %v7852_v15, %v7788_v48  ;;  %v7380_v22 = vmul.f32 %v21906_v51, %v21263_v45  ;;  %v7449_v36 = vmul.f32 %v21914_v56, %v21271_v41 }
 0x773   : > { %v8108_v42 = vadd.f32 %v7980_v26, %v7916_v33  ;;  %v7518_v52 = vmul.f32 %v21921_v32, %v21279_v12  ;;  %v7587_v61 = vmul.f32 %v21928_v35, %v21259_v63  ;;  %v7656_v0 = vmul.f32 %v21935_v59, %v21267_v10 }
 0x774   : > { %v8356_v5 = vsel %vm8271_vm7, %v8235_v13, 0.0  ;;  %v7725_v46 = vmul.f32 %v21942_v7, %v21275_v47  ;;  %v7789_v57 = vadd.f32 %v7242_v50, %v7173_v20  ;;  %v7853_v45 = vadd.f32 %v7380_v22, %v7311_v9 }
 0x775   : > { %8357 = vadd.xlane.f32.xlu0 %v8356_v5  ;;  %v8172_v17 = vadd.f32 %v8108_v42, %v8044_v3  ;;  %v7917_v41 = vadd.f32 %v7518_v52, %v7449_v36  ;;  %v7981_v39 = vadd.f32 %v7656_v0, %v7587_v61  ;;  %v7174_v12 = vmul.f32 %v21885_v28, %v22049_v16  ;;  %v6867_v16 = vld [vmem:[#allocation2 + $0x88] sm:$0xff] }
 0x776   : > { %v8045_v38 = vadd.f32 %v7853_v45, %v7789_v57  ;;  %v7243_v63 = vmul.f32 %v21892_v2, %v22051_v34  ;;  %v7312_v10 = vmul.f32 %v21899_v24, %v22053_v58  ;;  %v7381_v31 = vmul.f32 %v21906_v51, %v21296_v21 }
 0x777   : > { %v8236_v47 = vadd.f32 %v8172_v17, %v7724_v14  ;;  %v8109_v55 = vadd.f32 %v7981_v39, %v7917_v41  ;;  %v7450_v62 = vmul.f32 %v21914_v56, %v21374_v37  ;;  %v7519_v19 = vmul.f32 %v21921_v32, %v21380_v4 }
 0x778   : > { %v7588_v34 = vmul.f32 %v21928_v35, %v21265_v1  ;;  %v7657_v58 = vmul.f32 %v21935_v59, %v21370_v18  ;;  %v7726_v21 = vmul.f32 %v21942_v7, %v21376_v29  ;;  %v7790_v40 = vadd.f32 %v7243_v63, %v7174_v12  ;;  %v7073_v29 = vld [vmem:[#allocation4 + $0xf8] sm:$0xff] }
 0x779   : > { %v8359_v37 = vsel %vm8271_vm7, %v8236_v47, 0.0  ;;  %v8173_v30 = vadd.f32 %v8109_v55, %v8045_v38  ;;  %v7854_v53 = vadd.f32 %v7381_v31, %v7312_v10  ;;  %v7918_v4 = vadd.f32 %v7519_v19, %v7450_v62 }
 0x77a   : > { %8360 = vadd.xlane.f32.xlu1 %v8359_v37  ;;  %v7982_v60 = vadd.f32 %v7657_v58, %v7588_v34  ;;  %v22150_v1 = vunpack.c.l.bf16 %v6866_v54  ;;  %v22152_v23 = vunpack.c.l.bf16 %v6867_v16  ;;  %v22154_v18 = vunpack.c.l.bf16 %v6881_v49 }
 0x77b   : > { %v8237_v14 = vadd.f32 %v8173_v30, %v7725_v46  ;;  %v8046_v48 = vadd.f32 %v7854_v53, %v7790_v40  ;;  %v22156_v43 = vunpack.c.l.bf16 %v6962_v11  ;;  %v22158_v44 = vunpack.c.l.bf16 %v6963_v8  ;;  %v6868_v40 = vld [vmem:[#allocation2 + $0x90] sm:$0xff] }
 0x77c   : > { %v8110_v15 = vadd.f32 %v7982_v60, %v7918_v4  ;;  %v22160_v33 = vunpack.c.l.bf16 %v6977_v27  ;;  %v22162_v26 = vunpack.c.l.bf16 %v7058_v25  ;;  %v22164_v20 = vunpack.c.l.bf16 %v7059_v6  ;;  %v7060_v4 = vld [vmem:[#allocation4 + $0x90] sm:$0xff] }
 0x77d   : > { %v8362_v50 = vsel %vm8271_vm7, %v8237_v14, 0.0  ;;  %v22167_v9 = vunpack.c.l.bf16 %v7073_v29  ;;  %v7175_v13 = vmul.f32 %v21885_v28, %v22154_v18  ;;  %v7382_v3 = vmul.f32 %v21906_v51, %v22150_v1 }
 0x77e   : > { %8363 = vadd.xlane.f32.xlu0 %v8362_v50  ;;  %v8174_v22 = vadd.f32 %v8110_v15, %v8046_v48  ;;  %v7244_v36 = vmul.f32 %v21892_v2, %v22160_v33  ;;  %v7451_v42 = vmul.f32 %v21914_v56, %v22156_v43  ;;  %v7520_v52 = vmul.f32 %v21921_v32, %v22162_v26 }
 0x77f   : > { %v7313_v61 = vmul.f32 %v21899_v24, %v22167_v9  ;;  %v7589_v0 = vmul.f32 %v21928_v35, %v22152_v23  ;;  %v7658_v5 = vmul.f32 %v21935_v59, %v22158_v44  ;;  %v7727_v46 = vmul.f32 %v21942_v7, %v22164_v20 }
 0x780   : > { %v8238_v57 = vadd.f32 %v8174_v22, %v7726_v21  ;;  %v7791_v45 = vadd.f32 %v7244_v36, %v7175_v13  ;;  %v7919_v17 = vadd.f32 %v7520_v52, %v7451_v42  ;;  %v22187_v41 = vunpack.c.h.bf16 %v6866_v54 }
 0x781   : > { %v7855_v39 = vadd.f32 %v7382_v3, %v7313_v61  ;;  %v7983_v12 = vadd.f32 %v7658_v5, %v7589_v0  ;;  %v22189_v38 = vunpack.c.h.bf16 %v6867_v16  ;;  %v22191_v63 = vunpack.c.h.bf16 %v6881_v49  ;;  %s14156_s19 = spop %14155 }
 0x782   : > { %v8365_v10 = vsel %vm8271_vm7, %v8238_v57, 0.0  ;;  %v22194_v31 = vunpack.c.h.bf16 %v6962_v11  ;;  %v22196_v47 = vunpack.c.h.bf16 %v6963_v8  ;;  %v22198_v55 = vunpack.c.h.bf16 %v6977_v27  ;;  %v6964_v11 = vld [vmem:[#allocation3 + $0x90] sm:$0xff] }
 0x783   : > { %8366 = vadd.xlane.f32.xlu1 %v8365_v10  ;;  %v8047_v62 = vadd.f32 %v7855_v39, %v7791_v45  ;;  %v8111_v19 = vadd.f32 %v7983_v12, %v7919_v17  ;;  %v22200_v34 = vunpack.c.h.bf16 %v7058_v25  ;;  %v22202_v54 = vunpack.c.h.bf16 %v7059_v6 }
 0x784   : > { %v22204_v58 = vunpack.c.h.bf16 %v7073_v29  ;;  %v7176_v16 = vmul.f32 %v21885_v28, %v22191_v63  ;;  %v7245_v49 = vmul.f32 %v21892_v2, %v22198_v55  ;;  %v7383_v21 = vmul.f32 %v21906_v51, %v22187_v41 }
 0x785   : > { %v8175_v8 = vadd.f32 %v8111_v19, %v8047_v62  ;;  %v7452_v37 = vmul.f32 %v21914_v56, %v22194_v31  ;;  %v7521_v30 = vmul.f32 %v21921_v32, %v22200_v34  ;;  %v7590_v53 = vmul.f32 %v21928_v35, %v22189_v38 }
 0x786   : > { %v7314_v27 = vmul.f32 %v21899_v24, %v22204_v58  ;;  %v7659_v25 = vmul.f32 %v21935_v59, %v22196_v47  ;;  %v7728_v6 = vmul.f32 %v21942_v7, %v22202_v54  ;;  %v7792_v60 = vadd.f32 %v7245_v49, %v7176_v16 }
 0x787   : > { %v8239_v29 = vadd.f32 %v8175_v8, %v7727_v46  ;;  %v7920_v14 = vadd.f32 %v7521_v30, %v7452_v37  ;;  %v22224_v48 = vunpack.c.l.bf16 %v6868_v40  ;;  %v22226_v15 = vunpack.c.l.bf16 %v6964_v11 }
 0x788   : > { %v7856_v50 = vadd.f32 %v7383_v21, %v7314_v27  ;;  %v7984_v13 = vadd.f32 %v7659_v25, %v7590_v53  ;;  %v22228_v3 = vunpack.c.l.bf16 %v7060_v4  ;;  %v7177_v22 = vmul.f32 %v21885_v28, %v22150_v1 }
 0x789   : > { %v8368_v36 = vsel %vm8271_vm7, %v8239_v29, 0.0  ;;  %v7246_v42 = vmul.f32 %v21892_v2, %v22156_v43  ;;  %v7315_v52 = vmul.f32 %v21899_v24, %v22162_v26  ;;  %v7384_v61 = vmul.f32 %v21906_v51, %v22152_v23  ;;  %v6869_v29 = vld [vmem:[#allocation2 + $0x98] sm:$0xff] }
 0x78a   : > { %8369 = vadd.xlane.f32.xlu0 %v8368_v36  ;;  %v8048_v0 = vadd.f32 %v7856_v50, %v7792_v60  ;;  %v8112_v5 = vadd.f32 %v7984_v13, %v7920_v14  ;;  %v7453_v46 = vmul.f32 %v21914_v56, %v22158_v44  ;;  %v7522_v57 = vmul.f32 %v21921_v32, %v22164_v20  ;;  %v6965_v14 = vld [vmem:[#allocation3 + $0x98] sm:$0xff] }
 0x78b   : > { %v7591_v45 = vmul.f32 %v21928_v35, %v22224_v48  ;;  %v7660_v17 = vmul.f32 %v21935_v59, %v22226_v15  ;;  %v7729_v39 = vmul.f32 %v21942_v7, %v22228_v3  ;;  %v7793_v12 = vadd.f32 %v7246_v42, %v7177_v22 }
 0x78c   : > { %v8176_v10 = vadd.f32 %v8112_v5, %v8048_v0  ;;  %v7857_v62 = vadd.f32 %v7384_v61, %v7315_v52  ;;  %v7921_v19 = vadd.f32 %v7522_v57, %v7453_v46  ;;  %v22249_v16 = vunpack.c.h.bf16 %v6868_v40 }
 0x78d   : > { %v7985_v49 = vadd.f32 %v7660_v17, %v7591_v45  ;;  %v22251_v21 = vunpack.c.h.bf16 %v6964_v11  ;;  %v22253_v8 = vunpack.c.h.bf16 %v7060_v4  ;;  %v7178_v37 = vmul.f32 %v21885_v28, %v22187_v41 }
 0x78e   : > { %v8240_v30 = vadd.f32 %v8176_v10, %v7728_v6  ;;  %v8049_v53 = vadd.f32 %v7857_v62, %v7793_v12  ;;  %v7247_v27 = vmul.f32 %v21892_v2, %v22194_v31  ;;  %v7316_v25 = vmul.f32 %v21899_v24, %v22200_v34  ;;  %v7061_v6 = vld [vmem:[#allocation4 + $0x98] sm:$0xff] }
 0x78f   : > { %v8113_v60 = vadd.f32 %v7985_v49, %v7921_v19  ;;  %v7385_v40 = vmul.f32 %v21906_v51, %v22189_v38  ;;  %v7454_v11 = vmul.f32 %v21914_v56, %v22196_v47  ;;  %v7523_v4 = vmul.f32 %v21921_v32, %v22202_v54 }
 0x790   : > { %v8371_v50 = vsel %vm8271_vm7, %v8240_v30, 0.0  ;;  %v7592_v13 = vmul.f32 %v21928_v35, %v22249_v16  ;;  %v7661_v22 = vmul.f32 %v21935_v59, %v22251_v21  ;;  %v7730_v36 = vmul.f32 %v21942_v7, %v22253_v8 }
 0x791   : > { %8372 = vadd.xlane.f32.xlu1 %v8371_v50  ;;  %v8177_v42 = vadd.f32 %v8113_v60, %v8049_v53  ;;  %v7794_v52 = vadd.f32 %v7247_v27, %v7178_v37  ;;  %v7858_v61 = vadd.f32 %v7385_v40, %v7316_v25  ;;  %v7922_v0 = vadd.f32 %v7523_v4, %v7454_v11 }
 0x792   : > { %v7986_v5 = vadd.f32 %v7661_v22, %v7592_v13  ;;  %v22274_v46 = vunpack.c.l.bf16 %v6869_v29  ;;  %v22276_v57 = vunpack.c.l.bf16 %v6965_v14  ;;  %v22278_v45 = vunpack.c.l.bf16 %v7061_v6 }
 0x793   : > { %v8241_v17 = vadd.f32 %v8177_v42, %v7729_v39  ;;  %v8050_v12 = vadd.f32 %v7858_v61, %v7794_v52  ;;  %v7179_v10 = vmul.f32 %v21885_v28, %v22152_v23  ;;  %v7248_v62 = vmul.f32 %v21892_v2, %v22158_v44 }
 0x794   : > { %v8114_v19 = vadd.f32 %v7986_v5, %v7922_v0  ;;  %v7317_v49 = vmul.f32 %v21899_v24, %v22164_v20  ;;  %v7386_v37 = vmul.f32 %v21906_v51, %v22224_v48  ;;  %v7455_v30 = vmul.f32 %v21914_v56, %v22226_v15 }
 0x795   : > { %v8374_v53 = vsel %vm8271_vm7, %v8241_v17, 0.0  ;;  %v7524_v39 = vmul.f32 %v21921_v32, %v22228_v3  ;;  %v7593_v23 = vmul.f32 %v21928_v35, %v22274_v46  ;;  %v7662_v44 = vmul.f32 %v21935_v59, %v22276_v57  ;;  %v6870_v17 = vld [vmem:[#allocation2 + $0xa0] sm:$0xff] }
 0x796   : > { %8375 = vadd.xlane.f32.xlu0 %v8374_v53  ;;  %v8178_v27 = vadd.f32 %v8114_v19, %v8050_v12  ;;  %v7731_v20 = vmul.f32 %v21942_v7, %v22278_v45  ;;  %v7795_v25 = vadd.f32 %v7248_v62, %v7179_v10  ;;  %v7859_v60 = vadd.f32 %v7386_v37, %v7317_v49 }
 0x797   : > { %v7923_v40 = vadd.f32 %v7524_v39, %v7455_v30  ;;  %v7987_v11 = vadd.f32 %v7662_v44, %v7593_v23  ;;  %v22299_v4 = vunpack.c.h.bf16 %v6869_v29  ;;  %v22301_v50 = vunpack.c.h.bf16 %v6965_v14  ;;  %v6966_v14 = vld [vmem:[#allocation3 + $0xa0] sm:$0xff] }
 0x798   : > { %v8242_v13 = vadd.f32 %v8178_v27, %v7730_v36  ;;  %v8051_v22 = vadd.f32 %v7859_v60, %v7795_v25  ;;  %v22303_v42 = vunpack.c.h.bf16 %v7061_v6  ;;  %v7180_v52 = vmul.f32 %v21885_v28, %v22189_v38 }
 0x799   : > { %v8115_v61 = vadd.f32 %v7987_v11, %v7923_v40  ;;  %v7249_v0 = vmul.f32 %v21892_v2, %v22196_v47  ;;  %v7318_v5 = vmul.f32 %v21899_v24, %v22202_v54  ;;  %v7387_v29 = vmul.f32 %v21906_v51, %v22249_v16  ;;  %v7062_v47 = vld [vmem:[#allocation4 + $0xa0] sm:$0xff] }
 0x79a   : > { %v8377_v36 = vsel %vm8271_vm7, %v8242_v13, 0.0  ;;  %v7456_v6 = vmul.f32 %v21914_v56, %v22251_v21  ;;  %v7525_v38 = vmul.f32 %v21921_v32, %v22253_v8  ;;  %v7594_v12 = vmul.f32 %v21928_v35, %v22299_v4 }
 0x79b   : > { %8378 = vadd.xlane.f32.xlu1 %v8377_v36  ;;  %v8179_v10 = vadd.f32 %v8115_v61, %v8051_v22  ;;  %v7663_v54 = vmul.f32 %v21935_v59, %v22301_v50  ;;  %v7732_v62 = vmul.f32 %v21942_v7, %v22303_v42  ;;  %v7796_v19 = vadd.f32 %v7249_v0, %v7180_v52 }
 0x79c   : > { %v7860_v49 = vadd.f32 %v7387_v29, %v7318_v5  ;;  %v7924_v37 = vadd.f32 %v7525_v38, %v7456_v6  ;;  %v22324_v30 = vunpack.c.l.bf16 %v6870_v17  ;;  %v22326_v53 = vunpack.c.l.bf16 %v6966_v14 }
 0x79d   : > { %v8243_v39 = vadd.f32 %v8179_v10, %v7731_v20  ;;  %v7988_v23 = vadd.f32 %v7663_v54, %v7594_v12  ;;  %v22328_v44 = vunpack.c.l.bf16 %v7062_v47  ;;  %v7181_v27 = vmul.f32 %v21885_v28, %v22224_v48 }
 0x79e   : > { %v8052_v25 = vadd.f32 %v7860_v49, %v7796_v19  ;;  %v7250_v60 = vmul.f32 %v21892_v2, %v22226_v15  ;;  %v7319_v40 = vmul.f32 %v21899_v24, %v22228_v3  ;;  %v7388_v11 = vmul.f32 %v21906_v51, %v22274_v46 }
 0x79f   : > { %v8380_v13 = vsel %vm8271_vm7, %v8243_v39, 0.0  ;;  %v8116_v22 = vadd.f32 %v7988_v23, %v7924_v37  ;;  %v7457_v20 = vmul.f32 %v21914_v56, %v22276_v57  ;;  %v7526_v52 = vmul.f32 %v21921_v32, %v22278_v45  ;;  %v6871_v23 = vld [vmem:[#allocation2 + $0xa8] sm:$0xff] }
 0x7a0   : > { %8381 = vadd.xlane.f32.xlu0 %v8380_v13  ;;  %v7595_v48 = vmul.f32 %v21928_v35, %v22324_v30  ;;  %v7664_v15 = vmul.f32 %v21935_v59, %v22326_v53  ;;  %v7733_v3 = vmul.f32 %v21942_v7, %v22328_v44  ;;  %v7797_v61 = vadd.f32 %v7250_v60, %v7181_v27 }
 0x7a1   : > { %v8180_v0 = vadd.f32 %v8116_v22, %v8052_v25  ;;  %v7861_v5 = vadd.f32 %v7388_v11, %v7319_v40  ;;  %v7925_v29 = vadd.f32 %v7526_v52, %v7457_v20  ;;  %v22349_v36 = vunpack.c.h.bf16 %v6870_v17 }
 0x7a2   : > { %v7989_v6 = vadd.f32 %v7664_v15, %v7595_v48  ;;  %v22351_v38 = vunpack.c.h.bf16 %v6966_v14  ;;  %v22353_v12 = vunpack.c.h.bf16 %v7062_v47  ;;  %v7182_v10 = vmul.f32 %v21885_v28, %v22249_v16  ;;  %v6967_v16 = vld [vmem:[#allocation3 + $0xa8] sm:$0xff] }
 0x7a3   : > { %v8244_v54 = vadd.f32 %v8180_v0, %v7732_v62  ;;  %v8053_v19 = vadd.f32 %v7861_v5, %v7797_v61  ;;  %v7251_v49 = vmul.f32 %v21892_v2, %v22251_v21  ;;  %v7320_v37 = vmul.f32 %v21899_v24, %v22253_v8  ;;  %v7063_v62 = vld [vmem:[#allocation4 + $0xa8] sm:$0xff] }
 0x7a4   : > { %v8117_v39 = vadd.f32 %v7989_v6, %v7925_v29  ;;  %v7389_v17 = vmul.f32 %v21906_v51, %v22299_v4  ;;  %v7458_v14 = vmul.f32 %v21914_v56, %v22301_v50  ;;  %v7527_v47 = vmul.f32 %v21921_v32, %v22303_v42 }
 0x7a5   : > { %v8383_v27 = vsel %vm8271_vm7, %v8244_v54, 0.0  ;;  %v7596_v21 = vmul.f32 %v21928_v35, %v22349_v36  ;;  %v7665_v8 = vmul.f32 %v21935_v59, %v22351_v38  ;;  %v7734_v25 = vmul.f32 %v21942_v7, %v22353_v12 }
 0x7a6   : > { %8384 = vadd.xlane.f32.xlu1 %v8383_v27  ;;  %v8181_v60 = vadd.f32 %v8117_v39, %v8053_v19  ;;  %v7798_v40 = vadd.f32 %v7251_v49, %v7182_v10  ;;  %v7862_v11 = vadd.f32 %v7389_v17, %v7320_v37  ;;  %v7926_v13 = vadd.f32 %v7527_v47, %v7458_v14 }
 0x7a7   : > { %v7990_v22 = vadd.f32 %v7665_v8, %v7596_v21  ;;  %v22374_v20 = vunpack.c.l.bf16 %v6871_v23  ;;  %v22376_v52 = vunpack.c.l.bf16 %v6967_v16  ;;  %v22378_v48 = vunpack.c.l.bf16 %v7063_v62 }
 0x7a8   : > { %v8245_v15 = vadd.f32 %v8181_v60, %v7733_v3  ;;  %v8054_v61 = vadd.f32 %v7862_v11, %v7798_v40  ;;  %v7183_v0 = vmul.f32 %v21885_v28, %v22274_v46  ;;  %v7252_v5 = vmul.f32 %v21892_v2, %v22276_v57 }
 0x7a9   : > { %v8118_v29 = vadd.f32 %v7990_v22, %v7926_v13  ;;  %v7321_v6 = vmul.f32 %v21899_v24, %v22278_v45  ;;  %v7390_v10 = vmul.f32 %v21906_v51, %v22324_v30  ;;  %v7459_v54 = vmul.f32 %v21914_v56, %v22326_v53 }
 0x7aa   : > { %v8386_v19 = vsel %vm8271_vm7, %v8245_v15, 0.0  ;;  %v7528_v3 = vmul.f32 %v21921_v32, %v22328_v44  ;;  %v7597_v46 = vmul.f32 %v21928_v35, %v22374_v20  ;;  %v7666_v57 = vmul.f32 %v21935_v59, %v22376_v52  ;;  %v6872_v15 = vld [vmem:[#allocation2 + $0xb0] sm:$0xff] }
 0x7ab   : > { %8387 = vadd.xlane.f32.xlu0 %v8386_v19  ;;  %v8182_v49 = vadd.f32 %v8118_v29, %v8054_v61  ;;  %v7735_v45 = vmul.f32 %v21942_v7, %v22378_v48  ;;  %v7799_v37 = vadd.f32 %v7252_v5, %v7183_v0  ;;  %v7863_v39 = vadd.f32 %v7390_v10, %v7321_v6 }
 0x7ac   : > { %v7927_v17 = vadd.f32 %v7528_v3, %v7459_v54  ;;  %v7991_v14 = vadd.f32 %v7666_v57, %v7597_v46  ;;  %v22399_v47 = vunpack.c.h.bf16 %v6871_v23  ;;  %v22401_v27 = vunpack.c.h.bf16 %v6967_v16  ;;  %v6968_v16 = vld [vmem:[#allocation3 + $0xb0] sm:$0xff] }
 0x7ad   : > { %v8246_v21 = vadd.f32 %v8182_v49, %v7734_v25  ;;  %v8055_v8 = vadd.f32 %v7863_v39, %v7799_v37  ;;  %v22403_v60 = vunpack.c.h.bf16 %v7063_v62  ;;  %v7184_v40 = vmul.f32 %v21885_v28, %v22299_v4 }
 0x7ae   : > { %v8119_v11 = vadd.f32 %v7991_v14, %v7927_v17  ;;  %v7253_v13 = vmul.f32 %v21892_v2, %v22301_v50  ;;  %v7322_v22 = vmul.f32 %v21899_v24, %v22303_v42  ;;  %v7391_v23 = vmul.f32 %v21906_v51, %v22349_v36  ;;  %v7064_v50 = vld [vmem:[#allocation4 + $0xb0] sm:$0xff] }
 0x7af   : > { %v8389_v25 = vsel %vm8271_vm7, %v8246_v21, 0.0  ;;  %v7460_v62 = vmul.f32 %v21914_v56, %v22351_v38  ;;  %v7529_v4 = vmul.f32 %v21921_v32, %v22353_v12  ;;  %v7598_v61 = vmul.f32 %v21928_v35, %v22399_v47 }
 0x7b0   : > { %8390 = vadd.xlane.f32.xlu1 %v8389_v25  ;;  %v8183_v0 = vadd.f32 %v8119_v11, %v8055_v8  ;;  %v7667_v42 = vmul.f32 %v21935_v59, %v22401_v27  ;;  %v7736_v5 = vmul.f32 %v21942_v7, %v22403_v60  ;;  %v7800_v29 = vadd.f32 %v7253_v13, %v7184_v40 }
 0x7b1   : > { %v7864_v6 = vadd.f32 %v7391_v23, %v7322_v22  ;;  %v7928_v10 = vadd.f32 %v7529_v4, %v7460_v62  ;;  %v22424_v54 = vunpack.c.l.bf16 %v6872_v15  ;;  %v22426_v19 = vunpack.c.l.bf16 %v6968_v16 }
 0x7b2   : > { %v8247_v3 = vadd.f32 %v8183_v0, %v7735_v45  ;;  %v7992_v46 = vadd.f32 %v7667_v42, %v7598_v61  ;;  %v22428_v57 = vunpack.c.l.bf16 %v7064_v50  ;;  %v7185_v49 = vmul.f32 %v21885_v28, %v22324_v30 }
 0x7b3   : > { %v8056_v37 = vadd.f32 %v7864_v6, %v7800_v29  ;;  %v7254_v39 = vmul.f32 %v21892_v2, %v22326_v53  ;;  %v7323_v17 = vmul.f32 %v21899_v24, %v22328_v44  ;;  %v7392_v14 = vmul.f32 %v21906_v51, %v22374_v20 }
 0x7b4   : > { %v8392_v21 = vsel %vm8271_vm7, %v8247_v3, 0.0  ;;  %v8120_v8 = vadd.f32 %v7992_v46, %v7928_v10  ;;  %v7461_v45 = vmul.f32 %v21914_v56, %v22376_v52  ;;  %v7530_v40 = vmul.f32 %v21921_v32, %v22378_v48  ;;  %v6873_v46 = vld [vmem:[#allocation2 + $0xb8] sm:$0xff] }
 0x7b5   : > { %8393 = vadd.xlane.f32.xlu0 %v8392_v21  ;;  %v7599_v30 = vmul.f32 %v21928_v35, %v22424_v54  ;;  %v7668_v53 = vmul.f32 %v21935_v59, %v22426_v19  ;;  %v7737_v44 = vmul.f32 %v21942_v7, %v22428_v57  ;;  %v7801_v11 = vadd.f32 %v7254_v39, %v7185_v49  ;;  %v22490_v21 = vld [vmem:[%s24270_s3 + $0x1] ss:$0 sm:$0xff] }
 0x7b6   : > { %v8184_v13 = vadd.f32 %v8120_v8, %v8056_v37  ;;  %v7865_v22 = vadd.f32 %v7392_v14, %v7323_v17  ;;  %v7929_v23 = vadd.f32 %v7530_v40, %v7461_v45  ;;  %v22449_v25 = vunpack.c.h.bf16 %v6872_v15  ;;  %v22497_v40 = vld [vmem:[%s24270_s3 + $0x2] ss:$0 sm:$0xff] }
 0x7b7   : > { %v7993_v62 = vadd.f32 %v7668_v53, %v7599_v30  ;;  %v22451_v4 = vunpack.c.h.bf16 %v6968_v16  ;;  %v22453_v61 = vunpack.c.h.bf16 %v7064_v50  ;;  %v7186_v0 = vmul.f32 %v21885_v28, %v22349_v36  ;;  %v6969_v28 = vld [vmem:[#allocation3 + $0xb8] sm:$0xff] }
 0x7b8   : > { %v8248_v42 = vadd.f32 %v8184_v13, %v7736_v5  ;;  %v8057_v29 = vadd.f32 %v7865_v22, %v7801_v11  ;;  %v7255_v6 = vmul.f32 %v21892_v2, %v22351_v38  ;;  %v7324_v10 = vmul.f32 %v21899_v24, %v22353_v12  ;;  %v7065_v36 = vld [vmem:[#allocation4 + $0xb8] sm:$0xff]  ;;  %v22526_v22 = vld [vmem:[%s24270_s3 + $0x6] ss:$0 sm:$0xff] }
 0x7b9   : > { %v8121_v3 = vadd.f32 %v7993_v62, %v7929_v23  ;;  %v7393_v15 = vmul.f32 %v21906_v51, %v22399_v47  ;;  %v7462_v16 = vmul.f32 %v21914_v56, %v22401_v27  ;;  %v7531_v50 = vmul.f32 %v21921_v32, %v22403_v60  ;;  %v22533_v62 = vld [vmem:[%s24270_s3 + $0x7] ss:$0 sm:$0xff] }
 0x7ba   : > { %v8395_v5 = vsel %vm8271_vm7, %v8248_v42, 0.0  ;;  %v7600_v2 = vmul.f32 %v21928_v35, %v22449_v25  ;;  %v7669_v24 = vmul.f32 %v21935_v59, %v22451_v4  ;;  %v7738_v51 = vmul.f32 %v21942_v7, %v22453_v61  ;;  %v22483_v59 = vld [vmem:[%s24270_s3] ss:$0 sm:$0xff] }
 0x7bb   : > { %8396 = vadd.xlane.f32.xlu1 %v8395_v5  ;;  %v8185_v38 = vadd.f32 %v8121_v3, %v8057_v29  ;;  %v7802_v56 = vadd.f32 %v7255_v6, %v7186_v0  ;;  %v7866_v12 = vadd.f32 %v7393_v15, %v7324_v10  ;;  %v7930_v49 = vadd.f32 %v7531_v50, %v7462_v16  ;;  %v22540_v29 = vld [vmem:[%s24270_s3 + $0x8] ss:$0 sm:$0xff] }
 0x7bc   : > { %v7994_v32 = vadd.f32 %v7669_v24, %v7600_v2  ;;  %v22474_v37 = vunpack.c.l.bf16 %v6873_v46  ;;  %v22476_v39 = vunpack.c.l.bf16 %v6969_v28  ;;  %v22478_v17 = vunpack.c.l.bf16 %v7065_v36 }
 0x7bd   : > { %v8249_v14 = vadd.f32 %v8185_v38, %v7737_v44  ;;  %v8058_v35 = vadd.f32 %v7866_v12, %v7802_v56  ;;  %v7187_v7 = vmul.f32 %v22483_v59, %v22374_v20  ;;  %v7256_v8 = vmul.f32 %v22490_v21, %v22376_v52  ;;  %v22504_v20 = vld [vmem:[%s24270_s3 + $0x3] ss:$0 sm:$0xff]  ;;  %v22511_v52 = vld [vmem:[%s24270_s3 + $0x4] ss:$0 sm:$0xff] }
 0x7be   : > { %v8122_v45 = vadd.f32 %v7994_v32, %v7930_v49  ;;  %v7325_v30 = vmul.f32 %v22497_v40, %v22378_v48  ;;  %v7394_v53 = vmul.f32 %v22504_v20, %v22424_v54  ;;  %v7463_v44 = vmul.f32 %v22511_v52, %v22426_v19  ;;  %v22519_v48 = vld [vmem:[%s24270_s3 + $0x5] ss:$0 sm:$0xff] }
 0x7bf   : > { %v8398_v11 = vsel %vm8271_vm7, %v8249_v14, 0.0  ;;  %v7532_v13 = vmul.f32 %v22519_v48, %v22428_v57  ;;  %v7601_v23 = vmul.f32 %v22526_v22, %v22474_v37  ;;  %v7670_v0 = vmul.f32 %v22533_v62, %v22476_v39  ;;  %v6874_v14 = vld [vmem:[#allocation2 + $0xc0] sm:$0xff] }
 0x7c0   : > { %8399 = vadd.xlane.f32.xlu0 %v8398_v11  ;;  %v8186_v42 = vadd.f32 %v8122_v45, %v8058_v35  ;;  %v7739_v6 = vmul.f32 %v22540_v29, %v22478_v17  ;;  %v7803_v10 = vadd.f32 %v7256_v8, %v7187_v7  ;;  %v7867_v3 = vadd.f32 %v7394_v53, %v7325_v30 }
 0x7c1   : > { %v7931_v15 = vadd.f32 %v7532_v13, %v7463_v44  ;;  %v7995_v16 = vadd.f32 %v7670_v0, %v7601_v23  ;;  %v22544_v50 = vunpack.c.h.bf16 %v6873_v46  ;;  %v22546_v5 = vunpack.c.h.bf16 %v6969_v28  ;;  %v6970_v28 = vld [vmem:[#allocation3 + $0xc0] sm:$0xff] }
 0x7c2   : > { %v8250_v2 = vadd.f32 %v8186_v42, %v7738_v51  ;;  %v8059_v24 = vadd.f32 %v7867_v3, %v7803_v10  ;;  %v22548_v38 = vunpack.c.h.bf16 %v7065_v36  ;;  %v7188_v56 = vmul.f32 %v22483_v59, %v22399_v47 }
 0x7c3   : > { %v8123_v12 = vadd.f32 %v7995_v16, %v7931_v15  ;;  %v7257_v49 = vmul.f32 %v22490_v21, %v22401_v27  ;;  %v7326_v32 = vmul.f32 %v22497_v40, %v22403_v60  ;;  %v7395_v46 = vmul.f32 %v22504_v20, %v22449_v25  ;;  %v7066_v27 = vld [vmem:[#allocation4 + $0xc0] sm:$0xff] }
 0x7c4   : > { %v8401_v51 = vsel %vm8271_vm7, %v8250_v2, 0.0  ;;  %v7464_v36 = vmul.f32 %v22511_v52, %v22451_v4  ;;  %v7533_v47 = vmul.f32 %v22519_v48, %v22453_v61  ;;  %v7602_v35 = vmul.f32 %v22526_v22, %v22544_v50 }
 0x7c5   : > { %8402 = vadd.xlane.f32.xlu1 %v8401_v51  ;;  %v8187_v7 = vadd.f32 %v8123_v12, %v8059_v24  ;;  %v7671_v60 = vmul.f32 %v22533_v62, %v22546_v5  ;;  %v7740_v8 = vmul.f32 %v22540_v29, %v22548_v38  ;;  %v7804_v45 = vadd.f32 %v7257_v49, %v7188_v56 }
 0x7c6   : > { %v7868_v30 = vadd.f32 %v7395_v46, %v7326_v32  ;;  %v7932_v53 = vadd.f32 %v7533_v47, %v7464_v36  ;;  %v22569_v44 = vunpack.c.l.bf16 %v6874_v14  ;;  %v22571_v11 = vunpack.c.l.bf16 %v6970_v28 }
 0x7c7   : > { %v8251_v13 = vadd.f32 %v8187_v7, %v7739_v6  ;;  %v7996_v23 = vadd.f32 %v7671_v60, %v7602_v35  ;;  %v22573_v0 = vunpack.c.l.bf16 %v7066_v27  ;;  %v7189_v42 = vmul.f32 %v22483_v59, %v22424_v54 }
 0x7c8   : > { %v8060_v10 = vadd.f32 %v7868_v30, %v7804_v45  ;;  %v7258_v3 = vmul.f32 %v22490_v21, %v22426_v19  ;;  %v7327_v15 = vmul.f32 %v22497_v40, %v22428_v57  ;;  %v7396_v16 = vmul.f32 %v22504_v20, %v22474_v37 }
 0x7c9   : > { %v8404_v2 = vsel %vm8271_vm7, %v8251_v13, 0.0  ;;  %v8124_v24 = vadd.f32 %v7996_v23, %v7932_v53  ;;  %v7465_v6 = vmul.f32 %v22511_v52, %v22476_v39  ;;  %v7534_v56 = vmul.f32 %v22519_v48, %v22478_v17  ;;  %v6875_v23 = vld [vmem:[#allocation2 + $0xc8] sm:$0xff] }
 0x7ca   : > { %8405 = vadd.xlane.f32.xlu0 %v8404_v2  ;;  %v7603_v54 = vmul.f32 %v22526_v22, %v22569_v44  ;;  %v7672_v19 = vmul.f32 %v22533_v62, %v22571_v11  ;;  %v7741_v57 = vmul.f32 %v22540_v29, %v22573_v0  ;;  %v7805_v12 = vadd.f32 %v7258_v3, %v7189_v42 }
 0x7cb   : > { %v8188_v49 = vadd.f32 %v8124_v24, %v8060_v10  ;;  %v7869_v32 = vadd.f32 %v7396_v16, %v7327_v15  ;;  %v7933_v46 = vadd.f32 %v7534_v56, %v7465_v6  ;;  %v22594_v51 = vunpack.c.h.bf16 %v6874_v14 }
 0x7cc   : > { %v7997_v36 = vadd.f32 %v7672_v19, %v7603_v54  ;;  %v22596_v47 = vunpack.c.h.bf16 %v6970_v28  ;;  %v22598_v35 = vunpack.c.h.bf16 %v7066_v27  ;;  %v7190_v7 = vmul.f32 %v22483_v59, %v22449_v25  ;;  %v6971_v25 = vld [vmem:[#allocation3 + $0xc8] sm:$0xff] }
 0x7cd   : > { %v8252_v60 = vadd.f32 %v8188_v49, %v7740_v8  ;;  %v8061_v45 = vadd.f32 %v7869_v32, %v7805_v12  ;;  %v7259_v30 = vmul.f32 %v22490_v21, %v22451_v4  ;;  %v7328_v53 = vmul.f32 %v22497_v40, %v22453_v61  ;;  %v7067_v8 = vld [vmem:[#allocation4 + $0xc8] sm:$0xff] }
 0x7ce   : > { %v8125_v13 = vadd.f32 %v7997_v36, %v7933_v46  ;;  %v7397_v14 = vmul.f32 %v22504_v20, %v22544_v50  ;;  %v7466_v28 = vmul.f32 %v22511_v52, %v22546_v5  ;;  %v7535_v27 = vmul.f32 %v22519_v48, %v22548_v38 }
 0x7cf   : > { %v8407_v42 = vsel %vm8271_vm7, %v8252_v60, 0.0  ;;  %v7604_v4 = vmul.f32 %v22526_v22, %v22594_v51  ;;  %v7673_v61 = vmul.f32 %v22533_v62, %v22596_v47  ;;  %v7742_v10 = vmul.f32 %v22540_v29, %v22598_v35 }
 0x7d0   : > { %8408 = vadd.xlane.f32.xlu1 %v8407_v42  ;;  %v8189_v3 = vadd.f32 %v8125_v13, %v8061_v45  ;;  %v7806_v15 = vadd.f32 %v7259_v30, %v7190_v7  ;;  %v7870_v16 = vadd.f32 %v7397_v14, %v7328_v53  ;;  %v7934_v2 = vadd.f32 %v7535_v27, %v7466_v28 }
 0x7d1   : > { %v7998_v24 = vadd.f32 %v7673_v61, %v7604_v4  ;;  %v22619_v6 = vunpack.c.l.bf16 %v6875_v23  ;;  %v22621_v56 = vunpack.c.l.bf16 %v6971_v25  ;;  %v22623_v54 = vunpack.c.l.bf16 %v7067_v8 }
 0x7d2   : > { %v8253_v19 = vadd.f32 %v8189_v3, %v7741_v57  ;;  %v8062_v12 = vadd.f32 %v7870_v16, %v7806_v15  ;;  %v7191_v49 = vmul.f32 %v22483_v59, %v22474_v37  ;;  %v7260_v32 = vmul.f32 %v22490_v21, %v22476_v39 }
 0x7d3   : > { %v8126_v46 = vadd.f32 %v7998_v24, %v7934_v2  ;;  %v7329_v36 = vmul.f32 %v22497_v40, %v22478_v17  ;;  %v7398_v7 = vmul.f32 %v22504_v20, %v22569_v44  ;;  %v7467_v60 = vmul.f32 %v22511_v52, %v22571_v11 }
 0x7d4   : > { %v8410_v45 = vsel %vm8271_vm7, %v8253_v19, 0.0  ;;  %v7536_v57 = vmul.f32 %v22519_v48, %v22573_v0  ;;  %v7605_v37 = vmul.f32 %v22526_v22, %v22619_v6  ;;  %v7674_v39 = vmul.f32 %v22533_v62, %v22621_v56  ;;  %v6876_v19 = vld [vmem:[#allocation2 + $0xd0] sm:$0xff] }
 0x7d5   : > { %8411 = vadd.xlane.f32.xlu0 %v8410_v45  ;;  %v8190_v30 = vadd.f32 %v8126_v46, %v8062_v12  ;;  %v7743_v17 = vmul.f32 %v22540_v29, %v22623_v54  ;;  %v7807_v53 = vadd.f32 %v7260_v32, %v7191_v49  ;;  %v7871_v13 = vadd.f32 %v7398_v7, %v7329_v36 }
 0x7d6   : > { %v7935_v14 = vadd.f32 %v7536_v57, %v7467_v60  ;;  %v7999_v28 = vadd.f32 %v7674_v39, %v7605_v37  ;;  %v22644_v27 = vunpack.c.h.bf16 %v6875_v23  ;;  %v22646_v42 = vunpack.c.h.bf16 %v6971_v25  ;;  %v6972_v25 = vld [vmem:[#allocation3 + $0xd0] sm:$0xff] }
 0x7d7   : > { %v8254_v4 = vadd.f32 %v8190_v30, %v7742_v10  ;;  %v8063_v61 = vadd.f32 %v7871_v13, %v7807_v53  ;;  %v22648_v3 = vunpack.c.h.bf16 %v7067_v8  ;;  %v7192_v15 = vmul.f32 %v22483_v59, %v22544_v50 }
 0x7d8   : > { %v8127_v16 = vadd.f32 %v7999_v28, %v7935_v14  ;;  %v7261_v2 = vmul.f32 %v22490_v21, %v22546_v5  ;;  %v7330_v24 = vmul.f32 %v22497_v40, %v22548_v38  ;;  %v7399_v23 = vmul.f32 %v22504_v20, %v22594_v51  ;;  %v7068_v5 = vld [vmem:[#allocation4 + $0xd0] sm:$0xff] }
 0x7d9   : > { %v8413_v10 = vsel %vm8271_vm7, %v8254_v4, 0.0  ;;  %v7468_v8 = vmul.f32 %v22511_v52, %v22596_v47  ;;  %v7537_v50 = vmul.f32 %v22519_v48, %v22598_v35  ;;  %v7606_v12 = vmul.f32 %v22526_v22, %v22644_v27 }
 0x7da   : > { %8414 = vadd.xlane.f32.xlu1 %v8413_v10  ;;  %v8191_v49 = vadd.f32 %v8127_v16, %v8063_v61  ;;  %v7675_v38 = vmul.f32 %v22533_v62, %v22646_v42  ;;  %v7744_v32 = vmul.f32 %v22540_v29, %v22648_v3  ;;  %v7808_v46 = vadd.f32 %v7261_v2, %v7192_v15 }
 0x7db   : > { %v7872_v36 = vadd.f32 %v7399_v23, %v7330_v24  ;;  %v7936_v7 = vadd.f32 %v7537_v50, %v7468_v8  ;;  %v22669_v60 = vunpack.c.l.bf16 %v6876_v19  ;;  %v22671_v45 = vunpack.c.l.bf16 %v6972_v25 }
 0x7dc   : > { %v8255_v57 = vadd.f32 %v8191_v49, %v7743_v17  ;;  %v8000_v37 = vadd.f32 %v7675_v38, %v7606_v12  ;;  %v22673_v39 = vunpack.c.l.bf16 %v7068_v5  ;;  %v7193_v30 = vmul.f32 %v22483_v59, %v22569_v44 }
 0x7dd   : > { %v8064_v53 = vadd.f32 %v7872_v36, %v7808_v46  ;;  %v7262_v13 = vmul.f32 %v22490_v21, %v22571_v11  ;;  %v7331_v14 = vmul.f32 %v22497_v40, %v22573_v0  ;;  %v7400_v28 = vmul.f32 %v22504_v20, %v22619_v6 }
 0x7de   : > { %v8416_v4 = vsel %vm8271_vm7, %v8255_v57, 0.0  ;;  %v8128_v61 = vadd.f32 %v8000_v37, %v7936_v7  ;;  %v7469_v17 = vmul.f32 %v22511_v52, %v22621_v56  ;;  %v7538_v15 = vmul.f32 %v22519_v48, %v22623_v54  ;;  %v6877_v37 = vld [vmem:[#allocation2 + $0xd8] sm:$0xff] }
 0x7df   : > { %8417 = vadd.xlane.f32.xlu0 %v8416_v4  ;;  %v7607_v44 = vmul.f32 %v22526_v22, %v22669_v60  ;;  %v7676_v11 = vmul.f32 %v22533_v62, %v22671_v45  ;;  %v7745_v0 = vmul.f32 %v22540_v29, %v22673_v39  ;;  %v7809_v16 = vadd.f32 %v7262_v13, %v7193_v30 }
 0x7e0   : > { %v8192_v2 = vadd.f32 %v8128_v61, %v8064_v53  ;;  %v7873_v24 = vadd.f32 %v7400_v28, %v7331_v14  ;;  %v7937_v23 = vadd.f32 %v7538_v15, %v7469_v17  ;;  %v22694_v10 = vunpack.c.h.bf16 %v6876_v19 }
 0x7e1   : > { %v8001_v8 = vadd.f32 %v7676_v11, %v7607_v44  ;;  %v22696_v50 = vunpack.c.h.bf16 %v6972_v25  ;;  %v22698_v12 = vunpack.c.h.bf16 %v7068_v5  ;;  %v7194_v49 = vmul.f32 %v22483_v59, %v22594_v51  ;;  %v6973_v51 = vld [vmem:[#allocation3 + $0xd8] sm:$0xff] }
 0x7e2   : > { %v8256_v38 = vadd.f32 %v8192_v2, %v7744_v32  ;;  %v8065_v46 = vadd.f32 %v7873_v24, %v7809_v16  ;;  %v7263_v36 = vmul.f32 %v22490_v21, %v22596_v47  ;;  %v7332_v7 = vmul.f32 %v22497_v40, %v22598_v35  ;;  %v7069_v32 = vld [vmem:[#allocation4 + $0xd8] sm:$0xff] }
 0x7e3   : > { %v8129_v57 = vadd.f32 %v8001_v8, %v7937_v23  ;;  %v7401_v19 = vmul.f32 %v22504_v20, %v22644_v27  ;;  %v7470_v25 = vmul.f32 %v22511_v52, %v22646_v42  ;;  %v7539_v5 = vmul.f32 %v22519_v48, %v22648_v3 }
 0x7e4   : > { %v8419_v30 = vsel %vm8271_vm7, %v8256_v38, 0.0  ;;  %v7608_v47 = vmul.f32 %v22526_v22, %v22694_v10  ;;  %v7677_v35 = vmul.f32 %v22533_v62, %v22696_v50  ;;  %v7746_v53 = vmul.f32 %v22540_v29, %v22698_v12 }
 0x7e5   : > { %8420 = vadd.xlane.f32.xlu1 %v8419_v30  ;;  %v8193_v13 = vadd.f32 %v8129_v57, %v8065_v46  ;;  %v7810_v14 = vadd.f32 %v7263_v36, %v7194_v49  ;;  %v7874_v28 = vadd.f32 %v7401_v19, %v7332_v7  ;;  %v7938_v4 = vadd.f32 %v7539_v5, %v7470_v25 }
 0x7e6   : > { %v8002_v61 = vadd.f32 %v7677_v35, %v7608_v47  ;;  %v22719_v17 = vunpack.c.l.bf16 %v6877_v37  ;;  %v22721_v15 = vunpack.c.l.bf16 %v6973_v51  ;;  %v22723_v44 = vunpack.c.l.bf16 %v7069_v32 }
 0x7e7   : > { %v8257_v11 = vadd.f32 %v8193_v13, %v7745_v0  ;;  %v8066_v16 = vadd.f32 %v7874_v28, %v7810_v14  ;;  %v7195_v2 = vmul.f32 %v22483_v59, %v22619_v6  ;;  %v7264_v24 = vmul.f32 %v22490_v21, %v22621_v56 }
 0x7e8   : > { %v8130_v23 = vadd.f32 %v8002_v61, %v7938_v4  ;;  %v7333_v8 = vmul.f32 %v22497_v40, %v22623_v54  ;;  %v7402_v49 = vmul.f32 %v22504_v20, %v22669_v60  ;;  %v7471_v38 = vmul.f32 %v22511_v52, %v22671_v45 }
 0x7e9   : > { %v8422_v46 = vsel %vm8271_vm7, %v8257_v11, 0.0  ;;  %v7540_v0 = vmul.f32 %v22519_v48, %v22673_v39  ;;  %v7609_v6 = vmul.f32 %v22526_v22, %v22719_v17  ;;  %v7678_v56 = vmul.f32 %v22533_v62, %v22721_v15  ;;  %v6878_v11 = vld [vmem:[#allocation2 + $0xe0] sm:$0xff] }
 0x7ea   : > { %8423 = vadd.xlane.f32.xlu0 %v8422_v46  ;;  %v8194_v36 = vadd.f32 %v8130_v23, %v8066_v16  ;;  %v7747_v54 = vmul.f32 %v22540_v29, %v22723_v44  ;;  %v7811_v7 = vadd.f32 %v7264_v24, %v7195_v2  ;;  %v7875_v57 = vadd.f32 %v7402_v49, %v7333_v8 }
 0x7eb   : > { %v7939_v19 = vadd.f32 %v7540_v0, %v7471_v38  ;;  %v8003_v25 = vadd.f32 %v7678_v56, %v7609_v6  ;;  %v22744_v5 = vunpack.c.h.bf16 %v6877_v37  ;;  %v22746_v30 = vunpack.c.h.bf16 %v6973_v51  ;;  %v6974_v51 = vld [vmem:[#allocation3 + $0xe0] sm:$0xff] }
 0x7ec   : > { %v8258_v47 = vadd.f32 %v8194_v36, %v7746_v53  ;;  %v8067_v35 = vadd.f32 %v7875_v57, %v7811_v7  ;;  %v22748_v13 = vunpack.c.h.bf16 %v7069_v32  ;;  %v7196_v14 = vmul.f32 %v22483_v59, %v22644_v27 }
 0x7ed   : > { %v8131_v28 = vadd.f32 %v8003_v25, %v7939_v19  ;;  %v7265_v4 = vmul.f32 %v22490_v21, %v22646_v42  ;;  %v7334_v61 = vmul.f32 %v22497_v40, %v22648_v3  ;;  %v7403_v37 = vmul.f32 %v22504_v20, %v22694_v10  ;;  %v7070_v42 = vld [vmem:[#allocation4 + $0xe0] sm:$0xff] }
 0x7ee   : > { %v8425_v53 = vsel %vm8271_vm7, %v8258_v47, 0.0  ;;  %v7472_v32 = vmul.f32 %v22511_v52, %v22696_v50  ;;  %v7541_v27 = vmul.f32 %v22519_v48, %v22698_v12  ;;  %v7610_v16 = vmul.f32 %v22526_v22, %v22744_v5 }
 0x7ef   : > { %8426 = vadd.xlane.f32.xlu1 %v8425_v53  ;;  %v8195_v2 = vadd.f32 %v8131_v28, %v8067_v35  ;;  %v7679_v3 = vmul.f32 %v22533_v62, %v22746_v30  ;;  %v7748_v24 = vmul.f32 %v22540_v29, %v22748_v13  ;;  %v7812_v23 = vadd.f32 %v7265_v4, %v7196_v14 }
 0x7f0   : > { %v7876_v8 = vadd.f32 %v7403_v37, %v7334_v61  ;;  %v7940_v49 = vadd.f32 %v7541_v27, %v7472_v32  ;;  %v22769_v38 = vunpack.c.l.bf16 %v6878_v11  ;;  %v22771_v46 = vunpack.c.l.bf16 %v6974_v51 }
 0x7f1   : > { %v8259_v0 = vadd.f32 %v8195_v2, %v7747_v54  ;;  %v8004_v6 = vadd.f32 %v7679_v3, %v7610_v16  ;;  %v22773_v56 = vunpack.c.l.bf16 %v7070_v42  ;;  %v7197_v36 = vmul.f32 %v22483_v59, %v22669_v60 }
 0x7f2   : > { %v8068_v7 = vadd.f32 %v7876_v8, %v7812_v23  ;;  %v7266_v57 = vmul.f32 %v22490_v21, %v22671_v45  ;;  %v7335_v19 = vmul.f32 %v22497_v40, %v22673_v39  ;;  %v7404_v25 = vmul.f32 %v22504_v20, %v22719_v17 }
 0x7f3   : > { %v8428_v47 = vsel %vm8271_vm7, %v8259_v0, 0.0  ;;  %v8132_v35 = vadd.f32 %v8004_v6, %v7940_v49  ;;  %v7473_v54 = vmul.f32 %v22511_v52, %v22721_v15  ;;  %v7542_v14 = vmul.f32 %v22519_v48, %v22723_v44  ;;  %v6879_v6 = vld [vmem:[#allocation2 + $0xe8] sm:$0xff] }
 0x7f4   : > { %8429 = vadd.xlane.f32.xlu0 %v8428_v47  ;;  %v7611_v60 = vmul.f32 %v22526_v22, %v22769_v38  ;;  %v7680_v45 = vmul.f32 %v22533_v62, %v22771_v46  ;;  %v7749_v39 = vmul.f32 %v22540_v29, %v22773_v56  ;;  %v7813_v28 = vadd.f32 %v7266_v57, %v7197_v36 }
 0x7f5   : > { %v8196_v4 = vadd.f32 %v8132_v35, %v8068_v7  ;;  %v7877_v61 = vadd.f32 %v7404_v25, %v7335_v19  ;;  %v7941_v37 = vadd.f32 %v7542_v14, %v7473_v54  ;;  %v22794_v53 = vunpack.c.h.bf16 %v6878_v11 }
 0x7f6   : > { %v8005_v32 = vadd.f32 %v7680_v45, %v7611_v60  ;;  %v22796_v27 = vunpack.c.h.bf16 %v6974_v51  ;;  %v22798_v16 = vunpack.c.h.bf16 %v7070_v42  ;;  %v7198_v2 = vmul.f32 %v22483_v59, %v22694_v10  ;;  %v6975_v10 = vld [vmem:[#allocation3 + $0xe8] sm:$0xff] }
 0x7f7   : > { %v8260_v3 = vadd.f32 %v8196_v4, %v7748_v24  ;;  %v8069_v23 = vadd.f32 %v7877_v61, %v7813_v28  ;;  %v7267_v8 = vmul.f32 %v22490_v21, %v22696_v50  ;;  %v7336_v49 = vmul.f32 %v22497_v40, %v22698_v12  ;;  %v7071_v24 = vld [vmem:[#allocation4 + $0xe8] sm:$0xff] }
 0x7f8   : > { %v8133_v0 = vadd.f32 %v8005_v32, %v7941_v37  ;;  %v7405_v11 = vmul.f32 %v22504_v20, %v22744_v5  ;;  %v7474_v51 = vmul.f32 %v22511_v52, %v22746_v30  ;;  %v7543_v42 = vmul.f32 %v22519_v48, %v22748_v13 }
 0x7f9   : > { %v8431_v36 = vsel %vm8271_vm7, %v8260_v3, 0.0  ;;  %v7612_v50 = vmul.f32 %v22526_v22, %v22794_v53  ;;  %v7681_v12 = vmul.f32 %v22533_v62, %v22796_v27  ;;  %v7750_v7 = vmul.f32 %v22540_v29, %v22798_v16 }
 0x7fa   : > { %8432 = vadd.xlane.f32.xlu1 %v8431_v36  ;;  %v8197_v57 = vadd.f32 %v8133_v0, %v8069_v23  ;;  %v7814_v19 = vadd.f32 %v7267_v8, %v7198_v2  ;;  %v7878_v25 = vadd.f32 %v7405_v11, %v7336_v49  ;;  %v7942_v47 = vadd.f32 %v7543_v42, %v7474_v51  ;;  %v22842_v8 = vpop.xlane.xlu1 %8279 }
 0x7fb   : > { %v8006_v35 = vadd.f32 %v7681_v12, %v7612_v50  ;;  %v22819_v54 = vunpack.c.l.bf16 %v6879_v6  ;;  %v22821_v14 = vunpack.c.l.bf16 %v6975_v10  ;;  %v22823_v60 = vunpack.c.l.bf16 %v7071_v24  ;;  %v22850_v12 = vpop.xlane.xlu0 %8273 }
 0x7fc   : > { %v8261_v45 = vadd.f32 %v8197_v57, %v7749_v39  ;;  %v8070_v28 = vadd.f32 %v7878_v25, %v7814_v19  ;;  %v7199_v4 = vmul.f32 %v22483_v59, %v22719_v17  ;;  %v7268_v61 = vmul.f32 %v22490_v21, %v22721_v15 }
 0x7fd   : > { %v8134_v37 = vadd.f32 %v8006_v35, %v7942_v47  ;;  %v7337_v32 = vmul.f32 %v22497_v40, %v22723_v44  ;;  %v7406_v2 = vmul.f32 %v22504_v20, %v22769_v38  ;;  %v7475_v3 = vmul.f32 %v22511_v52, %v22771_v46 }
 0x7fe   : > { %v8434_v23 = vsel %vm8271_vm7, %v8261_v45, 0.0  ;;  %v7544_v39 = vmul.f32 %v22519_v48, %v22773_v56  ;;  %v7613_v17 = vmul.f32 %v22526_v22, %v22819_v54  ;;  %v7682_v15 = vmul.f32 %v22533_v62, %v22821_v14 }
 0x7ff   : > { %8435 = vadd.xlane.f32.xlu0 %v8434_v23  ;;  %v8198_v44 = vadd.f32 %v8134_v37, %v8070_v28  ;;  %v7751_v49 = vmul.f32 %v22540_v29, %v22823_v60  ;;  %v7815_v0 = vadd.f32 %v7268_v61, %v7199_v4  ;;  %v7879_v11 = vadd.f32 %v7406_v2, %v7337_v32  ;;  %v6976_v4 = vld [vmem:[#allocation3 + $0xf0] sm:$0xff] }
 0x800   : > { %v7943_v51 = vadd.f32 %v7544_v39, %v7475_v3  ;;  %v8007_v42 = vadd.f32 %v7682_v15, %v7613_v17  ;;  %v22846_v36 = vunpack.c.h.bf16 %v6879_v6  ;;  %v22848_v50 = vunpack.c.h.bf16 %v6975_v10  ;;  %v6880_v10 = vld [vmem:[#allocation2 + $0xf0] sm:$0xff]  ;;  %v22873_v3 = vpop.xlane.xlu1 %8282 }
 0x801   : > { %v8262_v57 = vadd.f32 %v8198_v44, %v7750_v7  ;;  %v8071_v19 = vadd.f32 %v7879_v11, %v7815_v0  ;;  %v22852_v25 = vunpack.c.h.bf16 %v7071_v24  ;;  %v7200_v47 = vmul.f32 %v22483_v59, %v22744_v5 }
 0x802   : > { %v8135_v35 = vadd.f32 %v8007_v42, %v7943_v51  ;;  %v7269_v45 = vmul.f32 %v22490_v21, %v22746_v30  ;;  %v7338_v28 = vmul.f32 %v22497_v40, %v22748_v13  ;;  %v7407_v6 = vmul.f32 %v22504_v20, %v22794_v53  ;;  %v7072_v30 = vld [vmem:[#allocation4 + $0xf0] sm:$0xff]  ;;  %v22883_v42 = vpop.xlane.xlu0 %8276 }
 0x803   : > { %v8437_v7 = vsel %vm8271_vm7, %v8262_v57, 0.0  ;;  %v7476_v24 = vmul.f32 %v22511_v52, %v22796_v27  ;;  %v7545_v5 = vmul.f32 %v22519_v48, %v22798_v16  ;;  %v7614_v61 = vmul.f32 %v22526_v22, %v22846_v36 }
 0x804   : > { %8438 = vadd.xlane.f32.xlu1 %v8437_v7  ;;  %v8199_v37 = vadd.f32 %v8135_v35, %v8071_v19  ;;  %v7683_v13 = vmul.f32 %v22533_v62, %v22848_v50  ;;  %v7752_v32 = vmul.f32 %v22540_v29, %v22852_v25  ;;  %v7816_v2 = vadd.f32 %v7269_v45, %v7200_v47 }
 0x805   : > { %v7880_v23 = vadd.f32 %v7407_v6, %v7338_v28  ;;  %v7944_v39 = vadd.f32 %v7545_v5, %v7476_v24  ;;  %v22875_v17 = vunpack.c.l.bf16 %v6880_v10  ;;  %v22877_v15 = vunpack.c.l.bf16 %v6976_v4 }
 0x806   : > { %v8263_v44 = vadd.f32 %v8199_v37, %v7751_v49  ;;  %v8008_v0 = vadd.f32 %v7683_v13, %v7614_v61  ;;  %v22879_v11 = vunpack.c.l.bf16 %v7072_v30  ;;  %v7201_v51 = vmul.f32 %v22483_v59, %v22769_v38  ;;  %v22904_v13 = vpop.xlane.xlu1 %8288 }
 0x807   : > { %v8072_v57 = vadd.f32 %v7880_v23, %v7816_v2  ;;  %v7270_v19 = vmul.f32 %v22490_v21, %v22771_v46  ;;  %v7339_v47 = vmul.f32 %v22497_v40, %v22773_v56  ;;  %v7408_v35 = vmul.f32 %v22504_v20, %v22819_v54 }
 0x808   : > { %v8440_v49 = vsel %vm8271_vm7, %v8263_v44, 0.0  ;;  %v8136_v45 = vadd.f32 %v8008_v0, %v7944_v39  ;;  %v7477_v28 = vmul.f32 %v22511_v52, %v22821_v14  ;;  %v7546_v38 = vmul.f32 %v22519_v48, %v22823_v60 }
 0x809   : > { %8441 = vadd.xlane.f32.xlu0 %v8440_v49  ;;  %v7615_v6 = vmul.f32 %v22526_v22, %v22875_v17  ;;  %v7684_v46 = vmul.f32 %v22533_v62, %v22877_v15  ;;  %v7753_v56 = vmul.f32 %v22540_v29, %v22879_v11  ;;  %v7817_v7 = vadd.f32 %v7270_v19, %v7201_v51 }
 0x80a   : > { %v8200_v24 = vadd.f32 %v8136_v45, %v8072_v57  ;;  %v7881_v5 = vadd.f32 %v7408_v35, %v7339_v47  ;;  %v7945_v61 = vadd.f32 %v7546_v38, %v7477_v28  ;;  %v22902_v37 = vunpack.c.h.bf16 %v6880_v10  ;;  %v22916_v10 = vpop.xlane.xlu0 %8285 }
 0x80b   : > { %v8009_v2 = vadd.f32 %v7684_v46, %v7615_v6  ;;  %v22906_v23 = vunpack.c.h.bf16 %v6976_v4  ;;  %v22908_v39 = vunpack.c.h.bf16 %v7072_v30  ;;  %v7202_v44 = vmul.f32 %v22483_v59, %v22794_v53 }
 0x80c   : > { %v8264_v0 = vadd.f32 %v8200_v24, %v7752_v32  ;;  %v8073_v49 = vadd.f32 %v7881_v5, %v7817_v7  ;;  %v7271_v51 = vmul.f32 %v22490_v21, %v22796_v27  ;;  %v7340_v57 = vmul.f32 %v22497_v40, %v22798_v16  ;;  %v22937_v5 = vpop.xlane.xlu1 %8294 }
 0x80d   : > { %v8137_v19 = vadd.f32 %v8009_v2, %v7945_v61  ;;  %v7409_v4 = vmul.f32 %v22504_v20, %v22846_v36  ;;  %v7478_v30 = vmul.f32 %v22511_v52, %v22848_v50  ;;  %v7547_v53 = vmul.f32 %v22519_v48, %v22852_v25 }
 0x80e   : > { %v8443_v32 = vsel %vm8271_vm7, %v8264_v0, 0.0  ;;  %v7616_v27 = vmul.f32 %v22526_v22, %v22902_v37  ;;  %v7685_v16 = vmul.f32 %v22533_v62, %v22906_v23  ;;  %v7754_v47 = vmul.f32 %v22540_v29, %v22908_v39 }
 0x80f   : > { %8444 = vadd.xlane.f32.xlu1 %v8443_v32  ;;  %v8201_v35 = vadd.f32 %v8137_v19, %v8073_v49  ;;  %v7818_v45 = vadd.f32 %v7271_v51, %v7202_v44  ;;  %v7882_v28 = vadd.f32 %v7409_v4, %v7340_v57  ;;  %v7946_v38 = vadd.f32 %v7547_v53, %v7478_v30  ;;  %v22949_v51 = vpop.xlane.xlu0 %8291 }
 0x810   : > { %v8010_v6 = vadd.f32 %v7685_v16, %v7616_v27  ;;  %v7203_v46 = vmul.f32 %v22483_v59, %v22819_v54  ;;  %v7272_v7 = vmul.f32 %v22490_v21, %v22821_v14  ;;  %v7341_v24 = vmul.f32 %v22497_v40, %v22823_v60 }
 0x811   : > { %v8265_v61 = vadd.f32 %v8201_v35, %v7753_v56  ;;  %v8074_v2 = vadd.f32 %v7882_v28, %v7818_v45  ;;  %v7410_v0 = vmul.f32 %v22504_v20, %v22875_v17  ;;  %v7479_v44 = vmul.f32 %v22511_v52, %v22877_v15 }
 0x812   : > { %v8138_v49 = vadd.f32 %v8010_v6, %v7946_v38  ;;  %v7548_v54 = vmul.f32 %v22519_v48, %v22879_v11  ;;  %v7617_v14 = vmul.f32 %v22526_v22, %v22154_v18  ;;  %v7686_v60 = vmul.f32 %v22533_v62, %v22160_v33 }
 0x813   : > { %v8446_v56 = vsel %vm8271_vm7, %v8265_v61, 0.0  ;;  %v7755_v57 = vmul.f32 %v22540_v29, %v22167_v9  ;;  %v7819_v19 = vadd.f32 %v7272_v7, %v7203_v46  ;;  %v7883_v4 = vadd.f32 %v7410_v0, %v7341_v24  ;;  %v22966_v24 = vpop.xlane.xlu1 %8300 }
 0x814   : > { %8447 = vadd.xlane.f32.xlu0 %v8446_v56  ;;  %v8202_v30 = vadd.f32 %v8138_v49, %v8074_v2  ;;  %v7947_v53 = vadd.f32 %v7548_v54, %v7479_v44  ;;  %v8011_v32 = vadd.f32 %v7686_v60, %v7617_v14  ;;  %v7204_v27 = vmul.f32 %v22483_v59, %v22846_v36  ;;  %v22975_v49 = vpop.xlane.xlu0 %8297 }
 0x815   : > { %v8075_v16 = vadd.f32 %v7883_v4, %v7819_v19  ;;  %v7273_v35 = vmul.f32 %v22490_v21, %v22848_v50  ;;  %v7342_v45 = vmul.f32 %v22497_v40, %v22852_v25  ;;  %v7411_v28 = vmul.f32 %v22504_v20, %v22902_v37 }
 0x816   : > { %v8266_v38 = vadd.f32 %v8202_v30, %v7754_v47  ;;  %v8139_v6 = vadd.f32 %v8011_v32, %v7947_v53  ;;  %v7480_v46 = vmul.f32 %v22511_v52, %v22906_v23  ;;  %v7549_v7 = vmul.f32 %v22519_v48, %v22908_v39 }
 0x817   : > { %v7618_v36 = vmul.f32 %v22526_v22, %v22191_v63  ;;  %v7687_v50 = vmul.f32 %v22533_v62, %v22198_v55  ;;  %v7756_v25 = vmul.f32 %v22540_v29, %v22204_v58  ;;  %v7820_v61 = vadd.f32 %v7273_v35, %v7204_v27  ;;  %v22996_v35 = vpop.xlane.xlu1 %8306 }
 0x818   : > { %v8449_v47 = vsel %vm8271_vm7, %v8266_v38, 0.0  ;;  %v8203_v2 = vadd.f32 %v8139_v6, %v8075_v16  ;;  %v7884_v0 = vadd.f32 %v7411_v28, %v7342_v45  ;;  %v7948_v44 = vadd.f32 %v7549_v7, %v7480_v46  ;;  %v23006_v6 = vpop.xlane.xlu0 %8303 }
 0x819   : > { %8450 = vadd.xlane.f32.xlu1 %v8449_v47  ;;  %v8012_v54 = vadd.f32 %v7687_v50, %v7618_v36  ;;  %v7205_v14 = vmul.f32 %v22483_v59, %v22875_v17  ;;  %v7274_v60 = vmul.f32 %v22490_v21, %v22877_v15  ;;  %v7343_v56 = vmul.f32 %v22497_v40, %v22879_v11 }
 0x81a   : > { %v8267_v19 = vadd.f32 %v8203_v2, %v7755_v57  ;;  %v8076_v4 = vadd.f32 %v7884_v0, %v7820_v61  ;;  %v7412_v30 = vmul.f32 %v22504_v20, %v22154_v18  ;;  %v7481_v53 = vmul.f32 %v22511_v52, %v22160_v33 }
 0x81b   : > { %v8140_v32 = vadd.f32 %v8012_v54, %v7948_v44  ;;  %v7550_v27 = vmul.f32 %v22519_v48, %v22167_v9  ;;  %v7619_v17 = vmul.f32 %v22526_v22, %v22150_v1  ;;  %v7688_v15 = vmul.f32 %v22533_v62, %v22156_v43 }
 0x81c   : > { %v8452_v11 = vsel %vm8271_vm7, %v8267_v19, 0.0  ;;  %v7757_v57 = vmul.f32 %v22540_v29, %v22162_v26  ;;  %v7821_v16 = vadd.f32 %v7274_v60, %v7205_v14  ;;  %v7885_v18 = vadd.f32 %v7412_v30, %v7343_v56  ;;  %v23026_v47 = vpop.xlane.xlu0 %8309 }
 0x81d   : > { %8453 = vadd.xlane.f32.xlu0 %v8452_v11  ;;  %v8204_v33 = vadd.f32 %v8140_v32, %v8076_v4  ;;  %v7949_v45 = vadd.f32 %v7550_v27, %v7481_v53  ;;  %v8013_v28 = vadd.f32 %v7688_v15, %v7619_v17  ;;  %v7206_v9 = vmul.f32 %v22483_v59, %v22902_v37 }
 0x81e   : > { %v8077_v1 = vadd.f32 %v7885_v18, %v7821_v16  ;;  %v7275_v43 = vmul.f32 %v22490_v21, %v22906_v23  ;;  %v7344_v38 = vmul.f32 %v22497_v40, %v22908_v39  ;;  %v7413_v26 = vmul.f32 %v22504_v20, %v22191_v63 }
 0x81f   : > { %v8268_v46 = vadd.f32 %v8204_v33, %v7756_v25  ;;  %v8141_v7 = vadd.f32 %v8013_v28, %v7949_v45  ;;  %v7482_v36 = vmul.f32 %v22511_v52, %v22198_v55  ;;  %v7551_v59 = vmul.f32 %v22519_v48, %v22204_v58  ;;  %v23021_v48 = vpop.xlane.xlu1 %8312 }
 0x820   : > { %v7620_v21 = vmul.f32 %v22526_v22, %v22187_v41  ;;  %v7689_v40 = vmul.f32 %v22533_v62, %v22194_v31  ;;  %v7758_v63 = vmul.f32 %v22540_v29, %v22200_v34  ;;  %v7822_v20 = vadd.f32 %v7275_v43, %v7206_v9  ;;  %v23059_v45 = vpop.xlane.xlu0 %8315 }
 0x821   : > { %v8455_v37 = vsel %vm8271_vm7, %v8268_v46, 0.0  ;;  %v8205_v23 = vadd.f32 %v8141_v7, %v8077_v1  ;;  %v7886_v39 = vadd.f32 %v7413_v26, %v7344_v38  ;;  %v7950_v50 = vadd.f32 %v7551_v59, %v7482_v36 }
 0x822   : > { %8456 = vadd.xlane.f32.xlu1 %v8455_v37  ;;  %v8014_v55 = vadd.f32 %v7689_v40, %v7620_v21  ;;  %v23019_v52 = vstv %s14156_s19  ;;  %v24615_v58 = vlaneseq  ;;  %v14273_v25 = vmov 269488144  }
 0x823   : > { %v8269_v41 = vadd.f32 %v8205_v23, %v7757_v57  ;;  %v8078_v22 = vadd.f32 %v7886_v39, %v7822_v20  ;;  %v8598_v31 = vunpack.c.l.s4 %v14273_v25  ;;  %v14274_v29 = vmov 842150450   ;;  %v23043_v57 = vpop.xlane.xlu1 %8318 }
 0x824   : > { %v8142_v62 = vadd.f32 %v8014_v55, %v7950_v50  ;;  %v23024_v34 = vshrl.u32 %v24615_v58, 7  ;;  %v8605_v61 = vunpack.c.l.s4 %v14274_v29  ;;  %v14275_v44 = vmov 1414812756  }
 0x825   : > { %v8458_v2 = vsel %vm8271_vm7, %v8269_v41, 0.0  ;;  %v8599_v0 = vunpack.c.0.s8 %v8598_v31  ;;  %v8612_v54 = vunpack.c.l.s4 %v14275_v44  ;;  %v14276_v56 = vmov 1987475062   ;;  %v23102_v31 = vpop.xlane.xlu0 %8321 }
 0x826   : > { %8459 = vadd.xlane.f32.xlu0 %v8458_v2  ;;  %v8206_v14 = vadd.f32 %v8142_v62, %v8078_v22  ;;  %v8606_v60 = vunpack.c.0.s8 %v8605_v61  ;;  %v8619_v19 = vunpack.c.l.s4 %v14276_v56  ;;  %v8469_v4 = vadd.f32 %v23019_v52, %v22850_v12 }
 0x827   : > { %v23032_v30 = vsub.s32 %v8599_v0, %v23024_v34  ;;  %v8613_v53 = vunpack.c.0.s8 %v8612_v54  ;;  %v23036_v32 = vadd.f32 %v23019_v52, %v22842_v8  ;;  %v8470_v27 = vadd.f32 %v23019_v52, %v22883_v42  ;;  %v23088_v37 = vpop.xlane.xlu1 %8324 }
 0x828   : > { %v8270_v17 = vadd.f32 %v8206_v14, %v7758_v63  ;;  %v23041_v15 = vsub.s32 %v8606_v60, %v23024_v34  ;;  %v8620_v11 = vunpack.c.0.s8 %v8619_v19  ;;  %v23050_v16 = vadd.f32 %v23019_v52, %v22873_v3 }
 0x829   : > { %v23046_v12 = vsub.s32 %v8613_v53, %v23024_v34  ;;  %v8603_v42 = vrot.slane %v8469_v4, %v23032_v30  ;;  %v8659_v33 = vrot.slane %v23036_v32, %v23032_v30  ;;  %v8631_v1 = vrot.slane %v8470_v27, %v23032_v30 }
 0x82a   : > { %v8461_v8 = vsel %vm8271_vm7, %v8270_v17, 0.0  ;;  %v23054_v18 = vsub.s32 %v8620_v11, %v23024_v34  ;;  %v8610_v28 = vrot.slane %v8469_v4, %v23041_v15  ;;  %v8666_v3 = vrot.slane %v23036_v32, %v23041_v15 }
 0x82b   : > { %8462 = vadd.xlane.f32.xlu1 %v8461_v8  ;;  %v8617_v9 = vrot.slane %v8469_v4, %v23046_v12  ;;  %v8673_v38 = vrot.slane %v23036_v32, %v23046_v12  ;;  %v8638_v26 = vrot.slane %v8470_v27, %v23041_v15  ;;  %v8645_v46 = vrot.slane %v8470_v27, %v23046_v12 }
 0x82c   : > { %v8624_v43 = vrot.slane %v8469_v4, %v23054_v18  ;;  %v8680_v7 = vrot.slane %v23036_v32, %v23054_v18  ;;  %v8652_v36 = vrot.slane %v8470_v27, %v23054_v18  ;;  %v8687_v59 = vrot.slane %v23050_v16, %v23032_v30 }
 0x82d   : > { %v23078_v21 = vadd.f32 %v23019_v52, %v22916_v10  ;;  %v8694_v40 = vrot.slane %v23050_v16, %v23041_v15  ;;  %v8701_v63 = vrot.slane %v23050_v16, %v23046_v12  ;;  %v23086_v20 = vadd.f32 %v23019_v52, %v22904_v13 }
 0x82e   : > { %v8708_v23 = vrot.slane %v23050_v16, %v23054_v18  ;;  %v14277_v10 = vmov 0   ;;  %v10389_v50 = vcombine.low %v8603_v42, %v8610_v28  ;;  %v10390_v55 = vcombine.low %v8617_v9, %v8624_v43  ;;  %v23151_v9 = vpop.xlane.xlu0 %8327 }
 0x82f   : > { %v8715_v39 = vrot.slane %v23078_v21, %v23032_v30  ;;  %14245 = vset.pattern.permute.xlu0 %v14277_v10  ;;  %v8722_v41 = vrot.slane %v23078_v21, %v23041_v15  ;;  %v8729_v22 = vrot.slane %v23078_v21, %v23046_v12  ;;  %v8736_v13 = vrot.slane %v23078_v21, %v23054_v18 }
 0x830   : > { %v8743_v25 = vrot.slane %v23086_v20, %v23032_v30  ;;  %14246 = vset.pattern.permute.xlu1 %v14277_v10  ;;  %v8750_v62 = vrot.slane %v23086_v20, %v23041_v15  ;;  %v23108_v29 = vadd.f32 %v23019_v52, %v22949_v51  ;;  %v23112_v61 = vadd.f32 %v23019_v52, %v22937_v5 }
 0x831   : > { %v8757_v2 = vrot.slane %v23086_v20, %v23046_v12  ;;  %v8764_v0 = vrot.slane %v23086_v20, %v23054_v18  ;;  %v14278_v44 = vmov 1983009808   ;;  %v23120_v14 = vadd.f32 %v23019_v52, %v22975_v49  ;;  %v23132_v49 = vpop.xlane.xlu1 %8330 }
 0x832   : > { %v10392_v54 = vunpack.c.l.s4 %v14278_v44  ;;  %v8771_v51 = vrot.slane %v23108_v29, %v23032_v30  ;;  %v10406_v60 = vcombine.low %v8631_v1, %v8638_v26  ;;  %v10407_v56 = vcombine.low %v8645_v46, %v8652_v36 }
 0x833   : > { %v8478_v5 = vadd.f32 %v23019_v52, %v22966_v24  ;;  %v8778_v4 = vrot.slane %v23108_v29, %v23041_v15  ;;  %v8785_v53 = vrot.slane %v23108_v29, %v23046_v12  ;;  %v8792_v32 = vrot.slane %v23108_v29, %v23054_v18 }
 0x834   : > { %v10393_v19 = vunpack.c.0.s8 %v10392_v54  ;;  %v8799_v27 = vrot.slane %v23112_v61, %v23032_v30  ;;  %v8806_v17 = vrot.slane %v23112_v61, %v23041_v15  ;;  %v8813_v24 = vrot.slane %v23112_v61, %v23046_v12 }
 0x835   : > { %v8820_v11 = vrot.slane %v23112_v61, %v23054_v18  ;;  %v8827_v8 = vrot.slane %v23120_v14, %v23032_v30  ;;  %v8834_v42 = vrot.slane %v23120_v14, %v23041_v15  ;;  %v8848_v1 = vrot.slane %v23120_v14, %v23054_v18 }
 0x836   : > { %v23143_v16 = vsub.s32 %v10393_v19, %v23024_v34  ;;  %v8855_v43 = vrot.slane %v8478_v5, %v23032_v30  ;;  %v10423_v26 = vcombine.low %v8659_v33, %v8666_v3  ;;  %v10424_v46 = vcombine.low %v8673_v38, %v8680_v7 }
 0x837   : > { %v23164_v28 = vadd.f32 %v23019_v52, %v23006_v6  ;;  %v8480_v33 = vadd.f32 %v23019_v52, %v22996_v35  ;;  %v10440_v7 = vcombine.low %v8687_v59, %v8694_v40  ;;  %v23179_v40 = vpop.xlane.xlu0 %8333  ;;  %vm11694_vm10 = vcmask 261312  }
 0x838   : > { %v10397_v36 = vrot.slane %v10389_v50, %v23143_v16  ;;  %v10404_v10 = vrot.slane %v10390_v55, %v23143_v16  ;;  %v10414_v44 = vrot.slane %v10406_v60, %v23143_v16  ;;  %v10421_v54 = vrot.slane %v10407_v56, %v23143_v16  ;;  %v23168_v55 = vpop.xlane.xlu1 %8336 }
 0x839   : > { %v10431_v19 = vrot.slane %v10423_v26, %v23143_v16  ;;  %v10438_v58 = vrot.slane %v10424_v46, %v23143_v16  ;;  %v10441_v50 = vcombine.low %v8701_v63, %v8708_v23  ;;  %v8862_v60 = vrot.slane %v8478_v5, %v23041_v15 }
 0x83a   : > { %v10405_v3 = vcombine.low %v10397_v36, %v10404_v10  ;;  %v10422_v38 = vcombine.low %v10414_v44, %v10421_v54  ;;  %v8869_v56 = vrot.slane %v8478_v5, %v23046_v12  ;;  %v8876_v26 = vrot.slane %v8478_v5, %v23054_v18 }
 0x83b   : > { %v10439_v46 = vcombine.low %v10431_v19, %v10438_v58  ;;  %v8883_v6 = vrot.slane %v23164_v28, %v23032_v30  ;;  %v8890_v35 = vrot.slane %v23164_v28, %v23041_v15  ;;  %v8897_v59 = vrot.slane %v23164_v28, %v23046_v12 }
 0x83c   : > { %11478 = vperm.xlu0 %14245, %v10405_v3   ;;  %11481 = vperm.xlu1 %14246, %v10422_v38   ;;  %v8904_v63 = vrot.slane %v23164_v28, %v23054_v18  ;;  %v8911_v23 = vrot.slane %v8480_v33, %v23032_v30  ;;  %v10448_v58 = vrot.slane %v10440_v7, %v23143_v16  ;;  %vm11701_vm11 = vcmask 326912  }
 0x83d   : > { %v10455_v5 = vrot.slane %v10441_v50, %v23143_v16  ;;  %v23188_v36 = vadd.f32 %v23019_v52, %v23026_v47  ;;  %v8482_v10 = vadd.f32 %v23019_v52, %v23021_v48  ;;  %v10457_v44 = vcombine.low %v8715_v39, %v8722_v41  ;;  %v23213_v50 = vpop.xlane.xlu1 %8342 }
 0x83e   : > { %v10458_v54 = vcombine.low %v8729_v22, %v8736_v13  ;;  %v8918_v47 = vrot.slane %v8480_v33, %v23041_v15  ;;  %v10542_v19 = vcombine.low %v8855_v43, %v8862_v60  ;;  %v10543_v3 = vcombine.low %v8869_v56, %v8876_v26  ;;  %v23226_v26 = vpop.xlane.xlu0 %8339 }
 0x83f   : > { %v23207_v48 = vadd.f32 %v23019_v52, %v23059_v45  ;;  %v8925_v38 = vrot.slane %v8480_v33, %v23046_v12  ;;  %v8932_v39 = vrot.slane %v8480_v33, %v23054_v18  ;;  %v10456_v41 = vcombine.low %v10448_v58, %v10455_v5 }
 0x840   : > { %11484 = vperm.xlu1 %14246, %v10439_v46   ;;  %v8939_v7 = vrot.slane %v23188_v36, %v23032_v30  ;;  %v8946_v21 = vrot.slane %v23188_v36, %v23041_v15  ;;  %v8967_v13 = vrot.slane %v8482_v10, %v23032_v30  ;;  %v10465_v43 = vrot.slane %v10457_v44, %v23143_v16 }
 0x841   : > { %v10472_v33 = vrot.slane %v10458_v54, %v23143_v16  ;;  %v10550_v60 = vrot.slane %v10542_v19, %v23143_v16  ;;  %v10557_v56 = vrot.slane %v10543_v3, %v23143_v16  ;;  %v8974_v46 = vrot.slane %v8482_v10, %v23041_v15  ;;  %v23258_v22 = vpop.xlane.xlu1 %8348 }
 0x842   : > { %v8981_v58 = vrot.slane %v8482_v10, %v23046_v12  ;;  %v8988_v5 = vrot.slane %v8482_v10, %v23054_v18  ;;  %v9002_v44 = vrot.slane %v23207_v48, %v23041_v15  ;;  %v8484_v54 = vadd.f32 %v23019_v52, %v23043_v57 }
 0x843   : > { %v10558_v45 = vcombine.low %v10550_v60, %v10557_v56  ;;  %v10474_v19 = vcombine.low %v8743_v25, %v8750_v62  ;;  %v10475_v10 = vcombine.low %v8757_v2, %v8764_v0  ;;  %v10576_v3 = vcombine.low %v8911_v23, %v8918_v47 }
 0x844   : > { %11487 = vperm.xlu1 %14246, %v10456_v41   ;;  %v10577_v41 = vcombine.low %v8925_v38, %v8932_v39  ;;  %v23251_v60 = vadd.f32 %v23019_v52, %v23102_v31  ;;  %v10473_v57 = vcombine.low %v10465_v43, %v10472_v33  ;;  %v9009_v56 = vrot.slane %v23207_v48, %v23046_v12 }
 0x845   : > { %11505 = vperm.xlu0 %14245, %v10558_v45   ;;  %v9016_v25 = vrot.slane %v23207_v48, %v23054_v18  ;;  %v9023_v62 = vrot.slane %v8484_v54, %v23032_v30  ;;  %v10482_v20 = vrot.slane %v10474_v19, %v23143_v16  ;;  %v10489_v2 = vrot.slane %v10475_v10, %v23143_v16  ;;  %v23269_v45 = vpop.xlane.xlu0 %8345 }
 0x846   : > { %v10584_v0 = vrot.slane %v10576_v3, %v23143_v16  ;;  %v10591_v31 = vrot.slane %v10577_v41, %v23143_v16  ;;  %v9030_v23 = vrot.slane %v8484_v54, %v23041_v15  ;;  %v9037_v47 = vrot.slane %v8484_v54, %v23046_v12 }
 0x847   : > { %v9044_v38 = vrot.slane %v8484_v54, %v23054_v18  ;;  %v9051_v39 = vrot.slane %v23251_v60, %v23032_v30  ;;  %v10490_v43 = vcombine.low %v10482_v20, %v10489_v2  ;;  %v8486_v19 = vadd.f32 %v23019_v52, %v23088_v37 }
 0x848   : > { %11490 = vperm.xlu1 %14246, %v10473_v57   ;;  %v10592_v33 = vcombine.low %v10584_v0, %v10591_v31  ;;  %v10491_v10 = vcombine.low %v8771_v51, %v8778_v4  ;;  %v10492_v54 = vcombine.low %v8785_v53, %v8792_v32  ;;  %v10610_v3 = vcombine.low %v8967_v13, %v8974_v46  ;;  %v23300_v13 = vpop.xlane.xlu1 %8354 }
 0x849   : > { %v10611_v41 = vcombine.low %v8981_v58, %v8988_v5  ;;  %v23287_v57 = vadd.f32 %v23019_v52, %v23151_v9  ;;  %v9058_v37 = vrot.slane %v23251_v60, %v23041_v15  ;;  %v9065_v51 = vrot.slane %v23251_v60, %v23046_v12 }
 0x84a   : > { %11511 = vperm.xlu0 %14245, %v10592_v33   ;;  %v9072_v4 = vrot.slane %v23251_v60, %v23054_v18  ;;  %v9079_v20 = vrot.slane %v8486_v19, %v23032_v30  ;;  %v10499_v29 = vrot.slane %v10491_v10, %v23143_v16  ;;  %v10506_v53 = vrot.slane %v10492_v54, %v23143_v16  ;;  %v23315_v10 = vpop.xlane.xlu0 %8351 }
 0x84b   : > { %v10618_v32 = vrot.slane %v10610_v3, %v23143_v16  ;;  %v10625_v9 = vrot.slane %v10611_v41, %v23143_v16  ;;  %v9086_v46 = vrot.slane %v8486_v19, %v23041_v15  ;;  %v9093_v58 = vrot.slane %v8486_v19, %v23046_v12 }
 0x84c   : > { %11493 = vperm.xlu1 %14246, %v10490_v43   ;;  %v9100_v5 = vrot.slane %v8486_v19, %v23054_v18  ;;  %v9107_v2 = vrot.slane %v23287_v57, %v23032_v30  ;;  %v10507_v0 = vcombine.low %v10499_v29, %v10506_v53  ;;  %v8488_v43 = vadd.f32 %v23019_v52, %v23132_v49  ;;  %v23341_v29 = vpop.xlane.xlu1 %8360 }
 0x84d   : > { %v10626_v31 = vcombine.low %v10618_v32, %v10625_v9  ;;  %v10508_v33 = vcombine.low %v8799_v27, %v8806_v17  ;;  %v10509_v19 = vcombine.low %v8813_v24, %v8820_v11  ;;  %v10644_v54 = vcombine.low %v9023_v62, %v9030_v23 }
 0x84e   : > { %v10645_v3 = vcombine.low %v9037_v47, %v9044_v38  ;;  %v23325_v49 = vadd.f32 %v23019_v52, %v23179_v40  ;;  %v9114_v27 = vrot.slane %v23287_v57, %v23041_v15  ;;  %v9121_v17 = vrot.slane %v23287_v57, %v23046_v12 }
 0x84f   : > { %11517 = vperm.xlu0 %14245, %v10626_v31   ;;  %v9128_v41 = vrot.slane %v23287_v57, %v23054_v18  ;;  %v9135_v61 = vrot.slane %v8488_v43, %v23032_v30  ;;  %v10516_v24 = vrot.slane %v10508_v33, %v23143_v16  ;;  %v10523_v11 = vrot.slane %v10509_v19, %v23143_v16 }
 0x850   : > { %11496 = vperm.xlu1 %14246, %v10507_v0   ;;  %v10652_v40 = vrot.slane %v10644_v54, %v23143_v16  ;;  %v9142_v62 = vrot.slane %v8488_v43, %v23041_v15  ;;  %v9149_v23 = vrot.slane %v8488_v43, %v23046_v12  ;;  %v9156_v47 = vrot.slane %v8488_v43, %v23054_v18 }
 0x851   : > { %v10659_v38 = vrot.slane %v10645_v3, %v23143_v16  ;;  %v10524_v53 = vcombine.low %v10516_v24, %v10523_v11  ;;  %v9163_v32 = vrot.slane %v23325_v49, %v23032_v30  ;;  %v8490_v9 = vadd.f32 %v23019_v52, %v23168_v55  ;;  %v23359_v3 = vpop.xlane.xlu0 %8357 }
 0x852   : > { %v10525_v0 = vcombine.low %v8827_v8, %v8834_v42  ;;  %v26274_v43 = vrot.slane %v23120_v14, %v23046_v12  ;;  %v10678_v19 = vcombine.low %v9079_v20, %v9086_v46  ;;  %v10679_v54 = vcombine.low %v9093_v58, %v9100_v5 }
 0x853   : > { %v10660_v31 = vcombine.low %v10652_v40, %v10659_v38  ;;  %v9170_v55 = vrot.slane %v23325_v49, %v23041_v15  ;;  %v9177_v24 = vrot.slane %v23325_v49, %v23046_v12  ;;  %v9184_v8 = vrot.slane %v23325_v49, %v23054_v18 }
 0x854   : > { %v10526_v33 = vcombine.low %v26274_v43, %v8848_v1  ;;  %11499 = vperm.xlu1 %14246, %v10524_v53   ;;  %v9191_v42 = vrot.slane %v8490_v9, %v23032_v30  ;;  %v10533_v14 = vrot.slane %v10525_v0, %v23143_v16  ;;  %v10686_v20 = vrot.slane %v10678_v19, %v23143_v16 }
 0x855   : > { %11523 = vperm.xlu0 %14245, %v10660_v31   ;;  %v10693_v46 = vrot.slane %v10679_v54, %v23143_v16  ;;  %v23374_v58 = vadd.f32 %v23019_v52, %v23226_v26  ;;  %v8492_v5 = vadd.f32 %v23019_v52, %v23213_v50  ;;  %v10559_v11 = vcombine.low %v8883_v6, %v8890_v35  ;;  %v23390_v31 = vpop.xlane.xlu1 %8366 }
 0x856   : > { %v10540_v1 = vrot.slane %v10526_v33, %v23143_v16  ;;  %v10560_v40 = vcombine.low %v8897_v59, %v8904_v63  ;;  %v10712_v53 = vcombine.low %v9135_v61, %v9142_v62  ;;  %v10713_v0 = vcombine.low %v9149_v23, %v9156_v47  ;;  %v23403_v63 = vpop.xlane.xlu0 %8363 }
 0x857   : > { %v10694_v26 = vcombine.low %v10686_v20, %v10693_v46  ;;  %v9198_v50 = vrot.slane %v8490_v9, %v23041_v15  ;;  %v9205_v43 = vrot.slane %v8490_v9, %v23046_v12  ;;  %v9212_v33 = vrot.slane %v8490_v9, %v23054_v18 }
 0x858   : > { %v10541_v38 = vcombine.low %v10533_v14, %v10540_v1  ;;  %v9219_v6 = vrot.slane %v23374_v58, %v23032_v30  ;;  %v9226_v28 = vrot.slane %v23374_v58, %v23041_v15  ;;  %v9233_v35 = vrot.slane %v23374_v58, %v23046_v12 }
 0x859   : > { %11529 = vperm.xlu0 %14245, %v10694_v26   ;;  %v9240_v59 = vrot.slane %v23374_v58, %v23054_v18  ;;  %v9247_v61 = vrot.slane %v8492_v5, %v23032_v30  ;;  %v10567_v62 = vrot.slane %v10559_v11, %v23143_v16  ;;  %v10574_v23 = vrot.slane %v10560_v40, %v23143_v16 }
 0x85a   : > { %11502 = vperm.xlu1 %14246, %v10541_v38   ;;  %v10720_v47 = vrot.slane %v10712_v53, %v23143_v16  ;;  %v10727_v9 = vrot.slane %v10713_v0, %v23143_v16  ;;  %v23412_v19 = vadd.f32 %v23019_v52, %v23269_v45  ;;  %v8494_v54 = vadd.f32 %v23019_v52, %v23258_v22  ;;  %v23431_v0 = vpop.xlane.xlu1 %8372 }
 0x85b   : > { %v10593_v14 = vcombine.low %v8939_v7, %v8946_v21  ;;  %v10575_v1 = vcombine.low %v10567_v62, %v10574_v23  ;;  %v26275_v20 = vrot.slane %v23188_v36, %v23054_v18  ;;  %v26276_v46 = vrot.slane %v23188_v36, %v23046_v12  ;;  %v23445_v62 = vpop.xlane.xlu0 %8369 }
 0x85c   : > { %v10746_v45 = vcombine.low %v9191_v42, %v9198_v50  ;;  %v10747_v40 = vcombine.low %v9205_v43, %v9212_v33  ;;  %v9254_v38 = vrot.slane %v8492_v5, %v23041_v15  ;;  %v9261_v22 = vrot.slane %v8492_v5, %v23046_v12 }
 0x85d   : > { %v10594_v11 = vcombine.low %v26276_v46, %v26275_v20  ;;  %v9268_v26 = vrot.slane %v8492_v5, %v23054_v18  ;;  %v10728_v53 = vcombine.low %v10720_v47, %v10727_v9  ;;  %v9275_v7 = vrot.slane %v23412_v19, %v23032_v30 }
 0x85e   : > { %11508 = vperm.xlu1 %14246, %v10575_v1   ;;  %v9282_v21 = vrot.slane %v23412_v19, %v23041_v15  ;;  %v9289_v36 = vrot.slane %v23412_v19, %v23046_v12  ;;  %v9296_v42 = vrot.slane %v23412_v19, %v23054_v18  ;;  %v9303_v50 = vrot.slane %v8494_v54, %v23032_v30 }
 0x85f   : > { %11535 = vperm.xlu0 %14245, %v10728_v53   ;;  %v10601_v5 = vrot.slane %v10593_v14, %v23143_v16  ;;  %v10608_v43 = vrot.slane %v10594_v11, %v23143_v16  ;;  %v10754_v33 = vrot.slane %v10746_v45, %v23143_v16  ;;  %v10761_v23 = vrot.slane %v10747_v40, %v23143_v16 }
 0x860   : > { %v23450_v47 = vadd.f32 %v23019_v52, %v23315_v10  ;;  %v23454_v9 = vadd.f32 %v23019_v52, %v23300_v13  ;;  %v26277_v14 = vrot.slane %v23207_v48, %v23032_v30  ;;  %v10628_v10 = vcombine.low %v9009_v56, %v9016_v25  ;;  %v23479_v25 = vpop.xlane.xlu1 %8378 }
 0x861   : > { %v10609_v20 = vcombine.low %v10601_v5, %v10608_v43  ;;  %v10780_v46 = vcombine.low %v9247_v61, %v9254_v38  ;;  %v10781_v11 = vcombine.low %v9261_v22, %v9268_v26  ;;  %v9310_v13 = vrot.slane %v8494_v54, %v23041_v15 }
 0x862   : > { %v10627_v1 = vcombine.low %v26277_v14, %v9002_v44  ;;  %v9317_v45 = vrot.slane %v8494_v54, %v23046_v12  ;;  %v9324_v40 = vrot.slane %v8494_v54, %v23054_v18  ;;  %v10762_v53 = vcombine.low %v10754_v33, %v10761_v23  ;;  %v23499_v14 = vpop.xlane.xlu0 %8375 }
 0x863   : > { %11514 = vperm.xlu1 %14246, %v10609_v20   ;;  %v9331_v44 = vrot.slane %v23450_v47, %v23032_v30  ;;  %v9338_v5 = vrot.slane %v23450_v47, %v23041_v15  ;;  %v9345_v48 = vrot.slane %v23450_v47, %v23046_v12  ;;  %v9352_v56 = vrot.slane %v23450_v47, %v23054_v18 }
 0x864   : > { %11541 = vperm.xlu0 %14245, %v10762_v53   ;;  %v9359_v61 = vrot.slane %v23454_v9, %v23032_v30  ;;  %v10635_v54 = vrot.slane %v10627_v1, %v23143_v16  ;;  %v10642_v38 = vrot.slane %v10628_v10, %v23143_v16  ;;  %v10788_v22 = vrot.slane %v10780_v46, %v23143_v16 }
 0x865   : > { %v10795_v26 = vrot.slane %v10781_v11, %v23143_v16  ;;  %v8497_v43 = vadd.f32 %v23019_v52, %v23359_v3  ;;  %v23491_v33 = vadd.f32 %v23019_v52, %v23341_v29  ;;  %v10661_v23 = vcombine.low %v9051_v39, %v9058_v37 }
 0x866   : > { %v10643_v1 = vcombine.low %v10635_v54, %v10642_v38  ;;  %v10662_v3 = vcombine.low %v9065_v51, %v9072_v4  ;;  %v10814_v20 = vcombine.low %v9303_v50, %v9310_v13  ;;  %v10815_v29 = vcombine.low %v9317_v45, %v9324_v40  ;;  %v23523_v45 = vpop.xlane.xlu1 %8384 }
 0x867   : > { %v9366_v10 = vrot.slane %v23454_v9, %v23041_v15  ;;  %v9373_v46 = vrot.slane %v23454_v9, %v23046_v12  ;;  %v9380_v39 = vrot.slane %v23454_v9, %v23054_v18  ;;  %v10796_v37 = vcombine.low %v10788_v22, %v10795_v26 }
 0x868   : > { %11520 = vperm.xlu1 %14246, %v10643_v1   ;;  %v9387_v11 = vrot.slane %v8497_v43, %v23032_v30  ;;  %v9394_v53 = vrot.slane %v8497_v43, %v23041_v15  ;;  %v9401_v60 = vrot.slane %v8497_v43, %v23046_v12  ;;  %v9408_v51 = vrot.slane %v8497_v43, %v23054_v18 }
 0x869   : > { %11547 = vperm.xlu0 %14245, %v10796_v37   ;;  %v9415_v4 = vrot.slane %v23491_v33, %v23032_v30  ;;  %v9422_v50 = vrot.slane %v23491_v33, %v23041_v15  ;;  %v10669_v13 = vrot.slane %v10661_v23, %v23143_v16  ;;  %v10676_v9 = vrot.slane %v10662_v3, %v23143_v16 }
 0x86a   : > { %v9429_v40 = vrot.slane %v23491_v33, %v23046_v12  ;;  %v10822_v54 = vrot.slane %v10814_v20, %v23143_v16  ;;  %v10829_v38 = vrot.slane %v10815_v29, %v23143_v16  ;;  %v8499_v22 = vadd.f32 %v23019_v52, %v23403_v63  ;;  %v23547_v63 = vpop.xlane.xlu0 %8381 }
 0x86b   : > { %v10677_v26 = vcombine.low %v10669_v13, %v10676_v9  ;;  %v23533_v43 = vadd.f32 %v23019_v52, %v23390_v31  ;;  %v10695_v23 = vcombine.low %v9107_v2, %v9114_v27  ;;  %v10696_v1 = vcombine.low %v9121_v17, %v9128_v41  ;;  %v23569_v9 = vpop.xlane.xlu1 %8390 }
 0x86c   : > { %v23549_v3 = vcombine.low %v9387_v11, %v9394_v53  ;;  %v23551_v31 = vcombine.low %v9401_v60, %v9408_v51  ;;  %v9436_v20 = vrot.slane %v23491_v33, %v23054_v18  ;;  %v10830_v29 = vcombine.low %v10822_v54, %v10829_v38 }
 0x86d   : > { %11526 = vperm.xlu1 %14246, %v10677_v26   ;;  %v9443_v2 = vrot.slane %v8499_v22, %v23032_v30  ;;  %v9450_v27 = vrot.slane %v8499_v22, %v23041_v15  ;;  %v9457_v37 = vrot.slane %v8499_v22, %v23046_v12  ;;  %v9464_v57 = vrot.slane %v8499_v22, %v23054_v18 }
 0x86e   : > { %11553 = vperm.xlu0 %14245, %v10830_v29   ;;  %v9471_v17 = vrot.slane %v23533_v43, %v23032_v30  ;;  %v9478_v41 = vrot.slane %v23533_v43, %v23041_v15  ;;  %v10703_v11 = vrot.slane %v10695_v23, %v23143_v16  ;;  %v10710_v33 = vrot.slane %v10696_v1, %v23143_v16 }
 0x86f   : > { %v9485_v53 = vrot.slane %v23533_v43, %v23046_v12  ;;  %v10848_v60 = vcombine.low %v9359_v61, %v9366_v10  ;;  %v10849_v51 = vcombine.low %v9373_v46, %v9380_v39  ;;  %v8501_v13 = vadd.f32 %v23019_v52, %v23445_v62  ;;  %v23589_v39 = vpop.xlane.xlu0 %8387 }
 0x870   : > { %v10711_v54 = vcombine.low %v10703_v11, %v10710_v33  ;;  %v8502_v38 = vadd.f32 %v23019_v52, %v23431_v0  ;;  %v10729_v22 = vcombine.low %v9163_v32, %v9170_v55  ;;  %v10730_v62 = vcombine.low %v9177_v24, %v9184_v8 }
 0x871   : > { %v10856_v61 = vrot.slane %v10848_v60, %v23143_v16  ;;  %v10863_v10 = vrot.slane %v10849_v51, %v23143_v16  ;;  %v9499_v0 = vrot.slane %v8501_v13, %v23032_v30  ;;  %v9506_v46 = vrot.slane %v8501_v13, %v23041_v15  ;;  %v23617_v60 = vpop.xlane.xlu1 %8396 }
 0x872   : > { %v23591_v26 = vcombine.low %v9443_v2, %v9450_v27  ;;  %v23593_v32 = vcombine.low %v9457_v37, %v9464_v57  ;;  %v9492_v55 = vrot.slane %v23533_v43, %v23054_v18  ;;  %11532 = vperm.xlu1 %14246, %v10711_v54   ;;  %v9513_v49 = vrot.slane %v8501_v13, %v23046_v12 }
 0x873   : > { %v10864_v24 = vcombine.low %v10856_v61, %v10863_v10  ;;  %v9520_v8 = vrot.slane %v8501_v13, %v23054_v18  ;;  %v9527_v23 = vrot.slane %v8502_v38, %v23032_v30  ;;  %v9534_v1 = vrot.slane %v8502_v38, %v23041_v15 }
 0x874   : > { %v23601_v29 = vcombine.low %v9499_v0, %v9506_v46  ;;  %v10737_v2 = vrot.slane %v10729_v22, %v23143_v16  ;;  %v10744_v27 = vrot.slane %v10730_v62, %v23143_v16  ;;  %v10882_v37 = vcombine.low %v9415_v4, %v9422_v50 }
 0x875   : > { %11559 = vperm.xlu0 %14245, %v10864_v24   ;;  %v10883_v57 = vcombine.low %v9429_v40, %v9436_v20  ;;  %v8503_v43 = vadd.f32 %v23019_v52, %v23499_v14  ;;  %v23609_v11 = vadd.f32 %v23019_v52, %v23479_v25  ;;  %v10763_v33 = vcombine.low %v9219_v6, %v9226_v28  ;;  %v23631_v28 = vpop.xlane.xlu0 %8393 }
 0x876   : > { %v10745_v51 = vcombine.low %v10737_v2, %v10744_v27  ;;  %v10890_v4 = vrot.slane %v10882_v37, %v23143_v16  ;;  %v10764_v25 = vcombine.low %v9233_v35, %v9240_v59  ;;  %v10916_v14 = vcombine.low %v9471_v17, %v9478_v41 }
 0x877   : > { %v23626_v50 = vcombine.low %v9513_v49, %v9520_v8  ;;  %v9541_v40 = vrot.slane %v8502_v38, %v23046_v12  ;;  %v9548_v20 = vrot.slane %v8502_v38, %v23054_v18  ;;  %v10897_v6 = vrot.slane %v10883_v57, %v23143_v16 }
 0x878   : > { %11538 = vperm.xlu1 %14246, %v10745_v51   ;;  %v9555_v13 = vrot.slane %v8503_v43, %v23032_v30  ;;  %v9562_v54 = vrot.slane %v8503_v43, %v23041_v15  ;;  %v9569_v22 = vrot.slane %v8503_v43, %v23046_v12  ;;  %v9576_v58 = vrot.slane %v8503_v43, %v23054_v18 }
 0x879   : > { %v10898_v35 = vcombine.low %v10890_v4, %v10897_v6  ;;  %v9583_v59 = vrot.slane %v23609_v11, %v23032_v30  ;;  %v9590_v17 = vrot.slane %v23609_v11, %v23041_v15  ;;  %v10771_v41 = vrot.slane %v10763_v33, %v23143_v16  ;;  %v23674_v37 = vpop.xlane.xlu0 %8399 }
 0x87a   : > { %v9597_v38 = vrot.slane %v23609_v11, %v23046_v12  ;;  %v10778_v62 = vrot.slane %v10764_v25, %v23143_v16  ;;  %v10917_v61 = vcombine.low %v9485_v53, %v9492_v55  ;;  %v10924_v10 = vrot.slane %v10916_v14, %v23143_v16  ;;  %v23664_v55 = vpop.xlane.xlu1 %8402 }
 0x87b   : > { %11565 = vperm.xlu0 %14245, %v10898_v35   ;;  %v8505_v0 = vadd.f32 %v23019_v52, %v23547_v63  ;;  %v23650_v46 = vadd.f32 %v23019_v52, %v23523_v45  ;;  %v10797_v49 = vcombine.low %v9275_v7, %v9282_v21  ;;  %v10798_v53 = vcombine.low %v9289_v36, %v9296_v42 }
 0x87c   : > { %v10779_v63 = vcombine.low %v10771_v41, %v10778_v62  ;;  %v10931_v45 = vrot.slane %v10917_v61, %v23143_v16  ;;  %v10950_v24 = vcombine.low %v9527_v23, %v9534_v1  ;;  %v10951_v8 = vcombine.low %v9541_v40, %v9548_v20 }
 0x87d   : > { %v23667_v2 = vcombine.low %v9555_v13, %v9562_v54  ;;  %v23669_v27 = vcombine.low %v9569_v22, %v9576_v58  ;;  %v9604_v7 = vrot.slane %v23609_v11, %v23054_v18  ;;  %v9611_v21 = vrot.slane %v8505_v0, %v23032_v30  ;;  %v23718_v47 = vpop.xlane.xlu0 %8405 }
 0x87e   : > { %11544 = vperm.xlu1 %14246, %v10779_v63   ;;  %v10932_v19 = vcombine.low %v10924_v10, %v10931_v45  ;;  %v9618_v36 = vrot.slane %v8505_v0, %v23041_v15  ;;  %v9625_v42 = vrot.slane %v8505_v0, %v23046_v12  ;;  %v9632_v23 = vrot.slane %v8505_v0, %v23054_v18 }
 0x87f   : > { %v9639_v1 = vrot.slane %v23650_v46, %v23032_v30  ;;  %v9646_v57 = vrot.slane %v23650_v46, %v23041_v15  ;;  %v9653_v43 = vrot.slane %v23650_v46, %v23046_v12  ;;  %v10805_v11 = vrot.slane %v10797_v49, %v23143_v16 }
 0x880   : > { %11571 = vperm.xlu0 %14245, %v10932_v19   ;;  %v10812_v33 = vrot.slane %v10798_v53, %v23143_v16  ;;  %v10958_v51 = vrot.slane %v10950_v24, %v23143_v16  ;;  %v10965_v4 = vrot.slane %v10951_v8, %v23143_v16  ;;  %v8507_v25 = vadd.f32 %v23019_v52, %v23589_v39  ;;  %v23707_v39 = vpop.xlane.xlu1 %8408 }
 0x881   : > { %v23693_v14 = vadd.f32 %v23019_v52, %v23569_v9  ;;  %v10831_v40 = vcombine.low %v9331_v44, %v9338_v5  ;;  %v10832_v20 = vcombine.low %v9345_v48, %v9352_v56  ;;  %v10984_v6 = vcombine.low %v9583_v59, %v9590_v17 }
 0x882   : > { %v10813_v13 = vcombine.low %v10805_v11, %v10812_v33  ;;  %v10966_v9 = vcombine.low %v10958_v51, %v10965_v4  ;;  %v9667_v54 = vrot.slane %v8507_v25, %v23032_v30  ;;  %v9674_v22 = vrot.slane %v8507_v25, %v23041_v15 }
 0x883   : > { %v23711_v58 = vcombine.low %v9611_v21, %v9618_v36  ;;  %v23713_v35 = vcombine.low %v9625_v42, %v9632_v23  ;;  %v9660_v44 = vrot.slane %v23650_v46, %v23054_v18  ;;  %v9681_v5 = vrot.slane %v8507_v25, %v23046_v12  ;;  %v8412_v23 = vpop.xlane.xlu0 %8411 }
 0x884   : > { %11550 = vperm.xlu1 %14246, %v10813_v13   ;;  %11577 = vperm.xlu0 %14245, %v10966_v9   ;;  %v9688_v48 = vrot.slane %v8507_v25, %v23054_v18  ;;  %v9695_v56 = vrot.slane %v23693_v14, %v23032_v30  ;;  %v9702_v59 = vrot.slane %v23693_v14, %v23041_v15  ;;  %v26278_v17 = vlaneseq  ;;  %v23742_v19 = vpop.xlane.xlu1 %8414 }
 0x885   : > { %v23728_v62 = vcombine.low %v9667_v54, %v9674_v22  ;;  %v10839_v61 = vrot.slane %v10831_v40, %v23143_v16  ;;  %v10846_v10 = vrot.slane %v10832_v20, %v23143_v16  ;;  %v10985_v0 = vcombine.low %v9597_v38, %v9604_v7 }
 0x886   : > { %v23726_v41 = vand.u32 127, %v26278_v17  ;;  %v10992_v46 = vrot.slane %v10984_v6, %v23143_v16  ;;  %v8509_v49 = vadd.f32 %v23019_v52, %v23631_v28  ;;  %v8510_v53 = vadd.f32 %v23019_v52, %v23617_v60 }
 0x887   : > { %v10873_v63 = vrot.slane %v23549_v3, %v23143_v16  ;;  %v10847_v45 = vcombine.low %v10839_v61, %v10846_v10  ;;  %v10999_v24 = vrot.slane %v10985_v0, %v23143_v16  ;;  %v10880_v8 = vrot.slane %v23551_v31, %v23143_v16  ;;  %v8418_v10 = vpop.xlane.xlu0 %8417 }
 0x888   : > { %v11018_v21 = vcombine.low %v9639_v1, %v9646_v57  ;;  %v9709_v38 = vrot.slane %v23693_v14, %v23046_v12  ;;  %v9716_v28 = vrot.slane %v23693_v14, %v23054_v18  ;;  %v9723_v60 = vrot.slane %v8509_v49, %v23032_v30  ;;  %v23774_v22 = vpop.xlane.xlu1 %8420 }
 0x889   : > { %v9730_v7 = vrot.slane %v8509_v49, %v23041_v15  ;;  %v23750_v3 = vcombine.low %v9681_v5, %v9688_v48  ;;  %11556 = vperm.xlu1 %14246, %v10847_v45   ;;  %v11000_v36 = vcombine.low %v10992_v46, %v10999_v24  ;;  %v9737_v42 = vrot.slane %v8509_v49, %v23046_v12 }
 0x88a   : > { %v9744_v31 = vrot.slane %v8509_v49, %v23054_v18  ;;  %v9751_v57 = vrot.slane %v8510_v53, %v23032_v30  ;;  %v9758_v11 = vrot.slane %v8510_v53, %v23041_v15  ;;  %v9765_v33 = vrot.slane %v8510_v53, %v23046_v12 }
 0x88b   : > { %v23754_v1 = vcombine.low %v9723_v60, %v9730_v7  ;;  %11583 = vperm.xlu0 %14245, %v11000_v36   ;;  %v10881_v51 = vcombine.low %v10873_v63, %v10880_v8  ;;  %v11019_v4 = vcombine.low %v9653_v43, %v9660_v44  ;;  %v11026_v25 = vrot.slane %v11018_v21, %v23143_v16 }
 0x88c   : > { %v8511_v14 = vadd.f32 %v23019_v52, %v23674_v37  ;;  %v9772_v40 = vrot.slane %v8510_v53, %v23054_v18  ;;  %v8512_v20 = vadd.f32 %v23019_v52, %v23664_v55  ;;  %v10907_v6 = vrot.slane %v23591_v26, %v23143_v16 }
 0x88d   : > { %v10914_v13 = vrot.slane %v23593_v32, %v23143_v16  ;;  %v23769_v9 = vcombine.low %v9737_v42, %v9744_v31  ;;  %11562 = vperm.xlu1 %14246, %v10881_v51   ;;  %v11033_v43 = vrot.slane %v11019_v4, %v23143_v16  ;;  %v11086_v0 = vcombine.low %v9751_v57, %v9758_v11  ;;  %v8424_v51 = vpop.xlane.xlu0 %8423 }
 0x88e   : > { %v9779_v54 = vrot.slane %v8511_v14, %v23032_v30  ;;  %v9786_v37 = vrot.slane %v8511_v14, %v23041_v15  ;;  %v9793_v44 = vrot.slane %v8511_v14, %v23046_v12  ;;  %v9800_v55 = vrot.slane %v8511_v14, %v23054_v18 }
 0x88f   : > { %v9807_v26 = vrot.slane %v8512_v20, %v23032_v30  ;;  %v9814_v5 = vrot.slane %v8512_v20, %v23041_v15  ;;  %v11034_v32 = vcombine.low %v11026_v25, %v11033_v43  ;;  %v9821_v48 = vrot.slane %v8512_v20, %v23046_v12 }
 0x890   : > { %v9828_v17 = vrot.slane %v8512_v20, %v23054_v18  ;;  %v10915_v61 = vcombine.low %v10907_v6, %v10914_v13  ;;  %v11087_v46 = vcombine.low %v9765_v33, %v9772_v40  ;;  %v11052_v49 = vcombine.low %v9695_v56, %v9702_v59 }
 0x891   : > { %v11053_v53 = vcombine.low %v9709_v38, %v9716_v28  ;;  %11589 = vperm.xlu0 %14245, %v11034_v32   ;;  %v23782_v63 = vcombine.low %v9779_v54, %v9786_v37  ;;  %v8513_v45 = vadd.f32 %v23019_v52, %v23718_v47  ;;  %v8514_v24 = vadd.f32 %v23019_v52, %v23707_v39  ;;  %v8427_v39 = vpop.xlane.xlu1 %8426 }
 0x892   : > { %11568 = vperm.xlu1 %14246, %v10915_v61   ;;  %v23789_v8 = vadd.s32 4294967288, %v23726_v41  ;;  %v11060_v21 = vrot.slane %v11052_v49, %v23143_v16  ;;  %v10941_v56 = vrot.slane %v23601_v29, %v23143_v16  ;;  %v10948_v59 = vrot.slane %v23626_v50, %v23143_v16 }
 0x893   : > { %v11067_v60 = vrot.slane %v11053_v53, %v23143_v16  ;;  %v23797_v38 = vcombine.low %v9793_v44, %v9800_v55  ;;  %v23799_v28 = vcombine.low %v9807_v26, %v9814_v5  ;;  %v23801_v47 = vcombine.low %v9821_v48, %v9828_v17  ;;  %v8430_v53 = vpop.xlane.xlu0 %8429 }
 0x894   : > { %v23804_v7 = vadd.s32 4294967280, %v23726_v41  ;;  %v9835_v42 = vrot.slane %v8513_v45, %v23032_v30  ;;  %v9842_v31 = vrot.slane %v8513_v45, %v23041_v15  ;;  %v9849_v29 = vrot.slane %v8513_v45, %v23046_v12 }
 0x895   : > { %v11068_v36 = vcombine.low %v11060_v21, %v11067_v60  ;;  %v9856_v57 = vrot.slane %v8513_v45, %v23054_v18  ;;  %v9863_v50 = vrot.slane %v8514_v24, %v23032_v30  ;;  %v9870_v11 = vrot.slane %v8514_v24, %v23041_v15  ;;  %v8433_v5 = vpop.xlane.xlu1 %8432 }
 0x896   : > { %v10949_v33 = vcombine.low %v10941_v56, %v10948_v59  ;;  %v9877_v4 = vrot.slane %v8514_v24, %v23046_v12  ;;  %v11094_v25 = vrot.slane %v11086_v0, %v23143_v16  ;;  %v11101_v14 = vrot.slane %v11087_v46, %v23143_v16 }
 0x897   : > { %11595 = vperm.xlu0 %14245, %v11068_v36   ;;  %v8515_v40 = vadd.f32 %v23019_v52, %v8412_v23  ;;  %v9884_v20 = vrot.slane %v8514_v24, %v23054_v18  ;;  %v23819_v6 = vadd.f32 %v23019_v52, %v23742_v19  ;;  %v10975_v13 = vrot.slane %v23667_v2, %v23143_v16 }
 0x898   : > { %11574 = vperm.xlu1 %14246, %v10949_v33   ;;  %v10982_v43 = vrot.slane %v23669_v27, %v23143_v16  ;;  %v23825_v54 = vcombine.low %v9835_v42, %v9842_v31  ;;  %v11102_v37 = vcombine.low %v11094_v25, %v11101_v14  ;;  %v23835_v32 = vcombine.low %v9849_v29, %v9856_v57 }
 0x899   : > { %v9891_v44 = vrot.slane %v8515_v40, %v23032_v30  ;;  %v9898_v23 = vrot.slane %v8515_v40, %v23041_v15  ;;  %v9905_v55 = vrot.slane %v8515_v40, %v23046_v12  ;;  %v9912_v26 = vrot.slane %v8515_v40, %v23054_v18  ;;  %v8439_v33 = vpop.xlane.xlu1 %8438 }
 0x89a   : > { %v9919_v19 = vrot.slane %v23819_v6, %v23032_v30  ;;  %v9926_v2 = vrot.slane %v23819_v6, %v23041_v15  ;;  %v23837_v27 = vcombine.low %v9863_v50, %v9870_v11  ;;  %v10983_v48 = vcombine.low %v10975_v13, %v10982_v43  ;;  %v8436_v43 = vpop.xlane.xlu0 %8435 }
 0x89b   : > { %11601 = vperm.xlu0 %14245, %v11102_v37   ;;  %v8517_v17 = vadd.f32 %v23019_v52, %v8418_v10  ;;  %v23840_v61 = vcombine.low %v9877_v4, %v9884_v20  ;;  %v23842_v0 = vcombine.low %v9891_v44, %v9898_v23  ;;  %v9933_v46 = vrot.slane %v23819_v6, %v23046_v12 }
 0x89c   : > { %v8518_v49 = vadd.f32 %v23019_v52, %v23774_v22  ;;  %v9940_v45 = vrot.slane %v23819_v6, %v23054_v18  ;;  %11580 = vperm.xlu1 %14246, %v10983_v48   ;;  %v11009_v10 = vrot.slane %v23711_v58, %v23143_v16  ;;  %v23854_v60 = vcombine.low %v9905_v55, %v9912_v26 }
 0x89d   : > { %v9947_v24 = vrot.slane %v8517_v17, %v23032_v30  ;;  %v9954_v21 = vrot.slane %v8517_v17, %v23041_v15  ;;  %v23856_v56 = vcombine.low %v9919_v19, %v9926_v2  ;;  %v9961_v59 = vrot.slane %v8517_v17, %v23046_v12 }
 0x89e   : > { %v9968_v22 = vrot.slane %v8517_v17, %v23054_v18  ;;  %v9975_v36 = vrot.slane %v8518_v49, %v23032_v30  ;;  %v9982_v42 = vrot.slane %v8518_v49, %v23041_v15  ;;  %v11016_v31 = vrot.slane %v23713_v35, %v23143_v16 }
 0x89f   : > { %v8519_v29 = vadd.f32 %v23019_v52, %v8424_v51  ;;  %v11205_v57 = vcombine.low %v9947_v24, %v9954_v21  ;;  %v9989_v58 = vrot.slane %v8518_v49, %v23046_v12  ;;  %v9996_v50 = vrot.slane %v8518_v49, %v23054_v18 }
 0x8a0   : > { %v8520_v11 = vadd.f32 %v23019_v52, %v8427_v39  ;;  %v11017_v4 = vcombine.low %v11009_v10, %v11016_v31  ;;  %v11043_v40 = vrot.slane %v23728_v62, %v23143_v16  ;;  %v11206_v20 = vcombine.low %v9961_v59, %v9968_v22  ;;  %v8445_v59 = vpop.xlane.xlu1 %8444 }
 0x8a1   : > { %v10003_v25 = vrot.slane %v8519_v29, %v23032_v30  ;;  %v10010_v14 = vrot.slane %v8519_v29, %v23041_v15  ;;  %v10017_v35 = vrot.slane %v8519_v29, %v23046_v12  ;;  %v10024_v51 = vrot.slane %v8519_v29, %v23054_v18  ;;  %v8442_v29 = vpop.xlane.xlu0 %8441 }
 0x8a2   : > { %v10031_v13 = vrot.slane %v8520_v11, %v23032_v30  ;;  %11586 = vperm.xlu1 %14246, %v11017_v4   ;;  %v10038_v39 = vrot.slane %v8520_v11, %v23041_v15  ;;  %v10045_v37 = vrot.slane %v8520_v11, %v23046_v12  ;;  %v10052_v44 = vrot.slane %v8520_v11, %v23054_v18 }
 0x8a3   : > { %v11050_v23 = vrot.slane %v23750_v3, %v23143_v16  ;;  %v23880_v55 = vcombine.low %v9975_v36, %v9982_v42  ;;  %v23882_v62 = vcombine.low %v9989_v58, %v9996_v50  ;;  %v8521_v26 = vadd.f32 %v23019_v52, %v8430_v53 }
 0x8a4   : > { %v8522_v19 = vadd.f32 %v23019_v52, %v8433_v5  ;;  %v11239_v2 = vcombine.low %v10003_v25, %v10010_v14  ;;  %v11077_v17 = vrot.slane %v23754_v1, %v23143_v16  ;;  %v11084_v49 = vrot.slane %v23769_v9, %v23143_v16 }
 0x8a5   : > { %v11051_v48 = vcombine.low %v11043_v40, %v11050_v23  ;;  %v10059_v24 = vrot.slane %v8521_v26, %v23032_v30  ;;  %v10066_v3 = vrot.slane %v8521_v26, %v23041_v15  ;;  %v10073_v21 = vrot.slane %v8521_v26, %v23046_v12 }
 0x8a6   : > { %v10080_v10 = vrot.slane %v8521_v26, %v23054_v18  ;;  %v11240_v53 = vcombine.low %v10017_v35, %v10024_v51  ;;  %v23894_v22 = vcombine.low %v10031_v13, %v10038_v39  ;;  %v23896_v5 = vcombine.low %v10045_v37, %v10052_v44  ;;  %v8451_v37 = vpop.xlane.xlu1 %8450 }
 0x8a7   : > { %11592 = vperm.xlu1 %14246, %v11051_v48   ;;  %v10087_v1 = vrot.slane %v8522_v19, %v23032_v30  ;;  %v11273_v36 = vcombine.low %v10059_v24, %v10066_v3  ;;  %v10094_v9 = vrot.slane %v8522_v19, %v23041_v15  ;;  %v10101_v42 = vrot.slane %v8522_v19, %v23046_v12 }
 0x8a8   : > { %v11213_v31 = vrot.slane %v11205_v57, %v23143_v16  ;;  %v11274_v58 = vcombine.low %v10073_v21, %v10080_v10  ;;  %v11085_v50 = vcombine.low %v11077_v17, %v11084_v49  ;;  %v11220_v11 = vrot.slane %v11206_v20, %v23143_v16  ;;  %v8448_v49 = vpop.xlane.xlu0 %8447 }
 0x8a9   : > { %v8523_v4 = vadd.f32 %v23019_v52, %v8436_v43  ;;  %v8524_v25 = vadd.f32 %v23019_v52, %v8439_v33  ;;  %v11111_v14 = vrot.slane %v23782_v63, %v23143_v16  ;;  %v11118_v40 = vrot.slane %v23797_v38, %v23143_v16 }
 0x8aa   : > { %v11247_v35 = vrot.slane %v11239_v2, %v23143_v16  ;;  %v11221_v51 = vcombine.low %v11213_v31, %v11220_v11  ;;  %v10108_v43 = vrot.slane %v8522_v19, %v23054_v18  ;;  %v11254_v26 = vrot.slane %v11240_v53, %v23143_v16 }
 0x8ab   : > { %11598 = vperm.xlu1 %14246, %v11085_v50   ;;  %v10115_v57 = vrot.slane %v8523_v4, %v23032_v30  ;;  %v10122_v13 = vrot.slane %v8523_v4, %v23041_v15  ;;  %v10129_v20 = vrot.slane %v8523_v4, %v23046_v12  ;;  %v10136_v33 = vrot.slane %v8523_v4, %v23054_v18 }
 0x8ac   : > { %v10143_v39 = vrot.slane %v8524_v25, %v23032_v30  ;;  %v10150_v63 = vrot.slane %v8524_v25, %v23041_v15  ;;  %11622 = vperm.xlu0 %14245, %v11221_v51   ;;  %v10157_v38 = vrot.slane %v8524_v25, %v23046_v12  ;;  %v10164_v44 = vrot.slane %v8524_v25, %v23054_v18 }
 0x8ad   : > { %v11119_v23 = vcombine.low %v11111_v14, %v11118_v40  ;;  %v23920_v2 = vcombine.low %v10087_v1, %v10094_v9  ;;  %v11307_v48 = vcombine.low %v10115_v57, %v10122_v13  ;;  %v8525_v19 = vadd.f32 %v23019_v52, %v8442_v29 }
 0x8ae   : > { %v8526_v17 = vadd.f32 %v23019_v52, %v8445_v59  ;;  %v11308_v24 = vcombine.low %v10129_v20, %v10136_v33  ;;  %v11255_v3 = vcombine.low %v11247_v35, %v11254_v26  ;;  %v11281_v21 = vrot.slane %v11273_v36, %v23143_v16  ;;  %v8454_v33 = vpop.xlane.xlu0 %8453 }
 0x8af   : > { %11604 = vperm.xlu1 %14246, %v11119_v23   ;;  %v11288_v10 = vrot.slane %v11274_v58, %v23143_v16  ;;  %v10171_v31 = vrot.slane %v8525_v19, %v23032_v30  ;;  %v10178_v50 = vrot.slane %v8525_v19, %v23041_v15  ;;  %v10185_v53 = vrot.slane %v8525_v19, %v23046_v12  ;;  %v8457_v14 = vpop.xlane.xlu1 %8456 }
 0x8b0   : > { %v10192_v1 = vrot.slane %v8525_v19, %v23054_v18  ;;  %v23930_v9 = vcombine.low %v10101_v42, %v10108_v43  ;;  %v23932_v29 = vcombine.low %v10143_v39, %v10150_v63  ;;  %v23934_v59 = vcombine.low %v10157_v38, %v10164_v44  ;;  %11628 = vperm.xlu0 %14245, %v11255_v3  }
 0x8b1   : > { %v10199_v11 = vrot.slane %v8526_v17, %v23032_v30  ;;  %v10206_v36 = vrot.slane %v8526_v17, %v23041_v15  ;;  %v10213_v58 = vrot.slane %v8526_v17, %v23046_v12  ;;  %v11289_v4 = vcombine.low %v11281_v21, %v11288_v10 }
 0x8b2   : > { %v11230_v25 = vrot.slane %v23880_v55, %v23143_v16  ;;  %v11341_v40 = vcombine.low %v10171_v31, %v10178_v50  ;;  %v11342_v35 = vcombine.low %v10185_v53, %v10192_v1  ;;  %v11237_v42 = vrot.slane %v23882_v62, %v23143_v16 }
 0x8b3   : > { %v8527_v51 = vadd.f32 %v23019_v52, %v8448_v49  ;;  %v8528_v57 = vadd.f32 %v23019_v52, %v8451_v37  ;;  %v11315_v13 = vrot.slane %v11307_v48, %v23143_v16  ;;  %v11322_v20 = vrot.slane %v11308_v24, %v23143_v16 }
 0x8b4   : > { %v11264_v43 = vrot.slane %v23894_v22, %v23143_v16  ;;  %11634 = vperm.xlu0 %14245, %v11289_v4   ;;  %v11238_v55 = vcombine.low %v11230_v25, %v11237_v42  ;;  %v10220_v38 = vrot.slane %v8526_v17, %v23054_v18  ;;  %v11271_v19 = vrot.slane %v23896_v5, %v23143_v16 }
 0x8b5   : > { %v10227_v39 = vrot.slane %v8527_v51, %v23032_v30  ;;  %v10234_v63 = vrot.slane %v8527_v51, %v23041_v15  ;;  %v10241_v62 = vrot.slane %v8527_v51, %v23046_v12  ;;  %v10248_v37 = vrot.slane %v8527_v51, %v23054_v18 }
 0x8b6   : > { %v10255_v44 = vrot.slane %v8528_v57, %v23032_v30  ;;  %v10262_v23 = vrot.slane %v8528_v57, %v23041_v15  ;;  %11625 = vperm.xlu1 %14246, %v11238_v55   ;;  %v10269_v22 = vrot.slane %v8528_v57, %v23046_v12  ;;  %v10276_v26 = vrot.slane %v8528_v57, %v23054_v18 }
 0x8b7   : > { %v11323_v48 = vcombine.low %v11315_v13, %v11322_v20  ;;  %v23960_v49 = vcombine.low %v10199_v11, %v10206_v36  ;;  %v11375_v24 = vcombine.low %v10227_v39, %v10234_v63  ;;  %v8529_v17 = vadd.f32 %v23019_v52, %v8454_v33  ;;  %v8460_v36 = vpop.xlane.xlu0 %8459 }
 0x8b8   : > { %v8530_v3 = vadd.f32 %v23019_v52, %v8457_v14  ;;  %v8463_v21 = vpop.xlane.xlu1 %8462  ;;  %v11376_v10 = vcombine.low %v10241_v62, %v10248_v37  ;;  %v11272_v31 = vcombine.low %v11264_v43, %v11271_v19  ;;  %v11349_v50 = vrot.slane %v11341_v40, %v23143_v16 }
 0x8b9   : > { %11640 = vperm.xlu0 %14245, %v11323_v48   ;;  %v11356_v53 = vrot.slane %v11342_v35, %v23143_v16  ;;  %v10283_v1 = vrot.slane %v8529_v17, %v23032_v30  ;;  %v10290_v4 = vrot.slane %v8529_v17, %v23041_v15  ;;  %v10297_v5 = vrot.slane %v8529_v17, %v23046_v12 }
 0x8ba   : > { %v10304_v11 = vrot.slane %v8529_v17, %v23054_v18  ;;  %v11359_v25 = vcombine.low %v10213_v58, %v10220_v38  ;;  %v11392_v42 = vcombine.low %v10255_v44, %v10262_v23  ;;  %v11393_v14 = vcombine.low %v10269_v22, %v10276_v26  ;;  %11631 = vperm.xlu1 %14246, %v11272_v31  }
 0x8bb   : > { %v10311_v51 = vrot.slane %v8530_v3, %v23032_v30  ;;  %v10318_v57 = vrot.slane %v8530_v3, %v23041_v15  ;;  %v10325_v40 = vrot.slane %v8530_v3, %v23046_v12  ;;  %v11357_v35 = vcombine.low %v11349_v50, %v11356_v53 }
 0x8bc   : > { %v11298_v13 = vrot.slane %v23920_v2, %v23143_v16  ;;  %v23975_v20 = vpop.permute.xlu1 %11481  ;;  %v11409_v43 = vcombine.low %v10283_v1, %v10290_v4  ;;  %v10332_v33 = vrot.slane %v8530_v3, %v23054_v18  ;;  %v11305_v58 = vrot.slane %v23930_v9, %v23143_v16  ;;  %v11479_v3 = vpop.permute.xlu0 %11478 }
 0x8bd   : > { %v8531_v55 = vadd.f32 %v23019_v52, %v8460_v36  ;;  %v11410_v39 = vcombine.low %v10297_v5, %v10304_v11  ;;  %11646 = vperm.xlu0 %14245, %v11357_v35   ;;  %v8532_v63 = vadd.f32 %v23019_v52, %v8463_v21  ;;  %v11383_v62 = vrot.slane %v11375_v24, %v23143_v16 }
 0x8be   : > { %v11390_v38 = vrot.slane %v11376_v10, %v23143_v16  ;;  %v11306_v37 = vcombine.low %v11298_v13, %v11305_v58  ;;  %v11332_v23 = vrot.slane %v23932_v29, %v23143_v16  ;;  %v11339_v29 = vrot.slane %v23934_v59, %v23143_v16 }
 0x8bf   : > { %v10339_v2 = vrot.slane %v8531_v55, %v23032_v30  ;;  %v10346_v44 = vrot.slane %v8531_v55, %v23041_v15  ;;  %v10353_v9 = vrot.slane %v8531_v55, %v23046_v12  ;;  %v10360_v22 = vrot.slane %v8531_v55, %v23054_v18 }
 0x8c0   : > { %v10367_v26 = vrot.slane %v8532_v63, %v23032_v30  ;;  %v10374_v52 = vrot.slane %v8532_v63, %v23041_v15  ;;  %v23992_v48 = vpop.permute.xlu1 %11484  ;;  %11637 = vperm.xlu1 %14246, %v11306_v37   ;;  %v10381_v19 = vrot.slane %v8532_v63, %v23046_v12  ;;  %v10388_v24 = vrot.slane %v8532_v63, %v23054_v18 }
 0x8c1   : > { %v11391_v17 = vcombine.low %v11383_v62, %v11390_v38  ;;  %v24004_v30 = vcombine.low %v9933_v46, %v9940_v45  ;;  %v11426_v15 = vcombine.low %v10311_v51, %v10318_v57  ;;  %v11366_v21 = vrot.slane %v23960_v49, %v23143_v16 }
 0x8c2   : > { %v11373_v10 = vrot.slane %v11359_v25, %v23143_v16  ;;  %v11427_v31 = vcombine.low %v10325_v40, %v10332_v33  ;;  %v11340_v50 = vcombine.low %v11332_v23, %v11339_v29  ;;  %v11400_v59 = vrot.slane %v11392_v42, %v23143_v16 }
 0x8c3   : > { %11652 = vperm.xlu0 %14245, %v11391_v17   ;;  %v11407_v53 = vrot.slane %v11393_v14, %v23143_v16  ;;  %v11443_v1 = vcombine.low %v10339_v2, %v10346_v44  ;;  %v11444_v18 = vcombine.low %v10353_v9, %v10360_v22  ;;  %v11460_v4 = vcombine.low %v10367_v26, %v10374_v52 }
 0x8c4   : > { %v11417_v12 = vrot.slane %v11409_v43, %v23143_v16  ;;  %v24012_v6 = vpop.permute.xlu1 %11487  ;;  %v11461_v46 = vcombine.low %v10381_v19, %v10388_v24  ;;  %11643 = vperm.xlu1 %14246, %v11340_v50   ;;  %v11424_v49 = vrot.slane %v11410_v39, %v23143_v16  ;;  %v24017_v5 = vsub.s32 %v23726_v41, %v23024_v34  ;;  %v24019_v11 = vpop.permute.xlu0 %11505 }
 0x8c5   : > { %v11408_v45 = vcombine.low %v11400_v59, %v11407_v53  ;;  %v11374_v36 = vcombine.low %v11366_v21, %v11373_v10  ;;  %v11128_v25 = vrot.slane %v23799_v28, %v23143_v16  ;;  %v11135_v42 = vrot.slane %v23801_v47, %v23143_v16 }
 0x8c6   : > { %v11145_v14 = vrot.slane %v23825_v54, %v23143_v16  ;;  %v11674_v51 = vrot.slane %v11479_v3, %v24017_v5  ;;  %v11152_v57 = vrot.slane %v23835_v32, %v23143_v16  ;;  %v11434_v40 = vrot.slane %v11426_v15, %v23143_v16 }
 0x8c7   : > { %11655 = vperm.xlu0 %14245, %v11408_v45   ;;  %v24033_v35 = vsub.s32 %v23789_v8, %v23024_v34  ;;  %v11425_v13 = vcombine.low %v11417_v12, %v11424_v49  ;;  %v11441_v28 = vrot.slane %v11427_v31, %v23143_v16  ;;  %v11162_v47 = vrot.slane %v23837_v27, %v23143_v16 }
 0x8c8   : > { %v11169_v54 = vrot.slane %v23840_v61, %v23143_v16  ;;  %v11491_v43 = vpop.permute.xlu1 %11490  ;;  %11649 = vperm.xlu1 %14246, %v11374_v36   ;;  %v11451_v33 = vrot.slane %v11443_v1, %v23143_v16  ;;  %v11458_v58 = vrot.slane %v11444_v18, %v23143_v16  ;;  %v24046_v8 = vsub.s32 %v23804_v7, %v23024_v34 }
 0x8c9   : > { %v11679_v32 = vrot.slane %v23975_v20, %v24033_v35  ;;  %v11136_v55 = vcombine.low %v11128_v25, %v11135_v42  ;;  %v11179_v27 = vrot.slane %v23842_v0, %v23143_v16  ;;  %v11186_v61 = vrot.slane %v23854_v60, %v23143_v16  ;;  %v24052_v39 = vpop.permute.xlu0 %11511 }
 0x8ca   : > { %v11686_v63 = vrot.slane %v23992_v48, %v24046_v8  ;;  %v11468_v62 = vrot.slane %v11460_v4, %v23143_v16  ;;  %v11475_v7 = vrot.slane %v11461_v46, %v23143_v16  ;;  %v11153_v38 = vcombine.low %v11145_v14, %v11152_v57 }
 0x8cb   : > { %11658 = vperm.xlu0 %14245, %v11425_v13   ;;  %v11681_v20 = vsel %vm11680_vm8, %v11679_v32, %v11674_v51  ;;  %v11442_v37 = vcombine.low %v11434_v40, %v11441_v28  ;;  %v11170_v2 = vcombine.low %v11162_v47, %v11169_v54  ;;  %v11689_v0 = vadd.s32 4294967272, %v23726_v41 }
 0x8cc   : > { %v11494_v44 = vpop.permute.xlu1 %11493  ;;  %11607 = vperm.xlu1 %14246, %v11136_v55   ;;  %v11459_v60 = vcombine.low %v11451_v33, %v11458_v58  ;;  %v11688_v23 = vsel %vm11687_vm9, %v11686_v63, %v11681_v20  ;;  %v11187_v9 = vcombine.low %v11179_v27, %v11186_v61  ;;  %v11731_v22 = vadd.s32 4294967224, %v23726_v41 }
 0x8cd   : > { %v24063_v26 = vsub.s32 %v11689_v0, %v23024_v34  ;;  %v11696_v52 = vadd.s32 4294967264, %v23726_v41  ;;  %v11745_v48 = vadd.s32 4294967208, %v23726_v41  ;;  %v11476_v19 = vcombine.low %v11468_v62, %v11475_v7 }
 0x8ce   : > { %v24068_v24 = vsub.s32 %v11731_v22, %v23024_v34  ;;  %v11703_v17 = vadd.s32 4294967256, %v23726_v41  ;;  %v24071_v29 = vpop.permute.xlu0 %11517  ;;  %v11759_v10 = vadd.s32 4294967192, %v23726_v41  ;;  %vm11708_vm12 = vcmask 392512  }
 0x8cf   : > { %11661 = vperm.xlu0 %14245, %v11442_v37   ;;  %v11693_v3 = vrot.slane %v24012_v6, %v24063_v26  ;;  %v24076_v15 = vsub.s32 %v11696_v52, %v23024_v34  ;;  %v24079_v21 = vsub.s32 %v11745_v48, %v23024_v34  ;;  %v11710_v53 = vadd.s32 4294967248, %v23726_v41 }
 0x8d0   : > { %v11497_v31 = vpop.permute.xlu1 %11496  ;;  %11610 = vperm.xlu1 %14246, %v11153_v38   ;;  %v11735_v50 = vrot.slane %v24019_v11, %v24068_v24  ;;  %v24085_v59 = vsub.s32 %v11703_v17, %v23024_v34  ;;  %v24093_v12 = vsub.s32 %v11759_v10, %v23024_v34  ;;  %v11773_v45 = vadd.s32 4294967176, %v23726_v41 }
 0x8d1   : > { %v11695_v1 = vsel %vm11694_vm10, %v11693_v3, %v11688_v23  ;;  %v11700_v18 = vrot.slane %v11491_v43, %v24076_v15  ;;  %v11749_v4 = vrot.slane %v24052_v39, %v24079_v21  ;;  %v24097_v46 = vsub.s32 %v11710_v53, %v23024_v34 }
 0x8d2   : > { %v11707_v6 = vrot.slane %v11494_v44, %v24085_v59  ;;  %v11717_v49 = vadd.s32 4294967240, %v23726_v41  ;;  %v11763_v36 = vrot.slane %v24071_v29, %v24093_v12  ;;  %vm11715_vm13 = vcmask 458112  }
 0x8d3   : > { %11664 = vperm.xlu0 %14245, %v11459_v60   ;;  %v11702_v11 = vsel %vm11701_vm11, %v11700_v18, %v11695_v1  ;;  %v11724_v42 = vadd.s32 4294967232, %v23726_v41  ;;  %v11714_v51 = vrot.slane %v11497_v31, %v24097_v46  ;;  %v24108_v57 = vsub.s32 %v11773_v45, %v23024_v34 }
 0x8d4   : > { %v11500_v25 = vpop.permute.xlu1 %11499  ;;  %11613 = vperm.xlu1 %14246, %v11170_v2   ;;  %v11709_v14 = vsel %vm11708_vm12, %v11707_v6, %v11702_v11  ;;  %v11524_v40 = vpop.permute.xlu0 %11523  ;;  %v24111_v13 = vsub.s32 %v11717_v49, %v23024_v34  ;;  %v11196_v28 = vrot.slane %v23856_v56, %v23143_v16  ;;  %v11203_v47 = vrot.slane %v24004_v30, %v23143_v16 }
 0x8d5   : > { %vm11722_vm14 = vcmask 523712   ;;  %v24118_v54 = vsub.s32 %v11724_v42, %v23024_v34  ;;  %v11716_v43 = vsel %vm11715_vm13, %v11714_v51, %v11709_v14  ;;  %v11777_v32 = vrot.slane %v11524_v40, %v24108_v57 }
 0x8d6   : > { %v11721_v33 = vrot.slane %v11500_v25, %v24111_v13  ;;  %v11738_v58 = vadd.s32 4294967216, %v23726_v41  ;;  %vm11729_vm15 = vcmask 589312   ;;  %vm11736_vm0 = vcmask 654912  }
 0x8d7   : > { %11667 = vperm.xlu0 %14245, %v11476_v19   ;;  %v11204_v61 = vcombine.low %v11196_v28, %v11203_v47  ;;  %v11752_v63 = vadd.s32 4294967200, %v23726_v41  ;;  %vm11743_vm1 = vcmask 720512   ;;  %vm11750_vm2 = vcmask 786112  }
 0x8d8   : > { %11616 = vperm.xlu1 %14246, %v11187_v9   ;;  %v11723_v55 = vsel %vm11722_vm14, %v11721_v33, %v11716_v43  ;;  %v11530_v56 = vpop.permute.xlu0 %11529  ;;  %v24128_v39 = vsub.s32 %v11738_v58, %v23024_v34  ;;  %v11766_v60 = vadd.s32 4294967184, %v23726_v41  ;;  %vm11757_vm3 = vcmask 851712  }
 0x8d9   : > { %v11503_v27 = vpop.permute.xlu1 %11502  ;;  %v11787_v16 = vrot.slane %v11530_v56, %v24033_v35  ;;  %v24136_v0 = vsub.s32 %v11752_v63, %v23024_v34  ;;  %vm11764_vm4 = vcmask 917312   ;;  %vm11771_vm5 = vcmask 982912  }
 0x8da   : > { %v11728_v30 = vrot.slane %v11503_v27, %v24118_v54  ;;  %v24144_v19 = vsub.s32 %v11766_v60, %v23024_v34  ;;  %vm11778_vm6 = vcmask 1048512   ;;  %vm12017_vm7 = vcmask 1041409  }
 0x8dc   : > { %v11730_v20 = vsel %vm11729_vm15, %v11728_v30, %v11723_v55  ;;  %11619 = vperm.xlu1 %14246, %v11204_v61  }
 0x8dd   : > { %v11737_v62 = vsel %vm11736_vm0, %v11735_v50, %v11730_v20  ;;  %v11509_v7 = vpop.permute.xlu1 %11508 }
 0x8de   : > { %v11536_v38 = vpop.permute.xlu0 %11535  ;;  %v11742_v37 = vrot.slane %v11509_v7, %v24128_v39 }
 0x8df   : > { %v11797_v2 = vrot.slane %v11536_v38, %v24063_v26 }
 0x8e0   : > { %v11744_v44 = vsel %vm11743_vm1, %v11742_v37, %v11737_v62 }
 0x8e1   : > { %v11751_v23 = vsel %vm11750_vm2, %v11749_v4, %v11744_v44 }
 0x8e2   : > { %v11515_v9 = vpop.permute.xlu1 %11514 }
 0x8e3   : > { %v11542_v22 = vpop.permute.xlu0 %11541  ;;  %v11756_v52 = vrot.slane %v11515_v9, %v24136_v0 }
 0x8e4   : > { %v11807_v48 = vrot.slane %v11542_v22, %v24085_v59 }
 0x8e5   : > { %v11758_v17 = vsel %vm11757_vm3, %v11756_v52, %v11751_v23 }
 0x8e6   : > { %v11765_v29 = vsel %vm11764_vm4, %v11763_v36, %v11758_v17 }
 0x8e7   : > { %v11521_v3 = vpop.permute.xlu1 %11520 }
 0x8e8   : > { %v11548_v41 = vpop.permute.xlu0 %11547  ;;  %v11770_v10 = vrot.slane %v11521_v3, %v24144_v19 }
 0x8e9   : > { %v11817_v31 = vrot.slane %v11548_v41, %v24111_v13 }
 0x8ea   : > { %v11772_v50 = vsel %vm11771_vm5, %v11770_v10, %v11765_v29 }
 0x8eb   : > { %v24152_v53 = vsel %vm11778_vm6, %v11777_v32, %v11772_v50 }
 0x8ec   : > { %v11527_v1 = vpop.permute.xlu1 %11526 }
 0x8ed   : > { %v11554_v34 = vpop.permute.xlu0 %11553  ;;  %v11783_v18 = vrot.slane %v11527_v1, %v24017_v5 }
 0x8ee   : > { %v11827_v4 = vrot.slane %v11554_v34, %v24068_v24 }
 0x8ef   : > { %v11788_v6 = vsel %vm11680_vm8, %v11787_v16, %v11783_v18 }
 0x8f1   : > { %v11533_v45 = vpop.permute.xlu1 %11532 }
 0x8f2   : > { %v11792_v49 = vrot.slane %v11533_v45, %v24046_v8 }
 0x8f4   : > { %v11560_v11 = vpop.permute.xlu0 %11559  ;;  %v11793_v36 = vsel %vm11687_vm9, %v11792_v49, %v11788_v6 }
 0x8f5   : > { %v11837_v25 = vrot.slane %v11560_v11, %v24079_v21  ;;  %v11798_v42 = vsel %vm11694_vm10, %v11797_v2, %v11793_v36 }
 0x8f7   : > { %v11539_v14 = vpop.permute.xlu1 %11538 }
 0x8f8   : > { %v11802_v51 = vrot.slane %v11539_v14, %v24076_v15 }
 0x8fa   : > { %v11566_v40 = vpop.permute.xlu0 %11565  ;;  %v11803_v28 = vsel %vm11701_vm11, %v11802_v51, %v11798_v42 }
 0x8fb   : > { %v11847_v47 = vrot.slane %v11566_v40, %v24093_v12  ;;  %v11808_v43 = vsel %vm11708_vm12, %v11807_v48, %v11803_v28 }
 0x8fd   : > { %v11545_v32 = vpop.permute.xlu1 %11544 }
 0x8fe   : > { %v11812_v33 = vrot.slane %v11545_v32, %v24097_v46 }
 0x8ff   : > { %v11572_v58 = vpop.permute.xlu0 %11571 }
 0x900   : > { %v11857_v55 = vrot.slane %v11572_v58, %v24108_v57  ;;  %v11813_v56 = vsel %vm11715_vm13, %v11812_v33, %v11808_v43 }
 0x901   : > { %v11818_v27 = vsel %vm11722_vm14, %v11817_v31, %v11813_v56 }
 0x903   : > { %v11551_v16 = vpop.permute.xlu1 %11550  ;;  %v11578_v44 = vpop.permute.xlu0 %11577 }
 0x904   : > { %v11822_v30 = vrot.slane %v11551_v16, %v24118_v54 }
 0x906   : > { %v11823_v61 = vsel %vm11729_vm15, %v11822_v30, %v11818_v27 }
 0x907   : > { %v11828_v20 = vsel %vm11736_vm0, %v11827_v4, %v11823_v61 }
 0x908   : > { %v11557_v63 = vpop.permute.xlu1 %11556 }
 0x909   : > { %v11832_v62 = vrot.slane %v11557_v63, %v24128_v39 }
 0x90a   : > { %v11584_v17 = vpop.permute.xlu0 %11583 }
 0x90b   : > { %v11833_v7 = vsel %vm11743_vm1, %v11832_v62, %v11828_v20 }
 0x90c   : > { %v11838_v38 = vsel %vm11750_vm2, %v11837_v25, %v11833_v7  ;;  %v11563_v37 = vpop.permute.xlu1 %11562  ;;  %v11866_v7 = vrot.slane %v11578_v44, %v24033_v35 }
 0x90d   : > { %v11842_v2 = vrot.slane %v11563_v37, %v24136_v0 }
 0x90f   : > { %v11843_v60 = vsel %vm11757_vm3, %v11842_v2, %v11838_v38 }
 0x910   : > { %v11848_v23 = vsel %vm11764_vm4, %v11847_v47, %v11843_v60  ;;  %v11590_v3 = vpop.permute.xlu0 %11589 }
 0x911   : > { %v11569_v9 = vpop.permute.xlu1 %11568 }
 0x912   : > { %v11852_v22 = vrot.slane %v11569_v9, %v24144_v19 }
 0x914   : > { %v11853_v52 = vsel %vm11771_vm5, %v11852_v22, %v11848_v23 }
 0x915   : > { %v24181_v48 = vsel %vm11778_vm6, %v11857_v55, %v11853_v52  ;;  %v11876_v52 = vrot.slane %v11584_v17, %v24063_v26 }
 0x916   : > { %v24183_v10 = vpop.permute.xlu0 %11595 }
 0x917   : > { %v11575_v29 = vpop.permute.xlu1 %11574 }
 0x918   : > { %v11862_v16 = vrot.slane %v11575_v29, %v24017_v5 }
 0x91a   : > { %v24185_v1 = vpop.permute.xlu0 %11601  ;;  %v11867_v2 = vsel %vm11680_vm8, %v11866_v7, %v11862_v16 }
 0x91b   : > { %v11581_v41 = vpop.permute.xlu1 %11580 }
 0x91c   : > { %v11871_v20 = vrot.slane %v11581_v41, %v24046_v8 }
 0x91e   : > { %v11872_v23 = vsel %vm11687_vm9, %v11871_v20, %v11867_v2 }
 0x91f   : > { %v11877_v29 = vsel %vm11694_vm10, %v11876_v52, %v11872_v23 }
 0x921   : > { %v11587_v31 = vpop.permute.xlu1 %11586 }
 0x922   : > { %v11881_v9 = vrot.slane %v11587_v31, %v24076_v15 }
 0x926   : > { %v11593_v50 = vpop.permute.xlu1 %11592 }
 0x92a   : > { %v24187_v34 = vpop.permute.xlu1 %11598 }
 0x92b   : > { %v11623_v18 = vpop.permute.xlu0 %11622 }
 0x92c   : > { %v11941_v42 = vrot.slane %v11623_v18, %v24017_v5  ;;  %v11882_v18 = vsel %vm11701_vm11, %v11881_v9, %v11877_v29 }
 0x92e   : > { %v24189_v6 = vpop.permute.xlu1 %11604 }
 0x92f   : > { %v11629_v4 = vpop.permute.xlu0 %11628 }
 0x930   : > { %v11950_v28 = vrot.slane %v11629_v4, %v24046_v8  ;;  %v11891_v4 = vrot.slane %v11593_v50, %v24097_v46  ;;  %v11896_v50 = vrot.slane %v24183_v10, %v24111_v13 }
 0x933   : > { %v11635_v45 = vpop.permute.xlu0 %11634 }
 0x934   : > { %v11960_v58 = vrot.slane %v11635_v45, %v24076_v15  ;;  %v11886_v15 = vrot.slane %v11590_v3, %v24085_v59 }
 0x935   : > { %v11626_v49 = vpop.permute.xlu1 %11625 }
 0x936   : > { %v11945_v36 = vrot.slane %v11626_v49, %v24033_v35 }
 0x938   : > { %v11641_v11 = vpop.permute.xlu0 %11640  ;;  %v11946_v14 = vsel %vm11680_vm8, %v11945_v36, %v11941_v42 }
 0x939   : > { %v11632_v25 = vpop.permute.xlu1 %11631  ;;  %v11951_v47 = vsel %vm11687_vm9, %v11950_v28, %v11946_v14  ;;  %v11970_v63 = vrot.slane %v11641_v11, %v24097_v46 }
 0x93a   : > { %v11955_v51 = vrot.slane %v11632_v25, %v24063_v26  ;;  %v11887_v26 = vsel %vm11708_vm12, %v11886_v15, %v11882_v18  ;;  %v11901_v25 = vrot.slane %v24187_v34, %v24118_v54 }
 0x93b   : > { %v11892_v36 = vsel %vm11715_vm13, %v11891_v4, %v11887_v26 }
 0x93c   : > { %v11647_v40 = vpop.permute.xlu0 %11646  ;;  %v11956_v32 = vsel %vm11694_vm10, %v11955_v51, %v11951_v47 }
 0x93d   : > { %v11961_v56 = vsel %vm11701_vm11, %v11960_v58, %v11956_v32  ;;  %v11980_v8 = vrot.slane %v11647_v40, %v24118_v54  ;;  %v11897_v40 = vsel %vm11722_vm14, %v11896_v50, %v11892_v36  ;;  %v11911_v54 = vrot.slane %v24189_v6, %v24128_v39 }
 0x93e   : > { %v11902_v28 = vsel %vm11729_vm15, %v11901_v25, %v11897_v40 }
 0x93f   : > { %v11638_v43 = vpop.permute.xlu1 %11637 }
 0x940   : > { %v11965_v33 = vrot.slane %v11638_v43, %v24085_v59 }
 0x942   : > { %v11653_v55 = vpop.permute.xlu0 %11652  ;;  %v11966_v30 = vsel %vm11708_vm12, %v11965_v33, %v11961_v56 }
 0x943   : > { %v11644_v27 = vpop.permute.xlu1 %11643  ;;  %v11971_v38 = vsel %vm11715_vm13, %v11970_v63, %v11966_v30  ;;  %v11990_v45 = vrot.slane %v11653_v55, %v24128_v39 }
 0x944   : > { %v11975_v61 = vrot.slane %v11644_v27, %v24111_v13  ;;  %v11906_v13 = vrot.slane %v24185_v1, %v24068_v24 }
 0x946   : > { %v11656_v62 = vpop.permute.xlu0 %11655  ;;  %v11976_v60 = vsel %vm11722_vm14, %v11975_v61, %v11971_v38  ;;  %v11907_v39 = vsel %vm11736_vm0, %v11906_v13, %v11902_v28 }
 0x947   : > { %v11650_v37 = vpop.permute.xlu1 %11649  ;;  %v11981_v35 = vsel %vm11729_vm15, %v11980_v8, %v11976_v60  ;;  %v11995_v17 = vrot.slane %v11656_v62, %v24079_v21  ;;  %v11912_v27 = vsel %vm11743_vm1, %v11911_v54, %v11907_v39 }
 0x948   : > { %v11985_v5 = vrot.slane %v11650_v37, %v24068_v24 }
 0x94a   : > { %v11659_v22 = vpop.permute.xlu0 %11658  ;;  %v11986_v41 = vsel %vm11736_vm0, %v11985_v5, %v11981_v35 }
 0x94b   : > { %v11608_v44 = vpop.permute.xlu1 %11607  ;;  %v11991_v31 = vsel %vm11743_vm1, %v11990_v45, %v11986_v41  ;;  %v12000_v42 = vrot.slane %v11659_v22, %v24136_v0 }
 0x94c   : > { %v11996_v59 = vsel %vm11750_vm2, %v11995_v17, %v11991_v31  ;;  %v11916_v10 = vrot.slane %v11608_v44, %v24079_v21 }
 0x94d   : > { %v12001_v34 = vsel %vm11757_vm3, %v12000_v42, %v11996_v59 }
 0x94e   : > { %v11662_v49 = vpop.permute.xlu0 %11661  ;;  %v11917_v1 = vsel %vm11750_vm2, %v11916_v10, %v11912_v27 }
 0x94f   : > { %v11611_v11 = vpop.permute.xlu1 %11610  ;;  %v12005_v3 = vrot.slane %v11662_v49, %v24093_v12 }
 0x950   : > { %v11921_v33 = vrot.slane %v11611_v11, %v24136_v0 }
 0x951   : > { %v12006_v43 = vsel %vm11764_vm4, %v12005_v3, %v12001_v34 }
 0x952   : > { %v11665_v46 = vpop.permute.xlu0 %11664  ;;  %v11922_v0 = vsel %vm11757_vm3, %v11921_v33, %v11917_v1 }
 0x953   : > { %v12010_v14 = vrot.slane %v11665_v46, %v24144_v19  ;;  %v11614_v51 = vpop.permute.xlu1 %11613 }
 0x954   : > { %v11926_v6 = vrot.slane %v11614_v51, %v24093_v12 }
 0x955   : > { %v12011_v58 = vsel %vm11771_vm5, %v12010_v14, %v12006_v43 }
 0x956   : > { %v11668_v47 = vpop.permute.xlu0 %11667  ;;  %v11927_v30 = vsel %vm11764_vm4, %v11926_v6, %v11922_v0 }
 0x957   : > { %v12015_v32 = vrot.slane %v11668_v47, %v24108_v57  ;;  %v11617_v55 = vpop.permute.xlu1 %11616 }
 0x958   : > { %v11931_v21 = vrot.slane %v11617_v55, %v24144_v19 }
 0x959   : > { %v12016_v56 = vsel %vm11778_vm6, %v12015_v32, %v12011_v58 }
 0x95a   : > { %v12019_v24 = vsel %vm12017_vm7, %v12016_v56, %v24181_v48  ;;  %v11932_v12 = vsel %vm11771_vm5, %v11931_v21, %v11927_v30 }
 0x95b   : > { %v11620_v16 = vpop.permute.xlu1 %11619 }
 0x95c   : > { %v11936_v61 = vrot.slane %v11620_v16, %v24108_v57 }
 0x95e   : > { %v11937_v20 = vsel %vm11778_vm6, %v11936_v61, %v11932_v12 }
 0x95f   : > { %v12018_v63 = vsel %vm12017_vm7, %v11937_v20, %v24152_v53 }
 0x960   : > { %v12020_v62 = vcombine.low %v12018_v63, %v12019_v24 }
 0x962   : > { %12552 = vst.sshfl [vmem:[%s24274_s7] sm:$0x33 pattern:$0x76325410] %v12020_v62 }
 0x963 PF: > { %s17_s24 = sadd.s32 1, %s14271_s24  }
 0x964   : > { %p14_p11 = scmp.ge.s32.totalorder %s17_s24, 19  }
 0x966   :  { %16 = sbr.rel (!%p14_p11) target bundleno = 1 (0x1), region = 97 }

</bundles_post_ra>
